<compile_context>
chip_gen: v6e
topology: v6e:2x2x1
jax: 0.10.0
libtpu: 0.0.40
codegen_flags: <defaults>
</compile_context>

<pallas_src>
from functools import partial

import numpy as np
import jax
import jax.numpy as jnp
from jax.experimental import pallas as pl
from jax.experimental.pallas import tpu as pltpu


OFF = 16    # zero rows in front of the 128-row board block (covers shift -12)
TAIL = 16   # zero rows behind                      (covers shift +12)


# ----------------------------------------------------------------------------
# The fused kernel: one grid program == one batch element (one 128-row block).
# ----------------------------------------------------------------------------
def _utttnet_kernel(
    # inputs
    x_ref, imask_ref, gv_ref,
    win_ref,
    bn1s_ref, bn1t_ref, w1_ref,
    bn2s_ref, bn2t_ref, w2_ref,
    bnfs_ref, bnft_ref,
    wp1_ref, bnps_ref, bnpt_ref, wp2_ref,
    wv1_ref, bnvs_ref, bnvt_ref, wv2_ref, bv2_ref,
    wfc_ref, bfc_ref,
    # outputs
    p_out_ref, v_out_ref,
    # scratch
    feat_ref, padbuf_ref, cstage_ref, vstage_ref,
    *, F, blocks):
  f32 = jnp.float32
  bf16 = jnp.bfloat16
  mask = imask_ref[...]                       # (128, 1) interior mask

  def conv3x3(w):
    """3x3 same-conv: stage 9 shifted row-windows on lanes, one deep dot.
    Output rows are only valid at interior rows (mask afterwards)."""
    for di in range(3):
      for dj in range(3):
        t = di * 3 + dj
        s = (di - 1) * 11 + (dj - 1)                       # flat row shift
        cstage_ref[:, t * F:(t + 1) * F] = (
            padbuf_ref[OFF + s:OFF + s + 128, :].astype(bf16))
    return jnp.dot(cstage_ref[...], w, preferred_element_type=f32)   # (128, F)

  # Padding rows of the shifted-read buffer must stay exactly zero.
  padbuf_ref[...] = jnp.zeros(padbuf_ref.shape, f32)

  # ---- stem: feat = cat([x, in_conv(x)], channels) --------------------------
  # win_ref is in_conv expanded to (9F, F): tap rows 0..7 = raw channels,
  # output cols 8..F-1 = conv channels, rest zero, so the concat is free.
  x = x_ref[0]                                              # (128, F) f32
  padbuf_ref[OFF:OFF + 128, :] = x
  c0 = conv3x3(win_ref[...])
  # NOTE: every `* mask` below is load-bearing: it keeps border rows and the 7
  # per-block pad rows at exactly 0 so the shifted conv reads and the residual
  # accumulator never pick up garbage (and never produce inf*0 = nan).
  feat_ref[...] = x + c0 * mask

  # ---- residual pre-activation trunk ----------------------------------------
  for b in range(blocks):
    h = jnp.maximum(feat_ref[...] * bn1s_ref[b] + bn1t_ref[b], 0.0) * mask
    padbuf_ref[OFF:OFF + 128, :] = h
    c1 = conv3x3(w1_ref[b])
    h = jnp.maximum(c1 * bn2s_ref[b] + bn2t_ref[b], 0.0) * mask
    padbuf_ref[OFF:OFF + 128, :] = h
    c2 = conv3x3(w2_ref[b])
    feat_ref[...] = feat_ref[...] + c2 * mask

  featf = jnp.maximum(feat_ref[...] * bnfs_ref[...] + bnft_ref[...], 0.0) * mask
  featb = featf.astype(bf16)

  # ---- policy head: 1x1 convs + fused log_softmax over the 81 interior rows -
  t1 = jnp.dot(featb, wp1_ref[...], preferred_element_type=f32)
  t1 = jnp.maximum(t1 * bnps_ref[...] + bnpt_ref[...], 0.0)
  logits = jnp.dot(t1.astype(bf16), wp2_ref[...], preferred_element_type=f32)  # (128,1)
  lgm = jnp.where(mask > 0.0, logits, -1e30)      # keep f32: -1e30 overflows bf16
  mx = jnp.max(lgm, axis=0, keepdims=True)                      # (1, 1)
  ex = jnp.where(mask > 0.0, jnp.exp(lgm - mx), 0.0)
  lse = jnp.log(jnp.sum(ex, axis=0, keepdims=True)) + mx
  p_out_ref[0] = logits - lse                                    # (128, 1)

  # ---- value head ------------------------------------------------------------
  # One constant 0/1 matmul gathers the 81 (tap, position) rows of the stride-3
  # conv into 16-row-aligned tap blocks; taps are then staged on lanes so the
  # stride-3 conv is a single K=9F dot, and positions are staged on lanes so
  # the following 3x3 conv is another single K=9F dot.
  gv = jnp.dot(gv_ref[...], featb, preferred_element_type=f32)    # (144, F)
  for t in range(9):
    vstage_ref[:, t * F:(t + 1) * F] = gv[t * 16:(t + 1) * 16, :].astype(bf16)
  v1 = jnp.dot(vstage_ref[...], wv1_ref[...], preferred_element_type=f32)   # (16, F)
  hv = jnp.maximum(v1 * bnvs_ref[...] + bnvt_ref[...], 0.0)       # rows 0..8 valid
  for p in range(9):
    vstage_ref[0:1, p * F:(p + 1) * F] = hv[p:p + 1, :].astype(bf16)
  v2 = jnp.dot(vstage_ref[0:1, :], wv2_ref[...], preferred_element_type=f32)  # (1, F)
  v2 = jnp.maximum(v2 + bv2_ref[...], 0.0)
  v = jnp.dot(v2.astype(bf16), wfc_ref[...], preferred_element_type=f32)      # (1, 1)
  v_out_ref[0] = jnp.broadcast_to(jnp.tanh(v + bfc_ref[...]), (1, 128))


# ----------------------------------------------------------------------------
# Forward wrapper (layout prep is pure index glue, constant-folded under jit)
# ----------------------------------------------------------------------------
def utttnet_forward(x_nchw, params):
  N = x_nchw.shape[0]
  F = params["wp1"].shape[0]
  blocks = params["w1"].shape[0]

  # NCHW -> per-batch flat padded layout (N, 128, F): row = r*11 + c over the
  # zero-padded 11x11 board, channels on lanes 0..7 (8..F-1 zero).
  xh = jnp.transpose(x_nchw.astype(jnp.float32), (0, 2, 3, 1))        # (N,9,9,8)
  xp = jnp.pad(xh, ((0, 0), (1, 1), (1, 1), (0, 0))).reshape(N, 121, 8)
  x_pad = jnp.pad(xp, ((0, 0), (0, 7), (0, F - 8)))                   # (N,128,F)

  # ---- compile-time constants (numpy, folded into the executable) -----------
  k = np.arange(128)
  rr, cc = k // 11, k % 11
  imask = jnp.asarray(((rr >= 1) & (rr <= 9) & (cc >= 1) & (cc <= 9))
                      .astype(np.float32).reshape(128, 1))
  # gather matrix for the value head's stride-3 conv: row t*16 + p (p = Y*3+X)
  # is one-hot at flat padded row (3Y+di+1)*11 + (3X+dj+1); rows t*16+9.. zero.
  gv_np = np.zeros((144, 128), np.float32)
  for di in range(3):
    for dj in range(3):
      t = di * 3 + dj
      for Y in range(3):
        for X in range(3):
          gv_np[t * 16 + Y * 3 + X, (3 * Y + di + 1) * 11 + (3 * X + dj + 1)] = 1.0
  gatherv = jnp.asarray(gv_np, jnp.bfloat16)
  interior = np.array([(y + 1) * 11 + (x + 1) for y in range(9) for x in range(9)],
                      np.int32)

  args = (x_pad, imask, gatherv, params["win"],
          params["bn1_s"], params["bn1_t"], params["w1"],
          params["bn2_s"], params["bn2_t"], params["w2"],
          params["bnf_s"], params["bnf_t"],
          params["wp1"], params["bnp_s"], params["bnp_t"], params["wp2"],
          params["wv1"], params["bnv_s"], params["bnv_t"], params["wv2"],
          params["bv2"], params["wfc"], params["bfc"])

  def full(a):  # whole array resident in VMEM, same block every grid step
    shape = tuple(a.shape)
    return pl.BlockSpec(shape, lambda *_: (0,) * len(shape))

  in_specs = ([pl.BlockSpec((1, 128, F), lambda n: (n, 0, 0))]
              + [full(a) for a in args[1:]])

  # advisory cost estimate for XLA's scheduler
  conv_flops = 2 * 128 * 9 * F * F
  flops = N * ((2 * blocks + 1) * conv_flops
               + 2 * 128 * F * F + 2 * 128 * F                      # policy
               + 2 * 144 * 128 * F + 2 * 16 * 9 * F * F             # value gather+conv1
               + 2 * 9 * F * F + 2 * F)                             # value conv2 + fc
  bytes_accessed = sum(int(a.size) * a.dtype.itemsize for a in args)
  bytes_accessed += N * 128 * 4 + N * 128 * 4                       # outputs
  cost = pl.CostEstimate(flops=int(flops), transcendentals=int(N * 130),
                         bytes_accessed=int(bytes_accessed))

  p_col, v_row = pl.pallas_call(
      partial(_utttnet_kernel, F=F, blocks=blocks),
      grid=(N,),
      out_shape=(jax.ShapeDtypeStruct((N, 128, 1), jnp.float32),
                 jax.ShapeDtypeStruct((N, 1, 128), jnp.float32)),
      in_specs=in_specs,
      out_specs=(pl.BlockSpec((1, 128, 1), lambda n: (n, 0, 0)),
                 pl.BlockSpec((1, 1, 128), lambda n: (n, 0, 0))),
      scratch_shapes=[pltpu.VMEM((128, F), jnp.float32),             # resident feat
                      pltpu.VMEM((OFF + 128 + TAIL, F), jnp.float32),  # shifted reads
                      pltpu.VMEM((128, 9 * F), jnp.bfloat16),        # im2col stage
                      pltpu.VMEM((16, 9 * F), jnp.bfloat16)],        # value stage
      compiler_params=pltpu.CompilerParams(
          dimension_semantics=("parallel",),
          vmem_limit_bytes=32 * 1024 * 1024),
      cost_estimate=cost,
  )(*args)

  p = p_col.reshape(N, 128)[:, interior].reshape(N, 9, 9)
  v = v_row[:, 0, 0:1]
  return p, v


# ----------------------------------------------------------------------------
# Parameter construction (synthetic, PyTorch-layout "raw" + packed kernel form)
# ----------------------------------------------------------------------------
def _conv_taps(w):
  """(Cout, Cin, kh, kw) -> (kh*kw*Cin, Cout), tap-major rows (t = di*kw+dj)."""
  cout, cin, kh, kw = w.shape
  return jnp.transpose(w, (2, 3, 1, 0)).reshape(kh * kw * cin, cout)


def _fold_bn(bn, eps=1e-5):
  s = bn["gamma"] / jnp.sqrt(bn["var"] + eps)
  t = bn["beta"] - bn["mean"] * s
  return s.reshape(1, -1).astype(jnp.float32), t.reshape(1, -1).astype(jnp.float32)


def pack_params(raw):
  F = raw["in_conv"].shape[0] + 8
  bf = jnp.bfloat16
  # expand in_conv (F-8, 8, 3, 3) to a (9F, F) tap-major weight living directly
  # in the concatenated-feature layout (rows 0..7 = raw channels, cols 8..F-1).
  wt = _conv_taps(raw["in_conv"])                          # (9*8, F-8)
  win = jnp.zeros((9 * F, F), jnp.float32)
  for t in range(9):
    win = win.at[t * F:t * F + 8, 8:F].set(wt[t * 8:(t + 1) * 8, :])
  p = {"win": win.astype(bf)}

  b1s, b1t, b2s, b2t, w1, w2 = [], [], [], [], [], []
  for blk in raw["blocks"]:
    s, t_ = _fold_bn(blk["bn1"]); b1s.append(s); b1t.append(t_)
    s, t_ = _fold_bn(blk["bn2"]); b2s.append(s); b2t.append(t_)
    w1.append(_conv_taps(blk["conv1"])); w2.append(_conv_taps(blk["conv2"]))
  p["bn1_s"], p["bn1_t"] = jnp.stack(b1s), jnp.stack(b1t)   # (blocks, 1, F)
  p["bn2_s"], p["bn2_t"] = jnp.stack(b2s), jnp.stack(b2t)
  p["w1"] = jnp.stack(w1).astype(bf)                        # (blocks, 9F, F)
  p["w2"] = jnp.stack(w2).astype(bf)
  p["bnf_s"], p["bnf_t"] = _fold_bn(raw["bn_final"])
  p["wp1"] = _conv_taps(raw["p_conv1"]).astype(bf)          # (F, F)
  p["bnp_s"], p["bnp_t"] = _fold_bn(raw["p_bn"])
  p["wp2"] = _conv_taps(raw["p_conv2"]).astype(bf)          # (F, 1)
  p["wv1"] = _conv_taps(raw["v_conv1"]).astype(bf)          # (9F, F)
  p["bnv_s"], p["bnv_t"] = _fold_bn(raw["v_bn"])
  p["wv2"] = _conv_taps(raw["v_conv2"]).astype(bf)          # (9F, F)
  p["bv2"] = raw["v_conv2_b"].reshape(1, F)
  p["wfc"] = raw["fc_w"].T.astype(bf)                       # (F, 1)
  p["bfc"] = raw["fc_b"].reshape(1, 1)
  return p


def init_params(key, blocks, filters):
  F = filters
  keys = iter(jax.random.split(key, 16 + 8 * blocks))

  def convw(cout, cin, kh, kw):
    return (jax.random.normal(next(keys), (cout, cin, kh, kw), jnp.float32)
            / jnp.sqrt(float(cin * kh * kw)))

  def bn(c):
    k1, k2, k3, k4 = jax.random.split(next(keys), 4)
    return dict(gamma=1.0 + 0.1 * jax.random.normal(k1, (c,), jnp.float32),
                beta=0.1 * jax.random.normal(k2, (c,), jnp.float32),
                mean=0.1 * jax.random.normal(k3, (c,), jnp.float32),
                var=1.0 + 0.1 * jnp.abs(jax.random.normal(k4, (c,), jnp.float32)))

  raw = {"in_conv": convw(F - 8, 8, 3, 3)}
  raw["blocks"] = [dict(bn1=bn(F), conv1=convw(F, F, 3, 3),
                        bn2=bn(F), conv2=convw(F, F, 3, 3))
                   for _ in range(blocks)]
  raw["bn_final"] = bn(F)
  raw["p_conv1"] = convw(F, F, 1, 1)
  raw["p_bn"] = bn(F)
  raw["p_conv2"] = convw(1, F, 1, 1)
  raw["v_conv1"] = convw(F, F, 3, 3)
  raw["v_bn"] = bn(F)
  raw["v_conv2"] = convw(F, F, 3, 3)
  raw["v_conv2_b"] = 0.1 * jax.random.normal(next(keys), (F,), jnp.float32)
  raw["fc_w"] = jax.random.normal(next(keys), (1, F), jnp.float32) / jnp.sqrt(float(F))
  raw["fc_b"] = 0.1 * jax.random.normal(next(keys), (1,), jnp.float32)
  return pack_params(raw), raw


# ----------------------------------------------------------------------------
# Pure-JAX f32 reference of the PyTorch forward (for a structural self-check)
# ----------------------------------------------------------------------------
def ref_forward(x, raw, eps=1e-5):
  def conv(h, w, stride=1, pad=0):
    return jax.lax.conv_general_dilated(
        h, w, (stride, stride), [(pad, pad), (pad, pad)],
        dimension_numbers=("NCHW", "OIHW", "NCHW"))

  def bnrelu(h, bn):
    s = bn["gamma"] / jnp.sqrt(bn["var"] + eps)
    t = bn["beta"] - bn["mean"] * s
    return jnp.maximum(h * s[None, :, None, None] + t[None, :, None, None], 0.0)

  N = x.shape[0]
  h = jnp.concatenate([x, conv(x, raw["in_conv"], 1, 1)], axis=1)
  for blk in raw["blocks"]:
    t1 = conv(bnrelu(h, blk["bn1"]), blk["conv1"], 1, 1)
    t1 = conv(bnrelu(t1, blk["bn2"]), blk["conv2"], 1, 1)
    h = h + t1
  h = bnrelu(h, raw["bn_final"])
  p = conv(h, raw["p_conv1"], 1, 0)
  p = bnrelu(p, raw["p_bn"])
  p = conv(p, raw["p_conv2"], 1, 0)
  p = jax.nn.log_softmax(p.reshape(N, 81), axis=1).reshape(N, 9, 9)
  v = bnrelu(conv(h, raw["v_conv1"], 3, 0), raw["v_bn"])
  v = conv(v, raw["v_conv2"], 1, 0) + raw["v_conv2_b"][None, :, None, None]
  v = jnp.maximum(v, 0.0)[:, :, 0, 0]
  v = jnp.tanh(v @ raw["fc_w"].T + raw["fc_b"][None, :])
  return p, v


# ----------------------------------------------------------------------------
if __name__ == "__main__":
  BLOCKS, FILTERS, BATCH = 2, 32, 2      # small config of UTTTNet(blocks, filters)
  key = jax.random.PRNGKey(0)
  kx, kp = jax.random.split(key)
  x = jax.random.normal(kx, (BATCH, 8, 9, 9), jnp.float32)   # NCHW like PyTorch
  params, raw = init_params(kp, BLOCKS, FILTERS)

  fwd = jax.jit(utttnet_forward)
  p, v = fwd(x, params)
  jax.block_until_ready((p, v))

  assert p.shape == (BATCH, 9, 9) and v.shape == (BATCH, 1)
  # log_softmax rows exponentiate-sum to 1; value lies in [-1, 1]
  assert bool(jnp.allclose(jnp.sum(jnp.exp(p.reshape(BATCH, 81)), axis=-1),
                           1.0, atol=1e-3))
  assert bool(jnp.all(jnp.abs(v) <= 1.0))

  # structural cross-check against the f32 reference (loose tol: bf16 MXU ops)
  p_ref, v_ref = ref_forward(x, raw)
  assert float(jnp.max(jnp.abs(p - p_ref))) < 0.2
  assert float(jnp.max(jnp.abs(v - v_ref))) < 0.1

  print("KERNEL_OK")
</pallas_src>

<mosaic_0001>
module attributes {stable_mosaic.version = 11 : i64} {
  func.func @_utttnet_kernel(%arg0: i32, %arg1: memref<1x128x32xf32, #tpu.memory_space<vmem>>, %arg2: memref<128x1xf32, #tpu.memory_space<vmem>>, %arg3: memref<144x128xbf16, #tpu.memory_space<vmem>>, %arg4: memref<288x32xbf16, #tpu.memory_space<vmem>>, %arg5: memref<2x1x32xf32, #tpu.memory_space<vmem>>, %arg6: memref<2x1x32xf32, #tpu.memory_space<vmem>>, %arg7: memref<2x288x32xbf16, #tpu.memory_space<vmem>>, %arg8: memref<2x1x32xf32, #tpu.memory_space<vmem>>, %arg9: memref<2x1x32xf32, #tpu.memory_space<vmem>>, %arg10: memref<2x288x32xbf16, #tpu.memory_space<vmem>>, %arg11: memref<1x32xf32, #tpu.memory_space<vmem>>, %arg12: memref<1x32xf32, #tpu.memory_space<vmem>>, %arg13: memref<32x32xbf16, #tpu.memory_space<vmem>>, %arg14: memref<1x32xf32, #tpu.memory_space<vmem>>, %arg15: memref<1x32xf32, #tpu.memory_space<vmem>>, %arg16: memref<32x1xbf16, #tpu.memory_space<vmem>>, %arg17: memref<288x32xbf16, #tpu.memory_space<vmem>>, %arg18: memref<1x32xf32, #tpu.memory_space<vmem>>, %arg19: memref<1x32xf32, #tpu.memory_space<vmem>>, %arg20: memref<288x32xbf16, #tpu.memory_space<vmem>>, %arg21: memref<1x32xf32, #tpu.memory_space<vmem>>, %arg22: memref<32x1xbf16, #tpu.memory_space<vmem>>, %arg23: memref<1x1xf32, #tpu.memory_space<vmem>>, %arg24: memref<1x128x1xf32, #tpu.memory_space<vmem>>, %arg25: memref<1x1x128xf32, #tpu.memory_space<vmem>>, %arg26: memref<128x32xf32, #tpu.memory_space<vmem>>, %arg27: memref<160x32xf32, #tpu.memory_space<vmem>>, %arg28: memref<128x288xbf16, #tpu.memory_space<vmem>>, %arg29: memref<16x288xbf16, #tpu.memory_space<vmem>>) attributes {dimension_semantics = [#tpu.dimension_semantics<parallel>], iteration_bounds = array<i64: 2>, scalar_prefetch = 0 : i64, scratch_operands = 4 : i64, tpu.core_type = #tpu.core_type<tc>, window_params = [{transform_indices = @transform_0, window_bounds = array<i64: 1, 128, 32>}, {pipeline_mode = #tpu.pipeline_mode<synchronous>, transform_indices = @transform_1, window_bounds = array<i64: 128, 1>}, {pipeline_mode = #tpu.pipeline_mode<synchronous>, transform_indices = @transform_2, window_bounds = array<i64: 144, 128>}, {pipeline_mode = #tpu.pipeline_mode<synchronous>, transform_indices = @transform_3, window_bounds = array<i64: 288, 32>}, {pipeline_mode = #tpu.pipeline_mode<synchronous>, transform_indices = @transform_4, window_bounds = array<i64: 2, 1, 32>}, {pipeline_mode = #tpu.pipeline_mode<synchronous>, transform_indices = @transform_5, window_bounds = array<i64: 2, 1, 32>}, {pipeline_mode = #tpu.pipeline_mode<synchronous>, transform_indices = @transform_6, window_bounds = array<i64: 2, 288, 32>}, {pipeline_mode = #tpu.pipeline_mode<synchronous>, transform_indices = @transform_7, window_bounds = array<i64: 2, 1, 32>}, {pipeline_mode = #tpu.pipeline_mode<synchronous>, transform_indices = @transform_8, window_bounds = array<i64: 2, 1, 32>}, {pipeline_mode = #tpu.pipeline_mode<synchronous>, transform_indices = @transform_9, window_bounds = array<i64: 2, 288, 32>}, {pipeline_mode = #tpu.pipeline_mode<synchronous>, transform_indices = @transform_10, window_bounds = array<i64: 1, 32>}, {pipeline_mode = #tpu.pipeline_mode<synchronous>, transform_indices = @transform_11, window_bounds = array<i64: 1, 32>}, {pipeline_mode = #tpu.pipeline_mode<synchronous>, transform_indices = @transform_12, window_bounds = array<i64: 32, 32>}, {pipeline_mode = #tpu.pipeline_mode<synchronous>, transform_indices = @transform_13, window_bounds = array<i64: 1, 32>}, {pipeline_mode = #tpu.pipeline_mode<synchronous>, transform_indices = @transform_14, window_bounds = array<i64: 1, 32>}, {pipeline_mode = #tpu.pipeline_mode<synchronous>, transform_indices = @transform_15, window_bounds = array<i64: 32, 1>}, {pipeline_mode = #tpu.pipeline_mode<synchronous>, transform_indices = @transform_16, window_bounds = array<i64: 288, 32>}, {pipeline_mode = #tpu.pipeline_mode<synchronous>, transform_indices = @transform_17, window_bounds = array<i64: 1, 32>}, {pipeline_mode = #tpu.pipeline_mode<synchronous>, transform_indices = @transform_18, window_bounds = array<i64: 1, 32>}, {pipeline_mode = #tpu.pipeline_mode<synchronous>, transform_indices = @transform_19, window_bounds = array<i64: 288, 32>}, {pipeline_mode = #tpu.pipeline_mode<synchronous>, transform_indices = @transform_20, window_bounds = array<i64: 1, 32>}, {pipeline_mode = #tpu.pipeline_mode<synchronous>, transform_indices = @transform_21, window_bounds = array<i64: 32, 1>}, {pipeline_mode = #tpu.pipeline_mode<synchronous>, transform_indices = @transform_22, window_bounds = array<i64: 1, 1>}, {transform_indices = @transform_23, window_bounds = array<i64: 1, 128, 1>}, {transform_indices = @transform_24, window_bounds = array<i64: 1, 1, 128>}]} {
    %c0 = arith.constant 0 : index
    %c0_0 = arith.constant 0 : index
    %0 = vector.load %arg2[%c0, %c0_0] : memref<128x1xf32, #tpu.memory_space<vmem>>, vector<128x1xf32>
    %cst = arith.constant 0.000000e+00 : f32
    %1 = vector.broadcast %cst : f32 to vector<160x32xf32>
    %c0_1 = arith.constant 0 : index
    %c0_2 = arith.constant 0 : index
    %2 = vector.load %arg27[%c0_1, %c0_2] : memref<160x32xf32, #tpu.memory_space<vmem>>, vector<160x32xf32>
    tpu.vector_store %arg27[%c0_1, %c0_2], %1 {strides = array<i32>} : memref<160x32xf32, #tpu.memory_space<vmem>>, vector<160x32xf32>,
    %c0_3 = arith.constant 0 : index
    %c0_4 = arith.constant 0 : index
    %c0_5 = arith.constant 0 : index
    %3 = vector.load %arg1[%c0_3, %c0_4, %c0_5] : memref<1x128x32xf32, #tpu.memory_space<vmem>>, vector<1x128x32xf32>
    %4 = vector.shape_cast %3 : vector<1x128x32xf32> to vector<128x32xf32>
    %c16 = arith.constant 16 : index
    %c0_6 = arith.constant 0 : index
    %5 = vector.load %arg27[%c16, %c0_6] : memref<160x32xf32, #tpu.memory_space<vmem>>, vector<128x32xf32>
    tpu.vector_store %arg27[%c16, %c0_6], %4 {strides = array<i32>} : memref<160x32xf32, #tpu.memory_space<vmem>>, vector<128x32xf32>,
    %c0_7 = arith.constant 0 : index
    %c0_8 = arith.constant 0 : index
    %6 = vector.load %arg4[%c0_7, %c0_8] : memref<288x32xbf16, #tpu.memory_space<vmem>>, vector<288x32xbf16>
    %c4 = arith.constant 4 : index
    %c0_9 = arith.constant 0 : index
    %7 = vector.load %arg27[%c4, %c0_9] : memref<160x32xf32, #tpu.memory_space<vmem>>, vector<128x32xf32>
    %8 = arith.truncf %7 : vector<128x32xf32> to vector<128x32xbf16>
    %c0_10 = arith.constant 0 : index
    %c0_11 = arith.constant 0 : index
    %9 = vector.load %arg28[%c0_10, %c0_11] : memref<128x288xbf16, #tpu.memory_space<vmem>>, vector<128x32xbf16>
    tpu.vector_store %arg28[%c0_10, %c0_11], %8 {strides = array<i32>} : memref<128x288xbf16, #tpu.memory_space<vmem>>, vector<128x32xbf16>,
    %c5 = arith.constant 5 : index
    %c0_12 = arith.constant 0 : index
    %10 = vector.load %arg27[%c5, %c0_12] : memref<160x32xf32, #tpu.memory_space<vmem>>, vector<128x32xf32>
    %11 = arith.truncf %10 : vector<128x32xf32> to vector<128x32xbf16>
    %c0_13 = arith.constant 0 : index
    %c32 = arith.constant 32 : index
    %12 = vector.load %arg28[%c0_13, %c32] : memref<128x288xbf16, #tpu.memory_space<vmem>>, vector<128x32xbf16>
    tpu.vector_store %arg28[%c0_13, %c32], %11 {strides = array<i32>} : memref<128x288xbf16, #tpu.memory_space<vmem>>, vector<128x32xbf16>,
    %c6 = arith.constant 6 : index
    %c0_14 = arith.constant 0 : index
    %13 = vector.load %arg27[%c6, %c0_14] : memref<160x32xf32, #tpu.memory_space<vmem>>, vector<128x32xf32>
    %14 = arith.truncf %13 : vector<128x32xf32> to vector<128x32xbf16>
    %c0_15 = arith.constant 0 : index
    %c64 = arith.constant 64 : index
    %15 = vector.load %arg28[%c0_15, %c64] : memref<128x288xbf16, #tpu.memory_space<vmem>>, vector<128x32xbf16>
    tpu.vector_store %arg28[%c0_15, %c64], %14 {strides = array<i32>} : memref<128x288xbf16, #tpu.memory_space<vmem>>, vector<128x32xbf16>,
    %c15 = arith.constant 15 : index
    %c0_16 = arith.constant 0 : index
    %16 = vector.load %arg27[%c15, %c0_16] : memref<160x32xf32, #tpu.memory_space<vmem>>, vector<128x32xf32>
    %17 = arith.truncf %16 : vector<128x32xf32> to vector<128x32xbf16>
    %c0_17 = arith.constant 0 : index
    %c96 = arith.constant 96 : index
    %18 = vector.load %arg28[%c0_17, %c96] : memref<128x288xbf16, #tpu.memory_space<vmem>>, vector<128x32xbf16>
    tpu.vector_store %arg28[%c0_17, %c96], %17 {strides = array<i32>} : memref<128x288xbf16, #tpu.memory_space<vmem>>, vector<128x32xbf16>,
    %c16_18 = arith.constant 16 : index
    %c0_19 = arith.constant 0 : index
    %19 = vector.load %arg27[%c16_18, %c0_19] : memref<160x32xf32, #tpu.memory_space<vmem>>, vector<128x32xf32>
    %20 = arith.truncf %19 : vector<128x32xf32> to vector<128x32xbf16>
    %c0_20 = arith.constant 0 : index
    %c128 = arith.constant 128 : index
    %21 = vector.load %arg28[%c0_20, %c128] : memref<128x288xbf16, #tpu.memory_space<vmem>>, vector<128x32xbf16>
    tpu.vector_store %arg28[%c0_20, %c128], %20 {strides = array<i32>} : memref<128x288xbf16, #tpu.memory_space<vmem>>, vector<128x32xbf16>,
    %c17 = arith.constant 17 : index
    %c0_21 = arith.constant 0 : index
    %22 = vector.load %arg27[%c17, %c0_21] : memref<160x32xf32, #tpu.memory_space<vmem>>, vector<128x32xf32>
    %23 = arith.truncf %22 : vector<128x32xf32> to vector<128x32xbf16>
    %c0_22 = arith.constant 0 : index
    %c160 = arith.constant 160 : index
    %24 = vector.load %arg28[%c0_22, %c160] : memref<128x288xbf16, #tpu.memory_space<vmem>>, vector<128x32xbf16>
    tpu.vector_store %arg28[%c0_22, %c160], %23 {strides = array<i32>} : memref<128x288xbf16, #tpu.memory_space<vmem>>, vector<128x32xbf16>,
    %c26 = arith.constant 26 : index
    %c0_23 = arith.constant 0 : index
    %25 = vector.load %arg27[%c26, %c0_23] : memref<160x32xf32, #tpu.memory_space<vmem>>, vector<128x32xf32>
    %26 = arith.truncf %25 : vector<128x32xf32> to vector<128x32xbf16>
    %c0_24 = arith.constant 0 : index
    %c192 = arith.constant 192 : index
    %27 = vector.load %arg28[%c0_24, %c192] : memref<128x288xbf16, #tpu.memory_space<vmem>>, vector<128x32xbf16>
    tpu.vector_store %arg28[%c0_24, %c192], %26 {strides = array<i32>} : memref<128x288xbf16, #tpu.memory_space<vmem>>, vector<128x32xbf16>,
    %c27 = arith.constant 27 : index
    %c0_25 = arith.constant 0 : index
    %28 = vector.load %arg27[%c27, %c0_25] : memref<160x32xf32, #tpu.memory_space<vmem>>, vector<128x32xf32>
    %29 = arith.truncf %28 : vector<128x32xf32> to vector<128x32xbf16>
    %c0_26 = arith.constant 0 : index
    %c224 = arith.constant 224 : index
    %30 = vector.load %arg28[%c0_26, %c224] : memref<128x288xbf16, #tpu.memory_space<vmem>>, vector<128x32xbf16>
    tpu.vector_store %arg28[%c0_26, %c224], %29 {strides = array<i32>} : memref<128x288xbf16, #tpu.memory_space<vmem>>, vector<128x32xbf16>,
    %c28 = arith.constant 28 : index
    %c0_27 = arith.constant 0 : index
    %31 = vector.load %arg27[%c28, %c0_27] : memref<160x32xf32, #tpu.memory_space<vmem>>, vector<128x32xf32>
    %32 = arith.truncf %31 : vector<128x32xf32> to vector<128x32xbf16>
    %c0_28 = arith.constant 0 : index
    %c256 = arith.constant 256 : index
    %33 = vector.load %arg28[%c0_28, %c256] : memref<128x288xbf16, #tpu.memory_space<vmem>>, vector<128x32xbf16>
    tpu.vector_store %arg28[%c0_28, %c256], %32 {strides = array<i32>} : memref<128x288xbf16, #tpu.memory_space<vmem>>, vector<128x32xbf16>,
    %c0_29 = arith.constant 0 : index
    %c0_30 = arith.constant 0 : index
    %34 = vector.load %arg28[%c0_29, %c0_30] : memref<128x288xbf16, #tpu.memory_space<vmem>>, vector<128x288xbf16>
    %cst_31 = arith.constant dense<0.000000e+00> : vector<128x32xf32>
    %35 = tpu.matmul %34, %6, %cst_31 {dimension_numbers = #tpu.dot_dimension_numbers<[1], [0], [0], [1], [0, 0, 1, 1], [], []>} : vector<128x288xbf16>, vector<288x32xbf16>, vector<128x32xf32> -> vector<128x32xf32>
    %36 = vector.broadcast %0 : vector<128x1xf32> to vector<128x32xf32>
    %37 = arith.mulf %35, %36 : vector<128x32xf32>
    %38 = arith.addf %4, %37 : vector<128x32xf32>
    %c0_32 = arith.constant 0 : index
    %c0_33 = arith.constant 0 : index
    %39 = vector.load %arg26[%c0_32, %c0_33] : memref<128x32xf32, #tpu.memory_space<vmem>>, vector<128x32xf32>
    tpu.vector_store %arg26[%c0_32, %c0_33], %38 {strides = array<i32>} : memref<128x32xf32, #tpu.memory_space<vmem>>, vector<128x32xf32>,
    %c0_34 = arith.constant 0 : index
    %c0_35 = arith.constant 0 : index
    %40 = vector.load %arg26[%c0_34, %c0_35] : memref<128x32xf32, #tpu.memory_space<vmem>>, vector<128x32xf32>
    %c0_36 = arith.constant 0 : index
    %c0_37 = arith.constant 0 : index
    %c0_38 = arith.constant 0 : index
    %41 = vector.load %arg5[%c0_36, %c0_37, %c0_38] : memref<2x1x32xf32, #tpu.memory_space<vmem>>, vector<1x1x32xf32>
    %42 = vector.shape_cast %41 : vector<1x1x32xf32> to vector<1x32xf32>
    %43 = vector.broadcast %42 : vector<1x32xf32> to vector<128x32xf32>
    %44 = arith.mulf %40, %43 : vector<128x32xf32>
    %c0_39 = arith.constant 0 : index
    %c0_40 = arith.constant 0 : index
    %c0_41 = arith.constant 0 : index
    %45 = vector.load %arg6[%c0_39, %c0_40, %c0_41] : memref<2x1x32xf32, #tpu.memory_space<vmem>>, vector<1x1x32xf32>
    %46 = vector.shape_cast %45 : vector<1x1x32xf32> to vector<1x32xf32>
    %47 = vector.broadcast %46 : vector<1x32xf32> to vector<128x32xf32>
    %48 = arith.addf %44, %47 : vector<128x32xf32>
    %cst_42 = arith.constant 0.000000e+00 : f32
    %49 = vector.broadcast %cst_42 : f32 to vector<128x32xf32>
    %50 = arith.maximumf %48, %49 : vector<128x32xf32>
    %51 = vector.broadcast %0 : vector<128x1xf32> to vector<128x32xf32>
    %52 = arith.mulf %50, %51 : vector<128x32xf32>
    %c16_43 = arith.constant 16 : index
    %c0_44 = arith.constant 0 : index
    %53 = vector.load %arg27[%c16_43, %c0_44] : memref<160x32xf32, #tpu.memory_space<vmem>>, vector<128x32xf32>
    tpu.vector_store %arg27[%c16_43, %c0_44], %52 {strides = array<i32>} : memref<160x32xf32, #tpu.memory_space<vmem>>, vector<128x32xf32>,
    %c0_45 = arith.constant 0 : index
    %c0_46 = arith.constant 0 : index
    %c0_47 = arith.constant 0 : index
    %54 = vector.load %arg7[%c0_45, %c0_46, %c0_47] : memref<2x288x32xbf16, #tpu.memory_space<vmem>>, vector<1x288x32xbf16>
    %55 = vector.shape_cast %54 : vector<1x288x32xbf16> to vector<288x32xbf16>
    %c4_48 = arith.constant 4 : index
    %c0_49 = arith.constant 0 : index
    %56 = vector.load %arg27[%c4_48, %c0_49] : memref<160x32xf32, #tpu.memory_space<vmem>>, vector<128x32xf32>
    %57 = arith.truncf %56 : vector<128x32xf32> to vector<128x32xbf16>
    %c0_50 = arith.constant 0 : index
    %c0_51 = arith.constant 0 : index
    %58 = vector.load %arg28[%c0_50, %c0_51] : memref<128x288xbf16, #tpu.memory_space<vmem>>, vector<128x32xbf16>
    tpu.vector_store %arg28[%c0_50, %c0_51], %57 {strides = array<i32>} : memref<128x288xbf16, #tpu.memory_space<vmem>>, vector<128x32xbf16>,
    %c5_52 = arith.constant 5 : index
    %c0_53 = arith.constant 0 : index
    %59 = vector.load %arg27[%c5_52, %c0_53] : memref<160x32xf32, #tpu.memory_space<vmem>>, vector<128x32xf32>
    %60 = arith.truncf %59 : vector<128x32xf32> to vector<128x32xbf16>
    %c0_54 = arith.constant 0 : index
    %c32_55 = arith.constant 32 : index
    %61 = vector.load %arg28[%c0_54, %c32_55] : memref<128x288xbf16, #tpu.memory_space<vmem>>, vector<128x32xbf16>
    tpu.vector_store %arg28[%c0_54, %c32_55], %60 {strides = array<i32>} : memref<128x288xbf16, #tpu.memory_space<vmem>>, vector<128x32xbf16>,
    %c6_56 = arith.constant 6 : index
    %c0_57 = arith.constant 0 : index
    %62 = vector.load %arg27[%c6_56, %c0_57] : memref<160x32xf32, #tpu.memory_space<vmem>>, vector<128x32xf32>
    %63 = arith.truncf %62 : vector<128x32xf32> to vector<128x32xbf16>
    %c0_58 = arith.constant 0 : index
    %c64_59 = arith.constant 64 : index
    %64 = vector.load %arg28[%c0_58, %c64_59] : memref<128x288xbf16, #tpu.memory_space<vmem>>, vector<128x32xbf16>
    tpu.vector_store %arg28[%c0_58, %c64_59], %63 {strides = array<i32>} : memref<128x288xbf16, #tpu.memory_space<vmem>>, vector<128x32xbf16>,
    %c15_60 = arith.constant 15 : index
    %c0_61 = arith.constant 0 : index
    %65 = vector.load %arg27[%c15_60, %c0_61] : memref<160x32xf32, #tpu.memory_space<vmem>>, vector<128x32xf32>
    %66 = arith.truncf %65 : vector<128x32xf32> to vector<128x32xbf16>
    %c0_62 = arith.constant 0 : index
    %c96_63 = arith.constant 96 : index
    %67 = vector.load %arg28[%c0_62, %c96_63] : memref<128x288xbf16, #tpu.memory_space<vmem>>, vector<128x32xbf16>
    tpu.vector_store %arg28[%c0_62, %c96_63], %66 {strides = array<i32>} : memref<128x288xbf16, #tpu.memory_space<vmem>>, vector<128x32xbf16>,
    %c16_64 = arith.constant 16 : index
    %c0_65 = arith.constant 0 : index
    %68 = vector.load %arg27[%c16_64, %c0_65] : memref<160x32xf32, #tpu.memory_space<vmem>>, vector<128x32xf32>
    %69 = arith.truncf %68 : vector<128x32xf32> to vector<128x32xbf16>
    %c0_66 = arith.constant 0 : index
    %c128_67 = arith.constant 128 : index
    %70 = vector.load %arg28[%c0_66, %c128_67] : memref<128x288xbf16, #tpu.memory_space<vmem>>, vector<128x32xbf16>
    tpu.vector_store %arg28[%c0_66, %c128_67], %69 {strides = array<i32>} : memref<128x288xbf16, #tpu.memory_space<vmem>>, vector<128x32xbf16>,
    %c17_68 = arith.constant 17 : index
    %c0_69 = arith.constant 0 : index
    %71 = vector.load %arg27[%c17_68, %c0_69] : memref<160x32xf32, #tpu.memory_space<vmem>>, vector<128x32xf32>
    %72 = arith.truncf %71 : vector<128x32xf32> to vector<128x32xbf16>
    %c0_70 = arith.constant 0 : index
    %c160_71 = arith.constant 160 : index
    %73 = vector.load %arg28[%c0_70, %c160_71] : memref<128x288xbf16, #tpu.memory_space<vmem>>, vector<128x32xbf16>
    tpu.vector_store %arg28[%c0_70, %c160_71], %72 {strides = array<i32>} : memref<128x288xbf16, #tpu.memory_space<vmem>>, vector<128x32xbf16>,
    %c26_72 = arith.constant 26 : index
    %c0_73 = arith.constant 0 : index
    %74 = vector.load %arg27[%c26_72, %c0_73] : memref<160x32xf32, #tpu.memory_space<vmem>>, vector<128x32xf32>
    %75 = arith.truncf %74 : vector<128x32xf32> to vector<128x32xbf16>
    %c0_74 = arith.constant 0 : index
    %c192_75 = arith.constant 192 : index
    %76 = vector.load %arg28[%c0_74, %c192_75] : memref<128x288xbf16, #tpu.memory_space<vmem>>, vector<128x32xbf16>
    tpu.vector_store %arg28[%c0_74, %c192_75], %75 {strides = array<i32>} : memref<128x288xbf16, #tpu.memory_space<vmem>>, vector<128x32xbf16>,
    %c27_76 = arith.constant 27 : index
    %c0_77 = arith.constant 0 : index
    %77 = vector.load %arg27[%c27_76, %c0_77] : memref<160x32xf32, #tpu.memory_space<vmem>>, vector<128x32xf32>
    %78 = arith.truncf %77 : vector<128x32xf32> to vector<128x32xbf16>
    %c0_78 = arith.constant 0 : index
    %c224_79 = arith.constant 224 : index
    %79 = vector.load %arg28[%c0_78, %c224_79] : memref<128x288xbf16, #tpu.memory_space<vmem>>, vector<128x32xbf16>
    tpu.vector_store %arg28[%c0_78, %c224_79], %78 {strides = array<i32>} : memref<128x288xbf16, #tpu.memory_space<vmem>>, vector<128x32xbf16>,
    %c28_80 = arith.constant 28 : index
    %c0_81 = arith.constant 0 : index
    %80 = vector.load %arg27[%c28_80, %c0_81] : memref<160x32xf32, #tpu.memory_space<vmem>>, vector<128x32xf32>
    %81 = arith.truncf %80 : vector<128x32xf32> to vector<128x32xbf16>
    %c0_82 = arith.constant 0 : index
    %c256_83 = arith.constant 256 : index
    %82 = vector.load %arg28[%c0_82, %c256_83] : memref<128x288xbf16, #tpu.memory_space<vmem>>, vector<128x32xbf16>
    tpu.vector_store %arg28[%c0_82, %c256_83], %81 {strides = array<i32>} : memref<128x288xbf16, #tpu.memory_space<vmem>>, vector<128x32xbf16>,
    %c0_84 = arith.constant 0 : index
    %c0_85 = arith.constant 0 : index
    %83 = vector.load %arg28[%c0_84, %c0_85] : memref<128x288xbf16, #tpu.memory_space<vmem>>, vector<128x288xbf16>
    %cst_86 = arith.constant dense<0.000000e+00> : vector<128x32xf32>
    %84 = tpu.matmul %83, %55, %cst_86 {dimension_numbers = #tpu.dot_dimension_numbers<[1], [0], [0], [1], [0, 0, 1, 1], [], []>} : vector<128x288xbf16>, vector<288x32xbf16>, vector<128x32xf32> -> vector<128x32xf32>
    %c0_87 = arith.constant 0 : index
    %c0_88 = arith.constant 0 : index
    %c0_89 = arith.constant 0 : index
    %85 = vector.load %arg8[%c0_87, %c0_88, %c0_89] : memref<2x1x32xf32, #tpu.memory_space<vmem>>, vector<1x1x32xf32>
    %86 = vector.shape_cast %85 : vector<1x1x32xf32> to vector<1x32xf32>
    %87 = vector.broadcast %86 : vector<1x32xf32> to vector<128x32xf32>
    %88 = arith.mulf %84, %87 : vector<128x32xf32>
    %c0_90 = arith.constant 0 : index
    %c0_91 = arith.constant 0 : index
    %c0_92 = arith.constant 0 : index
    %89 = vector.load %arg9[%c0_90, %c0_91, %c0_92] : memref<2x1x32xf32, #tpu.memory_space<vmem>>, vector<1x1x32xf32>
    %90 = vector.shape_cast %89 : vector<1x1x32xf32> to vector<1x32xf32>
    %91 = vector.broadcast %90 : vector<1x32xf32> to vector<128x32xf32>
    %92 = arith.addf %88, %91 : vector<128x32xf32>
    %cst_93 = arith.constant 0.000000e+00 : f32
    %93 = vector.broadcast %cst_93 : f32 to vector<128x32xf32>
    %94 = arith.maximumf %92, %93 : vector<128x32xf32>
    %95 = vector.broadcast %0 : vector<128x1xf32> to vector<128x32xf32>
    %96 = arith.mulf %94, %95 : vector<128x32xf32>
    %c16_94 = arith.constant 16 : index
    %c0_95 = arith.constant 0 : index
    %97 = vector.load %arg27[%c16_94, %c0_95] : memref<160x32xf32, #tpu.memory_space<vmem>>, vector<128x32xf32>
    tpu.vector_store %arg27[%c16_94, %c0_95], %96 {strides = array<i32>} : memref<160x32xf32, #tpu.memory_space<vmem>>, vector<128x32xf32>,
    %c0_96 = arith.constant 0 : index
    %c0_97 = arith.constant 0 : index
    %c0_98 = arith.constant 0 : index
    %98 = vector.load %arg10[%c0_96, %c0_97, %c0_98] : memref<2x288x32xbf16, #tpu.memory_space<vmem>>, vector<1x288x32xbf16>
    %99 = vector.shape_cast %98 : vector<1x288x32xbf16> to vector<288x32xbf16>
    %c4_99 = arith.constant 4 : index
    %c0_100 = arith.constant 0 : index
    %100 = vector.load %arg27[%c4_99, %c0_100] : memref<160x32xf32, #tpu.memory_space<vmem>>, vector<128x32xf32>
    %101 = arith.truncf %100 : vector<128x32xf32> to vector<128x32xbf16>
    %c0_101 = arith.constant 0 : index
    %c0_102 = arith.constant 0 : index
    %102 = vector.load %arg28[%c0_101, %c0_102] : memref<128x288xbf16, #tpu.memory_space<vmem>>, vector<128x32xbf16>
    tpu.vector_store %arg28[%c0_101, %c0_102], %101 {strides = array<i32>} : memref<128x288xbf16, #tpu.memory_space<vmem>>, vector<128x32xbf16>,
    %c5_103 = arith.constant 5 : index
    %c0_104 = arith.constant 0 : index
    %103 = vector.load %arg27[%c5_103, %c0_104] : memref<160x32xf32, #tpu.memory_space<vmem>>, vector<128x32xf32>
    %104 = arith.truncf %103 : vector<128x32xf32> to vector<128x32xbf16>
    %c0_105 = arith.constant 0 : index
    %c32_106 = arith.constant 32 : index
    %105 = vector.load %arg28[%c0_105, %c32_106] : memref<128x288xbf16, #tpu.memory_space<vmem>>, vector<128x32xbf16>
    tpu.vector_store %arg28[%c0_105, %c32_106], %104 {strides = array<i32>} : memref<128x288xbf16, #tpu.memory_space<vmem>>, vector<128x32xbf16>,
    %c6_107 = arith.constant 6 : index
    %c0_108 = arith.constant 0 : index
    %106 = vector.load %arg27[%c6_107, %c0_108] : memref<160x32xf32, #tpu.memory_space<vmem>>, vector<128x32xf32>
    %107 = arith.truncf %106 : vector<128x32xf32> to vector<128x32xbf16>
    %c0_109 = arith.constant 0 : index
    %c64_110 = arith.constant 64 : index
    %108 = vector.load %arg28[%c0_109, %c64_110] : memref<128x288xbf16, #tpu.memory_space<vmem>>, vector<128x32xbf16>
    tpu.vector_store %arg28[%c0_109, %c64_110], %107 {strides = array<i32>} : memref<128x288xbf16, #tpu.memory_space<vmem>>, vector<128x32xbf16>,
    %c15_111 = arith.constant 15 : index
    %c0_112 = arith.constant 0 : index
    %109 = vector.load %arg27[%c15_111, %c0_112] : memref<160x32xf32, #tpu.memory_space<vmem>>, vector<128x32xf32>
    %110 = arith.truncf %109 : vector<128x32xf32> to vector<128x32xbf16>
    %c0_113 = arith.constant 0 : index
    %c96_114 = arith.constant 96 : index
    %111 = vector.load %arg28[%c0_113, %c96_114] : memref<128x288xbf16, #tpu.memory_space<vmem>>, vector<128x32xbf16>
    tpu.vector_store %arg28[%c0_113, %c96_114], %110 {strides = array<i32>} : memref<128x288xbf16, #tpu.memory_space<vmem>>, vector<128x32xbf16>,
    %c16_115 = arith.constant 16 : index
    %c0_116 = arith.constant 0 : index
    %112 = vector.load %arg27[%c16_115, %c0_116] : memref<160x32xf32, #tpu.memory_space<vmem>>, vector<128x32xf32>
    %113 = arith.truncf %112 : vector<128x32xf32> to vector<128x32xbf16>
    %c0_117 = arith.constant 0 : index
    %c128_118 = arith.constant 128 : index
    %114 = vector.load %arg28[%c0_117, %c128_118] : memref<128x288xbf16, #tpu.memory_space<vmem>>, vector<128x32xbf16>
    tpu.vector_store %arg28[%c0_117, %c128_118], %113 {strides = array<i32>} : memref<128x288xbf16, #tpu.memory_space<vmem>>, vector<128x32xbf16>,
    %c17_119 = arith.constant 17 : index
    %c0_120 = arith.constant 0 : index
    %115 = vector.load %arg27[%c17_119, %c0_120] : memref<160x32xf32, #tpu.memory_space<vmem>>, vector<128x32xf32>
    %116 = arith.truncf %115 : vector<128x32xf32> to vector<128x32xbf16>
    %c0_121 = arith.constant 0 : index
    %c160_122 = arith.constant 160 : index
    %117 = vector.load %arg28[%c0_121, %c160_122] : memref<128x288xbf16, #tpu.memory_space<vmem>>, vector<128x32xbf16>
    tpu.vector_store %arg28[%c0_121, %c160_122], %116 {strides = array<i32>} : memref<128x288xbf16, #tpu.memory_space<vmem>>, vector<128x32xbf16>,
    %c26_123 = arith.constant 26 : index
    %c0_124 = arith.constant 0 : index
    %118 = vector.load %arg27[%c26_123, %c0_124] : memref<160x32xf32, #tpu.memory_space<vmem>>, vector<128x32xf32>
    %119 = arith.truncf %118 : vector<128x32xf32> to vector<128x32xbf16>
    %c0_125 = arith.constant 0 : index
    %c192_126 = arith.constant 192 : index
    %120 = vector.load %arg28[%c0_125, %c192_126] : memref<128x288xbf16, #tpu.memory_space<vmem>>, vector<128x32xbf16>
    tpu.vector_store %arg28[%c0_125, %c192_126], %119 {strides = array<i32>} : memref<128x288xbf16, #tpu.memory_space<vmem>>, vector<128x32xbf16>,
    %c27_127 = arith.constant 27 : index
    %c0_128 = arith.constant 0 : index
    %121 = vector.load %arg27[%c27_127, %c0_128] : memref<160x32xf32, #tpu.memory_space<vmem>>, vector<128x32xf32>
    %122 = arith.truncf %121 : vector<128x32xf32> to vector<128x32xbf16>
    %c0_129 = arith.constant 0 : index
    %c224_130 = arith.constant 224 : index
    %123 = vector.load %arg28[%c0_129, %c224_130] : memref<128x288xbf16, #tpu.memory_space<vmem>>, vector<128x32xbf16>
    tpu.vector_store %arg28[%c0_129, %c224_130], %122 {strides = array<i32>} : memref<128x288xbf16, #tpu.memory_space<vmem>>, vector<128x32xbf16>,
    %c28_131 = arith.constant 28 : index
    %c0_132 = arith.constant 0 : index
    %124 = vector.load %arg27[%c28_131, %c0_132] : memref<160x32xf32, #tpu.memory_space<vmem>>, vector<128x32xf32>
    %125 = arith.truncf %124 : vector<128x32xf32> to vector<128x32xbf16>
    %c0_133 = arith.constant 0 : index
    %c256_134 = arith.constant 256 : index
    %126 = vector.load %arg28[%c0_133, %c256_134] : memref<128x288xbf16, #tpu.memory_space<vmem>>, vector<128x32xbf16>
    tpu.vector_store %arg28[%c0_133, %c256_134], %125 {strides = array<i32>} : memref<128x288xbf16, #tpu.memory_space<vmem>>, vector<128x32xbf16>,
    %c0_135 = arith.constant 0 : index
    %c0_136 = arith.constant 0 : index
    %127 = vector.load %arg28[%c0_135, %c0_136] : memref<128x288xbf16, #tpu.memory_space<vmem>>, vector<128x288xbf16>
    %cst_137 = arith.constant dense<0.000000e+00> : vector<128x32xf32>
    %128 = tpu.matmul %127, %99, %cst_137 {dimension_numbers = #tpu.dot_dimension_numbers<[1], [0], [0], [1], [0, 0, 1, 1], [], []>} : vector<128x288xbf16>, vector<288x32xbf16>, vector<128x32xf32> -> vector<128x32xf32>
    %c0_138 = arith.constant 0 : index
    %c0_139 = arith.constant 0 : index
    %129 = vector.load %arg26[%c0_138, %c0_139] : memref<128x32xf32, #tpu.memory_space<vmem>>, vector<128x32xf32>
    %130 = vector.broadcast %0 : vector<128x1xf32> to vector<128x32xf32>
    %131 = arith.mulf %128, %130 : vector<128x32xf32>
    %132 = arith.addf %129, %131 : vector<128x32xf32>
    %c0_140 = arith.constant 0 : index
    %c0_141 = arith.constant 0 : index
    %133 = vector.load %arg26[%c0_140, %c0_141] : memref<128x32xf32, #tpu.memory_space<vmem>>, vector<128x32xf32>
    tpu.vector_store %arg26[%c0_140, %c0_141], %132 {strides = array<i32>} : memref<128x32xf32, #tpu.memory_space<vmem>>, vector<128x32xf32>,
    %c0_142 = arith.constant 0 : index
    %c0_143 = arith.constant 0 : index
    %134 = vector.load %arg26[%c0_142, %c0_143] : memref<128x32xf32, #tpu.memory_space<vmem>>, vector<128x32xf32>
    %c1 = arith.constant 1 : index
    %c0_144 = arith.constant 0 : index
    %c0_145 = arith.constant 0 : index
    %135 = vector.load %arg5[%c1, %c0_144, %c0_145] : memref<2x1x32xf32, #tpu.memory_space<vmem>>, vector<1x1x32xf32>
    %136 = vector.shape_cast %135 : vector<1x1x32xf32> to vector<1x32xf32>
    %137 = vector.broadcast %136 : vector<1x32xf32> to vector<128x32xf32>
    %138 = arith.mulf %134, %137 : vector<128x32xf32>
    %c1_146 = arith.constant 1 : index
    %c0_147 = arith.constant 0 : index
    %c0_148 = arith.constant 0 : index
    %139 = vector.load %arg6[%c1_146, %c0_147, %c0_148] : memref<2x1x32xf32, #tpu.memory_space<vmem>>, vector<1x1x32xf32>
    %140 = vector.shape_cast %139 : vector<1x1x32xf32> to vector<1x32xf32>
    %141 = vector.broadcast %140 : vector<1x32xf32> to vector<128x32xf32>
    %142 = arith.addf %138, %141 : vector<128x32xf32>
    %cst_149 = arith.constant 0.000000e+00 : f32
    %143 = vector.broadcast %cst_149 : f32 to vector<128x32xf32>
    %144 = arith.maximumf %142, %143 : vector<128x32xf32>
    %145 = vector.broadcast %0 : vector<128x1xf32> to vector<128x32xf32>
    %146 = arith.mulf %144, %145 : vector<128x32xf32>
    %c16_150 = arith.constant 16 : index
    %c0_151 = arith.constant 0 : index
    %147 = vector.load %arg27[%c16_150, %c0_151] : memref<160x32xf32, #tpu.memory_space<vmem>>, vector<128x32xf32>
    tpu.vector_store %arg27[%c16_150, %c0_151], %146 {strides = array<i32>} : memref<160x32xf32, #tpu.memory_space<vmem>>, vector<128x32xf32>,
    %c1_152 = arith.constant 1 : index
    %c0_153 = arith.constant 0 : index
    %c0_154 = arith.constant 0 : index
    %148 = vector.load %arg7[%c1_152, %c0_153, %c0_154] : memref<2x288x32xbf16, #tpu.memory_space<vmem>>, vector<1x288x32xbf16>
    %149 = vector.shape_cast %148 : vector<1x288x32xbf16> to vector<288x32xbf16>
    %c4_155 = arith.constant 4 : index
    %c0_156 = arith.constant 0 : index
    %150 = vector.load %arg27[%c4_155, %c0_156] : memref<160x32xf32, #tpu.memory_space<vmem>>, vector<128x32xf32>
    %151 = arith.truncf %150 : vector<128x32xf32> to vector<128x32xbf16>
    %c0_157 = arith.constant 0 : index
    %c0_158 = arith.constant 0 : index
    %152 = vector.load %arg28[%c0_157, %c0_158] : memref<128x288xbf16, #tpu.memory_space<vmem>>, vector<128x32xbf16>
    tpu.vector_store %arg28[%c0_157, %c0_158], %151 {strides = array<i32>} : memref<128x288xbf16, #tpu.memory_space<vmem>>, vector<128x32xbf16>,
    %c5_159 = arith.constant 5 : index
    %c0_160 = arith.constant 0 : index
    %153 = vector.load %arg27[%c5_159, %c0_160] : memref<160x32xf32, #tpu.memory_space<vmem>>, vector<128x32xf32>
    %154 = arith.truncf %153 : vector<128x32xf32> to vector<128x32xbf16>
    %c0_161 = arith.constant 0 : index
    %c32_162 = arith.constant 32 : index
    %155 = vector.load %arg28[%c0_161, %c32_162] : memref<128x288xbf16, #tpu.memory_space<vmem>>, vector<128x32xbf16>
    tpu.vector_store %arg28[%c0_161, %c32_162], %154 {strides = array<i32>} : memref<128x288xbf16, #tpu.memory_space<vmem>>, vector<128x32xbf16>,
    %c6_163 = arith.constant 6 : index
    %c0_164 = arith.constant 0 : index
    %156 = vector.load %arg27[%c6_163, %c0_164] : memref<160x32xf32, #tpu.memory_space<vmem>>, vector<128x32xf32>
    %157 = arith.truncf %156 : vector<128x32xf32> to vector<128x32xbf16>
    %c0_165 = arith.constant 0 : index
    %c64_166 = arith.constant 64 : index
    %158 = vector.load %arg28[%c0_165, %c64_166] : memref<128x288xbf16, #tpu.memory_space<vmem>>, vector<128x32xbf16>
    tpu.vector_store %arg28[%c0_165, %c64_166], %157 {strides = array<i32>} : memref<128x288xbf16, #tpu.memory_space<vmem>>, vector<128x32xbf16>,
    %c15_167 = arith.constant 15 : index
    %c0_168 = arith.constant 0 : index
    %159 = vector.load %arg27[%c15_167, %c0_168] : memref<160x32xf32, #tpu.memory_space<vmem>>, vector<128x32xf32>
    %160 = arith.truncf %159 : vector<128x32xf32> to vector<128x32xbf16>
    %c0_169 = arith.constant 0 : index
    %c96_170 = arith.constant 96 : index
    %161 = vector.load %arg28[%c0_169, %c96_170] : memref<128x288xbf16, #tpu.memory_space<vmem>>, vector<128x32xbf16>
    tpu.vector_store %arg28[%c0_169, %c96_170], %160 {strides = array<i32>} : memref<128x288xbf16, #tpu.memory_space<vmem>>, vector<128x32xbf16>,
    %c16_171 = arith.constant 16 : index
    %c0_172 = arith.constant 0 : index
    %162 = vector.load %arg27[%c16_171, %c0_172] : memref<160x32xf32, #tpu.memory_space<vmem>>, vector<128x32xf32>
    %163 = arith.truncf %162 : vector<128x32xf32> to vector<128x32xbf16>
    %c0_173 = arith.constant 0 : index
    %c128_174 = arith.constant 128 : index
    %164 = vector.load %arg28[%c0_173, %c128_174] : memref<128x288xbf16, #tpu.memory_space<vmem>>, vector<128x32xbf16>
    tpu.vector_store %arg28[%c0_173, %c128_174], %163 {strides = array<i32>} : memref<128x288xbf16, #tpu.memory_space<vmem>>, vector<128x32xbf16>,
    %c17_175 = arith.constant 17 : index
    %c0_176 = arith.constant 0 : index
    %165 = vector.load %arg27[%c17_175, %c0_176] : memref<160x32xf32, #tpu.memory_space<vmem>>, vector<128x32xf32>
    %166 = arith.truncf %165 : vector<128x32xf32> to vector<128x32xbf16>
    %c0_177 = arith.constant 0 : index
    %c160_178 = arith.constant 160 : index
    %167 = vector.load %arg28[%c0_177, %c160_178] : memref<128x288xbf16, #tpu.memory_space<vmem>>, vector<128x32xbf16>
    tpu.vector_store %arg28[%c0_177, %c160_178], %166 {strides = array<i32>} : memref<128x288xbf16, #tpu.memory_space<vmem>>, vector<128x32xbf16>,
    %c26_179 = arith.constant 26 : index
    %c0_180 = arith.constant 0 : index
    %168 = vector.load %arg27[%c26_179, %c0_180] : memref<160x32xf32, #tpu.memory_space<vmem>>, vector<128x32xf32>
    %169 = arith.truncf %168 : vector<128x32xf32> to vector<128x32xbf16>
    %c0_181 = arith.constant 0 : index
    %c192_182 = arith.constant 192 : index
    %170 = vector.load %arg28[%c0_181, %c192_182] : memref<128x288xbf16, #tpu.memory_space<vmem>>, vector<128x32xbf16>
    tpu.vector_store %arg28[%c0_181, %c192_182], %169 {strides = array<i32>} : memref<128x288xbf16, #tpu.memory_space<vmem>>, vector<128x32xbf16>,
    %c27_183 = arith.constant 27 : index
    %c0_184 = arith.constant 0 : index
    %171 = vector.load %arg27[%c27_183, %c0_184] : memref<160x32xf32, #tpu.memory_space<vmem>>, vector<128x32xf32>
    %172 = arith.truncf %171 : vector<128x32xf32> to vector<128x32xbf16>
    %c0_185 = arith.constant 0 : index
    %c224_186 = arith.constant 224 : index
    %173 = vector.load %arg28[%c0_185, %c224_186] : memref<128x288xbf16, #tpu.memory_space<vmem>>, vector<128x32xbf16>
    tpu.vector_store %arg28[%c0_185, %c224_186], %172 {strides = array<i32>} : memref<128x288xbf16, #tpu.memory_space<vmem>>, vector<128x32xbf16>,
    %c28_187 = arith.constant 28 : index
    %c0_188 = arith.constant 0 : index
    %174 = vector.load %arg27[%c28_187, %c0_188] : memref<160x32xf32, #tpu.memory_space<vmem>>, vector<128x32xf32>
    %175 = arith.truncf %174 : vector<128x32xf32> to vector<128x32xbf16>
    %c0_189 = arith.constant 0 : index
    %c256_190 = arith.constant 256 : index
    %176 = vector.load %arg28[%c0_189, %c256_190] : memref<128x288xbf16, #tpu.memory_space<vmem>>, vector<128x32xbf16>
    tpu.vector_store %arg28[%c0_189, %c256_190], %175 {strides = array<i32>} : memref<128x288xbf16, #tpu.memory_space<vmem>>, vector<128x32xbf16>,
    %c0_191 = arith.constant 0 : index
    %c0_192 = arith.constant 0 : index
    %177 = vector.load %arg28[%c0_191, %c0_192] : memref<128x288xbf16, #tpu.memory_space<vmem>>, vector<128x288xbf16>
    %cst_193 = arith.constant dense<0.000000e+00> : vector<128x32xf32>
    %178 = tpu.matmul %177, %149, %cst_193 {dimension_numbers = #tpu.dot_dimension_numbers<[1], [0], [0], [1], [0, 0, 1, 1], [], []>} : vector<128x288xbf16>, vector<288x32xbf16>, vector<128x32xf32> -> vector<128x32xf32>
    %c1_194 = arith.constant 1 : index
    %c0_195 = arith.constant 0 : index
    %c0_196 = arith.constant 0 : index
    %179 = vector.load %arg8[%c1_194, %c0_195, %c0_196] : memref<2x1x32xf32, #tpu.memory_space<vmem>>, vector<1x1x32xf32>
    %180 = vector.shape_cast %179 : vector<1x1x32xf32> to vector<1x32xf32>
    %181 = vector.broadcast %180 : vector<1x32xf32> to vector<128x32xf32>
    %182 = arith.mulf %178, %181 : vector<128x32xf32>
    %c1_197 = arith.constant 1 : index
    %c0_198 = arith.constant 0 : index
    %c0_199 = arith.constant 0 : index
    %183 = vector.load %arg9[%c1_197, %c0_198, %c0_199] : memref<2x1x32xf32, #tpu.memory_space<vmem>>, vector<1x1x32xf32>
    %184 = vector.shape_cast %183 : vector<1x1x32xf32> to vector<1x32xf32>
    %185 = vector.broadcast %184 : vector<1x32xf32> to vector<128x32xf32>
    %186 = arith.addf %182, %185 : vector<128x32xf32>
    %cst_200 = arith.constant 0.000000e+00 : f32
    %187 = vector.broadcast %cst_200 : f32 to vector<128x32xf32>
    %188 = arith.maximumf %186, %187 : vector<128x32xf32>
    %189 = vector.broadcast %0 : vector<128x1xf32> to vector<128x32xf32>
    %190 = arith.mulf %188, %189 : vector<128x32xf32>
    %c16_201 = arith.constant 16 : index
    %c0_202 = arith.constant 0 : index
    %191 = vector.load %arg27[%c16_201, %c0_202] : memref<160x32xf32, #tpu.memory_space<vmem>>, vector<128x32xf32>
    tpu.vector_store %arg27[%c16_201, %c0_202], %190 {strides = array<i32>} : memref<160x32xf32, #tpu.memory_space<vmem>>, vector<128x32xf32>,
    %c1_203 = arith.constant 1 : index
    %c0_204 = arith.constant 0 : index
    %c0_205 = arith.constant 0 : index
    %192 = vector.load %arg10[%c1_203, %c0_204, %c0_205] : memref<2x288x32xbf16, #tpu.memory_space<vmem>>, vector<1x288x32xbf16>
    %193 = vector.shape_cast %192 : vector<1x288x32xbf16> to vector<288x32xbf16>
    %c4_206 = arith.constant 4 : index
    %c0_207 = arith.constant 0 : index
    %194 = vector.load %arg27[%c4_206, %c0_207] : memref<160x32xf32, #tpu.memory_space<vmem>>, vector<128x32xf32>
    %195 = arith.truncf %194 : vector<128x32xf32> to vector<128x32xbf16>
    %c0_208 = arith.constant 0 : index
    %c0_209 = arith.constant 0 : index
    %196 = vector.load %arg28[%c0_208, %c0_209] : memref<128x288xbf16, #tpu.memory_space<vmem>>, vector<128x32xbf16>
    tpu.vector_store %arg28[%c0_208, %c0_209], %195 {strides = array<i32>} : memref<128x288xbf16, #tpu.memory_space<vmem>>, vector<128x32xbf16>,
    %c5_210 = arith.constant 5 : index
    %c0_211 = arith.constant 0 : index
    %197 = vector.load %arg27[%c5_210, %c0_211] : memref<160x32xf32, #tpu.memory_space<vmem>>, vector<128x32xf32>
    %198 = arith.truncf %197 : vector<128x32xf32> to vector<128x32xbf16>
    %c0_212 = arith.constant 0 : index
    %c32_213 = arith.constant 32 : index
    %199 = vector.load %arg28[%c0_212, %c32_213] : memref<128x288xbf16, #tpu.memory_space<vmem>>, vector<128x32xbf16>
    tpu.vector_store %arg28[%c0_212, %c32_213], %198 {strides = array<i32>} : memref<128x288xbf16, #tpu.memory_space<vmem>>, vector<128x32xbf16>,
    %c6_214 = arith.constant 6 : index
    %c0_215 = arith.constant 0 : index
    %200 = vector.load %arg27[%c6_214, %c0_215] : memref<160x32xf32, #tpu.memory_space<vmem>>, vector<128x32xf32>
    %201 = arith.truncf %200 : vector<128x32xf32> to vector<128x32xbf16>
    %c0_216 = arith.constant 0 : index
    %c64_217 = arith.constant 64 : index
    %202 = vector.load %arg28[%c0_216, %c64_217] : memref<128x288xbf16, #tpu.memory_space<vmem>>, vector<128x32xbf16>
    tpu.vector_store %arg28[%c0_216, %c64_217], %201 {strides = array<i32>} : memref<128x288xbf16, #tpu.memory_space<vmem>>, vector<128x32xbf16>,
    %c15_218 = arith.constant 15 : index
    %c0_219 = arith.constant 0 : index
    %203 = vector.load %arg27[%c15_218, %c0_219] : memref<160x32xf32, #tpu.memory_space<vmem>>, vector<128x32xf32>
    %204 = arith.truncf %203 : vector<128x32xf32> to vector<128x32xbf16>
    %c0_220 = arith.constant 0 : index
    %c96_221 = arith.constant 96 : index
    %205 = vector.load %arg28[%c0_220, %c96_221] : memref<128x288xbf16, #tpu.memory_space<vmem>>, vector<128x32xbf16>
    tpu.vector_store %arg28[%c0_220, %c96_221], %204 {strides = array<i32>} : memref<128x288xbf16, #tpu.memory_space<vmem>>, vector<128x32xbf16>,
    %c16_222 = arith.constant 16 : index
    %c0_223 = arith.constant 0 : index
    %206 = vector.load %arg27[%c16_222, %c0_223] : memref<160x32xf32, #tpu.memory_space<vmem>>, vector<128x32xf32>
    %207 = arith.truncf %206 : vector<128x32xf32> to vector<128x32xbf16>
    %c0_224 = arith.constant 0 : index
    %c128_225 = arith.constant 128 : index
    %208 = vector.load %arg28[%c0_224, %c128_225] : memref<128x288xbf16, #tpu.memory_space<vmem>>, vector<128x32xbf16>
    tpu.vector_store %arg28[%c0_224, %c128_225], %207 {strides = array<i32>} : memref<128x288xbf16, #tpu.memory_space<vmem>>, vector<128x32xbf16>,
    %c17_226 = arith.constant 17 : index
    %c0_227 = arith.constant 0 : index
    %209 = vector.load %arg27[%c17_226, %c0_227] : memref<160x32xf32, #tpu.memory_space<vmem>>, vector<128x32xf32>
    %210 = arith.truncf %209 : vector<128x32xf32> to vector<128x32xbf16>
    %c0_228 = arith.constant 0 : index
    %c160_229 = arith.constant 160 : index
    %211 = vector.load %arg28[%c0_228, %c160_229] : memref<128x288xbf16, #tpu.memory_space<vmem>>, vector<128x32xbf16>
    tpu.vector_store %arg28[%c0_228, %c160_229], %210 {strides = array<i32>} : memref<128x288xbf16, #tpu.memory_space<vmem>>, vector<128x32xbf16>,
    %c26_230 = arith.constant 26 : index
    %c0_231 = arith.constant 0 : index
    %212 = vector.load %arg27[%c26_230, %c0_231] : memref<160x32xf32, #tpu.memory_space<vmem>>, vector<128x32xf32>
    %213 = arith.truncf %212 : vector<128x32xf32> to vector<128x32xbf16>
    %c0_232 = arith.constant 0 : index
    %c192_233 = arith.constant 192 : index
    %214 = vector.load %arg28[%c0_232, %c192_233] : memref<128x288xbf16, #tpu.memory_space<vmem>>, vector<128x32xbf16>
    tpu.vector_store %arg28[%c0_232, %c192_233], %213 {strides = array<i32>} : memref<128x288xbf16, #tpu.memory_space<vmem>>, vector<128x32xbf16>,
    %c27_234 = arith.constant 27 : index
    %c0_235 = arith.constant 0 : index
    %215 = vector.load %arg27[%c27_234, %c0_235] : memref<160x32xf32, #tpu.memory_space<vmem>>, vector<128x32xf32>
    %216 = arith.truncf %215 : vector<128x32xf32> to vector<128x32xbf16>
    %c0_236 = arith.constant 0 : index
    %c224_237 = arith.constant 224 : index
    %217 = vector.load %arg28[%c0_236, %c224_237] : memref<128x288xbf16, #tpu.memory_space<vmem>>, vector<128x32xbf16>
    tpu.vector_store %arg28[%c0_236, %c224_237], %216 {strides = array<i32>} : memref<128x288xbf16, #tpu.memory_space<vmem>>, vector<128x32xbf16>,
    %c28_238 = arith.constant 28 : index
    %c0_239 = arith.constant 0 : index
    %218 = vector.load %arg27[%c28_238, %c0_239] : memref<160x32xf32, #tpu.memory_space<vmem>>, vector<128x32xf32>
    %219 = arith.truncf %218 : vector<128x32xf32> to vector<128x32xbf16>
    %c0_240 = arith.constant 0 : index
    %c256_241 = arith.constant 256 : index
    %220 = vector.load %arg28[%c0_240, %c256_241] : memref<128x288xbf16, #tpu.memory_space<vmem>>, vector<128x32xbf16>
    tpu.vector_store %arg28[%c0_240, %c256_241], %219 {strides = array<i32>} : memref<128x288xbf16, #tpu.memory_space<vmem>>, vector<128x32xbf16>,
    %c0_242 = arith.constant 0 : index
    %c0_243 = arith.constant 0 : index
    %221 = vector.load %arg28[%c0_242, %c0_243] : memref<128x288xbf16, #tpu.memory_space<vmem>>, vector<128x288xbf16>
    %cst_244 = arith.constant dense<0.000000e+00> : vector<128x32xf32>
    %222 = tpu.matmul %221, %193, %cst_244 {dimension_numbers = #tpu.dot_dimension_numbers<[1], [0], [0], [1], [0, 0, 1, 1], [], []>} : vector<128x288xbf16>, vector<288x32xbf16>, vector<128x32xf32> -> vector<128x32xf32>
    %c0_245 = arith.constant 0 : index
    %c0_246 = arith.constant 0 : index
    %223 = vector.load %arg26[%c0_245, %c0_246] : memref<128x32xf32, #tpu.memory_space<vmem>>, vector<128x32xf32>
    %224 = vector.broadcast %0 : vector<128x1xf32> to vector<128x32xf32>
    %225 = arith.mulf %222, %224 : vector<128x32xf32>
    %226 = arith.addf %223, %225 : vector<128x32xf32>
    %c0_247 = arith.constant 0 : index
    %c0_248 = arith.constant 0 : index
    %227 = vector.load %arg26[%c0_247, %c0_248] : memref<128x32xf32, #tpu.memory_space<vmem>>, vector<128x32xf32>
    tpu.vector_store %arg26[%c0_247, %c0_248], %226 {strides = array<i32>} : memref<128x32xf32, #tpu.memory_space<vmem>>, vector<128x32xf32>,
    %c0_249 = arith.constant 0 : index
    %c0_250 = arith.constant 0 : index
    %228 = vector.load %arg26[%c0_249, %c0_250] : memref<128x32xf32, #tpu.memory_space<vmem>>, vector<128x32xf32>
    %c0_251 = arith.constant 0 : index
    %c0_252 = arith.constant 0 : index
    %229 = vector.load %arg11[%c0_251, %c0_252] : memref<1x32xf32, #tpu.memory_space<vmem>>, vector<1x32xf32>
    %230 = vector.broadcast %229 : vector<1x32xf32> to vector<128x32xf32>
    %231 = arith.mulf %228, %230 : vector<128x32xf32>
    %c0_253 = arith.constant 0 : index
    %c0_254 = arith.constant 0 : index
    %232 = vector.load %arg12[%c0_253, %c0_254] : memref<1x32xf32, #tpu.memory_space<vmem>>, vector<1x32xf32>
    %233 = vector.broadcast %232 : vector<1x32xf32> to vector<128x32xf32>
    %234 = arith.addf %231, %233 : vector<128x32xf32>
    %cst_255 = arith.constant 0.000000e+00 : f32
    %235 = vector.broadcast %cst_255 : f32 to vector<128x32xf32>
    %236 = arith.maximumf %234, %235 : vector<128x32xf32>
    %237 = vector.broadcast %0 : vector<128x1xf32> to vector<128x32xf32>
    %238 = arith.mulf %236, %237 : vector<128x32xf32>
    %239 = arith.truncf %238 : vector<128x32xf32> to vector<128x32xbf16>
    %c0_256 = arith.constant 0 : index
    %c0_257 = arith.constant 0 : index
    %240 = vector.load %arg13[%c0_256, %c0_257] : memref<32x32xbf16, #tpu.memory_space<vmem>>, vector<32x32xbf16>
    %cst_258 = arith.constant dense<0.000000e+00> : vector<128x32xf32>
    %241 = tpu.matmul %239, %240, %cst_258 {dimension_numbers = #tpu.dot_dimension_numbers<[1], [0], [0], [1], [0, 0, 1, 1], [], []>} : vector<128x32xbf16>, vector<32x32xbf16>, vector<128x32xf32> -> vector<128x32xf32>
    %c0_259 = arith.constant 0 : index
    %c0_260 = arith.constant 0 : index
    %242 = vector.load %arg14[%c0_259, %c0_260] : memref<1x32xf32, #tpu.memory_space<vmem>>, vector<1x32xf32>
    %243 = vector.broadcast %242 : vector<1x32xf32> to vector<128x32xf32>
    %244 = arith.mulf %241, %243 : vector<128x32xf32>
    %c0_261 = arith.constant 0 : index
    %c0_262 = arith.constant 0 : index
    %245 = vector.load %arg15[%c0_261, %c0_262] : memref<1x32xf32, #tpu.memory_space<vmem>>, vector<1x32xf32>
    %246 = vector.broadcast %245 : vector<1x32xf32> to vector<128x32xf32>
    %247 = arith.addf %244, %246 : vector<128x32xf32>
    %cst_263 = arith.constant 0.000000e+00 : f32
    %248 = vector.broadcast %cst_263 : f32 to vector<128x32xf32>
    %249 = arith.maximumf %247, %248 : vector<128x32xf32>
    %250 = arith.truncf %249 : vector<128x32xf32> to vector<128x32xbf16>
    %c0_264 = arith.constant 0 : index
    %c0_265 = arith.constant 0 : index
    %251 = vector.load %arg16[%c0_264, %c0_265] : memref<32x1xbf16, #tpu.memory_space<vmem>>, vector<32x1xbf16>
    %cst_266 = arith.constant dense<0.000000e+00> : vector<128x1xf32>
    %252 = tpu.matmul %250, %251, %cst_266 {dimension_numbers = #tpu.dot_dimension_numbers<[1], [0], [0], [1], [0, 0, 1, 1], [], []>} : vector<128x32xbf16>, vector<32x1xbf16>, vector<128x1xf32> -> vector<128x1xf32>
    %cst_267 = arith.constant 0.000000e+00 : f32
    %253 = vector.broadcast %cst_267 : f32 to vector<128x1xf32>
    %254 = arith.cmpf ogt, %0, %253 : vector<128x1xf32>
    %cst_268 = arith.constant -1.000000e+30 : f32
    %255 = vector.broadcast %cst_268 : f32 to vector<128x1xf32>
    %256 = arith.select %254, %252, %255 : vector<128x1xi1>, vector<128x1xf32>
    %cst_269 = arith.constant dense<0xFF800000> : vector<1xf32>
    %257 = vector.multi_reduction <maximumf>, %256, %cst_269 [0] : vector<128x1xf32> to vector<1xf32>
    %258 = vector.shape_cast %257 : vector<1xf32> to vector<1x1xf32>
    %cst_270 = arith.constant 0.000000e+00 : f32
    %259 = vector.broadcast %cst_270 : f32 to vector<128x1xf32>
    %260 = arith.cmpf ogt, %0, %259 : vector<128x1xf32>
    %261 = vector.broadcast %258 : vector<1x1xf32> to vector<128x1xf32>
    %262 = arith.subf %256, %261 : vector<128x1xf32>
    %263 = math.exp %262 : vector<128x1xf32>
    %cst_271 = arith.constant 0.000000e+00 : f32
    %264 = vector.broadcast %cst_271 : f32 to vector<128x1xf32>
    %265 = arith.select %260, %263, %264 : vector<128x1xi1>, vector<128x1xf32>
    %cst_272 = arith.constant dense<0.000000e+00> : vector<1xf32>
    %266 = vector.multi_reduction <add>, %265, %cst_272 [0] : vector<128x1xf32> to vector<1xf32>
    %267 = vector.shape_cast %266 : vector<1xf32> to vector<1x1xf32>
    %268 = math.log %267 : vector<1x1xf32>
    %269 = arith.addf %268, %258 : vector<1x1xf32>
    %270 = vector.broadcast %269 : vector<1x1xf32> to vector<128x1xf32>
    %271 = arith.subf %252, %270 : vector<128x1xf32>
    %c0_273 = arith.constant 0 : index
    %c0_274 = arith.constant 0 : index
    %c0_275 = arith.constant 0 : index
    %272 = vector.load %arg24[%c0_273, %c0_274, %c0_275] : memref<1x128x1xf32, #tpu.memory_space<vmem>>, vector<1x128x1xf32>
    %273 = vector.shape_cast %272 : vector<1x128x1xf32> to vector<128x1xf32>
    %274 = vector.shape_cast %271 : vector<128x1xf32> to vector<1x128x1xf32>
    tpu.vector_store %arg24[%c0_273, %c0_274, %c0_275], %274 {strides = array<i32>} : memref<1x128x1xf32, #tpu.memory_space<vmem>>, vector<1x128x1xf32>,
    %c0_276 = arith.constant 0 : index
    %c0_277 = arith.constant 0 : index
    %275 = vector.load %arg3[%c0_276, %c0_277] : memref<144x128xbf16, #tpu.memory_space<vmem>>, vector<144x128xbf16>
    %cst_278 = arith.constant dense<0.000000e+00> : vector<144x32xf32>
    %276 = tpu.matmul %275, %239, %cst_278 {dimension_numbers = #tpu.dot_dimension_numbers<[1], [0], [0], [1], [0, 0, 1, 1], [], []>} : vector<144x128xbf16>, vector<128x32xbf16>, vector<144x32xf32> -> vector<144x32xf32>
    %277 = vector.extract_strided_slice %276 {offsets = [0, 0], sizes = [16, 32], strides = [1, 1]} : vector<144x32xf32> to vector<16x32xf32>
    %278 = arith.truncf %277 : vector<16x32xf32> to vector<16x32xbf16>
    %c0_279 = arith.constant 0 : index
    %c0_280 = arith.constant 0 : index
    %279 = vector.load %arg29[%c0_279, %c0_280] : memref<16x288xbf16, #tpu.memory_space<vmem>>, vector<16x32xbf16>
    tpu.vector_store %arg29[%c0_279, %c0_280], %278 {strides = array<i32>} : memref<16x288xbf16, #tpu.memory_space<vmem>>, vector<16x32xbf16>,
    %280 = vector.extract_strided_slice %276 {offsets = [16, 0], sizes = [16, 32], strides = [1, 1]} : vector<144x32xf32> to vector<16x32xf32>
    %281 = arith.truncf %280 : vector<16x32xf32> to vector<16x32xbf16>
    %c0_281 = arith.constant 0 : index
    %c32_282 = arith.constant 32 : index
    %282 = vector.load %arg29[%c0_281, %c32_282] : memref<16x288xbf16, #tpu.memory_space<vmem>>, vector<16x32xbf16>
    tpu.vector_store %arg29[%c0_281, %c32_282], %281 {strides = array<i32>} : memref<16x288xbf16, #tpu.memory_space<vmem>>, vector<16x32xbf16>,
    %283 = vector.extract_strided_slice %276 {offsets = [32, 0], sizes = [16, 32], strides = [1, 1]} : vector<144x32xf32> to vector<16x32xf32>
    %284 = arith.truncf %283 : vector<16x32xf32> to vector<16x32xbf16>
    %c0_283 = arith.constant 0 : index
    %c64_284 = arith.constant 64 : index
    %285 = vector.load %arg29[%c0_283, %c64_284] : memref<16x288xbf16, #tpu.memory_space<vmem>>, vector<16x32xbf16>
    tpu.vector_store %arg29[%c0_283, %c64_284], %284 {strides = array<i32>} : memref<16x288xbf16, #tpu.memory_space<vmem>>, vector<16x32xbf16>,
    %286 = vector.extract_strided_slice %276 {offsets = [48, 0], sizes = [16, 32], strides = [1, 1]} : vector<144x32xf32> to vector<16x32xf32>
    %287 = arith.truncf %286 : vector<16x32xf32> to vector<16x32xbf16>
    %c0_285 = arith.constant 0 : index
    %c96_286 = arith.constant 96 : index
    %288 = vector.load %arg29[%c0_285, %c96_286] : memref<16x288xbf16, #tpu.memory_space<vmem>>, vector<16x32xbf16>
    tpu.vector_store %arg29[%c0_285, %c96_286], %287 {strides = array<i32>} : memref<16x288xbf16, #tpu.memory_space<vmem>>, vector<16x32xbf16>,
    %289 = vector.extract_strided_slice %276 {offsets = [64, 0], sizes = [16, 32], strides = [1, 1]} : vector<144x32xf32> to vector<16x32xf32>
    %290 = arith.truncf %289 : vector<16x32xf32> to vector<16x32xbf16>
    %c0_287 = arith.constant 0 : index
    %c128_288 = arith.constant 128 : index
    %291 = vector.load %arg29[%c0_287, %c128_288] : memref<16x288xbf16, #tpu.memory_space<vmem>>, vector<16x32xbf16>
    tpu.vector_store %arg29[%c0_287, %c128_288], %290 {strides = array<i32>} : memref<16x288xbf16, #tpu.memory_space<vmem>>, vector<16x32xbf16>,
    %292 = vector.extract_strided_slice %276 {offsets = [80, 0], sizes = [16, 32], strides = [1, 1]} : vector<144x32xf32> to vector<16x32xf32>
    %293 = arith.truncf %292 : vector<16x32xf32> to vector<16x32xbf16>
    %c0_289 = arith.constant 0 : index
    %c160_290 = arith.constant 160 : index
    %294 = vector.load %arg29[%c0_289, %c160_290] : memref<16x288xbf16, #tpu.memory_space<vmem>>, vector<16x32xbf16>
    tpu.vector_store %arg29[%c0_289, %c160_290], %293 {strides = array<i32>} : memref<16x288xbf16, #tpu.memory_space<vmem>>, vector<16x32xbf16>,
    %295 = vector.extract_strided_slice %276 {offsets = [96, 0], sizes = [16, 32], strides = [1, 1]} : vector<144x32xf32> to vector<16x32xf32>
    %296 = arith.truncf %295 : vector<16x32xf32> to vector<16x32xbf16>
    %c0_291 = arith.constant 0 : index
    %c192_292 = arith.constant 192 : index
    %297 = vector.load %arg29[%c0_291, %c192_292] : memref<16x288xbf16, #tpu.memory_space<vmem>>, vector<16x32xbf16>
    tpu.vector_store %arg29[%c0_291, %c192_292], %296 {strides = array<i32>} : memref<16x288xbf16, #tpu.memory_space<vmem>>, vector<16x32xbf16>,
    %298 = vector.extract_strided_slice %276 {offsets = [112, 0], sizes = [16, 32], strides = [1, 1]} : vector<144x32xf32> to vector<16x32xf32>
    %299 = arith.truncf %298 : vector<16x32xf32> to vector<16x32xbf16>
    %c0_293 = arith.constant 0 : index
    %c224_294 = arith.constant 224 : index
    %300 = vector.load %arg29[%c0_293, %c224_294] : memref<16x288xbf16, #tpu.memory_space<vmem>>, vector<16x32xbf16>
    tpu.vector_store %arg29[%c0_293, %c224_294], %299 {strides = array<i32>} : memref<16x288xbf16, #tpu.memory_space<vmem>>, vector<16x32xbf16>,
    %301 = vector.extract_strided_slice %276 {offsets = [128, 0], sizes = [16, 32], strides = [1, 1]} : vector<144x32xf32> to vector<16x32xf32>
    %302 = arith.truncf %301 : vector<16x32xf32> to vector<16x32xbf16>
    %c0_295 = arith.constant 0 : index
    %c256_296 = arith.constant 256 : index
    %303 = vector.load %arg29[%c0_295, %c256_296] : memref<16x288xbf16, #tpu.memory_space<vmem>>, vector<16x32xbf16>
    tpu.vector_store %arg29[%c0_295, %c256_296], %302 {strides = array<i32>} : memref<16x288xbf16, #tpu.memory_space<vmem>>, vector<16x32xbf16>,
    %c0_297 = arith.constant 0 : index
    %c0_298 = arith.constant 0 : index
    %304 = vector.load %arg29[%c0_297, %c0_298] : memref<16x288xbf16, #tpu.memory_space<vmem>>, vector<16x288xbf16>
    %c0_299 = arith.constant 0 : index
    %c0_300 = arith.constant 0 : index
    %305 = vector.load %arg17[%c0_299, %c0_300] : memref<288x32xbf16, #tpu.memory_space<vmem>>, vector<288x32xbf16>
    %cst_301 = arith.constant dense<0.000000e+00> : vector<16x32xf32>
    %306 = tpu.matmul %304, %305, %cst_301 {dimension_numbers = #tpu.dot_dimension_numbers<[1], [0], [0], [1], [0, 0, 1, 1], [], []>} : vector<16x288xbf16>, vector<288x32xbf16>, vector<16x32xf32> -> vector<16x32xf32>
    %c0_302 = arith.constant 0 : index
    %c0_303 = arith.constant 0 : index
    %307 = vector.load %arg18[%c0_302, %c0_303] : memref<1x32xf32, #tpu.memory_space<vmem>>, vector<1x32xf32>
    %308 = vector.broadcast %307 : vector<1x32xf32> to vector<16x32xf32>
    %309 = arith.mulf %306, %308 : vector<16x32xf32>
    %c0_304 = arith.constant 0 : index
    %c0_305 = arith.constant 0 : index
    %310 = vector.load %arg19[%c0_304, %c0_305] : memref<1x32xf32, #tpu.memory_space<vmem>>, vector<1x32xf32>
    %311 = vector.broadcast %310 : vector<1x32xf32> to vector<16x32xf32>
    %312 = arith.addf %309, %311 : vector<16x32xf32>
    %cst_306 = arith.constant 0.000000e+00 : f32
    %313 = vector.broadcast %cst_306 : f32 to vector<16x32xf32>
    %314 = arith.maximumf %312, %313 : vector<16x32xf32>
    %315 = vector.extract_strided_slice %314 {offsets = [0, 0], sizes = [1, 32], strides = [1, 1]} : vector<16x32xf32> to vector<1x32xf32>
    %316 = arith.truncf %315 : vector<1x32xf32> to vector<1x32xbf16>
    %c0_307 = arith.constant 0 : index
    %c0_308 = arith.constant 0 : index
    %317 = vector.load %arg29[%c0_307, %c0_308] : memref<16x288xbf16, #tpu.memory_space<vmem>>, vector<1x32xbf16>
    tpu.vector_store %arg29[%c0_307, %c0_308], %316 {strides = array<i32>} : memref<16x288xbf16, #tpu.memory_space<vmem>>, vector<1x32xbf16>,
    %318 = vector.extract_strided_slice %314 {offsets = [1, 0], sizes = [1, 32], strides = [1, 1]} : vector<16x32xf32> to vector<1x32xf32>
    %319 = arith.truncf %318 : vector<1x32xf32> to vector<1x32xbf16>
    %c0_309 = arith.constant 0 : index
    %c32_310 = arith.constant 32 : index
    %320 = vector.load %arg29[%c0_309, %c32_310] : memref<16x288xbf16, #tpu.memory_space<vmem>>, vector<1x32xbf16>
    tpu.vector_store %arg29[%c0_309, %c32_310], %319 {strides = array<i32>} : memref<16x288xbf16, #tpu.memory_space<vmem>>, vector<1x32xbf16>,
    %321 = vector.extract_strided_slice %314 {offsets = [2, 0], sizes = [1, 32], strides = [1, 1]} : vector<16x32xf32> to vector<1x32xf32>
    %322 = arith.truncf %321 : vector<1x32xf32> to vector<1x32xbf16>
    %c0_311 = arith.constant 0 : index
    %c64_312 = arith.constant 64 : index
    %323 = vector.load %arg29[%c0_311, %c64_312] : memref<16x288xbf16, #tpu.memory_space<vmem>>, vector<1x32xbf16>
    tpu.vector_store %arg29[%c0_311, %c64_312], %322 {strides = array<i32>} : memref<16x288xbf16, #tpu.memory_space<vmem>>, vector<1x32xbf16>,
    %324 = vector.extract_strided_slice %314 {offsets = [3, 0], sizes = [1, 32], strides = [1, 1]} : vector<16x32xf32> to vector<1x32xf32>
    %325 = arith.truncf %324 : vector<1x32xf32> to vector<1x32xbf16>
    %c0_313 = arith.constant 0 : index
    %c96_314 = arith.constant 96 : index
    %326 = vector.load %arg29[%c0_313, %c96_314] : memref<16x288xbf16, #tpu.memory_space<vmem>>, vector<1x32xbf16>
    tpu.vector_store %arg29[%c0_313, %c96_314], %325 {strides = array<i32>} : memref<16x288xbf16, #tpu.memory_space<vmem>>, vector<1x32xbf16>,
    %327 = vector.extract_strided_slice %314 {offsets = [4, 0], sizes = [1, 32], strides = [1, 1]} : vector<16x32xf32> to vector<1x32xf32>
    %328 = arith.truncf %327 : vector<1x32xf32> to vector<1x32xbf16>
    %c0_315 = arith.constant 0 : index
    %c128_316 = arith.constant 128 : index
    %329 = vector.load %arg29[%c0_315, %c128_316] : memref<16x288xbf16, #tpu.memory_space<vmem>>, vector<1x32xbf16>
    tpu.vector_store %arg29[%c0_315, %c128_316], %328 {strides = array<i32>} : memref<16x288xbf16, #tpu.memory_space<vmem>>, vector<1x32xbf16>,
    %330 = vector.extract_strided_slice %314 {offsets = [5, 0], sizes = [1, 32], strides = [1, 1]} : vector<16x32xf32> to vector<1x32xf32>
    %331 = arith.truncf %330 : vector<1x32xf32> to vector<1x32xbf16>
    %c0_317 = arith.constant 0 : index
    %c160_318 = arith.constant 160 : index
    %332 = vector.load %arg29[%c0_317, %c160_318] : memref<16x288xbf16, #tpu.memory_space<vmem>>, vector<1x32xbf16>
    tpu.vector_store %arg29[%c0_317, %c160_318], %331 {strides = array<i32>} : memref<16x288xbf16, #tpu.memory_space<vmem>>, vector<1x32xbf16>,
    %333 = vector.extract_strided_slice %314 {offsets = [6, 0], sizes = [1, 32], strides = [1, 1]} : vector<16x32xf32> to vector<1x32xf32>
    %334 = arith.truncf %333 : vector<1x32xf32> to vector<1x32xbf16>
    %c0_319 = arith.constant 0 : index
    %c192_320 = arith.constant 192 : index
    %335 = vector.load %arg29[%c0_319, %c192_320] : memref<16x288xbf16, #tpu.memory_space<vmem>>, vector<1x32xbf16>
    tpu.vector_store %arg29[%c0_319, %c192_320], %334 {strides = array<i32>} : memref<16x288xbf16, #tpu.memory_space<vmem>>, vector<1x32xbf16>,
    %336 = vector.extract_strided_slice %314 {offsets = [7, 0], sizes = [1, 32], strides = [1, 1]} : vector<16x32xf32> to vector<1x32xf32>
    %337 = arith.truncf %336 : vector<1x32xf32> to vector<1x32xbf16>
    %c0_321 = arith.constant 0 : index
    %c224_322 = arith.constant 224 : index
    %338 = vector.load %arg29[%c0_321, %c224_322] : memref<16x288xbf16, #tpu.memory_space<vmem>>, vector<1x32xbf16>
    tpu.vector_store %arg29[%c0_321, %c224_322], %337 {strides = array<i32>} : memref<16x288xbf16, #tpu.memory_space<vmem>>, vector<1x32xbf16>,
    %339 = vector.extract_strided_slice %314 {offsets = [8, 0], sizes = [1, 32], strides = [1, 1]} : vector<16x32xf32> to vector<1x32xf32>
    %340 = arith.truncf %339 : vector<1x32xf32> to vector<1x32xbf16>
    %c0_323 = arith.constant 0 : index
    %c256_324 = arith.constant 256 : index
    %341 = vector.load %arg29[%c0_323, %c256_324] : memref<16x288xbf16, #tpu.memory_space<vmem>>, vector<1x32xbf16>
    tpu.vector_store %arg29[%c0_323, %c256_324], %340 {strides = array<i32>} : memref<16x288xbf16, #tpu.memory_space<vmem>>, vector<1x32xbf16>,
    %c0_325 = arith.constant 0 : index
    %c0_326 = arith.constant 0 : index
    %342 = vector.load %arg29[%c0_325, %c0_326] : memref<16x288xbf16, #tpu.memory_space<vmem>>, vector<1x288xbf16>
    %c0_327 = arith.constant 0 : index
    %c0_328 = arith.constant 0 : index
    %343 = vector.load %arg20[%c0_327, %c0_328] : memref<288x32xbf16, #tpu.memory_space<vmem>>, vector<288x32xbf16>
    %cst_329 = arith.constant dense<0.000000e+00> : vector<1x32xf32>
    %344 = tpu.matmul %342, %343, %cst_329 {dimension_numbers = #tpu.dot_dimension_numbers<[1], [0], [0], [1], [0, 0, 1, 1], [], []>} : vector<1x288xbf16>, vector<288x32xbf16>, vector<1x32xf32> -> vector<1x32xf32>
    %c0_330 = arith.constant 0 : index
    %c0_331 = arith.constant 0 : index
    %345 = vector.load %arg21[%c0_330, %c0_331] : memref<1x32xf32, #tpu.memory_space<vmem>>, vector<1x32xf32>
    %346 = arith.addf %344, %345 : vector<1x32xf32>
    %cst_332 = arith.constant 0.000000e+00 : f32
    %347 = vector.broadcast %cst_332 : f32 to vector<1x32xf32>
    %348 = arith.maximumf %346, %347 : vector<1x32xf32>
    %349 = arith.truncf %348 : vector<1x32xf32> to vector<1x32xbf16>
    %c0_333 = arith.constant 0 : index
    %c0_334 = arith.constant 0 : index
    %350 = vector.load %arg22[%c0_333, %c0_334] : memref<32x1xbf16, #tpu.memory_space<vmem>>, vector<32x1xbf16>
    %cst_335 = arith.constant dense<0.000000e+00> : vector<1x1xf32>
    %351 = tpu.matmul %349, %350, %cst_335 {dimension_numbers = #tpu.dot_dimension_numbers<[1], [0], [0], [1], [0, 0, 1, 1], [], []>} : vector<1x32xbf16>, vector<32x1xbf16>, vector<1x1xf32> -> vector<1x1xf32>
    %c0_336 = arith.constant 0 : index
    %c0_337 = arith.constant 0 : index
    %352 = vector.load %arg23[%c0_336, %c0_337] : memref<1x1xf32, #tpu.memory_space<vmem>>, vector<1x1xf32>
    %353 = arith.addf %351, %352 : vector<1x1xf32>
    %354 = math.tanh %353 : vector<1x1xf32>
    %355 = vector.shape_cast %354 : vector<1x1xf32> to vector<1x1xf32>
    %356 = vector.broadcast %355 : vector<1x1xf32> to vector<1x128xf32>
    %c0_338 = arith.constant 0 : index
    %c0_339 = arith.constant 0 : index
    %c0_340 = arith.constant 0 : index
    %357 = vector.load %arg25[%c0_338, %c0_339, %c0_340] : memref<1x1x128xf32, #tpu.memory_space<vmem>>, vector<1x1x128xf32>
    %358 = vector.shape_cast %357 : vector<1x1x128xf32> to vector<1x128xf32>
    %359 = vector.shape_cast %356 : vector<1x128xf32> to vector<1x1x128xf32>
    tpu.vector_store %arg25[%c0_338, %c0_339, %c0_340], %359 {strides = array<i32>} : memref<1x1x128xf32, #tpu.memory_space<vmem>>, vector<1x1x128xf32>,
    return
  }
  func.func @transform_0(%arg0: i32) -> (i32, i32, i32) {
    %c0_i32 = arith.constant 0 : i32
    %c0_i32_0 = arith.constant 0 : i32
    %c0_i32_1 = arith.constant 0 : i32
    return %arg0, %c0_i32, %c0_i32_0 : i32, i32, i32
  }
  func.func @transform_1(%arg0: i32) -> (i32, i32) {
    %c0_i32 = arith.constant 0 : i32
    %c0_i32_0 = arith.constant 0 : i32
    %c0_i32_1 = arith.constant 0 : i32
    return %c0_i32, %c0_i32_0 : i32, i32
  }
  func.func @transform_2(%arg0: i32) -> (i32, i32) {
    %c0_i32 = arith.constant 0 : i32
    %c0_i32_0 = arith.constant 0 : i32
    %c0_i32_1 = arith.constant 0 : i32
    return %c0_i32, %c0_i32_0 : i32, i32
  }
  func.func @transform_3(%arg0: i32) -> (i32, i32) {
    %c0_i32 = arith.constant 0 : i32
    %c0_i32_0 = arith.constant 0 : i32
    %c0_i32_1 = arith.constant 0 : i32
    return %c0_i32, %c0_i32_0 : i32, i32
  }
  func.func @transform_4(%arg0: i32) -> (i32, i32, i32) {
    %c0_i32 = arith.constant 0 : i32
    %c0_i32_0 = arith.constant 0 : i32
    %c0_i32_1 = arith.constant 0 : i32
    %c0_i32_2 = arith.constant 0 : i32
    return %c0_i32, %c0_i32_0, %c0_i32_1 : i32, i32, i32
  }
  func.func @transform_5(%arg0: i32) -> (i32, i32, i32) {
    %c0_i32 = arith.constant 0 : i32
    %c0_i32_0 = arith.constant 0 : i32
    %c0_i32_1 = arith.constant 0 : i32
    %c0_i32_2 = arith.constant 0 : i32
    return %c0_i32, %c0_i32_0, %c0_i32_1 : i32, i32, i32
  }
  func.func @transform_6(%arg0: i32) -> (i32, i32, i32) {
    %c0_i32 = arith.constant 0 : i32
    %c0_i32_0 = arith.constant 0 : i32
    %c0_i32_1 = arith.constant 0 : i32
    %c0_i32_2 = arith.constant 0 : i32
    return %c0_i32, %c0_i32_0, %c0_i32_1 : i32, i32, i32
  }
  func.func @transform_7(%arg0: i32) -> (i32, i32, i32) {
    %c0_i32 = arith.constant 0 : i32
    %c0_i32_0 = arith.constant 0 : i32
    %c0_i32_1 = arith.constant 0 : i32
    %c0_i32_2 = arith.constant 0 : i32
    return %c0_i32, %c0_i32_0, %c0_i32_1 : i32, i32, i32
  }
  func.func @transform_8(%arg0: i32) -> (i32, i32, i32) {
    %c0_i32 = arith.constant 0 : i32
    %c0_i32_0 = arith.constant 0 : i32
    %c0_i32_1 = arith.constant 0 : i32
    %c0_i32_2 = arith.constant 0 : i32
    return %c0_i32, %c0_i32_0, %c0_i32_1 : i32, i32, i32
  }
  func.func @transform_9(%arg0: i32) -> (i32, i32, i32) {
    %c0_i32 = arith.constant 0 : i32
    %c0_i32_0 = arith.constant 0 : i32
    %c0_i32_1 = arith.constant 0 : i32
    %c0_i32_2 = arith.constant 0 : i32
    return %c0_i32, %c0_i32_0, %c0_i32_1 : i32, i32, i32
  }
  func.func @transform_10(%arg0: i32) -> (i32, i32) {
    %c0_i32 = arith.constant 0 : i32
    %c0_i32_0 = arith.constant 0 : i32
    %c0_i32_1 = arith.constant 0 : i32
    return %c0_i32, %c0_i32_0 : i32, i32
  }
  func.func @transform_11(%arg0: i32) -> (i32, i32) {
    %c0_i32 = arith.constant 0 : i32
    %c0_i32_0 = arith.constant 0 : i32
    %c0_i32_1 = arith.constant 0 : i32
    return %c0_i32, %c0_i32_0 : i32, i32
  }
  func.func @transform_12(%arg0: i32) -> (i32, i32) {
    %c0_i32 = arith.constant 0 : i32
    %c0_i32_0 = arith.constant 0 : i32
    %c0_i32_1 = arith.constant 0 : i32
    return %c0_i32, %c0_i32_0 : i32, i32
  }
  func.func @transform_13(%arg0: i32) -> (i32, i32) {
    %c0_i32 = arith.constant 0 : i32
    %c0_i32_0 = arith.constant 0 : i32
    %c0_i32_1 = arith.constant 0 : i32
    return %c0_i32, %c0_i32_0 : i32, i32
  }
  func.func @transform_14(%arg0: i32) -> (i32, i32) {
    %c0_i32 = arith.constant 0 : i32
    %c0_i32_0 = arith.constant 0 : i32
    %c0_i32_1 = arith.constant 0 : i32
    return %c0_i32, %c0_i32_0 : i32, i32
  }
  func.func @transform_15(%arg0: i32) -> (i32, i32) {
    %c0_i32 = arith.constant 0 : i32
    %c0_i32_0 = arith.constant 0 : i32
    %c0_i32_1 = arith.constant 0 : i32
    return %c0_i32, %c0_i32_0 : i32, i32
  }
  func.func @transform_16(%arg0: i32) -> (i32, i32) {
    %c0_i32 = arith.constant 0 : i32
    %c0_i32_0 = arith.constant 0 : i32
    %c0_i32_1 = arith.constant 0 : i32
    return %c0_i32, %c0_i32_0 : i32, i32
  }
  func.func @transform_17(%arg0: i32) -> (i32, i32) {
    %c0_i32 = arith.constant 0 : i32
    %c0_i32_0 = arith.constant 0 : i32
    %c0_i32_1 = arith.constant 0 : i32
    return %c0_i32, %c0_i32_0 : i32, i32
  }
  func.func @transform_18(%arg0: i32) -> (i32, i32) {
    %c0_i32 = arith.constant 0 : i32
    %c0_i32_0 = arith.constant 0 : i32
    %c0_i32_1 = arith.constant 0 : i32
    return %c0_i32, %c0_i32_0 : i32, i32
  }
  func.func @transform_19(%arg0: i32) -> (i32, i32) {
    %c0_i32 = arith.constant 0 : i32
    %c0_i32_0 = arith.constant 0 : i32
    %c0_i32_1 = arith.constant 0 : i32
    return %c0_i32, %c0_i32_0 : i32, i32
  }
  func.func @transform_20(%arg0: i32) -> (i32, i32) {
    %c0_i32 = arith.constant 0 : i32
    %c0_i32_0 = arith.constant 0 : i32
    %c0_i32_1 = arith.constant 0 : i32
    return %c0_i32, %c0_i32_0 : i32, i32
  }
  func.func @transform_21(%arg0: i32) -> (i32, i32) {
    %c0_i32 = arith.constant 0 : i32
    %c0_i32_0 = arith.constant 0 : i32
    %c0_i32_1 = arith.constant 0 : i32
    return %c0_i32, %c0_i32_0 : i32, i32
  }
  func.func @transform_22(%arg0: i32) -> (i32, i32) {
    %c0_i32 = arith.constant 0 : i32
    %c0_i32_0 = arith.constant 0 : i32
    %c0_i32_1 = arith.constant 0 : i32
    return %c0_i32, %c0_i32_0 : i32, i32
  }
  func.func @transform_23(%arg0: i32) -> (i32, i32, i32) {
    %c0_i32 = arith.constant 0 : i32
    %c0_i32_0 = arith.constant 0 : i32
    %c0_i32_1 = arith.constant 0 : i32
    return %arg0, %c0_i32, %c0_i32_0 : i32, i32, i32
  }
  func.func @transform_24(%arg0: i32) -> (i32, i32, i32) {
    %c0_i32 = arith.constant 0 : i32
    %c0_i32_0 = arith.constant 0 : i32
    %c0_i32_1 = arith.constant 0 : i32
    return %arg0, %c0_i32, %c0_i32_0 : i32, i32, i32
  }
}

</mosaic_0001>

<bundles_post_ra>
// kernel: utttnet_forward.1
= control target key start
LH: loop header
LB: loop body
LE: loop exit
PB: predicated region body
PF: predicated region fallthrough
CT: control target
= control target key end

     0   :  { %s14053_s27 = smov 0   ;;  %s17072_s0 = inlined_call_operand.vmem [shape: f32[2,128,32], index: 0, kind: input, shape index: {}]   ;;  %s17073_s1 = inlined_call_operand.vmem [shape: f32[128,1], index: 1, kind: input, shape index: {}]   ;;  %s17074_s2 = inlined_call_operand.vmem [shape: bf16[144,128], index: 2, kind: input, shape index: {}]   ;;  %s17075_s3 = inlined_call_operand.vmem [shape: bf16[288,32], index: 3, kind: input, shape index: {}]   ;;  %s17076_s4 = inlined_call_operand.vmem [shape: f32[2,1,32], index: 4, kind: input, shape index: {}]   ;;  %s17077_s5 = inlined_call_operand.vmem [shape: f32[2,1,32], index: 5, kind: input, shape index: {}]   ;;  %s17078_s6 = inlined_call_operand.vmem [shape: bf16[2,288,32], index: 6, kind: input, shape index: {}]   ;;  %s17079_s7 = inlined_call_operand.vmem [shape: f32[2,1,32], index: 7, kind: input, shape index: {}]   ;;  %s17080_s8 = inlined_call_operand.vmem [shape: f32[2,1,32], index: 8, kind: input, shape index: {}]   ;;  %s17081_s9 = inlined_call_operand.vmem [shape: bf16[2,288,32], index: 9, kind: input, shape index: {}]   ;;  %s17082_s10 = inlined_call_operand.vmem [shape: f32[1,32], index: 10, kind: input, shape index: {}]   ;;  %s17083_s11 = inlined_call_operand.vmem [shape: f32[1,32], index: 11, kind: input, shape index: {}]   ;;  %s17084_s12 = inlined_call_operand.vmem [shape: bf16[32,32], index: 12, kind: input, shape index: {}]   ;;  %s17085_s13 = inlined_call_operand.vmem [shape: f32[1,32], index: 13, kind: input, shape index: {}]   ;;  %s17086_s14 = inlined_call_operand.vmem [shape: f32[1,32], index: 14, kind: input, shape index: {}]   ;;  %s17087_s15 = inlined_call_operand.vmem [shape: bf16[32,1], index: 15, kind: input, shape index: {}]   ;;  %s17088_s16 = inlined_call_operand.vmem [shape: bf16[288,32], index: 16, kind: input, shape index: {}]   ;;  %s17089_s17 = inlined_call_operand.vmem [shape: f32[1,32], index: 17, kind: input, shape index: {}]   ;;  %s17090_s18 = inlined_call_operand.vmem [shape: f32[1,32], index: 18, kind: input, shape index: {}]   ;;  %s17091_s19 = inlined_call_operand.vmem [shape: bf16[288,32], index: 19, kind: input, shape index: {}]   ;;  %s17092_s20 = inlined_call_operand.vmem [shape: f32[1,32], index: 20, kind: input, shape index: {}]   ;;  %s17093_s21 = inlined_call_operand.vmem [shape: bf16[32,1], index: 21, kind: input, shape index: {}]   ;;  %s17094_s22 = inlined_call_operand.<no memory space> [shape: f32[1,1], index: 22, kind: input, shape index: {}]   ;;  %s17095_s23 = inlined_call_operand.vmem [shape: f32[2,128,1], index: 23, kind: output, shape index: {0}]   ;;  %s17096_s24 = inlined_call_operand.vmem [shape: f32[2,1,128], index: 24, kind: output, shape index: {1}]  }
   0x1   :  { %17124 = sst [smem:[#allocation11_spill]] %s17072_s0  ;;  %v30_v0 = vstv %s17094_s22 }
   0x2   :  { %17125 = sst [smem:[#allocation12_spill]] %s17073_s1  ;;  %31 = vst [vmem:[#allocation6] sm:$0x1] %v30_v0 }
   0x3   :  { %17126 = sst [smem:[#allocation13_spill]] %s17074_s2 }
   0x4   :  { %17127 = sst [smem:[#allocation14_spill]] %s17075_s3 }
   0x5   :  { %17128 = sst [smem:[#allocation15_spill]] %s17076_s4 }
   0x6   :  { %17129 = sst [smem:[#allocation16_spill]] %s17077_s5 }
   0x7   :  { %17130 = sst [smem:[#allocation17_spill]] %s17078_s6 }
   0x8   :  { %17131 = sst [smem:[#allocation18_spill]] %s17079_s7 }
   0x9   :  { %17132 = sst [smem:[#allocation19_spill]] %s17080_s8 }
   0xa   :  { %17133 = sst [smem:[#allocation20_spill]] %s17081_s9 }
   0xb LB: > { %17134 = sst [smem:[#allocation7_spill]] %s13917_s27  ;;  %s11020_s28 = sadd.s32 4294967295, %s13917_s27   ;;  %s13917_s27 = sphi %s14053_s27, %s37_s27  }
   0xc   : > { %p11024_p0 = scmp.ge.s32.totalorder %s13917_s27, 1  ;;  %p667_p1 = scmp.lt.s32.totalorder %s13917_s27, 3 }
   0xe   : > { %p668_p2 = pnand %p11024_p0, %p667_p1 }
  0x10   : > { %671 = sbr.rel (%p668_p2) target bundleno = 3442 (0xd72), region = 112 }
  0x15   : > { %vm766_vm0 = vcmask 261120   ;;  %v17119_v1 = vmov 0.0   ;;  %p736_p3 = scmp.lt.s32.totalorder %s11020_s28, 1  ;;  %s17135_s2 = sld [smem:[#allocation14_spill]]  ;;  %vm935_vm1 = vcmask 257024   ;;  %vm1064_vm2 = vcmask 519424  }
  0x16   : > { %767 = vst.msk [vmem:[#allocation3] sm:$0xff] %vm766_vm0, %v17119_v1  ;;  %768 = vst.msk [vmem:[#allocation3 + $0x8] sm:$0xff] %vm766_vm0, %v17119_v1  ;;  %s17136_s25 = sld [smem:[#allocation11_spill]]  ;;  %s17108_s5 = smov 32   ;;  %vm1193_vm3 = vcmask 781824   ;;  %vm1322_vm4 = vcmask 1044224  }
  0x17   : > { %769 = vst.msk [vmem:[#allocation3 + $0x10] sm:$0xff] %vm766_vm0, %v17119_v1  ;;  %770 = vst.msk [vmem:[#allocation3 + $0x18] sm:$0xff] %vm766_vm0, %v17119_v1  ;;  %s17163_s28 = smov (!%p736_p3, %s11020_s28), 1  ;;  %s17111_s4 = smov 64   ;;  %vm13924_vm5 = vmmov 0   ;;  %vm9821_vm8 = vcmask 7168  }
  0x18   : > { %771 = vst.msk [vmem:[#allocation3 + $0x20] sm:$0xff] %vm766_vm0, %v17119_v1  ;;  %772 = vst.msk [vmem:[#allocation3 + $0x28] sm:$0xff] %vm766_vm0, %v17119_v1  ;;  %s17105_s7 = sshll.u32 %s17163_s28, 7  ;;  %s17106_s1 = smov 96  }
  0x19   : > { %773 = vst.msk [vmem:[#allocation3 + $0x30] sm:$0xff] %vm766_vm0, %v17119_v1  ;;  %774 = vst.msk [vmem:[#allocation3 + $0x38] sm:$0xff] %vm766_vm0, %v17119_v1  ;;  %s17138_s26 = sld [smem:[#allocation17_spill]]  ;;  %s17144_s0 = smov 32  }
  0x1a   : > { %775 = vst.msk [vmem:[#allocation3 + $0x40] sm:$0xff] %vm766_vm0, %v17119_v1  ;;  %776 = vst.msk [vmem:[#allocation3 + $0x48] sm:$0xff] %vm766_vm0, %v17119_v1  ;;  %s17139_s30 = sld [smem:[#allocation15_spill]]  ;;  %s17155_s27 = sshll.u32 %s17163_s28, 7 }
  0x1b   : > { %777 = vst.msk [vmem:[#allocation3 + $0x50] sm:$0xff] %vm766_vm0, %v17119_v1  ;;  %778 = vst.msk [vmem:[#allocation3 + $0x58] sm:$0xff] %vm766_vm0, %v17119_v1  ;;  %v13626_v2 = vld [vmem:[%s17135_s2 + $0x78] sm:$0xff]   ;;  %v13628_v4 = vld [vmem:[%s17135_s2 + $0x70] sm:$0xff]   ;;  %s17140_s22 = sld [smem:[#allocation16_spill]] }
  0x1c   : > { %779 = vst.msk [vmem:[#allocation3 + $0x60] sm:$0xff] %vm766_vm0, %v17119_v1  ;;  %780 = vst.msk [vmem:[#allocation3 + $0x68] sm:$0xff] %vm766_vm0, %v17119_v1  ;;  %v13627_v3 = vld [vmem:[%s17135_s2 + $0x38] sm:$0xff]   ;;  %12934 = vmatprep.subr.bf16.mxu0 %v13626_v2  ;;  %s14115_s8 = scalar_lea.vmem %s17136_s25, %s17105_s7  ;;  %v13629_v23 = vld [vmem:[%s17135_s2 + $0x30] sm:$0xff]   ;;  %s17137_s25 = sld [smem:[#allocation12_spill]] }
  0x1d   : > { %781 = vst.msk [vmem:[#allocation3 + $0x70] sm:$0xff] %vm766_vm0, %v17119_v1  ;;  %782 = vst.msk [vmem:[#allocation3 + $0x78] sm:$0xff] %vm766_vm0, %v17119_v1  ;;  %12935 = vmatpush3.bf16.msra.mxu0 %v13627_v3  ;;  %v14121_v5 = vld [vmem:[%s14115_s8] sm:$0xff]  ;;  %v14124_v6 = vld [vmem:[%s14115_s8 + $0x8] sm:$0xff]  ;;  %s17141_s9 = sld [smem:[#allocation20_spill]] }
  0x1e   : > { %783 = vst.msk [vmem:[#allocation3 + $0x80] sm:$0xff] %vm766_vm0, %v17119_v1  ;;  %784 = vst.msk [vmem:[#allocation3 + $0x88] sm:$0xff] %vm766_vm0, %v17119_v1  ;;  %v14127_v7 = vld [vmem:[%s14115_s8 + $0x10] sm:$0xff]  ;;  %v952_v8 = vld [vmem:[#allocation3 + $0x5] sm:$0xff]  ;;  %12936 = vmatprep.subr.bf16.mxu0 %v13628_v4  ;;  %s17142_s29 = sld [smem:[#allocation18_spill]] }
  0x1f   : > { %785 = vst.msk [vmem:[#allocation3 + $0x90] sm:$0xff] %vm766_vm0, %v17119_v1  ;;  %786 = vst.msk [vmem:[#allocation3 + $0x98] sm:$0xff] %vm766_vm0, %v17119_v1  ;;  %v1081_v9 = vld [vmem:[#allocation3 + $0x6] sm:$0xff]  ;;  %v14136_v10 = vld [vmem:[%s14115_s8 + $0x18] sm:$0xff]  ;;  %v12211_v11 = vpack.c.bf16 %v952_v8, %v952_v8  ;;  %s17143_s3 = sld [smem:[#allocation19_spill]] }
  0x20   : > { %803 = vst.msk [vmem:[#allocation3 + $0x10] sm:$0xff] %vm766_vm0, %v14121_v5  ;;  %804 = vst.msk [vmem:[#allocation3 + $0x18] sm:$0xff] %vm766_vm0, %v14124_v6  ;;  %v14141_v12 = vld [vmem:[%s14115_s8 + $0x20] sm:$0xff]  ;;  %v14144_v13 = vld [vmem:[%s14115_s8 + $0x28] sm:$0xff]  ;;  %v12227_v18 = vpack.c.bf16 %v1081_v9, %v1081_v9 }
  0x21   : > { %805 = vst.msk [vmem:[#allocation3 + $0x20] sm:$0xff] %vm766_vm0, %v14127_v7  ;;  %806 = vst.msk [vmem:[#allocation3 + $0x28] sm:$0xff] %vm766_vm0, %v14136_v10  ;;  %v14147_v14 = vld [vmem:[%s14115_s8 + $0x30] sm:$0xff]  ;;  %v14156_v15 = vld [vmem:[%s14115_s8 + $0x38] sm:$0xff]  ;;  %1016 = vrot.lane.b32.xlu0 %v12211_v11, %s17108_s5  ;;  %12937 = vmatpush3.bf16.msra.mxu0 %v13629_v23 }
  0x22   : > { %807 = vst.msk [vmem:[#allocation3 + $0x30] sm:$0xff] %vm766_vm0, %v14141_v12  ;;  %808 = vst.msk [vmem:[#allocation3 + $0x38] sm:$0xff] %vm766_vm0, %v14144_v13  ;;  %v14159_v16 = vld [vmem:[%s14115_s8 + $0x40] sm:$0xff]  ;;  %v14162_v17 = vld [vmem:[%s14115_s8 + $0x48] sm:$0xff] }
  0x23   : > { %809 = vst.msk [vmem:[#allocation3 + $0x40] sm:$0xff] %vm766_vm0, %v14147_v14  ;;  %810 = vst.msk [vmem:[#allocation3 + $0x48] sm:$0xff] %vm766_vm0, %v14156_v15  ;;  %v14172_v19 = vld [vmem:[%s14115_s8 + $0x50] sm:$0xff]  ;;  %v14175_v20 = vld [vmem:[%s14115_s8 + $0x58] sm:$0xff] }
  0x24   : > { %811 = vst.msk [vmem:[#allocation3 + $0x50] sm:$0xff] %vm766_vm0, %v14159_v16  ;;  %812 = vst.msk [vmem:[#allocation3 + $0x58] sm:$0xff] %vm766_vm0, %v14162_v17  ;;  %v855_v21 = vld [vmem:[#allocation3 + $0x4] sm:$0xff]  ;;  %v13634_v63 = vld [vmem:[%s17135_s2 + $0x58] sm:$0xff]  }
  0x25   : > { %813 = vst.msk [vmem:[#allocation3 + $0x60] sm:$0xff] %vm766_vm0, %v14172_v19  ;;  %814 = vst.msk [vmem:[#allocation3 + $0x68] sm:$0xff] %vm766_vm0, %v14175_v20  ;;  %v14181_v22 = vpack.c.bf16 %v855_v21, %v855_v21  ;;  %v13630_v24 = vld [vmem:[%s17135_s2 + $0x68] sm:$0xff]   ;;  %v14193_v26 = vld [vmem:[%s14115_s8 + $0x60] sm:$0xff]  ;;  %1145 = vrot.lane.b32.xlu0 %v12227_v18, %s17111_s4 }
  0x26   : > { %v13631_v25 = vld [vmem:[%s17135_s2 + $0x28] sm:$0xff]   ;;  %815 = vst.msk [vmem:[#allocation3 + $0x70] sm:$0xff] %vm766_vm0, %v14193_v26  ;;  %v13632_v27 = vld [vmem:[%s17135_s2 + $0x60] sm:$0xff]   ;;  %12938 = vmatprep.subr.bf16.mxu0 %v13630_v24  ;;  %v13635_v2 = vld [vmem:[%s17135_s2 + $0x18] sm:$0xff]  }
  0x27   : > { %936 = vst.msk [vmem:[#allocation4] sm:$0xf] %vm935_vm1, %v14181_v22  ;;  %v1435_v28 = vld [vmem:[#allocation3 + $0x11] sm:$0xff]  ;;  %12939 = vmatpush3.bf16.msra.mxu0 %v13631_v25  ;;  %v13633_v61 = vld [vmem:[%s17135_s2 + $0x20] sm:$0xff]   ;;  %v14228_v3 = vld [vmem:[%s14115_s8 + $0x68] sm:$0xff] }
  0x28   : > { %v1436_v29 = vld [vmem:[#allocation3 + $0x19] sm:$0xff]  ;;  %v953_v30 = vld [vmem:[#allocation3 + $0xd] sm:$0xff]  ;;  %v12275_v31 = vpack.c.bf16 %v1435_v28, %v1435_v28  ;;  %12940 = vmatprep.subr.bf16.mxu0 %v13632_v27  ;;  %v1564_v39 = vld [vmem:[#allocation3 + $0x22] sm:$0xff]  ;;  %816 = vst.msk [vmem:[#allocation3 + $0x78] sm:$0xff] %vm766_vm0, %v14228_v3 }
  0x29   : > { %v12212_v32 = vpack.c.bf16 %v953_v30, %v953_v30  ;;  %v1563_v33 = vld [vmem:[#allocation3 + $0x1a] sm:$0xff]  ;;  %v12276_v34 = vpack.c.bf16 %v1436_v29, %v1436_v29  ;;  %v1082_v35 = vld [vmem:[#allocation3 + $0xe] sm:$0xff]  ;;  %v12292_v42 = vpack.c.bf16 %v1564_v39, %v1564_v39  ;;  %v1692_v47 = vld [vmem:[#allocation3 + $0x23] sm:$0xff] }
  0x2a   : > { %1499 = vrot.lane.b32.xlu1 %v12275_v31, %s17108_s5  ;;  %v12291_v36 = vpack.c.bf16 %v1563_v33, %v1563_v33  ;;  %v1210_v37 = vld [vmem:[#allocation3 + $0xf] sm:$0xff]  ;;  %v12228_v38 = vpack.c.bf16 %v1082_v35, %v1082_v35  ;;  %v1691_v41 = vld [vmem:[#allocation3 + $0x1b] sm:$0xff]  ;;  %v12308_v50 = vpack.c.bf16 %v1692_v47, %v1692_v47  ;;  %v1820_v47 = vld [vmem:[#allocation3 + $0x24] sm:$0xff] }
  0x2b   : > { %1018 = vrot.lane.b32.xlu0 %v12212_v32, %s17108_s5  ;;  %v12243_v40 = vpack.c.bf16 %v1210_v37, %v1210_v37  ;;  %v1211_v43 = vld [vmem:[#allocation3 + $0x17] sm:$0xff]  ;;  %v12307_v44 = vpack.c.bf16 %v1691_v41, %v1691_v41  ;;  %v1437_v49 = vld [vmem:[#allocation3 + $0x21] sm:$0xff]  ;;  %v856_v56 = vld [vmem:[#allocation3 + $0xc] sm:$0xff]  ;;  %12941 = vmatpush3.bf16.msra.mxu0 %v13633_v61 }
  0x2c   : > { %v954_v45 = vld [vmem:[#allocation3 + $0x15] sm:$0xff]  ;;  %v12244_v46 = vpack.c.bf16 %v1211_v43, %v1211_v43  ;;  %v955_v52 = vld [vmem:[#allocation3 + $0x1d] sm:$0xff]  ;;  %v12277_v53 = vpack.c.bf16 %v1437_v49, %v1437_v49  ;;  %v12196_v59 = vpack.c.bf16 %v856_v56, %v856_v56  ;;  %v1438_v60 = vld [vmem:[#allocation3 + $0x29] sm:$0xff]  ;;  %12942 = vmatprep.subr.bf16.mxu0 %v13634_v63 }
  0x2d   : > { %v12213_v48 = vpack.c.bf16 %v954_v45, %v954_v45  ;;  %v1339_v51 = vld [vmem:[#allocation3 + $0x10] sm:$0xff]  ;;  %v1340_v55 = vld [vmem:[#allocation3 + $0x18] sm:$0xff]  ;;  %v12214_v62 = vpack.c.bf16 %v955_v52, %v955_v52  ;;  %v12278_v11 = vpack.c.bf16 %v1438_v60, %v1438_v60  ;;  %v13638_v27 = vld [vmem:[%s17135_s2 + $0x48] sm:$0xff]  }
  0x2e   : > { %1501 = vrot.lane.b32.xlu1 %v12276_v34, %s17108_s5  ;;  %v12259_v54 = vpack.c.bf16 %v1339_v51, %v1339_v51  ;;  %v1083_v57 = vld [vmem:[#allocation3 + $0x16] sm:$0xff]  ;;  %v12260_v58 = vpack.c.bf16 %v1340_v55, %v1340_v55  ;;  %937 = vst.msk [vmem:[#allocation4 + $0xc] sm:$0xf] %vm935_vm1, %v12196_v59  ;;  %v1565_v4 = vld [vmem:[#allocation3 + $0x2a] sm:$0xff]  ;;  %v1084_v18 = vld [vmem:[#allocation3 + $0x1e] sm:$0xff] }
  0x2f   : > { %1627 = vrot.lane.b32.xlu0 %v12291_v36, %s17111_s4  ;;  %v12229_v0 = vpack.c.bf16 %v1083_v57, %v1083_v57  ;;  %v13636_v8 = vld [vmem:[%s17135_s2 + $0x50] sm:$0xff]   ;;  %v1212_v21 = vld [vmem:[#allocation3 + $0x1f] sm:$0xff]  ;;  %v12293_v24 = vpack.c.bf16 %v1565_v4, %v1565_v4  ;;  %12943 = vmatpush3.bf16.msra.mxu0 %v13635_v2  ;;  %v12230_v32 = vpack.c.bf16 %v1084_v18, %v1084_v18  ;;  %v13640_v33 = vld [vmem:[%s17135_s2 + $0x88] sm:$0xff]  }
  0x30   : > { %1419 = vst.msk [vmem:[#allocation4 + $0x4] sm:$0xf] %vm935_vm1, %v12259_v54  ;;  %1420 = vst.msk [vmem:[#allocation4 + $0x10] sm:$0xf] %vm935_vm1, %v12260_v58  ;;  %v857_v9 = vld [vmem:[#allocation3 + $0x14] sm:$0xff]  ;;  %12944 = vmatprep.subr.bf16.mxu0 %v13636_v8  ;;  %v858_v28 = vld [vmem:[#allocation3 + $0x1c] sm:$0xff]  ;;  %v12245_v35 = vpack.c.bf16 %v1212_v21, %v1212_v21  ;;  %13394 = vmatprep.subr.bf16.mxu1 %v13640_v33 }
  0x31   : > { %v12197_v23 = vpack.c.bf16 %v857_v9, %v857_v9  ;;  %v13637_v25 = vld [vmem:[%s17135_s2 + $0x10] sm:$0xff]   ;;  %v1341_v29 = vld [vmem:[#allocation3 + $0x20] sm:$0xff]  ;;  %v12198_v30 = vpack.c.bf16 %v858_v28, %v858_v28  ;;  %v13639_v37 = vld [vmem:[%s17135_s2 + $0x8] sm:$0xff]   ;;  %13395 = vmatpush3.bf16.msra.mxu1 %v13640_v33 }
  0x32   : > { %1147 = vrot.lane.b32.xlu1 %v12228_v38, %s17111_s4  ;;  %v12261_v31 = vpack.c.bf16 %v1341_v29, %v1341_v29  ;;  %v1566_v34 = vld [vmem:[#allocation3 + $0x32] sm:$0xff]  ;;  %v13641_v38 = vld [vmem:[%s17135_s2 + $0x40] sm:$0xff]   ;;  %v1342_v39 = vld [vmem:[#allocation3 + $0x28] sm:$0xff] }
  0x33   : > { %1274 = vrot.lane.b32.xlu0 %v12243_v40, %s17106_s1  ;;  %938 = vst.msk [vmem:[#allocation4 + $0x18] sm:$0xf] %vm935_vm1, %v12197_v23  ;;  %v1693_v36 = vld [vmem:[#allocation3 + $0x2b] sm:$0xff]  ;;  %12945 = vmatpush3.bf16.msra.mxu0 %v13637_v25  ;;  %939 = vst.msk [vmem:[#allocation4 + $0x24] sm:$0xf] %vm935_vm1, %v12198_v30  ;;  %v12294_v40 = vpack.c.bf16 %v1566_v34, %v1566_v34  ;;  %v13642_v45 = vld [vmem:[%s17135_s2] sm:$0xff]  }
  0x34   : > { %1421 = vst.msk [vmem:[#allocation4 + $0x1c] sm:$0xf] %vm935_vm1, %v12261_v31  ;;  %1899 = vst.msk [vmem:[#allocation4 + $0x8] sm:$0xf] %vm935_vm1, %v12198_v30  ;;  %12946 = vmatprep.subr.bf16.mxu0 %v13638_v27  ;;  %v1213_v41 = vld [vmem:[#allocation3 + $0x27] sm:$0xff]  ;;  %v12309_v43 = vpack.c.bf16 %v1693_v36, %v1693_v36  ;;  %v1822_v49 = vld [vmem:[#allocation3 + $0x34] sm:$0xff] }
  0x35   : > { %v12326_v52 = vpack.c.bf16 %v1822_v49, %v1822_v49  ;;  %v12246_v54 = vpack.c.bf16 %v1213_v41, %v1213_v41  ;;  %v14274_v55 = vld [vmem:[%s14115_s8 + $0x78] sm:$0xff]  ;;  %v1343_v59 = vld [vmem:[#allocation3 + $0x30] sm:$0xff]  ;;  %v1085_v4 = vld [vmem:[#allocation3 + $0x26] sm:$0xff] }
  0x36   : > { %1629 = vrot.lane.b32.xlu1 %v12292_v42, %s17111_s4  ;;  %v12262_v42 = vpack.c.bf16 %v1342_v39, %v1342_v39  ;;  %v1694_v56 = vld [vmem:[#allocation3 + $0x33] sm:$0xff]  ;;  %818 = vst.msk [vmem:[#allocation3 + $0x88] sm:$0xff] %vm766_vm0, %v14274_v55  ;;  %v12263_v60 = vpack.c.bf16 %v1343_v59, %v1343_v59  ;;  %v12231_v18 = vpack.c.bf16 %v1085_v4, %v1085_v4  ;;  %v862_v29 = vld [vmem:[#allocation3 + $0x3c] sm:$0xff]  ;;  %v1824_v31 = vld [vmem:[#allocation3 + $0x44] sm:$0xff] }
  0x37   : > { %1755 = vrot.lane.b32.xlu0 %v12307_v44, %s17106_s1  ;;  %v956_v44 = vld [vmem:[#allocation3 + $0x25] sm:$0xff]  ;;  %12947 = vmatpush3.bf16.msra.mxu0 %v13639_v37  ;;  %v1439_v58 = vld [vmem:[#allocation3 + $0x31] sm:$0xff]  ;;  %1902 = vst.msk [vmem:[#allocation4 + $0x2c] sm:$0xf] %vm935_vm1, %v12326_v52  ;;  %942 = vst.msk [vmem:[#allocation4 + $0x48] sm:$0xf] %vm935_vm1, %v12326_v52  ;;  %v12202_v30 = vpack.c.bf16 %v862_v29, %v862_v29  ;;  %v12328_v34 = vpack.c.bf16 %v1824_v31, %v1824_v31 }
  0x38   : > { %12948 = vmatprep.subr.bf16.mxu0 %v13641_v38  ;;  %1422 = vst.msk [vmem:[#allocation4 + $0x28] sm:$0xf] %vm935_vm1, %v12262_v42  ;;  %v12215_v57 = vpack.c.bf16 %v956_v44, %v956_v44  ;;  %v1344_v61 = vld [vmem:[#allocation3 + $0x38] sm:$0xff]  ;;  %1423 = vst.msk [vmem:[#allocation4 + $0x34] sm:$0xf] %vm935_vm1, %v12263_v60  ;;  %v12279_v2 = vpack.c.bf16 %v1439_v58, %v1439_v58  ;;  %v1086_v25 = vld [vmem:[#allocation3 + $0x2e] sm:$0xff] }
  0x39   : > { %v12264_v63 = vpack.c.bf16 %v1344_v61, %v1344_v61  ;;  %v1567_v23 = vld [vmem:[#allocation3 + $0x3a] sm:$0xff]  ;;  %v1214_v28 = vld [vmem:[#allocation3 + $0x2f] sm:$0xff]  ;;  %v12232_v37 = vpack.c.bf16 %v1086_v25, %v1086_v25  ;;  %943 = vst.msk [vmem:[#allocation4 + $0x54] sm:$0xf] %vm935_vm1, %v12202_v30  ;;  %1903 = vst.msk [vmem:[#allocation4 + $0x38] sm:$0xf] %vm935_vm1, %v12202_v30 }
  0x3a   : > { %1276 = vrot.lane.b32.xlu1 %v12244_v46, %s17106_s1  ;;  %v13643_v46 = vld [vmem:[%s17135_s2 + $0x80] sm:$0xff]   ;;  %v12295_v27 = vpack.c.bf16 %v1567_v23, %v1567_v23  ;;  %v1826_v33 = vld [vmem:[#allocation3 + $0x54] sm:$0xff]  ;;  %v12247_v39 = vpack.c.bf16 %v1214_v28, %v1214_v28  ;;  %1904 = vst.msk [vmem:[#allocation4 + $0x44] sm:$0xf] %vm935_vm1, %v12328_v34  ;;  %944 = vst.msk [vmem:[#allocation4 + $0x60] sm:$0xf] %vm935_vm1, %v12328_v34 }
  0x3b   : > { %1020 = vrot.lane.b32.xlu0 %v12213_v48, %s17108_s5  ;;  %v1821_v48 = vld [vmem:[#allocation3 + $0x2c] sm:$0xff]  ;;  %13396 = vmatprep.subr.bf16.mxu1 %v13643_v46  ;;  %1424 = vst.msk [vmem:[#allocation4 + $0x40] sm:$0xf] %vm935_vm1, %v12264_v63  ;;  %v12330_v36 = vpack.c.bf16 %v1826_v33, %v1826_v33  ;;  %v1568_v38 = vld [vmem:[#allocation3 + $0x42] sm:$0xff]  ;;  %v1215_v41 = vld [vmem:[#allocation3 + $0x37] sm:$0xff]  ;;  %v13923_v23 = vmov 0  }
  0x3c   : > { %v12325_v51 = vpack.c.bf16 %v1821_v48, %v1821_v48  ;;  %13397 = vmatpush3.bf16.msra.mxu1 %v13643_v46  ;;  %12949 = vmatpush3.bf16.msra.mxu0 %v13642_v45  ;;  %v12296_v42 = vpack.c.bf16 %v1568_v38, %v1568_v38  ;;  %v958_v44 = vld [vmem:[#allocation3 + $0x35] sm:$0xff]  ;;  %v1696_v45 = vld [vmem:[#allocation3 + $0x43] sm:$0xff]  ;;  %v12248_v48 = vpack.c.bf16 %v1215_v41, %v1215_v41  ;;  %v961_v38 = vld [vmem:[#allocation3 + $0x4d] sm:$0xff]  ;;  %s17145_s2 = smov 96  }
  0x3d   : > { %1906 = vst.msk [vmem:[#allocation4 + $0x5c] sm:$0xf] %vm935_vm1, %v12330_v36  ;;  %946 = vst.msk [vmem:[#allocation4 + $0x78] sm:$0xf] %vm935_vm1, %v12330_v36  ;;  %v1345_v46 = vld [vmem:[#allocation3 + $0x40] sm:$0xff]  ;;  %v12312_v58 = vpack.c.bf16 %v1696_v45, %v1696_v45  ;;  %v1087_v59 = vld [vmem:[#allocation3 + $0x36] sm:$0xff]  ;;  %13624 = vset.pattern.permute.xlu0 %v13923_v23  ;;  %13625 = vset.pattern.permute.xlu1 %v13923_v23 }
  0x3e   : > { %1757 = vrot.lane.b32.xlu1 %v12308_v50, %s17106_s1  ;;  %v12324_v50 = vpack.c.bf16 %v1820_v47, %v1820_v47  ;;  %1901 = vst.msk [vmem:[#allocation4 + $0x20] sm:$0xf] %vm935_vm1, %v12325_v51  ;;  %941 = vst.msk [vmem:[#allocation4 + $0x3c] sm:$0xf] %vm935_vm1, %v12325_v51  ;;  %v1346_v47 = vld [vmem:[#allocation3 + $0x48] sm:$0xff]  ;;  %v1347_v30 = vld [vmem:[#allocation3 + $0x50] sm:$0xff] }
  0x3f   : > { %1503 = vrot.lane.b32.xlu0 %v12277_v53, %s17108_s5  ;;  %v14268_v53 = vld [vmem:[%s14115_s8 + $0x70] sm:$0xff]  ;;  %v1441_v49 = vld [vmem:[#allocation3 + $0x41] sm:$0xff]  ;;  %v12266_v52 = vpack.c.bf16 %v1346_v47, %v1346_v47  ;;  %v1348_v31 = vld [vmem:[#allocation3 + $0x58] sm:$0xff]  ;;  %s17146_s8 = smov 64  }
  0x40   : > { %817 = vst.msk [vmem:[#allocation3 + $0x80] sm:$0xff] %vm766_vm0, %v14268_v53  ;;  %v12281_v60 = vpack.c.bf16 %v1441_v49, %v1441_v49  ;;  %v1442_v61 = vld [vmem:[#allocation3 + $0x49] sm:$0xff]  ;;  %v1698_v33 = vld [vmem:[#allocation3 + $0x53] sm:$0xff]  ;;  %v12268_v36 = vpack.c.bf16 %v1348_v31, %v1348_v31  ;;  %v1445_v23 = vld [vmem:[#allocation3 + $0x61] sm:$0xff] }
  0x41   : > { %1900 = vst.msk [vmem:[#allocation4 + $0x14] sm:$0xf] %vm935_vm1, %v12324_v50  ;;  %940 = vst.msk [vmem:[#allocation4 + $0x30] sm:$0xf] %vm935_vm1, %v12324_v50  ;;  %v12265_v50 = vpack.c.bf16 %v1345_v46, %v1345_v46  ;;  %v13646_v51 = vld [vmem:[#allocation4 + $0x38] ss:$12 sps:$4 sm:$0xff]   ;;  %v12282_v4 = vpack.c.bf16 %v1442_v61, %v1442_v61 }
  0x42   : > { %1022 = vrot.lane.b32.xlu1 %v12214_v62, %s17108_s5  ;;  %v957_v62 = vld [vmem:[#allocation3 + $0x2d] sm:$0xff]  ;;  %1426 = vst.msk [vmem:[#allocation4 + $0x58] sm:$0xf] %vm935_vm1, %v12266_v52  ;;  %v960_v28 = vld [vmem:[#allocation3 + $0x45] sm:$0xff]  ;;  %1428 = vst.msk [vmem:[#allocation4 + $0x70] sm:$0xf] %vm935_vm1, %v12268_v36 }
  0x43   : > { %1149 = vrot.lane.b32.xlu0 %v12229_v0, %s17111_s4  ;;  %v12310_v0 = vpack.c.bf16 %v1694_v56, %v1694_v56  ;;  %v12216_v8 = vpack.c.bf16 %v957_v62, %v957_v62  ;;  %1425 = vst.msk [vmem:[#allocation4 + $0x4c] sm:$0xf] %vm935_vm1, %v12265_v50  ;;  %v1569_v63 = vld [vmem:[#allocation3 + $0x4a] sm:$0xff]  ;;  %v866_v50 = vld [vmem:[#allocation3 + $0x5c] sm:$0xff] }
  0x44   : > { %v1217_v25 = vld [vmem:[#allocation3 + $0x47] sm:$0xff]  ;;  %v1443_v34 = vld [vmem:[#allocation3 + $0x51] sm:$0xff]  ;;  %v12206_v52 = vpack.c.bf16 %v866_v50, %v866_v50 }
  0x45   : > { %v13645_v21 = vld [vmem:[#allocation4 + $0x20] ss:$12 sps:$4 sm:$0xff]   ;;  %v12283_v41 = vpack.c.bf16 %v1443_v34, %v1443_v34  ;;  %v1091_v34 = vld [vmem:[#allocation3 + $0x56] sm:$0xff] }
  0x46   : > { %1505 = vrot.lane.b32.xlu1 %v12278_v11, %s17108_s5  ;;  %v1440_v11 = vld [vmem:[#allocation3 + $0x39] sm:$0xff]  ;;  %v1090_v46 = vld [vmem:[#allocation3 + $0x4e] sm:$0xff]  ;;  %v1572_v61 = vld [vmem:[#allocation3 + $0x62] sm:$0xff]  ;;  %947 = vst.msk [vmem:[#allocation4 + $0x84] sm:$0xf] %vm935_vm1, %v12206_v52 }
  0x47   : > { %1631 = vrot.lane.b32.xlu0 %v12293_v24, %s17111_s4  ;;  %v12280_v24 = vpack.c.bf16 %v1440_v11, %v1440_v11  ;;  %v1570_v11 = vld [vmem:[#allocation3 + $0x52] sm:$0xff]  ;;  %1907 = vst.msk [vmem:[#allocation4 + $0x68] sm:$0xf] %vm935_vm1, %v12206_v52 }
  0x48   : > { %v13644_v9 = vld [vmem:[#allocation4 + $0x8] ss:$12 sps:$4 sm:$0xff]  }
  0x49   : > { %13398 = vmatprep.mubr.msk.bf16.mxu1 %vm766_vm0, %v13644_v9  ;;  %v12297_v9 = vpack.c.bf16 %v1569_v63, %v1569_v63  ;;  %v1574_v50 = vld [vmem:[#allocation3 + $0x72] sm:$0xff] }
  0x4a   : > { %1151 = vrot.lane.b32.xlu1 %v12230_v32, %s17111_s4  ;;  %13399 = vmatmul.mubr.msk.bf16.vlgmr.msra.gmra.mxu1 %vm766_vm0, %v13645_v21  ;;  %v1825_v32 = vld [vmem:[#allocation3 + $0x4c] sm:$0xff] }
  0x4b   : > { %1278 = vrot.lane.b32.xlu0 %v12245_v35, %s17106_s1  ;;  %v12329_v35 = vpack.c.bf16 %v1825_v32, %v1825_v32  ;;  %13402 = vmatprep.mubr.msk.bf16.mxu1 %vm766_vm0, %v13646_v51  ;;  %v1697_v21 = vld [vmem:[#allocation3 + $0x4b] sm:$0xff]  ;;  %v12250_v32 = vpack.c.bf16 %v1217_v25, %v1217_v25 }
  0x4c   : > { %v12313_v29 = vpack.c.bf16 %v1697_v21, %v1697_v21  ;;  %v1828_v51 = vld [vmem:[#allocation3 + $0x64] sm:$0xff] }
  0x4d   : > { %1905 = vst.msk [vmem:[#allocation4 + $0x50] sm:$0xf] %vm935_vm1, %v12329_v35  ;;  %945 = vst.msk [vmem:[#allocation4 + $0x6c] sm:$0xf] %vm935_vm1, %v12329_v35  ;;  %v12267_v35 = vpack.c.bf16 %v1347_v30, %v1347_v30  ;;  %v1701_v52 = vld [vmem:[#allocation3 + $0x6b] sm:$0xff] }
  0x4e   : > { %1633 = vrot.lane.b32.xlu1 %v12294_v40, %s17111_s4  ;;  %v1695_v40 = vld [vmem:[#allocation3 + $0x3b] sm:$0xff] }
  0x4f   : > { %1759 = vrot.lane.b32.xlu0 %v12309_v43, %s17106_s1  ;;  %v12311_v43 = vpack.c.bf16 %v1695_v40, %v1695_v40  ;;  %1427 = vst.msk [vmem:[#allocation4 + $0x64] sm:$0xf] %vm935_vm1, %v12267_v35  ;;  %v1089_v40 = vld [vmem:[#allocation3 + $0x46] sm:$0xff]  ;;  %v12285_v35 = vpack.c.bf16 %v1445_v23, %v1445_v23 }
  0x50   : > { %v12235_v45 = vpack.c.bf16 %v1089_v40, %v1089_v40  ;;  %v1573_v40 = vld [vmem:[#allocation3 + $0x6a] sm:$0xff] }
  0x52   : > { %1280 = vrot.lane.b32.xlu1 %v12246_v54, %s17106_s1  ;;  %v12217_v54 = vpack.c.bf16 %v958_v44, %v958_v44  ;;  %v1571_v44 = vld [vmem:[#allocation3 + $0x5a] sm:$0xff] }
  0x53   : > { %1024 = vrot.lane.b32.xlu0 %v12215_v57, %s17108_s5  ;;  %v959_v57 = vld [vmem:[#allocation3 + $0x3d] sm:$0xff]  ;;  %v12299_v49 = vpack.c.bf16 %v1571_v44, %v1571_v44 }
  0x54   : > { %v13647_v56 = vld [vmem:[#allocation4 + $0x50] ss:$12 sps:$4 sm:$0xff]   ;;  %v12218_v62 = vpack.c.bf16 %v959_v57, %v959_v57  ;;  %v1830_v57 = vld [vmem:[#allocation3 + $0x74] sm:$0xff] }
  0x55   : > { %13403 = vmatmul.mubr.msk.bf16.gmra.mxu1 %vm766_vm0, %v13647_v56  ;;  %v1829_v56 = vld [vmem:[#allocation3 + $0x6c] sm:$0xff]  ;;  %v1092_v44 = vld [vmem:[#allocation3 + $0x5e] sm:$0xff] }
  0x56   : > { %1761 = vrot.lane.b32.xlu1 %v12310_v0, %s17106_s1  ;;  %v12233_v0 = vpack.c.bf16 %v1087_v59, %v1087_v59  ;;  %v12334_v59 = vpack.c.bf16 %v1830_v57, %v1830_v57 }
  0x57   : > { %1507 = vrot.lane.b32.xlu0 %v12279_v2, %s17108_s5  ;;  %v1088_v2 = vld [vmem:[#allocation3 + $0x3e] sm:$0xff] }
  0x58   : > { %1910 = vst.msk [vmem:[#allocation4 + $0x8c] sm:$0xf] %vm935_vm1, %v12334_v59  ;;  %950 = vst.msk [vmem:[#allocation4 + $0xa8] sm:$0xf] %vm935_vm1, %v12334_v59  ;;  %v12302_v59 = vpack.c.bf16 %v1574_v50, %v1574_v50  ;;  %v1833_v50 = vld [vmem:[#allocation3 + $0x8c] sm:$0xff] }
  0x5a   : > { %1026 = vrot.lane.b32.xlu1 %v12216_v8, %s17108_s5  ;;  %v1216_v8 = vld [vmem:[#allocation3 + $0x3f] sm:$0xff] }
  0x5b   : > { %1153 = vrot.lane.b32.xlu0 %v12231_v18, %s17111_s4  ;;  %v12234_v18 = vpack.c.bf16 %v1088_v2, %v1088_v2  ;;  %v1219_v2 = vld [vmem:[#allocation3 + $0x57] sm:$0xff] }
  0x5c   : > { %v12252_v21 = vpack.c.bf16 %v1219_v2, %v1219_v2  ;;  %v1351_v2 = vld [vmem:[#allocation3 + $0x70] sm:$0xff] }
  0x5e   : > { %1509 = vrot.lane.b32.xlu1 %v12280_v24, %s17108_s5  ;;  %v12249_v24 = vpack.c.bf16 %v1216_v8, %v1216_v8 }
  0x5f   : > { %1635 = vrot.lane.b32.xlu0 %v12295_v27, %s17111_s4  ;;  %v12298_v27 = vpack.c.bf16 %v1570_v11, %v1570_v11  ;;  %v1700_v11 = vld [vmem:[#allocation3 + $0x63] sm:$0xff] }
  0x62   : > { %1155 = vrot.lane.b32.xlu1 %v12232_v37, %s17111_s4  ;;  %v12219_v37 = vpack.c.bf16 %v960_v28, %v960_v28 }
  0x63   : > { %1282 = vrot.lane.b32.xlu0 %v12247_v39, %s17106_s1  ;;  %v12314_v39 = vpack.c.bf16 %v1698_v33, %v1698_v33  ;;  %v12316_v33 = vpack.c.bf16 %v1700_v11, %v1700_v11  ;;  %v12271_v11 = vpack.c.bf16 %v1351_v2, %v1351_v2 }
  0x65   : > { %1431 = vst.msk [vmem:[#allocation4 + $0x94] sm:$0xf] %vm935_vm1, %v12271_v11  ;;  %v1353_v11 = vld [vmem:[#allocation3 + $0x80] sm:$0xff] }
  0x66   : > { %1637 = vrot.lane.b32.xlu1 %v12296_v42, %s17111_s4  ;;  %v1444_v42 = vld [vmem:[#allocation3 + $0x59] sm:$0xff] }
  0x67   : > { %1763 = vrot.lane.b32.xlu0 %v12311_v43, %s17106_s1  ;;  %v12220_v43 = vpack.c.bf16 %v961_v38, %v961_v38  ;;  %v12284_v47 = vpack.c.bf16 %v1444_v42, %v1444_v42  ;;  %v1446_v38 = vld [vmem:[#allocation3 + $0x69] sm:$0xff] }
  0x6a   : > { %1284 = vrot.lane.b32.xlu1 %v12248_v48, %s17106_s1  ;;  %v1218_v48 = vld [vmem:[#allocation3 + $0x4f] sm:$0xff] }
  0x6b   : > { %1028 = vrot.lane.b32.xlu0 %v12217_v54, %s17108_s5  ;;  %v12332_v54 = vpack.c.bf16 %v1828_v51, %v1828_v51  ;;  %v12251_v63 = vpack.c.bf16 %v1218_v48, %v1218_v48  ;;  %v12238_v51 = vpack.c.bf16 %v1092_v44, %v1092_v44  ;;  %v870_v44 = vld [vmem:[#allocation3 + $0x7c] sm:$0xff] }
  0x6d   : > { %1908 = vst.msk [vmem:[#allocation4 + $0x74] sm:$0xf] %vm935_vm1, %v12332_v54  ;;  %948 = vst.msk [vmem:[#allocation4 + $0x90] sm:$0xf] %vm935_vm1, %v12332_v54 }
  0x6e   : > { %1765 = vrot.lane.b32.xlu1 %v12312_v58, %s17106_s1  ;;  %v12333_v58 = vpack.c.bf16 %v1829_v56, %v1829_v56 }
  0x6f   : > { %1511 = vrot.lane.b32.xlu0 %v12281_v60, %s17108_s5  ;;  %v12236_v60 = vpack.c.bf16 %v1090_v46, %v1090_v46  ;;  %v1220_v46 = vld [vmem:[#allocation3 + $0x5f] sm:$0xff] }
  0x70   : > { %1909 = vst.msk [vmem:[#allocation4 + $0x80] sm:$0xf] %vm935_vm1, %v12333_v58  ;;  %949 = vst.msk [vmem:[#allocation4 + $0x9c] sm:$0xf] %vm935_vm1, %v12333_v58  ;;  %v12253_v54 = vpack.c.bf16 %v1220_v46, %v1220_v46  ;;  %v1221_v58 = vld [vmem:[#allocation3 + $0x67] sm:$0xff] }
  0x72   : > { %1030 = vrot.lane.b32.xlu1 %v12218_v62, %s17108_s5  ;;  %v1699_v62 = vld [vmem:[#allocation3 + $0x5b] sm:$0xff] }
  0x73   : > { %1157 = vrot.lane.b32.xlu0 %v12233_v0, %s17111_s4  ;;  %v12300_v0 = vpack.c.bf16 %v1572_v61, %v1572_v61  ;;  %v12315_v8 = vpack.c.bf16 %v1699_v62, %v1699_v62  ;;  %v12317_v61 = vpack.c.bf16 %v1701_v52, %v1701_v52 }
  0x74   : > { %v13648_v25 = vld [vmem:[#allocation4 + $0x68] ss:$12 sps:$4 sm:$0xff]  }
  0x75   : > { %13406 = vmatprep.mubr.msk.bf16.mxu1 %vm766_vm0, %v13648_v25 }
  0x76   : > { %1513 = vrot.lane.b32.xlu1 %v12282_v4, %s17108_s5  ;;  %v962_v4 = vld [vmem:[#allocation3 + $0x55] sm:$0xff] }
  0x77   : > { %1639 = vrot.lane.b32.xlu0 %v12297_v9, %s17111_s4  ;;  %v13649_v28 = vld [vmem:[#allocation4 + $0x80] ss:$12 sps:$4 sm:$0xff]  }
  0x78   : > { %13407 = vmatmul.mubr.msk.bf16.gmra.mxu1 %vm766_vm0, %v13649_v28 }
  0x7a   : > { %1159 = vrot.lane.b32.xlu1 %v12234_v18, %s17111_s4  ;;  %v1349_v18 = vld [vmem:[#allocation3 + $0x60] sm:$0xff] }
  0x7b   : > { %1286 = vrot.lane.b32.xlu0 %v12249_v24, %s17106_s1  ;;  %v12269_v24 = vpack.c.bf16 %v1349_v18, %v1349_v18 }
  0x7d   : > { %1429 = vst.msk [vmem:[#allocation4 + $0x7c] sm:$0xf] %vm935_vm1, %v12269_v24 }
  0x7e   : > { %1641 = vrot.lane.b32.xlu1 %v12298_v27, %s17111_s4  ;;  %v12221_v27 = vpack.c.bf16 %v962_v4, %v962_v4  ;;  %v1352_v4 = vld [vmem:[#allocation3 + $0x78] sm:$0xff] }
  0x7f   : > { %1767 = vrot.lane.b32.xlu0 %v12313_v29, %s17106_s1  ;;  %v1350_v29 = vld [vmem:[#allocation3 + $0x68] sm:$0xff]  ;;  %v12272_v18 = vpack.c.bf16 %v1352_v4, %v1352_v4 }
  0x80   : > { %v12270_v30 = vpack.c.bf16 %v1350_v29, %v1350_v29  ;;  %v1093_v29 = vld [vmem:[#allocation3 + $0x66] sm:$0xff] }
  0x81   : > { %1432 = vst.msk [vmem:[#allocation4 + $0xa0] sm:$0xf] %vm935_vm1, %v12272_v18 }
  0x82   : > { %1288 = vrot.lane.b32.xlu1 %v12250_v32, %s17106_s1  ;;  %v963_v32 = vld [vmem:[#allocation3 + $0x5d] sm:$0xff]  ;;  %1430 = vst.msk [vmem:[#allocation4 + $0x88] sm:$0xf] %vm935_vm1, %v12270_v30 }
  0x83   : > { %1032 = vrot.lane.b32.xlu0 %v12219_v37, %s17108_s5 }
  0x86   : > { %1769 = vrot.lane.b32.xlu1 %v12314_v39, %s17106_s1  ;;  %v12222_v39 = vpack.c.bf16 %v963_v32, %v963_v32 }
  0x87   : > { %1515 = vrot.lane.b32.xlu0 %v12283_v41, %s17108_s5  ;;  %v12237_v41 = vpack.c.bf16 %v1091_v34, %v1091_v34 }
  0x8a   : > { %1034 = vrot.lane.b32.xlu1 %v12220_v43, %s17108_s5 }
  0x8b   : > { %1161 = vrot.lane.b32.xlu0 %v12235_v45, %s17111_s4  ;;  %v12286_v45 = vpack.c.bf16 %v1446_v38, %v1446_v38 }
  0x8e   : > { %1517 = vrot.lane.b32.xlu1 %v12284_v47, %s17108_s5  ;;  %v12301_v47 = vpack.c.bf16 %v1573_v40, %v1573_v40 }
  0x8f   : > { %1643 = vrot.lane.b32.xlu0 %v12299_v49, %s17111_s4 }
  0x92   : > { %1163 = vrot.lane.b32.xlu1 %v12236_v60, %s17111_s4  ;;  %v964_v60 = vld [vmem:[#allocation3 + $0x65] sm:$0xff] }
  0x93   : > { %1290 = vrot.lane.b32.xlu0 %v12251_v63, %s17106_s1  ;;  %v1017_v9 = vpop.permute.xlu0 %1016 }
  0x94   : > { %1065 = vst.msk [vmem:[#allocation4] sm:$0xf] %vm1064_vm2, %v1017_v9  ;;  %v1447_v9 = vld [vmem:[#allocation3 + $0x71] sm:$0xff] }
  0x95   : > { %v12287_v30 = vpack.c.bf16 %v1447_v9, %v1447_v9 }
  0x96   : > { %1645 = vrot.lane.b32.xlu1 %v12300_v0, %s17111_s4  ;;  %v1702_v0 = vld [vmem:[#allocation3 + $0x73] sm:$0xff] }
  0x97   : > { %1771 = vrot.lane.b32.xlu0 %v12315_v8, %s17106_s1  ;;  %v1146_v31 = vpop.permute.xlu0 %1145  ;;  %v12254_v8 = vpack.c.bf16 %v1221_v58, %v1221_v58  ;;  %v12318_v28 = vpack.c.bf16 %v1702_v0, %v1702_v0  ;;  %v1576_v58 = vld [vmem:[#allocation3 + $0x82] sm:$0xff]  ;;  %v1223_v0 = vld [vmem:[#allocation3 + $0x77] sm:$0xff] }
  0x98   : > { %1194 = vst.msk [vmem:[#allocation4] sm:$0xf] %vm1193_vm3, %v1146_v31  ;;  %v12256_v18 = vpack.c.bf16 %v1223_v0, %v1223_v0 }
  0x9a   : > { %1292 = vrot.lane.b32.xlu1 %v12252_v21, %s17106_s1  ;;  %v12223_v21 = vpack.c.bf16 %v964_v60, %v964_v60 }
  0x9b   : > { %1036 = vrot.lane.b32.xlu0 %v12221_v27, %s17108_s5  ;;  %v965_v27 = vld [vmem:[#allocation3 + $0x6d] sm:$0xff] }
  0x9c   : > { %v1500_v36 = vpop.permute.xlu1 %1499  ;;  %v12224_v34 = vpack.c.bf16 %v965_v27, %v965_v27 }
  0x9d   : > { %1547 = vst.msk [vmem:[#allocation4 + $0x4] sm:$0xf] %vm1064_vm2, %v1500_v36  ;;  %v1019_v37 = vpop.permute.xlu0 %1018 }
  0x9e   : > { %1773 = vrot.lane.b32.xlu1 %v12316_v33, %s17106_s1  ;;  %1066 = vst.msk [vmem:[#allocation4 + $0xc] sm:$0xf] %vm1064_vm2, %v1019_v37  ;;  %v1448_v33 = vld [vmem:[#allocation3 + $0x79] sm:$0xff] }
  0x9f   : > { %1519 = vrot.lane.b32.xlu0 %v12285_v35, %s17108_s5  ;;  %v12239_v35 = vpack.c.bf16 %v1093_v29, %v1093_v29 }
  0xa0   : > { %v1502_v42 = vpop.permute.xlu1 %1501 }
  0xa1   : > { %1548 = vst.msk [vmem:[#allocation4 + $0x10] sm:$0xf] %vm1064_vm2, %v1502_v42  ;;  %v1628_v43 = vpop.permute.xlu0 %1627  ;;  %v1094_v42 = vld [vmem:[#allocation3 + $0x6e] sm:$0xff] }
  0xa2   : > { %1038 = vrot.lane.b32.xlu1 %v12222_v39, %s17108_s5  ;;  %1675 = vst.msk [vmem:[#allocation4 + $0x4] sm:$0xf] %vm1193_vm3, %v1628_v43 }
  0xa3   : > { %1165 = vrot.lane.b32.xlu0 %v12237_v41, %s17111_s4  ;;  %v12288_v41 = vpack.c.bf16 %v1448_v33, %v1448_v33 }
  0xa4   : > { %v1148_v48 = vpop.permute.xlu1 %1147 }
  0xa5   : > { %1195 = vst.msk [vmem:[#allocation4 + $0xc] sm:$0xf] %vm1193_vm3, %v1148_v48  ;;  %v1275_v49 = vpop.permute.xlu0 %1274  ;;  %v12210_v48 = vpack.c.bf16 %v870_v44, %v870_v44  ;;  %v1577_v44 = vld [vmem:[#allocation3 + $0x8a] sm:$0xff] }
  0xa6   : > { %1521 = vrot.lane.b32.xlu1 %v12286_v45, %s17108_s5  ;;  %1323 = vst.msk [vmem:[#allocation4] sm:$0xf] %vm1322_vm4, %v1275_v49  ;;  %v1832_v45 = vld [vmem:[#allocation3 + $0x84] sm:$0xff] }
  0xa7   : > { %1647 = vrot.lane.b32.xlu0 %v12301_v47, %s17111_s4  ;;  %v1222_v47 = vld [vmem:[#allocation3 + $0x6f] sm:$0xff]  ;;  %v12336_v49 = vpack.c.bf16 %v1832_v45, %v1832_v45  ;;  %951 = vst.msk [vmem:[#allocation4 + $0xb4] sm:$0xf] %vm935_vm1, %v12210_v48  ;;  %1911 = vst.msk [vmem:[#allocation4 + $0x98] sm:$0xf] %vm935_vm1, %v12210_v48 }
  0xa8   : > { %v1630_v56 = vpop.permute.xlu1 %1629 }
  0xa9   : > { %1676 = vst.msk [vmem:[#allocation4 + $0x10] sm:$0xf] %vm1193_vm3, %v1630_v56  ;;  %v1756_v57 = vpop.permute.xlu0 %1755 }
  0xaa   : > { %1167 = vrot.lane.b32.xlu1 %v12238_v51, %s17111_s4  ;;  %1803 = vst.msk [vmem:[#allocation4 + $0x4] sm:$0xf] %vm1322_vm4, %v1756_v57  ;;  %v1834_v51 = vld [vmem:[#allocation3 + $0x94] sm:$0xff]  ;;  %v12240_v57 = vpack.c.bf16 %v1094_v42, %v1094_v42 }
  0xab   : > { %1294 = vrot.lane.b32.xlu0 %v12253_v54, %s17106_s1  ;;  %v12337_v54 = vpack.c.bf16 %v1833_v50, %v1833_v50  ;;  %v12338_v56 = vpack.c.bf16 %v1834_v51, %v1834_v51  ;;  %1912 = vst.msk [vmem:[#allocation4 + $0xa4] sm:$0xf] %vm935_vm1, %v12336_v49  ;;  %v1096_v49 = vld [vmem:[#allocation3 + $0x7e] sm:$0xff]  ;;  %v12305_v50 = vpack.c.bf16 %v1577_v44, %v1577_v44 }
  0xac   : > { %v1277_v62 = vpop.permute.xlu1 %1276 }
  0xad   : > { %1324 = vst.msk [vmem:[#allocation4 + $0xc] sm:$0xf] %vm1322_vm4, %v1277_v62  ;;  %v1021_v63 = vpop.permute.xlu0 %1020 }
  0xae   : > { %1649 = vrot.lane.b32.xlu1 %v12302_v59, %s17111_s4  ;;  %1067 = vst.msk [vmem:[#allocation4 + $0x18] sm:$0xf] %vm1064_vm2, %v1021_v63  ;;  %v12255_v59 = vpack.c.bf16 %v1222_v47, %v1222_v47  ;;  %v12304_v63 = vpack.c.bf16 %v1576_v58, %v1576_v58 }
  0xaf   : > { %1775 = vrot.lane.b32.xlu0 %v12317_v61, %s17106_s1  ;;  %1913 = vst.msk [vmem:[#allocation4 + $0xb0] sm:$0xf] %vm935_vm1, %v12337_v54  ;;  %1914 = vst.msk [vmem:[#allocation4 + $0xbc] sm:$0xf] %vm935_vm1, %v12338_v56  ;;  %v1703_v61 = vld [vmem:[#allocation3 + $0x7b] sm:$0xff] }
  0xb0   : > { %v1758_v23 = vpop.permute.xlu1 %1757  ;;  %v12319_v2 = vpack.c.bf16 %v1703_v61, %v1703_v61 }
  0xb1   : > { %v1915_v24 = vld [vmem:[#allocation4] sm:$0xff]  ;;  %1804 = vst.msk [vmem:[#allocation4 + $0x10] sm:$0xf] %vm1322_vm4, %v1758_v23  ;;  %v1504_v25 = vpop.permute.xlu0 %1503 }
  0xb2   : > { %2747 = vst.msk [vmem:[#allocation4] sm:$0xf] %vm935_vm1, %v14181_v22  ;;  %1296 = vrot.lane.b32.xlu1 %v12254_v8, %s17106_s1  ;;  %v1575_v22 = vld [vmem:[#allocation3 + $0x7a] sm:$0xff] }
  0xb3   : > { %1549 = vst.msk [vmem:[#allocation4 + $0x1c] sm:$0xf] %vm1064_vm2, %v1504_v25  ;;  %1040 = vrot.lane.b32.xlu0 %v12223_v21, %s17108_s5  ;;  %v12303_v43 = vpack.c.bf16 %v1575_v22, %v1575_v22  ;;  %v966_v8 = vld [vmem:[#allocation3 + $0x75] sm:$0xff]  ;;  %v12273_v21 = vpack.c.bf16 %v1353_v11, %v1353_v11 }
  0xb4   : > { %v1023_v31 = vpop.permute.xlu1 %1022  ;;  %v13650_v23 = vld [vmem:[#allocation4 + $0x98] ss:$12 sps:$4 sm:$0xff]   ;;  %v12225_v25 = vpack.c.bf16 %v966_v8, %v966_v8 }
  0xb5   : > { %1068 = vst.msk [vmem:[#allocation4 + $0x24] sm:$0xf] %vm1064_vm2, %v1023_v31  ;;  %v1150_v32 = vpop.permute.xlu0 %1149  ;;  %13410 = vmatprep.mubr.msk.bf16.mxu1 %vm766_vm0, %v13650_v23 }
  0xb6   : > { %1777 = vrot.lane.b32.xlu1 %v12318_v28, %s17106_s1  ;;  %1196 = vst.msk [vmem:[#allocation4 + $0x18] sm:$0xf] %vm1193_vm3, %v1150_v32  ;;  %v13651_v27 = vld [vmem:[#allocation4 + $0xb0] ss:$12 sps:$4 sm:$0xff]   ;;  %v1354_v28 = vld [vmem:[#allocation3 + $0x88] sm:$0xff] }
  0xb7   : > { %1523 = vrot.lane.b32.xlu0 %v12287_v30, %s17108_s5  ;;  %v1449_v30 = vld [vmem:[#allocation3 + $0x81] sm:$0xff]  ;;  %1433 = vst.msk [vmem:[#allocation4 + $0xac] sm:$0xf] %vm935_vm1, %v12273_v21  ;;  %3722 = vst.msk [vmem:[#allocation4 + $0xbc] sm:$0xf] %vm935_vm1, %v12338_v56  ;;  %v12274_v31 = vpack.c.bf16 %v1354_v28, %v1354_v28  ;;  %13411 = vmatmul.mubr.msk.bf16.gmra.mxu1 %vm766_vm0, %v13651_v27  ;;  %v12242_v56 = vpack.c.bf16 %v1096_v49, %v1096_v49 }
  0xb8   : > { %v1917_v36 = vld [vmem:[#allocation4 + $0xc] sm:$0xff]  ;;  %v1506_v37 = vpop.permute.xlu1 %1505  ;;  %v12289_v22 = vpack.c.bf16 %v1449_v30, %v1449_v30 }
  0xb9   : > { %1550 = vst.msk [vmem:[#allocation4 + $0x28] sm:$0xf] %vm1064_vm2, %v1506_v37  ;;  %v11174_v38 = vcombine.high %v1915_v24, %v1917_v36  ;;  %v1632_v39 = vpop.permute.xlu0 %1631  ;;  %v11173_v40 = vcombine.low %v1915_v24, %v1917_v36  ;;  %v1704_v24 = vld [vmem:[#allocation3 + $0x83] sm:$0xff]  ;;  %v1095_v36 = vld [vmem:[#allocation3 + $0x76] sm:$0xff] }
  0xba   : > { %1042 = vrot.lane.b32.xlu1 %v12224_v34, %s17108_s5  ;;  %1677 = vst.msk [vmem:[#allocation4 + $0x1c] sm:$0xf] %vm1193_vm3, %v1632_v39  ;;  %v12320_v33 = vpack.c.bf16 %v1704_v24, %v1704_v24  ;;  %v967_v34 = vld [vmem:[#allocation3 + $0x7d] sm:$0xff]  ;;  %v1450_v39 = vld [vmem:[#allocation3 + $0x89] sm:$0xff] }
  0xbb   : > { %2231 = vmatprep.mubr.bf16.mxu0 %v11174_v38  ;;  %1169 = vrot.lane.b32.xlu0 %v12239_v35, %s17111_s4  ;;  %1434 = vst.msk [vmem:[#allocation4 + $0xb8] sm:$0xf] %vm935_vm1, %v12274_v31  ;;  %v12226_v38 = vpack.c.bf16 %v967_v34, %v967_v34  ;;  %v12290_v48 = vpack.c.bf16 %v1450_v39, %v1450_v39  ;;  %v751_v28 = vld [vmem:[%s17137_s25 + $0x8] sm:$0xff]  ;;  %v754_v39 = vld [vmem:[%s17137_s25 + $0x20] sm:$0xff] }
  0xbc   : > { %v1152_v46 = vpop.permute.xlu1 %1151  ;;  %2232 = vmatmul.mubr.bf16.vlgmr.msra.gmra.mxu0 %v11173_v40  ;;  %v12241_v40 = vpack.c.bf16 %v1095_v36, %v1095_v36  ;;  %v763_v49 = vld [vmem:[%s17137_s25 + $0x68] sm:$0xff] }
  0xbd   : > { %1197 = vst.msk [vmem:[#allocation4 + $0x24] sm:$0xf] %vm1193_vm3, %v1152_v46  ;;  %v1279_v52 = vpop.permute.xlu0 %1278 }
  0xbe   : > { %1525 = vrot.lane.b32.xlu1 %v12288_v41, %s17108_s5  ;;  %1325 = vst.msk [vmem:[#allocation4 + $0x18] sm:$0xf] %vm1322_vm4, %v1279_v52  ;;  %v1224_v52 = vld [vmem:[#allocation3 + $0x7f] sm:$0xff] }
  0xbf   : > { %1651 = vrot.lane.b32.xlu0 %v12303_v43, %s17111_s4  ;;  %v12257_v58 = vpack.c.bf16 %v1224_v52, %v1224_v52 }
  0xc0   : > { %v1634_v60 = vpop.permute.xlu1 %1633 }
  0xc1   : > { %1678 = vst.msk [vmem:[#allocation4 + $0x28] sm:$0xf] %vm1193_vm3, %v1634_v60  ;;  %v1760_v62 = vpop.permute.xlu0 %1759  ;;  %v1705_v60 = vld [vmem:[#allocation3 + $0x8b] sm:$0xff] }
  0xc2   : > { %1171 = vrot.lane.b32.xlu1 %v12240_v57, %s17111_s4  ;;  %1805 = vst.msk [vmem:[#allocation4 + $0x1c] sm:$0xf] %vm1322_vm4, %v1760_v62  ;;  %v1578_v57 = vld [vmem:[#allocation3 + $0x92] sm:$0xff]  ;;  %v12321_v0 = vpack.c.bf16 %v1705_v60, %v1705_v60 }
  0xc3   : > { %1298 = vrot.lane.b32.xlu0 %v12255_v59, %s17106_s1  ;;  %v14432_v62 = vpack.c.bf16 %v1578_v57, %v1578_v57  ;;  %v762_v57 = vld [vmem:[%s17137_s25 + $0x60] sm:$0xff] }
  0xc4   : > { %v1281_v4 = vpop.permute.xlu1 %1280 }
  0xc5   : > { %1326 = vst.msk [vmem:[#allocation4 + $0x24] sm:$0xf] %vm1322_vm4, %v1281_v4  ;;  %v1025_v9 = vpop.permute.xlu0 %1024 }
  0xc6   : > { %1653 = vrot.lane.b32.xlu1 %v12304_v63, %s17111_s4  ;;  %1069 = vst.msk [vmem:[#allocation4 + $0x30] sm:$0xf] %vm1064_vm2, %v1025_v9  ;;  %v1225_v63 = vld [vmem:[#allocation3 + $0x87] sm:$0xff]  ;;  %v1706_v9 = vld [vmem:[#allocation3 + $0x93] sm:$0xff] }
  0xc7   : > { %1779 = vrot.lane.b32.xlu0 %v12319_v2, %s17106_s1  ;;  %v12258_v8 = vpack.c.bf16 %v1225_v63, %v1225_v63  ;;  %v12322_v23 = vpack.c.bf16 %v1706_v9, %v1706_v9 }
  0xc8   : > { %v1762_v29 = vpop.permute.xlu1 %1761 }
  0xc9   : > { %1806 = vst.msk [vmem:[#allocation4 + $0x28] sm:$0xf] %vm1322_vm4, %v1762_v29  ;;  %v1508_v32 = vpop.permute.xlu0 %1507  ;;  %v1919_v41 = vld [vmem:[#allocation4 + $0x18] sm:$0xff] }
  0xca   : > { %1300 = vrot.lane.b32.xlu1 %v12256_v18, %s17106_s1  ;;  %1551 = vst.msk [vmem:[#allocation4 + $0x34] sm:$0xf] %vm1064_vm2, %v1508_v32  ;;  %v750_v18 = vld [vmem:[%s17137_s25] sm:$0xff]  ;;  %v755_v32 = vld [vmem:[%s17137_s25 + $0x28] sm:$0xff] }
  0xcb   : > { %1044 = vrot.lane.b32.xlu0 %v12225_v25, %s17108_s5  ;;  %v753_v25 = vld [vmem:[%s17137_s25 + $0x18] sm:$0xff] }
  0xcc   : > { %v1027_v35 = vpop.permute.xlu1 %1026 }
  0xcd   : > { %1070 = vst.msk [vmem:[#allocation4 + $0x3c] sm:$0xf] %vm1064_vm2, %v1027_v35  ;;  %v1154_v37 = vpop.permute.xlu0 %1153  ;;  %v752_v35 = vld [vmem:[%s17137_s25 + $0x10] sm:$0xff] }
  0xce   : > { %1781 = vrot.lane.b32.xlu1 %v12320_v33, %s17106_s1  ;;  %1198 = vst.msk [vmem:[#allocation4 + $0x30] sm:$0xf] %vm1193_vm3, %v1154_v37  ;;  %v757_v37 = vld [vmem:[%s17137_s25 + $0x38] sm:$0xff] }
  0xcf   : > { %1527 = vrot.lane.b32.xlu0 %v12289_v22, %s17108_s5 }
  0xd0   : > { %v1921_v42 = vld [vmem:[#allocation4 + $0x24] sm:$0xff]  ;;  %v1510_v43 = vpop.permute.xlu1 %1509 }
  0xd1   : > { %1552 = vst.msk [vmem:[#allocation4 + $0x40] sm:$0xf] %vm1064_vm2, %v1510_v43  ;;  %v11177_v45 = vcombine.high %v1919_v41, %v1921_v42  ;;  %v1636_v46 = vpop.permute.xlu0 %1635  ;;  %v11176_v47 = vcombine.low %v1919_v41, %v1921_v42  ;;  %v759_v41 = vld [vmem:[%s17137_s25 + $0x48] sm:$0xff]  ;;  %v756_v43 = vld [vmem:[%s17137_s25 + $0x30] sm:$0xff] }
  0xd2   : > { %1046 = vrot.lane.b32.xlu1 %v12226_v38, %s17108_s5  ;;  %1679 = vst.msk [vmem:[#allocation4 + $0x34] sm:$0xf] %vm1193_vm3, %v1636_v46 }
  0xd3   : > { %2239 = vmatprep.mubr.bf16.mxu0 %v11177_v45  ;;  %1173 = vrot.lane.b32.xlu0 %v12241_v40, %s17111_s4  ;;  %v761_v45 = vld [vmem:[%s17137_s25 + $0x58] sm:$0xff] }
  0xd4   : > { %v1156_v51 = vpop.permute.xlu1 %1155  ;;  %2240 = vmatmul.mubr.bf16.gmra.mxu0 %v11176_v47  ;;  %v758_v47 = vld [vmem:[%s17137_s25 + $0x40] sm:$0xff] }
  0xd5   : > { %1199 = vst.msk [vmem:[#allocation4 + $0x3c] sm:$0xf] %vm1193_vm3, %v1156_v51  ;;  %v1283_v54 = vpop.permute.xlu0 %1282  ;;  %v760_v51 = vld [vmem:[%s17137_s25 + $0x50] sm:$0xff] }
  0xd6   : > { %1529 = vrot.lane.b32.xlu1 %v12290_v48, %s17108_s5  ;;  %1327 = vst.msk [vmem:[#allocation4 + $0x30] sm:$0xf] %vm1322_vm4, %v1283_v54  ;;  %v765_v54 = vld [vmem:[%s17137_s25 + $0x78] sm:$0xff] }
  0xd7   : > { %1655 = vrot.lane.b32.xlu0 %v12305_v50, %s17111_s4 }
  0xd8   : > { %v1638_v59 = vpop.permute.xlu1 %1637 }
  0xd9   : > { %1680 = vst.msk [vmem:[#allocation4 + $0x40] sm:$0xf] %vm1193_vm3, %v1638_v59  ;;  %v1764_v61 = vpop.permute.xlu0 %1763 }
  0xda   : > { %1175 = vrot.lane.b32.xlu1 %v12242_v56, %s17111_s4  ;;  %1807 = vst.msk [vmem:[#allocation4 + $0x34] sm:$0xf] %vm1322_vm4, %v1764_v61 }
  0xdb   : > { %1302 = vrot.lane.b32.xlu0 %v12257_v58, %s17106_s1 }
  0xdc   : > { %v1285_v2 = vpop.permute.xlu1 %1284 }
  0xdd   : > { %1328 = vst.msk [vmem:[#allocation4 + $0x3c] sm:$0xf] %vm1322_vm4, %v1285_v2  ;;  %v1029_v4 = vpop.permute.xlu0 %1028  ;;  %v764_v2 = vld [vmem:[%s17137_s25 + $0x70] sm:$0xff] }
  0xde   : > { %1657 = vrot.lane.b32.xlu1 %v14432_v62, %s17111_s4  ;;  %1071 = vst.msk [vmem:[#allocation4 + $0x48] sm:$0xf] %vm1064_vm2, %v1029_v4 }
  0xdf   : > { %1783 = vrot.lane.b32.xlu0 %v12321_v0, %s17106_s1 }
  0xe0   : > { %v1766_v11 = vpop.permute.xlu1 %1765 }
  0xe1   : > { %1808 = vst.msk [vmem:[#allocation4 + $0x40] sm:$0xf] %vm1322_vm4, %v1766_v11  ;;  %v1512_v21 = vpop.permute.xlu0 %1511  ;;  %v1923_v29 = vld [vmem:[#allocation4 + $0x30] sm:$0xff] }
  0xe2   : > { %1304 = vrot.lane.b32.xlu1 %v12258_v8, %s17106_s1  ;;  %1553 = vst.msk [vmem:[#allocation4 + $0x4c] sm:$0xf] %vm1064_vm2, %v1512_v21 }
  0xe3   : > { %2395 = vperm.xlu0 %13624, %v750_v18  }
  0xe4   : > { %v1031_v24 = vpop.permute.xlu1 %1030 }
  0xe5   : > { %1072 = vst.msk [vmem:[#allocation4 + $0x54] sm:$0xf] %vm1064_vm2, %v1031_v24  ;;  %v1158_v27 = vpop.permute.xlu0 %1157 }
  0xe6   : > { %1785 = vrot.lane.b32.xlu1 %v12322_v23, %s17106_s1  ;;  %1200 = vst.msk [vmem:[#allocation4 + $0x48] sm:$0xf] %vm1193_vm3, %v1158_v27  ;;  %v2763_v27 = vld [vmem:[#allocation3 + $0x5] sm:$0xff] }
  0xe7   : > { %2410 = vperm.xlu0 %13624, %v753_v25  }
  0xe8   : > { %v1925_v30 = vld [vmem:[#allocation4 + $0x3c] sm:$0xff]  ;;  %v1514_v31 = vpop.permute.xlu1 %1513 }
  0xe9   : > { %1554 = vst.msk [vmem:[#allocation4 + $0x58] sm:$0xf] %vm1064_vm2, %v1514_v31  ;;  %v11180_v33 = vcombine.high %v1923_v29, %v1925_v30  ;;  %v1640_v34 = vpop.permute.xlu0 %1639  ;;  %v11179_v22 = vcombine.low %v1923_v29, %v1925_v30 }
  0xea   : > { %1681 = vst.msk [vmem:[#allocation4 + $0x4c] sm:$0xf] %vm1193_vm3, %v1640_v34  ;;  %2400 = vperm.xlu1 %13625, %v751_v28   ;;  %v12355_v28 = vpack.c.bf16 %v2763_v27, %v2763_v27  ;;  %v13653_v27 = vld [vmem:[%s17138_s26 + $0x88] sm:$0xff]  }
  0xeb   : > { %2247 = vmatprep.mubr.bf16.mxu0 %v11180_v33  ;;  %2420 = vperm.xlu0 %13624, %v755_v32  }
  0xec   : > { %v1160_v36 = vpop.permute.xlu1 %1159  ;;  %2248 = vmatmul.mubr.bf16.gmra.mxu0 %v11179_v22  ;;  %v2891_v22 = vld [vmem:[#allocation3 + $0x6] sm:$0xff]  ;;  %13414 = vmatprep.subr.bf16.mxu0 %v13653_v27 }
  0xed   : > { %1201 = vst.msk [vmem:[#allocation4 + $0x54] sm:$0xf] %vm1193_vm3, %v1160_v36  ;;  %v1287_v38 = vpop.permute.xlu0 %1286  ;;  %13415 = vmatpush3.bf16.msra.mxu0 %v13653_v27 }
  0xee   : > { %1329 = vst.msk [vmem:[#allocation4 + $0x48] sm:$0xf] %vm1322_vm4, %v1287_v38  ;;  %2405 = vperm.xlu1 %13625, %v752_v35   ;;  %v12371_v35 = vpack.c.bf16 %v2891_v22, %v2891_v22 }
  0xef   : > { %2430 = vperm.xlu0 %13624, %v757_v37  }
  0xf0   : > { %v1642_v40 = vpop.permute.xlu1 %1641 }
  0xf1   : > { %1682 = vst.msk [vmem:[#allocation4 + $0x58] sm:$0xf] %vm1193_vm3, %v1642_v40  ;;  %v1768_v42 = vpop.permute.xlu0 %1767 }
  0xf2   : > { %1809 = vst.msk [vmem:[#allocation4 + $0x4c] sm:$0xf] %vm1322_vm4, %v1768_v42  ;;  %2415 = vperm.xlu1 %13625, %v754_v39  }
  0xf3   : > { %2440 = vperm.xlu0 %13624, %v759_v41  }
  0xf4   : > { %v1289_v44 = vpop.permute.xlu1 %1288 }
  0xf5   : > { %1330 = vst.msk [vmem:[#allocation4 + $0x54] sm:$0xf] %vm1322_vm4, %v1289_v44  ;;  %v1033_v46 = vpop.permute.xlu0 %1032 }
  0xf6   : > { %1073 = vst.msk [vmem:[#allocation4 + $0x60] sm:$0xf] %vm1064_vm2, %v1033_v46  ;;  %2425 = vperm.xlu1 %13625, %v756_v43  }
  0xf7   : > { %2450 = vperm.xlu0 %13624, %v761_v45  }
  0xf8   : > { %v1770_v48 = vpop.permute.xlu1 %1769 }
  0xf9   : > { %1810 = vst.msk [vmem:[#allocation4 + $0x58] sm:$0xf] %vm1322_vm4, %v1770_v48  ;;  %v1516_v50 = vpop.permute.xlu0 %1515  ;;  %v1927_v58 = vld [vmem:[#allocation4 + $0x48] sm:$0xff] }
  0xfa   : > { %1555 = vst.msk [vmem:[#allocation4 + $0x64] sm:$0xf] %vm1064_vm2, %v1516_v50  ;;  %2435 = vperm.xlu1 %13625, %v758_v47  }
  0xfb   : > { %2460 = vperm.xlu0 %13624, %v763_v49  }
  0xfc   : > { %v1035_v52 = vpop.permute.xlu1 %1034 }
  0xfd   : > { %1074 = vst.msk [vmem:[#allocation4 + $0x6c] sm:$0xf] %vm1064_vm2, %v1035_v52  ;;  %v1162_v56 = vpop.permute.xlu0 %1161 }
  0xfe   : > { %1202 = vst.msk [vmem:[#allocation4 + $0x60] sm:$0xf] %vm1193_vm3, %v1162_v56  ;;  %2445 = vperm.xlu1 %13625, %v760_v51  }
  0xff   : > { %2470 = vperm.xlu0 %13624, %v765_v54  }
 0x100   : > { %v1929_v59 = vld [vmem:[#allocation4 + $0x54] sm:$0xff]  ;;  %v1518_v60 = vpop.permute.xlu1 %1517 }
 0x101   : > { %1556 = vst.msk [vmem:[#allocation4 + $0x70] sm:$0xf] %vm1064_vm2, %v1518_v60  ;;  %v11183_v61 = vcombine.high %v1927_v58, %v1929_v59  ;;  %v1644_v63 = vpop.permute.xlu0 %1643  ;;  %v11182_v0 = vcombine.low %v1927_v58, %v1929_v59 }
 0x102   : > { %1683 = vst.msk [vmem:[#allocation4 + $0x64] sm:$0xf] %vm1193_vm3, %v1644_v63  ;;  %2455 = vperm.xlu1 %13625, %v762_v57  }
 0x103   : > { %2255 = vmatprep.mubr.bf16.mxu0 %v11183_v61  ;;  %3465 = vrot.lane.b32.xlu0 %v14432_v62, %s17111_s4 }
 0x104   : > { %v1164_v4 = vpop.permute.xlu1 %1163  ;;  %2256 = vmatmul.mubr.bf16.gmra.mxu0 %v11182_v0 }
 0x105   : > { %1203 = vst.msk [vmem:[#allocation4 + $0x6c] sm:$0xf] %vm1193_vm3, %v1164_v4  ;;  %v1291_v8 = vpop.permute.xlu0 %1290 }
 0x106   : > { %1331 = vst.msk [vmem:[#allocation4 + $0x60] sm:$0xf] %vm1322_vm4, %v1291_v8  ;;  %2465 = vperm.xlu1 %13625, %v764_v2  }
 0x108   : > { %v1646_v9 = vpop.permute.xlu1 %1645 }
 0x109   : > { %1684 = vst.msk [vmem:[#allocation4 + $0x70] sm:$0xf] %vm1193_vm3, %v1646_v9  ;;  %v1772_v11 = vpop.permute.xlu0 %1771 }
 0x10a   : > { %1811 = vst.msk [vmem:[#allocation4 + $0x64] sm:$0xf] %vm1322_vm4, %v1772_v11  ;;  %2827 = vrot.lane.b32.xlu1 %v12355_v28, %s17108_s5 }
 0x10c   : > { %v1293_v18 = vpop.permute.xlu1 %1292 }
 0x10d   : > { %1332 = vst.msk [vmem:[#allocation4 + $0x6c] sm:$0xf] %vm1322_vm4, %v1293_v18  ;;  %v1037_v21 = vpop.permute.xlu0 %1036 }
 0x10e   : > { %1075 = vst.msk [vmem:[#allocation4 + $0x78] sm:$0xf] %vm1064_vm2, %v1037_v21  ;;  %2955 = vrot.lane.b32.xlu1 %v12371_v35, %s17111_s4 }
 0x110   : > { %v1774_v62 = vpop.permute.xlu1 %1773 }
 0x111   : > { %1812 = vst.msk [vmem:[#allocation4 + $0x70] sm:$0xf] %vm1322_vm4, %v1774_v62  ;;  %v1520_v23 = vpop.permute.xlu0 %1519  ;;  %v1931_v29 = vld [vmem:[#allocation4 + $0x60] sm:$0xff] }
 0x112   : > { %1557 = vst.msk [vmem:[#allocation4 + $0x7c] sm:$0xf] %vm1064_vm2, %v1520_v23 }
 0x114   : > { %v1039_v24 = vpop.permute.xlu1 %1038 }
 0x115   : > { %1076 = vst.msk [vmem:[#allocation4 + $0x84] sm:$0xf] %vm1064_vm2, %v1039_v24  ;;  %v1166_v25 = vpop.permute.xlu0 %1165 }
 0x116   : > { %1204 = vst.msk [vmem:[#allocation4 + $0x78] sm:$0xf] %vm1193_vm3, %v1166_v25 }
 0x118   : > { %v1933_v30 = vld [vmem:[#allocation4 + $0x6c] sm:$0xff]  ;;  %v1522_v31 = vpop.permute.xlu1 %1521 }
 0x119   : > { %1558 = vst.msk [vmem:[#allocation4 + $0x88] sm:$0xf] %vm1064_vm2, %v1522_v31  ;;  %v11186_v32 = vcombine.high %v1931_v29, %v1933_v30  ;;  %v1648_v33 = vpop.permute.xlu0 %1647  ;;  %v11185_v34 = vcombine.low %v1931_v29, %v1933_v30  ;;  %v13654_v29 = vld [vmem:[%s17138_s26 + $0x80] sm:$0xff]  }
 0x11a   : > { %1685 = vst.msk [vmem:[#allocation4 + $0x7c] sm:$0xf] %vm1193_vm3, %v1648_v33  ;;  %13416 = vmatprep.subr.bf16.mxu0 %v13654_v29 }
 0x11b   : > { %2263 = vmatprep.mubr.bf16.mxu0 %v11186_v32  ;;  %13417 = vmatpush3.bf16.msra.mxu0 %v13654_v29 }
 0x11c   : > { %v1168_v36 = vpop.permute.xlu1 %1167  ;;  %2264 = vmatmul.mubr.bf16.gmra.mxu0 %v11185_v34 }
 0x11d   : > { %1205 = vst.msk [vmem:[#allocation4 + $0x84] sm:$0xf] %vm1193_vm3, %v1168_v36  ;;  %v1295_v37 = vpop.permute.xlu0 %1294 }
 0x11e   : > { %1333 = vst.msk [vmem:[#allocation4 + $0x78] sm:$0xf] %vm1322_vm4, %v1295_v37  ;;  %v13400_v37 = vpop.f32.mrf.mxu1 }
 0x120   : > { %v1650_v38 = vpop.permute.xlu1 %1649 }
 0x121   : > { %1686 = vst.msk [vmem:[#allocation4 + $0x88] sm:$0xf] %vm1193_vm3, %v1650_v38  ;;  %v1776_v39 = vpop.permute.xlu0 %1775 }
 0x122   : > { %1813 = vst.msk [vmem:[#allocation4 + $0x7c] sm:$0xf] %vm1322_vm4, %v1776_v39  ;;  %v2330_v39 = vpop.f32.mrf.mxu1 }
 0x124   : > { %v1297_v40 = vpop.permute.xlu1 %1296 }
 0x125   : > { %1334 = vst.msk [vmem:[#allocation4 + $0x84] sm:$0xf] %vm1322_vm4, %v1297_v40  ;;  %v1041_v41 = vpop.permute.xlu0 %1040 }
 0x126   : > { %1077 = vst.msk [vmem:[#allocation4 + $0x90] sm:$0xf] %vm1064_vm2, %v1041_v41  ;;  %v13401_v41 = vpop.f32.mrf.mxu1 }
 0x128   : > { %v1778_v42 = vpop.permute.xlu1 %1777 }
 0x129   : > { %1814 = vst.msk [vmem:[#allocation4 + $0x88] sm:$0xf] %vm1322_vm4, %v1778_v42  ;;  %v1524_v43 = vpop.permute.xlu0 %1523  ;;  %v1935_v46 = vld [vmem:[#allocation4 + $0x78] sm:$0xff] }
 0x12a   : > { %1559 = vst.msk [vmem:[#allocation4 + $0x94] sm:$0xf] %vm1064_vm2, %v1524_v43 }
 0x12c   : > { %v1043_v44 = vpop.permute.xlu1 %1042 }
 0x12d   : > { %1078 = vst.msk [vmem:[#allocation4 + $0x9c] sm:$0xf] %vm1064_vm2, %v1043_v44  ;;  %v1170_v45 = vpop.permute.xlu0 %1169 }
 0x12e   : > { %1206 = vst.msk [vmem:[#allocation4 + $0x90] sm:$0xf] %vm1193_vm3, %v1170_v45 }
 0x130   : > { %v1937_v47 = vld [vmem:[#allocation4 + $0x84] sm:$0xff]  ;;  %v1526_v48 = vpop.permute.xlu1 %1525 }
 0x131   : > { %1560 = vst.msk [vmem:[#allocation4 + $0xa0] sm:$0xf] %vm1064_vm2, %v1526_v48  ;;  %v11189_v49 = vcombine.high %v1935_v46, %v1937_v47  ;;  %v1652_v50 = vpop.permute.xlu0 %1651  ;;  %v11188_v51 = vcombine.low %v1935_v46, %v1937_v47  ;;  %v2333_v47 = vpop.f32.mrf.mxu1 }
 0x132   : > { %1687 = vst.msk [vmem:[#allocation4 + $0x94] sm:$0xf] %vm1193_vm3, %v1652_v50 }
 0x133   : > { %2271 = vmatprep.mubr.bf16.mxu0 %v11189_v49 }
 0x134   : > { %v1172_v52 = vpop.permute.xlu1 %1171  ;;  %2272 = vmatmul.mubr.bf16.gmra.mxu0 %v11188_v51 }
 0x135   : > { %1207 = vst.msk [vmem:[#allocation4 + $0x9c] sm:$0xf] %vm1193_vm3, %v1172_v52  ;;  %v1299_v54 = vpop.permute.xlu0 %1298 }
 0x136   : > { %1335 = vst.msk [vmem:[#allocation4 + $0x90] sm:$0xf] %vm1322_vm4, %v1299_v54 }
 0x138   : > { %v1654_v56 = vpop.permute.xlu1 %1653 }
 0x139   : > { %1688 = vst.msk [vmem:[#allocation4 + $0xa0] sm:$0xf] %vm1193_vm3, %v1654_v56  ;;  %v1780_v57 = vpop.permute.xlu0 %1779 }
 0x13a   : > { %1815 = vst.msk [vmem:[#allocation4 + $0x94] sm:$0xf] %vm1322_vm4, %v1780_v57 }
 0x13c   : > { %v1301_v58 = vpop.permute.xlu1 %1300 }
 0x13d   : > { %1336 = vst.msk [vmem:[#allocation4 + $0x9c] sm:$0xf] %vm1322_vm4, %v1301_v58  ;;  %v1045_v59 = vpop.permute.xlu0 %1044 }
 0x13e   : > { %1079 = vst.msk [vmem:[#allocation4 + $0xa8] sm:$0xf] %vm1064_vm2, %v1045_v59 }
 0x140   : > { %v1782_v60 = vpop.permute.xlu1 %1781 }
 0x141   : > { %1816 = vst.msk [vmem:[#allocation4 + $0xa0] sm:$0xf] %vm1322_vm4, %v1782_v60  ;;  %v1528_v61 = vpop.permute.xlu0 %1527  ;;  %v1939_v2 = vld [vmem:[#allocation4 + $0x90] sm:$0xff]  ;;  %v14587_v60 = vld [vmem:[%s17139_s30] ss:$0 sm:$0xff] }
 0x142   : > { %1561 = vst.msk [vmem:[#allocation4 + $0xac] sm:$0xf] %vm1064_vm2, %v1528_v61 }
 0x144   : > { %v1047_v63 = vpop.permute.xlu1 %1046 }
 0x145   : > { %1080 = vst.msk [vmem:[#allocation4 + $0xb4] sm:$0xf] %vm1064_vm2, %v1047_v63  ;;  %v1174_v0 = vpop.permute.xlu0 %1173 }
 0x146   : > { %1208 = vst.msk [vmem:[#allocation4 + $0xa8] sm:$0xf] %vm1193_vm3, %v1174_v0 }
 0x148   : > { %v1941_v4 = vld [vmem:[#allocation4 + $0x9c] sm:$0xff]  ;;  %v1530_v8 = vpop.permute.xlu1 %1529 }
 0x149   : > { %1562 = vst.msk [vmem:[#allocation4 + $0xb8] sm:$0xf] %vm1064_vm2, %v1530_v8  ;;  %v11192_v9 = vcombine.high %v1939_v2, %v1941_v4  ;;  %v1656_v11 = vpop.permute.xlu0 %1655  ;;  %v11191_v18 = vcombine.low %v1939_v2, %v1941_v4 }
 0x14a   : > { %1689 = vst.msk [vmem:[#allocation4 + $0xac] sm:$0xf] %vm1193_vm3, %v1656_v11 }
 0x14b   : > { %2279 = vmatprep.mubr.bf16.mxu0 %v11192_v9 }
 0x14c   : > { %v1176_v21 = vpop.permute.xlu1 %1175  ;;  %2280 = vmatmul.mubr.bf16.gmra.mxu0 %v11191_v18 }
 0x14d   : > { %1209 = vst.msk [vmem:[#allocation4 + $0xb4] sm:$0xf] %vm1193_vm3, %v1176_v21  ;;  %v1303_v62 = vpop.permute.xlu0 %1302 }
 0x14e   : > { %1337 = vst.msk [vmem:[#allocation4 + $0xa8] sm:$0xf] %vm1322_vm4, %v1303_v62 }
 0x150   : > { %v1658_v23 = vpop.permute.xlu1 %1657 }
 0x151   : > { %1690 = vst.msk [vmem:[#allocation4 + $0xb8] sm:$0xf] %vm1193_vm3, %v1658_v23  ;;  %v1784_v24 = vpop.permute.xlu0 %1783 }
 0x152   : > { %1817 = vst.msk [vmem:[#allocation4 + $0xac] sm:$0xf] %vm1322_vm4, %v1784_v24 }
 0x154   : > { %v1305_v25 = vpop.permute.xlu1 %1304 }
 0x155   : > { %1338 = vst.msk [vmem:[#allocation4 + $0xb4] sm:$0xf] %vm1322_vm4, %v1305_v25 }
 0x158   : > { %v1786_v28 = vpop.permute.xlu1 %1785 }
 0x159   : > { %1818 = vst.msk [vmem:[#allocation4 + $0xb8] sm:$0xf] %vm1322_vm4, %v1786_v28  ;;  %v1943_v30 = vld [vmem:[#allocation4 + $0xa8] sm:$0xff] }
 0x15e   : > { %v14572_v48 = vpop.permute.xlu0 %2395 }
 0x160   : > { %v1945_v31 = vld [vmem:[#allocation4 + $0xb4] sm:$0xff] }
 0x161   : > { %v11195_v32 = vcombine.high %v1943_v30, %v1945_v31  ;;  %v11194_v33 = vcombine.low %v1943_v30, %v1945_v31 }
 0x163   : > { %2287 = vmatprep.mubr.bf16.mxu0 %v11195_v32 }
 0x164   : > { %2288 = vmatmul.mubr.bf16.gmra.mxu0 %v11194_v33 }
 0x165   : > { %v14560_v34 = vpop.permute.xlu1 %2400 }
 0x169   : > { %v14562_v22 = vpop.permute.xlu1 %2405 }
 0x16d   : > { %v14564_v35 = vpop.permute.xlu1 %2415 }
 0x171   : > { %v14566_v36 = vpop.permute.xlu1 %2425 }
 0x175   : > { %v14568_v38 = vpop.permute.xlu1 %2435 }
 0x179   : > { %v14570_v42 = vpop.permute.xlu1 %2445 }
 0x17c   : > { %v12950_v40 = vpop.f32.mrf.mxu0 }
 0x17d   : > { %v14575_v52 = vpop.permute.xlu1 %2455 }
 0x17e   : > { %v12951_v43 = vpop.f32.mrf.mxu0 }
 0x17f   : > { %v12952_v44 = vadd.f32 %v12951_v43, %v12950_v40 }
 0x180   : > { %v12953_v45 = vpop.f32.mrf.mxu0 }
 0x181   : > { %v2331_v46 = vadd.f32 %v12952_v44, %v2330_v39  ;;  %v14581_v59 = vpop.permute.xlu1 %2465  ;;  %v14606_v39 = vpop.permute.xlu0 %2410 }
 0x182   : > { %v12954_v49 = vpop.f32.mrf.mxu0 }
 0x183   : > { %v2473_v50 = vmul.f32 %v14572_v48, %v2331_v46  ;;  %v12955_v51 = vadd.f32 %v12954_v49, %v12953_v45 }
 0x185   : > { %v2489_v54 = vadd.f32 %v2473_v50, %v14121_v5  ;;  %v2334_v56 = vadd.f32 %v12955_v51, %v2333_v47  ;;  %v2828_v61 = vpop.permute.xlu1 %2827  ;;  %v14592_v5 = vld [vmem:[%s17140_s22] ss:$0 sm:$0xff] }
 0x186   : > { %2875 = vst.msk [vmem:[#allocation4] sm:$0xf] %vm1064_vm2, %v2828_v61 }
 0x187   : > { %2505 = vst.msk [vmem:[#allocation2] sm:$0xff] %vm766_vm0, %v2489_v54  ;;  %v2474_v57 = vmul.f32 %v14560_v34, %v2334_v56 }
 0x189   : > { %v2490_v58 = vadd.f32 %v2474_v57, %v14124_v6  ;;  %v2956_v2 = vpop.permute.xlu1 %2955 }
 0x18a   : > { %3003 = vst.msk [vmem:[#allocation4] sm:$0xf] %vm1193_vm3, %v2956_v2 }
 0x18b   : > { %2506 = vst.msk [vmem:[#allocation2 + $0x8] sm:$0xff] %vm766_vm0, %v2490_v58 }
 0x18e   : > { %v2521_v63 = vld [vmem:[#allocation2] sm:$0xff] }
 0x18f   : > { %v2544_v6 = vmul.f32 %v14587_v60, %v2521_v63 }
 0x191   : > { %v2567_v0 = vadd.f32 %v14592_v5, %v2544_v6 }
 0x192   : > { %v2522_v4 = vld [vmem:[#allocation2 + $0x8] sm:$0xff] }
 0x193   : > { %v2583_v8 = vmax.f32 %v2567_v0, 0.0  ;;  %v2545_v9 = vmul.f32 %v14587_v60, %v2522_v4 }
 0x194   : > { %v12956_v11 = vpop.f32.mrf.mxu0 }
 0x195   : > { %v2599_v18 = vmul.f32 %v2583_v8, %v14572_v48  ;;  %v2568_v21 = vadd.f32 %v14592_v5, %v2545_v9  ;;  %v13658_v9 = vld [vmem:[%s17138_s26 + $0x78] sm:$0xff]  }
 0x196   : > { %v12957_v62 = vpop.f32.mrf.mxu0  ;;  %13008 = vmatprep.subr.bf16.mxu1 %v13658_v9 }
 0x197   : > { %2615 = vst.msk [vmem:[#allocation3 + $0x10] sm:$0xff] %vm766_vm0, %v2599_v18  ;;  %v2584_v23 = vmax.f32 %v2568_v21, 0.0  ;;  %v12958_v24 = vadd.f32 %v12957_v62, %v12956_v11  ;;  %v14624_v11 = vpop.f32.mrf.mxu1  ;;  %v13660_v21 = vld [vmem:[%s17138_s26 + $0x38] sm:$0xff]  }
 0x198   : > { %v12959_v25 = vpop.f32.mrf.mxu0  ;;  %13009 = vmatpush3.bf16.msra.mxu1 %v13660_v21 }
 0x199   : > { %v2600_v27 = vmul.f32 %v2584_v23, %v14560_v34  ;;  %v2339_v28 = vadd.f32 %v13400_v37, %v12958_v24 }
 0x19a   : > { %v12960_v29 = vpop.f32.mrf.mxu0 }
 0x19b   : > { %2616 = vst.msk [vmem:[#allocation3 + $0x18] sm:$0xff] %vm766_vm0, %v2600_v27  ;;  %v2475_v30 = vmul.f32 %v14562_v22, %v2339_v28  ;;  %v12961_v31 = vadd.f32 %v12960_v29, %v12959_v25  ;;  %v13661_v28 = vld [vmem:[%s17138_s26 + $0x70] sm:$0xff]   ;;  %v2346_v29 = vpop.f32.mrf.mxu1 }
 0x19c   : > { %13010 = vmatprep.subr.bf16.mxu1 %v13661_v28 }
 0x19d   : > { %v2491_v32 = vadd.f32 %v2475_v30, %v14127_v7  ;;  %v2342_v33 = vadd.f32 %v13401_v41, %v12961_v31  ;;  %v13662_v31 = vld [vmem:[%s17138_s26 + $0x30] sm:$0xff]  }
 0x19e   : > { %v3019_v40 = vld [vmem:[#allocation3 + $0xf] sm:$0xff]  ;;  %13011 = vmatpush3.bf16.msra.mxu1 %v13662_v31 }
 0x19f   : > { %v2764_v43 = vld [vmem:[#allocation3 + $0xd] sm:$0xff]  ;;  %2507 = vst.msk [vmem:[#allocation2 + $0x10] sm:$0xff] %vm766_vm0, %v2491_v32  ;;  %v2476_v44 = vmul.f32 %v14606_v39, %v2342_v33  ;;  %v12387_v45 = vpack.c.bf16 %v3019_v40, %v3019_v40 }
 0x1a0   : > { %v12356_v46 = vpack.c.bf16 %v2764_v43, %v2764_v43  ;;  %v2668_v37 = vld [vmem:[#allocation3 + $0xc] sm:$0xff] }
 0x1a1   : > { %v3147_v47 = vld [vmem:[#allocation3 + $0x10] sm:$0xff]  ;;  %v12340_v50 = vpack.c.bf16 %v2668_v37, %v2668_v37  ;;  %v2492_v54 = vadd.f32 %v2476_v44, %v14136_v10  ;;  %3083 = vrot.lane.b32.xlu1 %v12387_v45, %s17106_s1  ;;  %v13663_v45 = vld [vmem:[%s17138_s26 + $0x68] sm:$0xff]  }
 0x1a2   : > { %v2892_v49 = vld [vmem:[#allocation3 + $0xe] sm:$0xff]  ;;  %v12403_v51 = vpack.c.bf16 %v3147_v47, %v3147_v47  ;;  %2829 = vrot.lane.b32.xlu0 %v12356_v46, %s17108_s5  ;;  %v3148_v58 = vld [vmem:[#allocation3 + $0x18] sm:$0xff]  ;;  %v14646_v46 = vpop.f32.mrf.mxu1  ;;  %13012 = vmatprep.subr.bf16.mxu1 %v13663_v45 }
 0x1a3   : > { %v3243_v7 = vld [vmem:[#allocation3 + $0x11] sm:$0xff]  ;;  %2748 = vst.msk [vmem:[#allocation4 + $0xc] sm:$0xf] %vm935_vm1, %v12340_v50  ;;  %v12372_v56 = vpack.c.bf16 %v2892_v49, %v2892_v49  ;;  %v12404_v0 = vpack.c.bf16 %v3148_v58, %v3148_v58  ;;  %v13664_v47 = vld [vmem:[%s17138_s26 + $0x28] sm:$0xff]  }
 0x1a4   : > { %3227 = vst.msk [vmem:[#allocation4 + $0x4] sm:$0xf] %vm935_vm1, %v12403_v51  ;;  %v12419_v41 = vpack.c.bf16 %v3243_v7, %v3243_v7  ;;  %v2669_v57 = vld [vmem:[#allocation3 + $0x14] sm:$0xff]  ;;  %13013 = vmatpush3.bf16.msra.mxu1 %v13664_v47 }
 0x1a5   : > { %2508 = vst.msk [vmem:[#allocation2 + $0x18] sm:$0xff] %vm766_vm0, %v2492_v54  ;;  %v2765_v61 = vld [vmem:[#allocation3 + $0x15] sm:$0xff]  ;;  %v12341_v6 = vpack.c.bf16 %v2669_v57, %v2669_v57  ;;  %v13666_v57 = vld [vmem:[%s17138_s26 + $0x20] sm:$0xff]  }
 0x1a6   : > { %v3020_v63 = vld [vmem:[#allocation3 + $0x17] sm:$0xff]  ;;  %3307 = vrot.lane.b32.xlu1 %v12419_v41, %s17108_s5  ;;  %2957 = vrot.lane.b32.xlu0 %v12372_v56, %s17111_s4  ;;  %3228 = vst.msk [vmem:[#allocation4 + $0x10] sm:$0xf] %vm935_vm1, %v12404_v0  ;;  %v12357_v4 = vpack.c.bf16 %v2765_v61, %v2765_v61  ;;  %v13665_v41 = vld [vmem:[%s17138_s26 + $0x60] sm:$0xff]   ;;  %v2349_v56 = vpop.f32.mrf.mxu1 }
 0x1a7   : > { %v2523_v10 = vld [vmem:[#allocation2 + $0x10] sm:$0xff]  ;;  %2749 = vst.msk [vmem:[#allocation4 + $0x18] sm:$0xf] %vm935_vm1, %v12341_v6  ;;  %v12388_v8 = vpack.c.bf16 %v3020_v63, %v3020_v63  ;;  %13014 = vmatprep.subr.bf16.mxu1 %v13665_v41  ;;  %v14661_v63 = vpop.permute.xlu0 %2420 }
 0x1a8   : > { %v2546_v2 = vmul.f32 %v14587_v60, %v2523_v10  ;;  %v2893_v18 = vld [vmem:[#allocation3 + $0x16] sm:$0xff]  ;;  %13015 = vmatpush3.bf16.msra.mxu1 %v13666_v57 }
 0x1a9   : > { %v12373_v27 = vpack.c.bf16 %v2893_v18, %v2893_v18 }
 0x1aa   : > { %v2569_v62 = vadd.f32 %v14592_v5, %v2546_v2  ;;  %2831 = vrot.lane.b32.xlu1 %v12357_v4, %s17108_s5  ;;  %3085 = vrot.lane.b32.xlu0 %v12388_v8, %s17106_s1 }
 0x1ac   : > { %v2524_v23 = vld [vmem:[#allocation2 + $0x18] sm:$0xff]  ;;  %v2585_v24 = vmax.f32 %v2569_v62, 0.0  ;;  %v12962_v30 = vpop.f32.mrf.mxu0 }
 0x1ad   : > { %v2547_v25 = vmul.f32 %v14587_v60, %v2524_v23 }
 0x1ae   : > { %v2601_v32 = vmul.f32 %v2585_v24, %v14562_v22  ;;  %2959 = vrot.lane.b32.xlu1 %v12373_v27, %s17111_s4  ;;  %v12963_v40 = vpop.f32.mrf.mxu0 }
 0x1af   : > { %v2570_v33 = vadd.f32 %v14592_v5, %v2547_v25  ;;  %v12964_v44 = vadd.f32 %v12963_v40, %v12962_v30  ;;  %v13668_v25 = vld [vmem:[%s17138_s26 + $0x18] sm:$0xff]  }
 0x1b0   : > { %2617 = vst.msk [vmem:[#allocation3 + $0x20] sm:$0xff] %vm766_vm0, %v2601_v32  ;;  %v12965_v37 = vpop.f32.mrf.mxu0  ;;  %v13669_v32 = vld [vmem:[%s17138_s26 + $0x50] sm:$0xff]  }
 0x1b1   : > { %v2586_v43 = vmax.f32 %v2570_v33, 0.0  ;;  %v2347_v50 = vadd.f32 %v12964_v44, %v2346_v29  ;;  %v13670_v33 = vld [vmem:[%s17138_s26 + $0x10] sm:$0xff]  }
 0x1b2   : > { %v12966_v51 = vpop.f32.mrf.mxu0 }
 0x1b3   : > { %v2602_v49 = vmul.f32 %v2586_v43, %v14606_v39  ;;  %v2477_v54 = vmul.f32 %v14564_v35, %v2347_v50  ;;  %v12967_v7 = vadd.f32 %v12966_v51, %v12965_v37 }
 0x1b5   : > { %2618 = vst.msk [vmem:[#allocation3 + $0x28] sm:$0xff] %vm766_vm0, %v2602_v49  ;;  %v2493_v58 = vadd.f32 %v2477_v54, %v14141_v12  ;;  %v2350_v61 = vadd.f32 %v12967_v7, %v2349_v56  ;;  %v13667_v12 = vld [vmem:[%s17138_s26 + $0x58] sm:$0xff]   ;;  %v13671_v49 = vld [vmem:[%s17138_s26 + $0x48] sm:$0xff]  }
 0x1b6   : > { %13016 = vmatprep.subr.bf16.mxu1 %v13667_v12  ;;  %v13673_v54 = vld [vmem:[%s17138_s26 + $0x8] sm:$0xff]  }
 0x1b7   : > { %v3371_v6 = vld [vmem:[#allocation3 + $0x1a] sm:$0xff]  ;;  %2509 = vst.msk [vmem:[#allocation2 + $0x20] sm:$0xff] %vm766_vm0, %v2493_v58  ;;  %v2478_v10 = vmul.f32 %v14661_v63, %v2350_v61  ;;  %13017 = vmatpush3.bf16.msra.mxu1 %v13668_v25 }
 0x1b8   : > { %v3244_v0 = vld [vmem:[#allocation3 + $0x19] sm:$0xff]  ;;  %v12435_v2 = vpack.c.bf16 %v3371_v6, %v3371_v6  ;;  %13018 = vmatprep.subr.bf16.mxu1 %v13669_v32 }
 0x1b9   : > { %v12420_v4 = vpack.c.bf16 %v3244_v0, %v3244_v0  ;;  %v3499_v8 = vld [vmem:[#allocation3 + $0x1b] sm:$0xff]  ;;  %v2494_v62 = vadd.f32 %v2478_v10, %v14144_v13 }
 0x1ba   : > { %v2766_v9 = vld [vmem:[#allocation3 + $0x1d] sm:$0xff]  ;;  %3435 = vrot.lane.b32.xlu1 %v12435_v2, %s17111_s4  ;;  %v12451_v28 = vpack.c.bf16 %v3499_v8, %v3499_v8 }
 0x1bb   : > { %v3627_v18 = vld [vmem:[#allocation3 + $0x1c] sm:$0xff]  ;;  %3309 = vrot.lane.b32.xlu0 %v12420_v4, %s17108_s5  ;;  %2510 = vst.msk [vmem:[#allocation2 + $0x28] sm:$0xff] %vm766_vm0, %v2494_v62  ;;  %v12358_v29 = vpack.c.bf16 %v2766_v9, %v2766_v9  ;;  %13019 = vmatpush3.bf16.msra.mxu1 %v13670_v33 }
 0x1bc   : > { %v3149_v21 = vld [vmem:[#allocation3 + $0x20] sm:$0xff]  ;;  %v12467_v23 = vpack.c.bf16 %v3627_v18, %v3627_v18  ;;  %v3150_v40 = vld [vmem:[#allocation3 + $0x28] sm:$0xff]  ;;  %13020 = vmatprep.subr.bf16.mxu1 %v13671_v49 }
 0x1bd   : > { %v12405_v24 = vpack.c.bf16 %v3149_v21, %v3149_v21  ;;  %v3628_v27 = vld [vmem:[#allocation3 + $0x24] sm:$0xff]  ;;  %v12406_v44 = vpack.c.bf16 %v3150_v40, %v3150_v40 }
 0x1be   : > { %v3021_v30 = vld [vmem:[#allocation3 + $0x1f] sm:$0xff]  ;;  %v12468_v31 = vpack.c.bf16 %v3628_v27, %v3628_v27  ;;  %3707 = vst.msk [vmem:[#allocation4 + $0x8] sm:$0xf] %vm935_vm1, %v12467_v23  ;;  %2750 = vst.msk [vmem:[#allocation4 + $0x24] sm:$0xf] %vm935_vm1, %v12467_v23  ;;  %3563 = vrot.lane.b32.xlu1 %v12451_v28, %s17106_s1  ;;  %v3022_v28 = vld [vmem:[#allocation3 + $0x27] sm:$0xff] }
 0x1bf   : > { %3229 = vst.msk [vmem:[#allocation4 + $0x1c] sm:$0xf] %vm935_vm1, %v12405_v24  ;;  %v2894_v13 = vld [vmem:[#allocation3 + $0x1e] sm:$0xff]  ;;  %2833 = vrot.lane.b32.xlu0 %v12358_v29, %s17108_s5  ;;  %v12389_v37 = vpack.c.bf16 %v3021_v30, %v3021_v30  ;;  %3230 = vst.msk [vmem:[#allocation4 + $0x28] sm:$0xf] %vm935_vm1, %v12406_v44  ;;  %13021 = vmatpush3.bf16.msra.mxu1 %v13673_v54  ;;  %v2895_v27 = vld [vmem:[#allocation3 + $0x26] sm:$0xff]  ;;  %v12390_v40 = vpack.c.bf16 %v3022_v28, %v3022_v28 }
 0x1c0   : > { %3708 = vst.msk [vmem:[#allocation4 + $0x14] sm:$0xf] %vm935_vm1, %v12468_v31  ;;  %2751 = vst.msk [vmem:[#allocation4 + $0x30] sm:$0xf] %vm935_vm1, %v12468_v31  ;;  %v2525_v43 = vld [vmem:[#allocation2 + $0x20] sm:$0xff]  ;;  %v12374_v47 = vpack.c.bf16 %v2894_v13, %v2894_v13  ;;  %v12375_v33 = vpack.c.bf16 %v2895_v27, %v2895_v27 }
 0x1c1   : > { %v2548_v45 = vmul.f32 %v14587_v60, %v2525_v43  ;;  %v3245_v50 = vld [vmem:[#allocation3 + $0x21] sm:$0xff] }
 0x1c2   : > { %v3372_v51 = vld [vmem:[#allocation3 + $0x22] sm:$0xff]  ;;  %3087 = vrot.lane.b32.xlu1 %v12389_v37, %s17106_s1  ;;  %v12421_v58 = vpack.c.bf16 %v3245_v50, %v3245_v50 }
 0x1c3   : > { %v2571_v7 = vadd.f32 %v14592_v5, %v2548_v45  ;;  %2961 = vrot.lane.b32.xlu0 %v12374_v47, %s17111_s4  ;;  %v2526_v41 = vld [vmem:[#allocation2 + $0x28] sm:$0xff]  ;;  %v12436_v61 = vpack.c.bf16 %v3372_v51, %v3372_v51  ;;  %v13674_v10 = vld [vmem:[%s17138_s26 + $0x40] sm:$0xff]  }
 0x1c4   : > { %v2549_v57 = vmul.f32 %v14587_v60, %v2526_v41  ;;  %v2767_v6 = vld [vmem:[#allocation3 + $0x25] sm:$0xff]  ;;  %v12968_v2 = vpop.f32.mrf.mxu0  ;;  %13022 = vmatprep.subr.bf16.mxu1 %v13674_v10 }
 0x1c5   : > { %v2587_v56 = vmax.f32 %v2571_v7, 0.0  ;;  %v3500_v0 = vld [vmem:[#allocation3 + $0x23] sm:$0xff]  ;;  %v12359_v23 = vpack.c.bf16 %v2767_v6, %v2767_v6 }
 0x1c6   : > { %v13675_v8 = vld [vmem:[%s17138_s26] sm:$0xff]   ;;  %v2572_v18 = vadd.f32 %v14592_v5, %v2549_v57  ;;  %3311 = vrot.lane.b32.xlu1 %v12421_v58, %s17108_s5  ;;  %v12969_v12 = vpop.f32.mrf.mxu0  ;;  %v12452_v24 = vpack.c.bf16 %v3500_v0, %v3500_v0 }
 0x1c7   : > { %v13652_v4 = vld [vmem:[#allocation4 + $0x8] ss:$12 sps:$4 sm:$0xff]   ;;  %v2603_v9 = vmul.f32 %v2587_v56, %v14564_v35  ;;  %3437 = vrot.lane.b32.xlu0 %v12436_v61, %s17111_s4  ;;  %v12970_v62 = vadd.f32 %v12969_v12, %v12968_v2  ;;  %13023 = vmatpush3.bf16.msra.mxu1 %v13675_v8  ;;  %v14739_v12 = vpop.f32.mrf.mxu1 }
 0x1c8   : > { %13418 = vmatprep.mubr.msk.bf16.mxu0 %vm766_vm0, %v13652_v4  ;;  %v2588_v21 = vmax.f32 %v2572_v18, 0.0  ;;  %v12971_v25 = vpop.f32.mrf.mxu0 }
 0x1c9   : > { %2619 = vst.msk [vmem:[#allocation3 + $0x30] sm:$0xff] %vm766_vm0, %v2603_v9  ;;  %v2355_v30 = vadd.f32 %v14624_v11, %v12970_v62  ;;  %v14722_v11 = vpop.permute.xlu0 %2430 }
 0x1ca   : > { %v2604_v29 = vmul.f32 %v2588_v21, %v14661_v63  ;;  %2835 = vrot.lane.b32.xlu1 %v12359_v23, %s17108_s5  ;;  %v12972_v31 = vpop.f32.mrf.mxu0 }
 0x1cb   : > { %3565 = vrot.lane.b32.xlu0 %v12452_v24, %s17106_s1  ;;  %v2479_v13 = vmul.f32 %v14566_v36, %v2355_v30  ;;  %v12973_v32 = vadd.f32 %v12972_v31, %v12971_v25  ;;  %v2362_v31 = vpop.f32.mrf.mxu1 }
 0x1cc   : > { %2620 = vst.msk [vmem:[#allocation3 + $0x38] sm:$0xff] %vm766_vm0, %v2604_v29 }
 0x1cd   : > { %v2495_v43 = vadd.f32 %v2479_v13, %v14147_v14  ;;  %v2358_v44 = vadd.f32 %v14646_v46, %v12973_v32 }
 0x1ce   : > { %2963 = vrot.lane.b32.xlu1 %v12375_v33, %s17111_s4 }
 0x1cf   : > { %3089 = vrot.lane.b32.xlu0 %v12390_v40, %s17106_s1  ;;  %2511 = vst.msk [vmem:[#allocation2 + $0x30] sm:$0xff] %vm766_vm0, %v2495_v43  ;;  %v2480_v47 = vmul.f32 %v14722_v11, %v2358_v44 }
 0x1d0   : > { %v3373_v45 = vld [vmem:[#allocation3 + $0x2a] sm:$0xff] }
 0x1d1   : > { %v3246_v37 = vld [vmem:[#allocation3 + $0x29] sm:$0xff]  ;;  %v12437_v49 = vpack.c.bf16 %v3373_v45, %v3373_v45  ;;  %v2496_v46 = vadd.f32 %v2480_v47, %v14156_v15 }
 0x1d2   : > { %v12422_v50 = vpack.c.bf16 %v3246_v37, %v3246_v37  ;;  %v3501_v51 = vld [vmem:[#allocation3 + $0x2b] sm:$0xff] }
 0x1d3   : > { %v2768_v54 = vld [vmem:[#allocation3 + $0x2d] sm:$0xff]  ;;  %3439 = vrot.lane.b32.xlu1 %v12437_v49, %s17111_s4  ;;  %2512 = vst.msk [vmem:[#allocation2 + $0x38] sm:$0xff] %vm766_vm0, %v2496_v46  ;;  %v12453_v58 = vpack.c.bf16 %v3501_v51, %v3501_v51  ;;  %v3152_v10 = vld [vmem:[#allocation3 + $0x38] sm:$0xff] }
 0x1d4   : > { %v3629_v7 = vld [vmem:[#allocation3 + $0x2c] sm:$0xff]  ;;  %3313 = vrot.lane.b32.xlu0 %v12422_v50, %s17108_s5  ;;  %v3630_v57 = vld [vmem:[#allocation3 + $0x34] sm:$0xff]  ;;  %v12360_v61 = vpack.c.bf16 %v2768_v54, %v2768_v54  ;;  %v12408_v2 = vpack.c.bf16 %v3152_v10, %v3152_v10  ;;  %v14751_v50 = vpop.f32.mrf.mxu1  ;;  %v14761_v10 = vpop.permute.xlu0 %2440 }
 0x1d5   : > { %v3151_v14 = vld [vmem:[#allocation3 + $0x30] sm:$0xff]  ;;  %v12469_v41 = vpack.c.bf16 %v3629_v7, %v3629_v7  ;;  %v12470_v6 = vpack.c.bf16 %v3630_v57, %v3630_v57 }
 0x1d6   : > { %v12407_v56 = vpack.c.bf16 %v3151_v14, %v3151_v14  ;;  %v3023_v0 = vld [vmem:[#allocation3 + $0x2f] sm:$0xff]  ;;  %3232 = vst.msk [vmem:[#allocation4 + $0x40] sm:$0xf] %vm935_vm1, %v12408_v2  ;;  %v3024_v7 = vld [vmem:[#allocation3 + $0x37] sm:$0xff] }
 0x1d7   : > { %3709 = vst.msk [vmem:[#allocation4 + $0x20] sm:$0xf] %vm935_vm1, %v12469_v41  ;;  %2752 = vst.msk [vmem:[#allocation4 + $0x3c] sm:$0xf] %vm935_vm1, %v12469_v41  ;;  %v2896_v15 = vld [vmem:[#allocation3 + $0x2e] sm:$0xff]  ;;  %3567 = vrot.lane.b32.xlu1 %v12453_v58, %s17106_s1  ;;  %v12391_v9 = vpack.c.bf16 %v3023_v0, %v3023_v0  ;;  %v2897_v54 = vld [vmem:[#allocation3 + $0x36] sm:$0xff] }
 0x1d8   : > { %3231 = vst.msk [vmem:[#allocation4 + $0x34] sm:$0xf] %vm935_vm1, %v12407_v56  ;;  %2837 = vrot.lane.b32.xlu0 %v12360_v61, %s17108_s5  ;;  %3710 = vst.msk [vmem:[#allocation4 + $0x2c] sm:$0xf] %vm935_vm1, %v12470_v6  ;;  %v2527_v4 = vld [vmem:[#allocation2 + $0x30] sm:$0xff]  ;;  %v12376_v18 = vpack.c.bf16 %v2896_v15, %v2896_v15  ;;  %v12377_v58 = vpack.c.bf16 %v2897_v54, %v2897_v54  ;;  %v12392_v61 = vpack.c.bf16 %v3024_v7, %v3024_v7 }
 0x1d9   : > { %2753 = vst.msk [vmem:[#allocation4 + $0x48] sm:$0xf] %vm935_vm1, %v12470_v6  ;;  %v2550_v8 = vmul.f32 %v14587_v60, %v2527_v4  ;;  %v3247_v21 = vld [vmem:[#allocation3 + $0x31] sm:$0xff]  ;;  %v2365_v6 = vpop.f32.mrf.mxu1 }
 0x1da   : > { %v3374_v62 = vld [vmem:[#allocation3 + $0x32] sm:$0xff]  ;;  %v12423_v28 = vpack.c.bf16 %v3247_v21, %v3247_v21 }
 0x1db   : > { %v2573_v23 = vadd.f32 %v14592_v5, %v2550_v8  ;;  %3091 = vrot.lane.b32.xlu1 %v12391_v9, %s17106_s1  ;;  %v2528_v24 = vld [vmem:[#allocation2 + $0x38] sm:$0xff]  ;;  %v12438_v29 = vpack.c.bf16 %v3374_v62, %v3374_v62 }
 0x1dc   : > { %2965 = vrot.lane.b32.xlu0 %v12376_v18, %s17111_s4  ;;  %v2551_v27 = vmul.f32 %v14587_v60, %v2528_v24  ;;  %v2769_v30 = vld [vmem:[#allocation3 + $0x35] sm:$0xff]  ;;  %v12974_v13 = vpop.f32.mrf.mxu0 }
 0x1dd   : > { %v2589_v25 = vmax.f32 %v2573_v23, 0.0  ;;  %v3502_v33 = vld [vmem:[#allocation3 + $0x33] sm:$0xff]  ;;  %v12361_v47 = vpack.c.bf16 %v2769_v30, %v2769_v30 }
 0x1de   : > { %v2574_v43 = vadd.f32 %v14592_v5, %v2551_v27  ;;  %v12975_v44 = vpop.f32.mrf.mxu0  ;;  %v12454_v49 = vpack.c.bf16 %v3502_v33, %v3502_v33 }
 0x1df   : > { %v13655_v32 = vld [vmem:[#allocation4 + $0x20] ss:$12 sps:$4 sm:$0xff]   ;;  %v2605_v40 = vmul.f32 %v2589_v25, %v14566_v36  ;;  %3315 = vrot.lane.b32.xlu1 %v12423_v28, %s17108_s5  ;;  %v12976_v37 = vadd.f32 %v12975_v44, %v12974_v13 }
 0x1e0   : > { %3441 = vrot.lane.b32.xlu0 %v12438_v29, %s17111_s4  ;;  %13419 = vmatmul.mubr.msk.bf16.vlgmr.msra.gmra.mxu0 %vm766_vm0, %v13655_v32  ;;  %v2590_v45 = vmax.f32 %v2574_v43, 0.0  ;;  %v12977_v51 = vpop.f32.mrf.mxu0 }
 0x1e1   : > { %2621 = vst.msk [vmem:[#allocation3 + $0x40] sm:$0xff] %vm766_vm0, %v2605_v40  ;;  %v2363_v46 = vadd.f32 %v12976_v37, %v2362_v31 }
 0x1e2   : > { %v2606_v14 = vmul.f32 %v2590_v45, %v14722_v11  ;;  %v12978_v41 = vpop.f32.mrf.mxu0 }
 0x1e3   : > { %2839 = vrot.lane.b32.xlu1 %v12361_v47, %s17108_s5  ;;  %v2481_v56 = vmul.f32 %v14568_v38, %v2363_v46  ;;  %v12979_v57 = vadd.f32 %v12978_v41, %v12977_v51 }
 0x1e4   : > { %3569 = vrot.lane.b32.xlu0 %v12454_v49, %s17106_s1  ;;  %2622 = vst.msk [vmem:[#allocation3 + $0x48] sm:$0xff] %vm766_vm0, %v2606_v14 }
 0x1e5   : > { %v2497_v0 = vadd.f32 %v2481_v56, %v14159_v16  ;;  %v2366_v15 = vadd.f32 %v12979_v57, %v2365_v6 }
 0x1e7   : > { %2967 = vrot.lane.b32.xlu1 %v12377_v58, %s17111_s4  ;;  %2513 = vst.msk [vmem:[#allocation2 + $0x40] sm:$0xff] %vm766_vm0, %v2497_v0  ;;  %v2482_v8 = vmul.f32 %v14761_v10, %v2366_v15 }
 0x1e8   : > { %3093 = vrot.lane.b32.xlu0 %v12392_v61, %s17106_s1  ;;  %v3375_v2 = vld [vmem:[#allocation3 + $0x3a] sm:$0xff] }
 0x1e9   : > { %v3248_v4 = vld [vmem:[#allocation3 + $0x39] sm:$0xff]  ;;  %v12439_v9 = vpack.c.bf16 %v3375_v2, %v3375_v2  ;;  %v2498_v16 = vadd.f32 %v2482_v8, %v14162_v17 }
 0x1ea   : > { %v12424_v18 = vpack.c.bf16 %v3248_v4, %v3248_v4  ;;  %v3503_v21 = vld [vmem:[#allocation3 + $0x3b] sm:$0xff] }
 0x1eb   : > { %v2770_v62 = vld [vmem:[#allocation3 + $0x3d] sm:$0xff]  ;;  %3443 = vrot.lane.b32.xlu1 %v12439_v9, %s17111_s4  ;;  %2514 = vst.msk [vmem:[#allocation2 + $0x48] sm:$0xff] %vm766_vm0, %v2498_v16  ;;  %v12455_v29 = vpack.c.bf16 %v3503_v21, %v3503_v21  ;;  %v3154_v32 = vld [vmem:[#allocation3 + $0x48] sm:$0xff] }
 0x1ec   : > { %v3631_v23 = vld [vmem:[#allocation3 + $0x3c] sm:$0xff]  ;;  %3317 = vrot.lane.b32.xlu0 %v12424_v18, %s17108_s5  ;;  %v3632_v28 = vld [vmem:[#allocation3 + $0x44] sm:$0xff]  ;;  %v12362_v30 = vpack.c.bf16 %v2770_v62, %v2770_v62  ;;  %v12410_v33 = vpack.c.bf16 %v3154_v32, %v3154_v32 }
 0x1ed   : > { %v3153_v24 = vld [vmem:[#allocation3 + $0x40] sm:$0xff]  ;;  %v12471_v25 = vpack.c.bf16 %v3631_v23, %v3631_v23  ;;  %v12472_v31 = vpack.c.bf16 %v3632_v28, %v3632_v28 }
 0x1ee   : > { %v12409_v27 = vpack.c.bf16 %v3153_v24, %v3153_v24  ;;  %v3025_v13 = vld [vmem:[#allocation3 + $0x3f] sm:$0xff]  ;;  %3234 = vst.msk [vmem:[#allocation4 + $0x58] sm:$0xf] %vm935_vm1, %v12410_v33  ;;  %v3026_v21 = vld [vmem:[#allocation3 + $0x47] sm:$0xff] }
 0x1ef   : > { %3711 = vst.msk [vmem:[#allocation4 + $0x38] sm:$0xf] %vm935_vm1, %v12471_v25  ;;  %2754 = vst.msk [vmem:[#allocation4 + $0x54] sm:$0xf] %vm935_vm1, %v12471_v25  ;;  %v2898_v17 = vld [vmem:[#allocation3 + $0x3e] sm:$0xff]  ;;  %3571 = vrot.lane.b32.xlu1 %v12455_v29, %s17106_s1  ;;  %v12393_v44 = vpack.c.bf16 %v3025_v13, %v3025_v13  ;;  %v2899_v18 = vld [vmem:[#allocation3 + $0x46] sm:$0xff]  ;;  %v12394_v28 = vpack.c.bf16 %v3026_v21, %v3026_v21  ;;  %v14794_v29 = vpop.permute.xlu0 %2450 }
 0x1f0   : > { %3233 = vst.msk [vmem:[#allocation4 + $0x4c] sm:$0xf] %vm935_vm1, %v12409_v27  ;;  %2841 = vrot.lane.b32.xlu0 %v12362_v30, %s17108_s5  ;;  %3712 = vst.msk [vmem:[#allocation4 + $0x44] sm:$0xf] %vm935_vm1, %v12472_v31  ;;  %v2529_v40 = vld [vmem:[#allocation2 + $0x40] sm:$0xff]  ;;  %v12378_v45 = vpack.c.bf16 %v2898_v17, %v2898_v17  ;;  %v12379_v27 = vpack.c.bf16 %v2899_v18, %v2899_v18 }
 0x1f1   : > { %2755 = vst.msk [vmem:[#allocation4 + $0x60] sm:$0xf] %vm935_vm1, %v12472_v31  ;;  %v2552_v43 = vmul.f32 %v14587_v60, %v2529_v40  ;;  %v3249_v37 = vld [vmem:[#allocation3 + $0x41] sm:$0xff] }
 0x1f2   : > { %v3376_v47 = vld [vmem:[#allocation3 + $0x42] sm:$0xff]  ;;  %v12425_v14 = vpack.c.bf16 %v3249_v37, %v3249_v37 }
 0x1f3   : > { %v2575_v49 = vadd.f32 %v14592_v5, %v2552_v43  ;;  %3095 = vrot.lane.b32.xlu1 %v12393_v44, %s17106_s1  ;;  %v2530_v51 = vld [vmem:[#allocation2 + $0x48] sm:$0xff]  ;;  %v12440_v46 = vpack.c.bf16 %v3376_v47, %v3376_v47 }
 0x1f4   : > { %2969 = vrot.lane.b32.xlu0 %v12378_v45, %s17111_s4  ;;  %v2553_v7 = vmul.f32 %v14587_v60, %v2530_v51  ;;  %v2771_v41 = vld [vmem:[#allocation3 + $0x45] sm:$0xff]  ;;  %v12980_v56 = vpop.f32.mrf.mxu0 }
 0x1f5   : > { %v2591_v54 = vmax.f32 %v2575_v49, 0.0  ;;  %v3504_v58 = vld [vmem:[#allocation3 + $0x43] sm:$0xff]  ;;  %v12363_v4 = vpack.c.bf16 %v2771_v41, %v2771_v41  ;;  %v14805_v49 = vpop.permute.xlu0 %2460 }
 0x1f6   : > { %v2576_v6 = vadd.f32 %v14592_v5, %v2553_v7  ;;  %v12981_v0 = vpop.f32.mrf.mxu0  ;;  %v12456_v8 = vpack.c.bf16 %v3504_v58, %v3504_v58 }
 0x1f7   : > { %v13656_v57 = vld [vmem:[#allocation4 + $0x38] ss:$12 sps:$4 sm:$0xff]   ;;  %v2607_v61 = vmul.f32 %v2591_v54, %v14568_v38  ;;  %3319 = vrot.lane.b32.xlu1 %v12425_v14, %s17108_s5  ;;  %v12982_v2 = vadd.f32 %v12981_v0, %v12980_v56 }
 0x1f8   : > { %3445 = vrot.lane.b32.xlu0 %v12440_v46, %s17111_s4  ;;  %13422 = vmatprep.mubr.msk.bf16.mxu0 %vm766_vm0, %v13656_v57  ;;  %v2592_v15 = vmax.f32 %v2576_v6, 0.0  ;;  %v12983_v9 = vpop.f32.mrf.mxu0  ;;  %v14817_v6 = vpop.f32.mrf.mxu1 }
 0x1f9   : > { %2623 = vst.msk [vmem:[#allocation3 + $0x50] sm:$0xff] %vm766_vm0, %v2607_v61  ;;  %v2371_v23 = vadd.f32 %v14739_v12, %v12982_v2  ;;  %v14819_v2 = vpop.permute.xlu0 %2470 }
 0x1fa   : > { %v2608_v62 = vmul.f32 %v2592_v15, %v14761_v10  ;;  %v12984_v24 = vpop.f32.mrf.mxu0 }
 0x1fb   : > { %2843 = vrot.lane.b32.xlu1 %v12363_v4, %s17108_s5  ;;  %v2483_v16 = vmul.f32 %v14570_v42, %v2371_v23  ;;  %v12985_v25 = vadd.f32 %v12984_v24, %v12983_v9  ;;  %v2378_v24 = vpop.f32.mrf.mxu1 }
 0x1fc   : > { %3573 = vrot.lane.b32.xlu0 %v12456_v8, %s17106_s1  ;;  %2624 = vst.msk [vmem:[#allocation3 + $0x58] sm:$0xff] %vm766_vm0, %v2608_v62 }
 0x1fd   : > { %v2499_v30 = vadd.f32 %v2483_v16, %v14172_v19  ;;  %v2374_v31 = vadd.f32 %v14751_v50, %v12985_v25 }
 0x1ff   : > { %2971 = vrot.lane.b32.xlu1 %v12379_v27, %s17111_s4  ;;  %2515 = vst.msk [vmem:[#allocation2 + $0x50] sm:$0xff] %vm766_vm0, %v2499_v30  ;;  %v2484_v17 = vmul.f32 %v14794_v29, %v2374_v31  ;;  %v14829_v31 = vpop.permute.xlu0 %3465 }
 0x200   : > { %3097 = vrot.lane.b32.xlu0 %v12394_v28, %s17106_s1  ;;  %v3377_v12 = vld [vmem:[#allocation3 + $0x4a] sm:$0xff] }
 0x201   : > { %v3250_v13 = vld [vmem:[#allocation3 + $0x49] sm:$0xff]  ;;  %v12441_v32 = vpack.c.bf16 %v3377_v12, %v3377_v12  ;;  %v2500_v19 = vadd.f32 %v2484_v17, %v14175_v20 }
 0x202   : > { %v12426_v33 = vpack.c.bf16 %v3250_v13, %v3250_v13  ;;  %v3505_v40 = vld [vmem:[#allocation3 + $0x4b] sm:$0xff] }
 0x203   : > { %v2772_v43 = vld [vmem:[#allocation3 + $0x4d] sm:$0xff]  ;;  %3447 = vrot.lane.b32.xlu1 %v12441_v32, %s17111_s4  ;;  %2516 = vst.msk [vmem:[#allocation2 + $0x58] sm:$0xff] %vm766_vm0, %v2500_v19  ;;  %v12457_v51 = vpack.c.bf16 %v3505_v40, %v3505_v40  ;;  %v3156_v46 = vld [vmem:[#allocation3 + $0x58] sm:$0xff]  ;;  %v14833_v40 = vpop.f32.mrf.mxu1 }
 0x204   : > { %v3633_v44 = vld [vmem:[#allocation3 + $0x4c] sm:$0xff]  ;;  %3321 = vrot.lane.b32.xlu0 %v12426_v33, %s17108_s5  ;;  %v3634_v47 = vld [vmem:[#allocation3 + $0x54] sm:$0xff]  ;;  %v12364_v54 = vpack.c.bf16 %v2772_v43, %v2772_v43  ;;  %v12412_v41 = vpack.c.bf16 %v3156_v46, %v3156_v46 }
 0x205   : > { %v3155_v45 = vld [vmem:[#allocation3 + $0x50] sm:$0xff]  ;;  %v12473_v50 = vpack.c.bf16 %v3633_v44, %v3633_v44  ;;  %v12474_v7 = vpack.c.bf16 %v3634_v47, %v3634_v47  ;;  %v2381_v46 = vpop.f32.mrf.mxu1 }
 0x206   : > { %v12411_v37 = vpack.c.bf16 %v3155_v45, %v3155_v45  ;;  %v3027_v20 = vld [vmem:[#allocation3 + $0x4f] sm:$0xff]  ;;  %3236 = vst.msk [vmem:[#allocation4 + $0x70] sm:$0xf] %vm935_vm1, %v12412_v41  ;;  %v3028_v45 = vld [vmem:[#allocation3 + $0x57] sm:$0xff] }
 0x207   : > { %3713 = vst.msk [vmem:[#allocation4 + $0x50] sm:$0xf] %vm935_vm1, %v12473_v50  ;;  %2756 = vst.msk [vmem:[#allocation4 + $0x6c] sm:$0xf] %vm935_vm1, %v12473_v50  ;;  %v2900_v14 = vld [vmem:[#allocation3 + $0x4e] sm:$0xff]  ;;  %3575 = vrot.lane.b32.xlu1 %v12457_v51, %s17106_s1  ;;  %v12395_v58 = vpack.c.bf16 %v3027_v20, %v3027_v20  ;;  %v2901_v44 = vld [vmem:[#allocation3 + $0x56] sm:$0xff] }
 0x208   : > { %3235 = vst.msk [vmem:[#allocation4 + $0x64] sm:$0xf] %vm935_vm1, %v12411_v37  ;;  %2845 = vrot.lane.b32.xlu0 %v12364_v54, %s17108_s5  ;;  %3714 = vst.msk [vmem:[#allocation4 + $0x5c] sm:$0xf] %vm935_vm1, %v12474_v7  ;;  %v2531_v56 = vld [vmem:[#allocation2 + $0x50] sm:$0xff]  ;;  %v12380_v61 = vpack.c.bf16 %v2900_v14, %v2900_v14  ;;  %v12381_v20 = vpack.c.bf16 %v2901_v44, %v2901_v44  ;;  %v12396_v14 = vpack.c.bf16 %v3028_v45, %v3028_v45 }
 0x209   : > { %2757 = vst.msk [vmem:[#allocation4 + $0x78] sm:$0xf] %vm935_vm1, %v12474_v7  ;;  %v2554_v57 = vmul.f32 %v14587_v60, %v2531_v56  ;;  %v3251_v0 = vld [vmem:[#allocation3 + $0x51] sm:$0xff] }
 0x20a   : > { %v3378_v15 = vld [vmem:[#allocation3 + $0x52] sm:$0xff]  ;;  %v12427_v21 = vpack.c.bf16 %v3251_v0, %v3251_v0 }
 0x20b   : > { %v2577_v4 = vadd.f32 %v14592_v5, %v2554_v57  ;;  %3099 = vrot.lane.b32.xlu1 %v12395_v58, %s17106_s1  ;;  %v2532_v8 = vld [vmem:[#allocation2 + $0x58] sm:$0xff]  ;;  %v12442_v62 = vpack.c.bf16 %v3378_v15, %v3378_v15 }
 0x20c   : > { %2973 = vrot.lane.b32.xlu0 %v12380_v61, %s17111_s4  ;;  %v2555_v18 = vmul.f32 %v14587_v60, %v2532_v8  ;;  %v2773_v23 = vld [vmem:[#allocation3 + $0x55] sm:$0xff]  ;;  %v12986_v16 = vpop.f32.mrf.mxu0 }
 0x20d   : > { %v2593_v9 = vmax.f32 %v2577_v4, 0.0  ;;  %v3506_v27 = vld [vmem:[#allocation3 + $0x53] sm:$0xff]  ;;  %v12365_v32 = vpack.c.bf16 %v2773_v23, %v2773_v23 }
 0x20e   : > { %v2578_v30 = vadd.f32 %v14592_v5, %v2555_v18  ;;  %v12987_v12 = vpop.f32.mrf.mxu0  ;;  %v12458_v33 = vpack.c.bf16 %v3506_v27, %v3506_v27 }
 0x20f   : > { %v13657_v25 = vld [vmem:[#allocation4 + $0x50] ss:$12 sps:$4 sm:$0xff]   ;;  %v2609_v28 = vmul.f32 %v2593_v9, %v14570_v42  ;;  %3323 = vrot.lane.b32.xlu1 %v12427_v21, %s17108_s5  ;;  %v12988_v17 = vadd.f32 %v12987_v12, %v12986_v16 }
 0x210   : > { %3449 = vrot.lane.b32.xlu0 %v12442_v62, %s17111_s4  ;;  %13423 = vmatmul.mubr.msk.bf16.gmra.mxu0 %vm766_vm0, %v13657_v25  ;;  %v2594_v13 = vmax.f32 %v2578_v30, 0.0  ;;  %v12989_v43 = vpop.f32.mrf.mxu0 }
 0x211   : > { %2625 = vst.msk [vmem:[#allocation3 + $0x60] sm:$0xff] %vm766_vm0, %v2609_v28  ;;  %v2379_v50 = vadd.f32 %v12988_v17, %v2378_v24 }
 0x212   : > { %v2610_v19 = vmul.f32 %v2594_v13, %v14794_v29  ;;  %v12990_v37 = vpop.f32.mrf.mxu0 }
 0x213   : > { %2847 = vrot.lane.b32.xlu1 %v12365_v32, %s17108_s5  ;;  %v2485_v47 = vmul.f32 %v14575_v52, %v2379_v50  ;;  %v12991_v51 = vadd.f32 %v12990_v37, %v12989_v43  ;;  %v3084_v54 = vpop.permute.xlu1 %3083 }
 0x214   : > { %3577 = vrot.lane.b32.xlu0 %v12458_v33, %s17106_s1  ;;  %2626 = vst.msk [vmem:[#allocation3 + $0x68] sm:$0xff] %vm766_vm0, %v2610_v19  ;;  %v2830_v7 = vpop.permute.xlu0 %2829 }
 0x215   : > { %3131 = vst.msk [vmem:[#allocation4] sm:$0xf] %vm1322_vm4, %v3084_v54  ;;  %v2501_v41 = vadd.f32 %v2485_v47, %v14193_v26  ;;  %v2382_v56 = vadd.f32 %v12991_v51, %v2381_v46 }
 0x216   : > { %2876 = vst.msk [vmem:[#allocation4 + $0xc] sm:$0xf] %vm1064_vm2, %v2830_v7 }
 0x217   : > { %2975 = vrot.lane.b32.xlu1 %v12381_v20, %s17111_s4  ;;  %2517 = vst.msk [vmem:[#allocation2 + $0x60] sm:$0xff] %vm766_vm0, %v2501_v41  ;;  %v2486_v61 = vmul.f32 %v14805_v49, %v2382_v56 }
 0x218   : > { %3101 = vrot.lane.b32.xlu0 %v12396_v14, %s17106_s1  ;;  %v3379_v57 = vld [vmem:[#allocation3 + $0x5a] sm:$0xff]  ;;  %v3308_v0 = vpop.permute.xlu1 %3307  ;;  %v2958_v15 = vpop.permute.xlu0 %2957 }
 0x219   : > { %v3252_v58 = vld [vmem:[#allocation3 + $0x59] sm:$0xff]  ;;  %v12443_v4 = vpack.c.bf16 %v3379_v57, %v3379_v57  ;;  %3355 = vst.msk [vmem:[#allocation4 + $0x4] sm:$0xf] %vm1064_vm2, %v3308_v0  ;;  %v2502_v62 = vadd.f32 %v2486_v61, %v14228_v3 }
 0x21a   : > { %v12428_v8 = vpack.c.bf16 %v3252_v58, %v3252_v58  ;;  %v3507_v9 = vld [vmem:[#allocation3 + $0x5b] sm:$0xff]  ;;  %3004 = vst.msk [vmem:[#allocation4 + $0xc] sm:$0xf] %vm1193_vm3, %v2958_v15 }
 0x21b   : > { %v2774_v26 = vld [vmem:[#allocation3 + $0x5d] sm:$0xff]  ;;  %3451 = vrot.lane.b32.xlu1 %v12443_v4, %s17111_s4  ;;  %2518 = vst.msk [vmem:[#allocation2 + $0x68] sm:$0xff] %vm766_vm0, %v2502_v62  ;;  %v12459_v28 = vpack.c.bf16 %v3507_v9, %v3507_v9  ;;  %v3158_v17 = vld [vmem:[#allocation3 + $0x68] sm:$0xff] }
 0x21c   : > { %v3635_v18 = vld [vmem:[#allocation3 + $0x5c] sm:$0xff]  ;;  %3325 = vrot.lane.b32.xlu0 %v12428_v8, %s17108_s5  ;;  %v3636_v16 = vld [vmem:[#allocation3 + $0x64] sm:$0xff]  ;;  %v2832_v25 = vpop.permute.xlu1 %2831  ;;  %v3086_v27 = vpop.permute.xlu0 %3085  ;;  %v12366_v30 = vpack.c.bf16 %v2774_v26, %v2774_v26  ;;  %v12414_v32 = vpack.c.bf16 %v3158_v17, %v3158_v17 }
 0x21d   : > { %v3157_v21 = vld [vmem:[#allocation3 + $0x60] sm:$0xff]  ;;  %v12475_v23 = vpack.c.bf16 %v3635_v18, %v3635_v18  ;;  %v12476_v12 = vpack.c.bf16 %v3636_v16, %v3636_v16  ;;  %2877 = vst.msk [vmem:[#allocation4 + $0x18] sm:$0xf] %vm1064_vm2, %v2832_v25 }
 0x21e   : > { %v12413_v24 = vpack.c.bf16 %v3157_v21, %v3157_v21  ;;  %3132 = vst.msk [vmem:[#allocation4 + $0xc] sm:$0xf] %vm1322_vm4, %v3086_v27  ;;  %v3029_v3 = vld [vmem:[#allocation3 + $0x5f] sm:$0xff]  ;;  %v3030_v21 = vld [vmem:[#allocation3 + $0x67] sm:$0xff] }
 0x21f   : > { %3715 = vst.msk [vmem:[#allocation4 + $0x68] sm:$0xf] %vm935_vm1, %v12475_v23  ;;  %2758 = vst.msk [vmem:[#allocation4 + $0x84] sm:$0xf] %vm935_vm1, %v12475_v23  ;;  %v2902_v13 = vld [vmem:[#allocation3 + $0x5e] sm:$0xff]  ;;  %3579 = vrot.lane.b32.xlu1 %v12459_v28, %s17106_s1  ;;  %v12397_v45 = vpack.c.bf16 %v3029_v3, %v3029_v3  ;;  %v2903_v18 = vld [vmem:[#allocation3 + $0x66] sm:$0xff] }
 0x220   : > { %3237 = vst.msk [vmem:[#allocation4 + $0x7c] sm:$0xf] %vm935_vm1, %v12413_v24  ;;  %2849 = vrot.lane.b32.xlu0 %v12366_v30, %s17108_s5  ;;  %3716 = vst.msk [vmem:[#allocation4 + $0x74] sm:$0xf] %vm935_vm1, %v12476_v12  ;;  %v2533_v33 = vld [vmem:[#allocation2 + $0x60] sm:$0xff]  ;;  %v2960_v44 = vpop.permute.xlu1 %2959  ;;  %v12382_v19 = vpack.c.bf16 %v2902_v13, %v2902_v13  ;;  %v12383_v30 = vpack.c.bf16 %v2903_v18, %v2903_v18 }
 0x221   : > { %2759 = vst.msk [vmem:[#allocation4 + $0x90] sm:$0xf] %vm935_vm1, %v12476_v12  ;;  %v2556_v43 = vmul.f32 %v14587_v60, %v2533_v33  ;;  %3238 = vst.msk [vmem:[#allocation4 + $0x88] sm:$0xf] %vm935_vm1, %v12414_v32  ;;  %v3253_v50 = vld [vmem:[#allocation3 + $0x61] sm:$0xff]  ;;  %v12398_v12 = vpack.c.bf16 %v3030_v21, %v3030_v21 }
 0x222   : > { %3005 = vst.msk [vmem:[#allocation4 + $0x18] sm:$0xf] %vm1193_vm3, %v2960_v44  ;;  %v3380_v37 = vld [vmem:[#allocation3 + $0x62] sm:$0xff]  ;;  %v14871_v60 = vld [vmem:[%s17139_s30] ss:$0 sm:$0xff]  ;;  %v12429_v20 = vpack.c.bf16 %v3253_v50, %v3253_v50 }
 0x223   : > { %v2579_v47 = vadd.f32 %v14592_v5, %v2556_v43  ;;  %3103 = vrot.lane.b32.xlu1 %v12397_v45, %s17106_s1  ;;  %v2534_v51 = vld [vmem:[#allocation2 + $0x68] sm:$0xff]  ;;  %v12444_v14 = vpack.c.bf16 %v3380_v37, %v3380_v37  ;;  %v14878_v58 = vld [vmem:[%s17140_s22] ss:$0 sm:$0xff] }
 0x224   : > { %2977 = vrot.lane.b32.xlu0 %v12382_v19, %s17111_s4  ;;  %v2557_v7 = vmul.f32 %v14871_v60, %v2534_v51  ;;  %v2775_v46 = vld [vmem:[#allocation3 + $0x65] sm:$0xff]  ;;  %v12992_v41 = vpop.f32.mrf.mxu0 }
 0x225   : > { %v2595_v54 = vmax.f32 %v2579_v47, 0.0  ;;  %v3508_v57 = vld [vmem:[#allocation3 + $0x63] sm:$0xff]  ;;  %v12367_v8 = vpack.c.bf16 %v2775_v46, %v2775_v46 }
 0x226   : > { %v2580_v61 = vadd.f32 %v14878_v58, %v2557_v7  ;;  %v12993_v0 = vpop.f32.mrf.mxu0  ;;  %v12460_v9 = vpack.c.bf16 %v3508_v57, %v3508_v57 }
 0x227   : > { %v13659_v56 = vld [vmem:[#allocation4 + $0x68] ss:$12 sps:$4 sm:$0xff]   ;;  %v2611_v5 = vmul.f32 %v2595_v54, %v14575_v52  ;;  %3327 = vrot.lane.b32.xlu1 %v12429_v20, %s17108_s5  ;;  %v12994_v4 = vadd.f32 %v12993_v0, %v12992_v41 }
 0x228   : > { %3453 = vrot.lane.b32.xlu0 %v12444_v14, %s17111_s4  ;;  %13426 = vmatprep.mubr.msk.bf16.mxu0 %vm766_vm0, %v13659_v56  ;;  %v2596_v15 = vmax.f32 %v2580_v61, 0.0  ;;  %v12995_v26 = vpop.f32.mrf.mxu0 }
 0x229   : > { %2627 = vst.msk [vmem:[#allocation3 + $0x70] sm:$0xff] %vm766_vm0, %v2611_v5  ;;  %v2387_v23 = vadd.f32 %v14817_v6, %v12994_v4 }
 0x22a   : > { %v2612_v62 = vmul.f32 %v2596_v15, %v14805_v49  ;;  %v12996_v24 = vpop.f32.mrf.mxu0 }
 0x22b   : > { %2851 = vrot.lane.b32.xlu1 %v12367_v8, %s17108_s5  ;;  %v2487_v16 = vmul.f32 %v14581_v59, %v2387_v23  ;;  %v12997_v25 = vadd.f32 %v12996_v24, %v12995_v26 }
 0x22c   : > { %3581 = vrot.lane.b32.xlu0 %v12460_v9, %s17106_s1  ;;  %2628 = vst.msk [vmem:[#allocation3 + $0x78] sm:$0xff] %vm766_vm0, %v2612_v62  ;;  %v3436_v27 = vpop.permute.xlu1 %3435 }
 0x22d   : > { %v3310_v28 = vpop.permute.xlu0 %3309  ;;  %3483 = vst.msk [vmem:[#allocation4 + $0x4] sm:$0xf] %vm1193_vm3, %v3436_v27  ;;  %v2503_v6 = vadd.f32 %v2487_v16, %v14268_v53  ;;  %v2390_v3 = vadd.f32 %v14833_v40, %v12997_v25 }
 0x22e   : > { %3356 = vst.msk [vmem:[#allocation4 + $0x10] sm:$0xf] %vm1064_vm2, %v3310_v28 }
 0x22f   : > { %2979 = vrot.lane.b32.xlu1 %v12383_v30, %s17111_s4  ;;  %2519 = vst.msk [vmem:[#allocation2 + $0x70] sm:$0xff] %vm766_vm0, %v2503_v6  ;;  %v2488_v32 = vmul.f32 %v14819_v2, %v2390_v3 }
 0x230   : > { %3105 = vrot.lane.b32.xlu0 %v12398_v12, %s17106_s1  ;;  %v3381_v13 = vld [vmem:[#allocation3 + $0x6a] sm:$0xff]  ;;  %v3564_v33 = vpop.permute.xlu1 %3563 }
 0x231   : > { %v3254_v17 = vld [vmem:[#allocation3 + $0x69] sm:$0xff]  ;;  %v2834_v43 = vpop.permute.xlu0 %2833  ;;  %v12445_v44 = vpack.c.bf16 %v3381_v13, %v3381_v13  ;;  %3611 = vst.msk [vmem:[#allocation4 + $0x4] sm:$0xf] %vm1322_vm4, %v3564_v33  ;;  %v2504_v37 = vadd.f32 %v2488_v32, %v14274_v55 }
 0x232   : > { %v12430_v45 = vpack.c.bf16 %v3254_v17, %v3254_v17  ;;  %v3509_v19 = vld [vmem:[#allocation3 + $0x6b] sm:$0xff]  ;;  %2878 = vst.msk [vmem:[#allocation4 + $0x24] sm:$0xf] %vm1064_vm2, %v2834_v43 }
 0x233   : > { %v2776_v53 = vld [vmem:[#allocation3 + $0x6d] sm:$0xff]  ;;  %3455 = vrot.lane.b32.xlu1 %v12445_v44, %s17111_s4  ;;  %2520 = vst.msk [vmem:[#allocation2 + $0x78] sm:$0xff] %vm766_vm0, %v2504_v37  ;;  %v12461_v14 = vpack.c.bf16 %v3509_v19, %v3509_v19  ;;  %v3160_v57 = vld [vmem:[#allocation3 + $0x78] sm:$0xff] }
 0x234   : > { %v3637_v40 = vld [vmem:[#allocation3 + $0x6c] sm:$0xff]  ;;  %3329 = vrot.lane.b32.xlu0 %v12430_v45, %s17108_s5  ;;  %v3638_v54 = vld [vmem:[#allocation3 + $0x74] sm:$0xff]  ;;  %v3088_v7 = vpop.permute.xlu1 %3087  ;;  %v12368_v46 = vpack.c.bf16 %v2776_v53, %v2776_v53  ;;  %v12416_v5 = vpack.c.bf16 %v3160_v57, %v3160_v57 }
 0x235   : > { %v3159_v50 = vld [vmem:[#allocation3 + $0x70] sm:$0xff]  ;;  %v12477_v47 = vpack.c.bf16 %v3637_v40, %v3637_v40  ;;  %v2962_v20 = vpop.permute.xlu0 %2961  ;;  %v12478_v41 = vpack.c.bf16 %v3638_v54, %v3638_v54  ;;  %3133 = vst.msk [vmem:[#allocation4 + $0x18] sm:$0xf] %vm1322_vm4, %v3088_v7 }
 0x236   : > { %v12415_v51 = vpack.c.bf16 %v3159_v50, %v3159_v50  ;;  %3006 = vst.msk [vmem:[#allocation4 + $0x24] sm:$0xf] %vm1193_vm3, %v2962_v20  ;;  %v3031_v55 = vld [vmem:[#allocation3 + $0x6f] sm:$0xff]  ;;  %v3032_v45 = vld [vmem:[#allocation3 + $0x77] sm:$0xff] }
 0x237   : > { %3717 = vst.msk [vmem:[#allocation4 + $0x80] sm:$0xf] %vm935_vm1, %v12477_v47  ;;  %2760 = vst.msk [vmem:[#allocation4 + $0x9c] sm:$0xf] %vm935_vm1, %v12477_v47  ;;  %v2904_v56 = vld [vmem:[#allocation3 + $0x6e] sm:$0xff]  ;;  %3583 = vrot.lane.b32.xlu1 %v12461_v14, %s17106_s1  ;;  %v12399_v8 = vpack.c.bf16 %v3031_v55, %v3031_v55  ;;  %v2905_v44 = vld [vmem:[#allocation3 + $0x76] sm:$0xff]  ;;  %v12400_v47 = vpack.c.bf16 %v3032_v45, %v3032_v45 }
 0x238   : > { %3239 = vst.msk [vmem:[#allocation4 + $0x94] sm:$0xf] %vm935_vm1, %v12415_v51  ;;  %2853 = vrot.lane.b32.xlu0 %v12368_v46, %s17108_s5  ;;  %3718 = vst.msk [vmem:[#allocation4 + $0x8c] sm:$0xf] %vm935_vm1, %v12478_v41  ;;  %v2535_v61 = vld [vmem:[#allocation2 + $0x70] sm:$0xff]  ;;  %v3312_v15 = vpop.permute.xlu1 %3311  ;;  %v12384_v9 = vpack.c.bf16 %v2904_v56, %v2904_v56  ;;  %v3723_v19 = vld [vmem:[#allocation4] sm:$0xff]  ;;  %v12385_v37 = vpack.c.bf16 %v2905_v44, %v2905_v44 }
 0x239   : > { %2761 = vst.msk [vmem:[#allocation4 + $0xa8] sm:$0xf] %vm935_vm1, %v12478_v41  ;;  %v2558_v0 = vmul.f32 %v14871_v60, %v2535_v61  ;;  %v3438_v4 = vpop.permute.xlu0 %3437  ;;  %3240 = vst.msk [vmem:[#allocation4 + $0xa0] sm:$0xf] %vm935_vm1, %v12416_v5  ;;  %v3255_v26 = vld [vmem:[#allocation3 + $0x71] sm:$0xff] }
 0x23a   : > { %3357 = vst.msk [vmem:[#allocation4 + $0x1c] sm:$0xf] %vm1064_vm2, %v3312_v15  ;;  %v3382_v18 = vld [vmem:[#allocation3 + $0x72] sm:$0xff]  ;;  %v12431_v27 = vpack.c.bf16 %v3255_v26, %v3255_v26 }
 0x23b   : > { %3484 = vst.msk [vmem:[#allocation4 + $0x10] sm:$0xf] %vm1193_vm3, %v3438_v4  ;;  %v2581_v21 = vadd.f32 %v14878_v58, %v2558_v0  ;;  %3107 = vrot.lane.b32.xlu1 %v12399_v8, %s17106_s1  ;;  %v2536_v62 = vld [vmem:[#allocation2 + $0x78] sm:$0xff]  ;;  %v12446_v28 = vpack.c.bf16 %v3382_v18, %v3382_v18 }
 0x23c   : > { %2981 = vrot.lane.b32.xlu0 %v12384_v9, %s17111_s4  ;;  %v2559_v24 = vmul.f32 %v14871_v60, %v2536_v62  ;;  %v2836_v16 = vpop.permute.xlu1 %2835  ;;  %v2777_v30 = vld [vmem:[#allocation3 + $0x75] sm:$0xff] }
 0x23d   : > { %v2597_v23 = vmax.f32 %v2581_v21, 0.0  ;;  %v3566_v25 = vpop.permute.xlu0 %3565  ;;  %2879 = vst.msk [vmem:[#allocation4 + $0x30] sm:$0xf] %vm1064_vm2, %v2836_v16  ;;  %v3510_v6 = vld [vmem:[#allocation3 + $0x73] sm:$0xff]  ;;  %v12369_v33 = vpack.c.bf16 %v2777_v30, %v2777_v30 }
 0x23e   : > { %3612 = vst.msk [vmem:[#allocation4 + $0x10] sm:$0xf] %vm1322_vm4, %v3566_v25  ;;  %v2582_v13 = vadd.f32 %v14878_v58, %v2559_v24  ;;  %v12462_v43 = vpack.c.bf16 %v3510_v6, %v3510_v6 }
 0x23f   : > { %v13672_v12 = vld [vmem:[#allocation4 + $0x80] ss:$12 sps:$4 sm:$0xff]   ;;  %v2613_v3 = vmul.f32 %v2597_v23, %v14581_v59  ;;  %3331 = vrot.lane.b32.xlu1 %v12431_v27, %s17108_s5 }
 0x240   : > { %3457 = vrot.lane.b32.xlu0 %v12446_v28, %s17111_s4  ;;  %13427 = vmatmul.mubr.msk.bf16.gmra.mxu0 %vm766_vm0, %v13672_v12  ;;  %v2598_v60 = vmax.f32 %v2582_v13, 0.0  ;;  %v2964_v17 = vpop.permute.xlu1 %2963 }
 0x241   : > { %2629 = vst.msk [vmem:[#allocation3 + $0x80] sm:$0xff] %vm766_vm0, %v2613_v3  ;;  %v3090_v32 = vpop.permute.xlu0 %3089  ;;  %v5306_v3 = vld [vmem:[#allocation3 + $0x94] sm:$0xff] }
 0x242   : > { %3007 = vst.msk [vmem:[#allocation4 + $0x30] sm:$0xf] %vm1193_vm3, %v2964_v17  ;;  %v2614_v58 = vmul.f32 %v2598_v60, %v14819_v2  ;;  %v12626_v17 = vpack.c.bf16 %v5306_v3, %v5306_v3 }
 0x243   : > { %3134 = vst.msk [vmem:[#allocation4 + $0x24] sm:$0xf] %vm1322_vm4, %v3090_v32  ;;  %2855 = vrot.lane.b32.xlu1 %v12369_v33, %s17108_s5 }
 0x244   : > { %3585 = vrot.lane.b32.xlu0 %v12462_v43, %s17106_s1  ;;  %2630 = vst.msk [vmem:[#allocation3 + $0x88] sm:$0xff] %vm766_vm0, %v2614_v58 }
 0x245   : > { %v3725_v53 = vld [vmem:[#allocation4 + $0xc] sm:$0xff]  ;;  %v3440_v40 = vpop.permute.xlu1 %3439 }
 0x246   : > { %v3314_v50 = vpop.permute.xlu0 %3313  ;;  %3485 = vst.msk [vmem:[#allocation4 + $0x1c] sm:$0xf] %vm1193_vm3, %v3440_v40  ;;  %v11370_v51 = vcombine.high %v3723_v19, %v3725_v53  ;;  %v11369_v54 = vcombine.low %v3723_v19, %v3725_v53 }
 0x247   : > { %3358 = vst.msk [vmem:[#allocation4 + $0x28] sm:$0xf] %vm1064_vm2, %v3314_v50  ;;  %2983 = vrot.lane.b32.xlu1 %v12385_v37, %s17111_s4 }
 0x248   : > { %3109 = vrot.lane.b32.xlu0 %v12400_v47, %s17106_s1  ;;  %4039 = vmatprep.mubr.bf16.mxu1 %v11370_v51  ;;  %v3383_v7 = vld [vmem:[#allocation3 + $0x7a] sm:$0xff] }
 0x249   : > { %v3256_v20 = vld [vmem:[#allocation3 + $0x79] sm:$0xff]  ;;  %v3568_v14 = vpop.permute.xlu1 %3567  ;;  %4040 = vmatmul.mubr.bf16.vlgmr.msra.gmra.mxu1 %v11369_v54  ;;  %v12447_v41 = vpack.c.bf16 %v3383_v7, %v3383_v7 }
 0x24a   : > { %v2838_v46 = vpop.permute.xlu0 %2837  ;;  %v12432_v55 = vpack.c.bf16 %v3256_v20, %v3256_v20  ;;  %v3511_v56 = vld [vmem:[#allocation3 + $0x7b] sm:$0xff]  ;;  %3613 = vst.msk [vmem:[#allocation4 + $0x1c] sm:$0xf] %vm1322_vm4, %v3568_v14 }
 0x24b   : > { %2880 = vst.msk [vmem:[#allocation4 + $0x3c] sm:$0xf] %vm1064_vm2, %v2838_v46  ;;  %v2778_v57 = vld [vmem:[#allocation3 + $0x7d] sm:$0xff]  ;;  %3459 = vrot.lane.b32.xlu1 %v12447_v41, %s17111_s4  ;;  %v12463_v26 = vpack.c.bf16 %v3511_v56, %v3511_v56  ;;  %v3641_v62 = vld [vmem:[#allocation3 + $0x8c] sm:$0xff] }
 0x24c   : > { %v3639_v5 = vld [vmem:[#allocation3 + $0x7c] sm:$0xff]  ;;  %3333 = vrot.lane.b32.xlu0 %v12432_v55, %s17108_s5  ;;  %v3640_v4 = vld [vmem:[#allocation3 + $0x84] sm:$0xff]  ;;  %v12370_v18 = vpack.c.bf16 %v2778_v57, %v2778_v57  ;;  %v12481_v16 = vpack.c.bf16 %v3641_v62, %v3641_v62 }
 0x24d   : > { %v3161_v61 = vld [vmem:[#allocation3 + $0x80] sm:$0xff]  ;;  %v12479_v0 = vpack.c.bf16 %v3639_v5, %v3639_v5  ;;  %v3092_v8 = vpop.permute.xlu1 %3091  ;;  %v12480_v21 = vpack.c.bf16 %v3640_v4, %v3640_v4  ;;  %v3162_v25 = vld [vmem:[#allocation3 + $0x88] sm:$0xff] }
 0x24e   : > { %v12417_v15 = vpack.c.bf16 %v3161_v61, %v3161_v61  ;;  %v2966_v9 = vpop.permute.xlu0 %2965  ;;  %3135 = vst.msk [vmem:[#allocation4 + $0x30] sm:$0xf] %vm1322_vm4, %v3092_v8  ;;  %v3033_v23 = vld [vmem:[#allocation3 + $0x7f] sm:$0xff]  ;;  %v12418_v27 = vpack.c.bf16 %v3162_v25, %v3162_v25  ;;  %v3385_v45 = vld [vmem:[#allocation3 + $0x8a] sm:$0xff]  ;;  %v3514_v61 = vld [vmem:[#allocation3 + $0x93] sm:$0xff] }
 0x24f   : > { %3719 = vst.msk [vmem:[#allocation4 + $0x98] sm:$0xf] %vm935_vm1, %v12479_v0  ;;  %2762 = vst.msk [vmem:[#allocation4 + $0xb4] sm:$0xf] %vm935_vm1, %v12479_v0  ;;  %v2906_v24 = vld [vmem:[#allocation3 + $0x7e] sm:$0xff]  ;;  %3587 = vrot.lane.b32.xlu1 %v12463_v26, %s17106_s1  ;;  %v12401_v12 = vpack.c.bf16 %v3033_v23, %v3033_v23  ;;  %v12449_v37 = vpack.c.bf16 %v3385_v45, %v3385_v45  ;;  %v3513_v51 = vld [vmem:[#allocation3 + $0x8b] sm:$0xff]  ;;  %v12466_v8 = vpack.c.bf16 %v3514_v61, %v3514_v61 }
 0x250   : > { %3241 = vst.msk [vmem:[#allocation4 + $0xac] sm:$0xf] %vm935_vm1, %v12417_v15  ;;  %2857 = vrot.lane.b32.xlu0 %v12370_v18, %s17108_s5  ;;  %3720 = vst.msk [vmem:[#allocation4 + $0xa4] sm:$0xf] %vm935_vm1, %v12480_v21  ;;  %v12386_v6 = vpack.c.bf16 %v2906_v24, %v2906_v24  ;;  %v3257_v13 = vld [vmem:[#allocation3 + $0x81] sm:$0xff]  ;;  %v3258_v54 = vld [vmem:[#allocation3 + $0x89] sm:$0xff]  ;;  %v12465_v41 = vpack.c.bf16 %v3513_v51, %v3513_v51 }
 0x251   : > { %3008 = vst.msk [vmem:[#allocation4 + $0x3c] sm:$0xf] %vm1193_vm3, %v2966_v9  ;;  %v3316_v28 = vpop.permute.xlu1 %3315  ;;  %v3384_v60 = vld [vmem:[#allocation3 + $0x82] sm:$0xff]  ;;  %v12433_v43 = vpack.c.bf16 %v3257_v13, %v3257_v13  ;;  %v3727_v7 = vld [vmem:[#allocation4 + $0x18] sm:$0xff]  ;;  %v12434_v55 = vpack.c.bf16 %v3258_v54, %v3258_v54 }
 0x252   : > { %3721 = vst.msk [vmem:[#allocation4 + $0xb0] sm:$0xf] %vm935_vm1, %v12481_v16  ;;  %v3442_v30 = vpop.permute.xlu0 %3441  ;;  %3242 = vst.msk [vmem:[#allocation4 + $0xb8] sm:$0xf] %vm935_vm1, %v12418_v27  ;;  %v12448_v44 = vpack.c.bf16 %v3384_v60, %v3384_v60  ;;  %v3512_v19 = vld [vmem:[#allocation3 + $0x83] sm:$0xff]  ;;  %v5050_v61 = vld [vmem:[#allocation3 + $0x92] sm:$0xff] }
 0x253   : > { %3359 = vst.msk [vmem:[#allocation4 + $0x34] sm:$0xf] %vm1064_vm2, %v3316_v28  ;;  %3111 = vrot.lane.b32.xlu1 %v12401_v12, %s17106_s1  ;;  %v12464_v47 = vpack.c.bf16 %v3512_v19, %v3512_v19  ;;  %v3034_v5 = vld [vmem:[#allocation3 + $0x87] sm:$0xff] }
 0x254   : > { %3486 = vst.msk [vmem:[#allocation4 + $0x28] sm:$0xf] %vm1193_vm3, %v3442_v30  ;;  %2985 = vrot.lane.b32.xlu0 %v12386_v6, %s17111_s4  ;;  %v12402_v4 = vpack.c.bf16 %v3034_v5, %v3034_v5  ;;  %v4555_v5 = vld [vmem:[#allocation3 + $0x6] sm:$0xff] }
 0x255   : > { %v2840_v32 = vpop.permute.xlu1 %2839 }
 0x256   : > { %v3570_v33 = vpop.permute.xlu0 %3569  ;;  %2881 = vst.msk [vmem:[#allocation4 + $0x48] sm:$0xf] %vm1064_vm2, %v2840_v32 }
 0x257   : > { %3614 = vst.msk [vmem:[#allocation4 + $0x28] sm:$0xf] %vm1322_vm4, %v3570_v33  ;;  %v13676_v58 = vld [vmem:[#allocation4 + $0x98] ss:$12 sps:$4 sm:$0xff]   ;;  %3335 = vrot.lane.b32.xlu1 %v12433_v43, %s17108_s5 }
 0x258   : > { %3461 = vrot.lane.b32.xlu0 %v12448_v44, %s17111_s4  ;;  %13430 = vmatprep.mubr.msk.bf16.mxu0 %vm766_vm0, %v13676_v58 }
 0x259   : > { %v13677_v53 = vld [vmem:[#allocation4 + $0xb0] ss:$12 sps:$4 sm:$0xff]   ;;  %v2968_v40 = vpop.permute.xlu1 %2967 }
 0x25a   : > { %5386 = vst.msk [vmem:[#allocation4 + $0xbc] sm:$0xf] %vm935_vm1, %v12626_v17  ;;  %v3094_v50 = vpop.permute.xlu0 %3093  ;;  %13431 = vmatmul.mubr.msk.bf16.gmra.mxu0 %vm766_vm0, %v13677_v53 }
 0x25b   : > { %3009 = vst.msk [vmem:[#allocation4 + $0x48] sm:$0xf] %vm1193_vm3, %v2968_v40  ;;  %3463 = vrot.lane.b32.xlu1 %v12449_v37, %s17111_s4 }
 0x25c   : > { %3136 = vst.msk [vmem:[#allocation4 + $0x3c] sm:$0xf] %vm1322_vm4, %v3094_v50  ;;  %3589 = vrot.lane.b32.xlu0 %v12464_v47, %s17106_s1 }
 0x25d   : > { %v3444_v14 = vpop.permute.xlu1 %3443 }
 0x25e   : > { %v3729_v20 = vld [vmem:[#allocation4 + $0x24] sm:$0xff]  ;;  %v3318_v46 = vpop.permute.xlu0 %3317  ;;  %3487 = vst.msk [vmem:[#allocation4 + $0x34] sm:$0xf] %vm1193_vm3, %v3444_v14 }
 0x25f   : > { %3360 = vst.msk [vmem:[#allocation4 + $0x40] sm:$0xf] %vm1064_vm2, %v3318_v46  ;;  %v11373_v56 = vcombine.high %v3727_v7, %v3729_v20  ;;  %v11372_v57 = vcombine.low %v3727_v7, %v3729_v20  ;;  %3591 = vrot.lane.b32.xlu1 %v12465_v41, %s17106_s1  ;;  %v4427_v41 = vld [vmem:[#allocation3 + $0x5] sm:$0xff] }
 0x260   : > { %3337 = vrot.lane.b32.xlu0 %v12434_v55, %s17108_s5  ;;  %v12499_v55 = vpack.c.bf16 %v4427_v41, %v4427_v41 }
 0x261   : > { %4047 = vmatprep.mubr.bf16.mxu1 %v11373_v56  ;;  %v3572_v0 = vpop.permute.xlu1 %3571 }
 0x262   : > { %v2842_v15 = vpop.permute.xlu0 %2841  ;;  %4048 = vmatmul.mubr.bf16.gmra.mxu1 %v11372_v57  ;;  %3615 = vst.msk [vmem:[#allocation4 + $0x34] sm:$0xf] %vm1322_vm4, %v3572_v0  ;;  %v12515_v0 = vpack.c.bf16 %v4555_v5, %v4555_v5 }
 0x263   : > { %2882 = vst.msk [vmem:[#allocation4 + $0x54] sm:$0xf] %vm1064_vm2, %v2842_v15  ;;  %4491 = vrot.lane.b32.xlu1 %v12499_v55, %s17108_s5  ;;  %v12594_v15 = vpack.c.bf16 %v5050_v61, %v5050_v61  ;;  %v13679_v55 = vld [vmem:[%s17141_s9 + $0x88] sm:$0xff]  }
 0x264   : > { %3113 = vrot.lane.b32.xlu0 %v12402_v4, %s17106_s1  ;;  %13434 = vmatprep.subr.bf16.mxu0 %v13679_v55 }
 0x265   : > { %v3096_v9 = vpop.permute.xlu1 %3095  ;;  %13435 = vmatpush3.bf16.msra.mxu0 %v13679_v55 }
 0x266   : > { %v2970_v26 = vpop.permute.xlu0 %2969  ;;  %3137 = vst.msk [vmem:[#allocation4 + $0x48] sm:$0xf] %vm1322_vm4, %v3096_v9 }
 0x267   : > { %3010 = vst.msk [vmem:[#allocation4 + $0x54] sm:$0xf] %vm1193_vm3, %v2970_v26  ;;  %4619 = vrot.lane.b32.xlu1 %v12515_v0, %s17111_s4 }
 0x268   : > { %3593 = vrot.lane.b32.xlu0 %v12466_v8, %s17106_s1 }
 0x269   : > { %v3320_v18 = vpop.permute.xlu1 %3319  ;;  %v3731_v25 = vld [vmem:[#allocation4 + $0x30] sm:$0xff] }
 0x26a   : > { %v3446_v21 = vpop.permute.xlu0 %3445  ;;  %3361 = vst.msk [vmem:[#allocation4 + $0x4c] sm:$0xf] %vm1064_vm2, %v3320_v18 }
 0x26b   : > { %3488 = vst.msk [vmem:[#allocation4 + $0x40] sm:$0xf] %vm1193_vm3, %v3446_v21 }
 0x26c   : > { %5129 = vrot.lane.b32.xlu0 %v12594_v15, %s17111_s4 }
 0x26d   : > { %v2844_v62 = vpop.permute.xlu1 %2843 }
 0x26e   : > { %v3574_v23 = vpop.permute.xlu0 %3573  ;;  %2883 = vst.msk [vmem:[#allocation4 + $0x60] sm:$0xf] %vm1064_vm2, %v2844_v62 }
 0x26f   : > { %3616 = vst.msk [vmem:[#allocation4 + $0x40] sm:$0xf] %vm1322_vm4, %v3574_v23 }
 0x271   : > { %v2972_v24 = vpop.permute.xlu1 %2971 }
 0x272   : > { %v3098_v16 = vpop.permute.xlu0 %3097  ;;  %3011 = vst.msk [vmem:[#allocation4 + $0x60] sm:$0xf] %vm1193_vm3, %v2972_v24 }
 0x273   : > { %3138 = vst.msk [vmem:[#allocation4 + $0x54] sm:$0xf] %vm1322_vm4, %v3098_v16 }
 0x275   : > { %v3448_v28 = vpop.permute.xlu1 %3447 }
 0x276   : > { %v3733_v27 = vld [vmem:[#allocation4 + $0x3c] sm:$0xff]  ;;  %v3322_v30 = vpop.permute.xlu0 %3321  ;;  %3489 = vst.msk [vmem:[#allocation4 + $0x4c] sm:$0xf] %vm1193_vm3, %v3448_v28 }
 0x277   : > { %3362 = vst.msk [vmem:[#allocation4 + $0x58] sm:$0xf] %vm1064_vm2, %v3322_v30  ;;  %v11376_v12 = vcombine.high %v3731_v25, %v3733_v27  ;;  %v11375_v6 = vcombine.low %v3731_v25, %v3733_v27 }
 0x279   : > { %4055 = vmatprep.mubr.bf16.mxu1 %v11376_v12  ;;  %v3576_v3 = vpop.permute.xlu1 %3575 }
 0x27a   : > { %v2846_v13 = vpop.permute.xlu0 %2845  ;;  %4056 = vmatmul.mubr.bf16.gmra.mxu1 %v11375_v6  ;;  %3617 = vst.msk [vmem:[#allocation4 + $0x4c] sm:$0xf] %vm1322_vm4, %v3576_v3 }
 0x27b   : > { %2884 = vst.msk [vmem:[#allocation4 + $0x6c] sm:$0xf] %vm1064_vm2, %v2846_v13 }
 0x27d   : > { %v3100_v60 = vpop.permute.xlu1 %3099 }
 0x27e   : > { %v2974_v17 = vpop.permute.xlu0 %2973  ;;  %3139 = vst.msk [vmem:[#allocation4 + $0x60] sm:$0xf] %vm1322_vm4, %v3100_v60 }
 0x27f   : > { %3012 = vst.msk [vmem:[#allocation4 + $0x6c] sm:$0xf] %vm1193_vm3, %v2974_v17 }
 0x281   : > { %v3324_v32 = vpop.permute.xlu1 %3323  ;;  %v3735_v19 = vld [vmem:[#allocation4 + $0x48] sm:$0xff] }
 0x282   : > { %v3450_v33 = vpop.permute.xlu0 %3449  ;;  %3363 = vst.msk [vmem:[#allocation4 + $0x64] sm:$0xf] %vm1064_vm2, %v3324_v32 }
 0x283   : > { %3490 = vst.msk [vmem:[#allocation4 + $0x58] sm:$0xf] %vm1193_vm3, %v3450_v33 }
 0x285   : > { %v2848_v43 = vpop.permute.xlu1 %2847 }
 0x286   : > { %v3578_v44 = vpop.permute.xlu0 %3577  ;;  %2885 = vst.msk [vmem:[#allocation4 + $0x78] sm:$0xf] %vm1064_vm2, %v2848_v43 }
 0x287   : > { %3618 = vst.msk [vmem:[#allocation4 + $0x58] sm:$0xf] %vm1322_vm4, %v3578_v44 }
 0x289   : > { %v2976_v45 = vpop.permute.xlu1 %2975 }
 0x28a   : > { %v3102_v58 = vpop.permute.xlu0 %3101  ;;  %3013 = vst.msk [vmem:[#allocation4 + $0x78] sm:$0xf] %vm1193_vm3, %v2976_v45 }
 0x28b   : > { %3140 = vst.msk [vmem:[#allocation4 + $0x6c] sm:$0xf] %vm1322_vm4, %v3102_v58 }
 0x28d   : > { %v3452_v40 = vpop.permute.xlu1 %3451 }
 0x28e   : > { %v3737_v53 = vld [vmem:[#allocation4 + $0x54] sm:$0xff]  ;;  %v3326_v50 = vpop.permute.xlu0 %3325  ;;  %3491 = vst.msk [vmem:[#allocation4 + $0x64] sm:$0xf] %vm1193_vm3, %v3452_v40 }
 0x28f   : > { %3364 = vst.msk [vmem:[#allocation4 + $0x70] sm:$0xf] %vm1064_vm2, %v3326_v50  ;;  %v11379_v37 = vcombine.high %v3735_v19, %v3737_v53  ;;  %v11378_v47 = vcombine.low %v3735_v19, %v3737_v53 }
 0x291   : > { %4063 = vmatprep.mubr.bf16.mxu1 %v11379_v37  ;;  %v3580_v51 = vpop.permute.xlu1 %3579 }
 0x292   : > { %v2850_v54 = vpop.permute.xlu0 %2849  ;;  %4064 = vmatmul.mubr.bf16.gmra.mxu1 %v11378_v47  ;;  %3619 = vst.msk [vmem:[#allocation4 + $0x64] sm:$0xf] %vm1322_vm4, %v3580_v51 }
 0x293   : > { %2886 = vst.msk [vmem:[#allocation4 + $0x84] sm:$0xf] %vm1064_vm2, %v2850_v54 }
 0x295   : > { %v3104_v7 = vpop.permute.xlu1 %3103 }
 0x296   : > { %v2978_v20 = vpop.permute.xlu0 %2977  ;;  %3141 = vst.msk [vmem:[#allocation4 + $0x78] sm:$0xf] %vm1322_vm4, %v3104_v7 }
 0x297   : > { %3014 = vst.msk [vmem:[#allocation4 + $0x84] sm:$0xf] %vm1193_vm3, %v2978_v20 }
 0x299   : > { %v3328_v14 = vpop.permute.xlu1 %3327  ;;  %v3739_v9 = vld [vmem:[#allocation4 + $0x60] sm:$0xff] }
 0x29a   : > { %v3454_v46 = vpop.permute.xlu0 %3453  ;;  %3365 = vst.msk [vmem:[#allocation4 + $0x7c] sm:$0xf] %vm1064_vm2, %v3328_v14 }
 0x29b   : > { %3492 = vst.msk [vmem:[#allocation4 + $0x70] sm:$0xf] %vm1193_vm3, %v3454_v46 }
 0x29d   : > { %v2852_v56 = vpop.permute.xlu1 %2851 }
 0x29e   : > { %v3582_v57 = vpop.permute.xlu0 %3581  ;;  %2887 = vst.msk [vmem:[#allocation4 + $0x90] sm:$0xf] %vm1064_vm2, %v2852_v56 }
 0x29f   : > { %3620 = vst.msk [vmem:[#allocation4 + $0x70] sm:$0xf] %vm1322_vm4, %v3582_v57 }
 0x2a0   : > { %v13420_v15 = vpop.f32.mrf.mxu0 }
 0x2a1   : > { %v2980_v4 = vpop.permute.xlu1 %2979 }
 0x2a2   : > { %v3106_v8 = vpop.permute.xlu0 %3105  ;;  %3015 = vst.msk [vmem:[#allocation4 + $0x90] sm:$0xf] %vm1193_vm3, %v2980_v4  ;;  %v4138_v4 = vpop.f32.mrf.mxu0 }
 0x2a3   : > { %3142 = vst.msk [vmem:[#allocation4 + $0x84] sm:$0xf] %vm1322_vm4, %v3106_v8 }
 0x2a5   : > { %v3456_v18 = vpop.permute.xlu1 %3455 }
 0x2a6   : > { %v3741_v26 = vld [vmem:[#allocation4 + $0x6c] sm:$0xff]  ;;  %v3330_v21 = vpop.permute.xlu0 %3329  ;;  %3493 = vst.msk [vmem:[#allocation4 + $0x7c] sm:$0xf] %vm1193_vm3, %v3456_v18  ;;  %v15046_v18 = vpop.f32.mrf.mxu0 }
 0x2a7   : > { %3366 = vst.msk [vmem:[#allocation4 + $0x88] sm:$0xf] %vm1064_vm2, %v3330_v21  ;;  %v11382_v62 = vcombine.high %v3739_v9, %v3741_v26  ;;  %v11381_v23 = vcombine.low %v3739_v9, %v3741_v26  ;;  %v15051_v21 = vld [vmem:[%s17142_s29] ss:$0 sm:$0xff] }
 0x2a9   : > { %4071 = vmatprep.mubr.bf16.mxu1 %v11382_v62  ;;  %v3584_v24 = vpop.permute.xlu1 %3583 }
 0x2aa   : > { %v2854_v16 = vpop.permute.xlu0 %2853  ;;  %4072 = vmatmul.mubr.bf16.gmra.mxu1 %v11381_v23  ;;  %3621 = vst.msk [vmem:[#allocation4 + $0x7c] sm:$0xf] %vm1322_vm4, %v3584_v24  ;;  %v15056_v24 = vld [vmem:[%s17143_s3] ss:$0 sm:$0xff] }
 0x2ab   : > { %2888 = vst.msk [vmem:[#allocation4 + $0x9c] sm:$0xf] %vm1064_vm2, %v2854_v16 }
 0x2ad   : > { %v3108_v25 = vpop.permute.xlu1 %3107 }
 0x2ae   : > { %v2982_v27 = vpop.permute.xlu0 %2981  ;;  %3143 = vst.msk [vmem:[#allocation4 + $0x90] sm:$0xf] %vm1322_vm4, %v3108_v25 }
 0x2af   : > { %3016 = vst.msk [vmem:[#allocation4 + $0x9c] sm:$0xf] %vm1193_vm3, %v2982_v27 }
 0x2b1   : > { %v3332_v28 = vpop.permute.xlu1 %3331  ;;  %v3743_v60 = vld [vmem:[#allocation4 + $0x78] sm:$0xff] }
 0x2b2   : > { %v3458_v30 = vpop.permute.xlu0 %3457  ;;  %3367 = vst.msk [vmem:[#allocation4 + $0x94] sm:$0xf] %vm1064_vm2, %v3332_v28 }
 0x2b3   : > { %3494 = vst.msk [vmem:[#allocation4 + $0x88] sm:$0xf] %vm1193_vm3, %v3458_v30  ;;  %v4141_v30 = vpop.f32.mrf.mxu0 }
 0x2b5   : > { %v2856_v12 = vpop.permute.xlu1 %2855 }
 0x2b6   : > { %v3586_v6 = vpop.permute.xlu0 %3585  ;;  %2889 = vst.msk [vmem:[#allocation4 + $0xa8] sm:$0xf] %vm1064_vm2, %v2856_v12 }
 0x2b7   : > { %3622 = vst.msk [vmem:[#allocation4 + $0x88] sm:$0xf] %vm1322_vm4, %v3586_v6 }
 0x2b9   : > { %v2984_v3 = vpop.permute.xlu1 %2983 }
 0x2ba   : > { %v3110_v13 = vpop.permute.xlu0 %3109  ;;  %3017 = vst.msk [vmem:[#allocation4 + $0xa8] sm:$0xf] %vm1193_vm3, %v2984_v3  ;;  %v4331_v3 = vld [vmem:[#allocation3 + $0x4] sm:$0xff] }
 0x2bb   : > { %3144 = vst.msk [vmem:[#allocation4 + $0x9c] sm:$0xf] %vm1322_vm4, %v3110_v13  ;;  %v12483_v13 = vpack.c.bf16 %v4331_v3, %v4331_v3 }
 0x2bd   : > { %v3460_v32 = vpop.permute.xlu1 %3459  ;;  %4411 = vst.msk [vmem:[#allocation4] sm:$0xf] %vm935_vm1, %v12483_v13 }
 0x2be   : > { %v3745_v17 = vld [vmem:[#allocation4 + $0x84] sm:$0xff]  ;;  %v3334_v33 = vpop.permute.xlu0 %3333  ;;  %3495 = vst.msk [vmem:[#allocation4 + $0x94] sm:$0xf] %vm1193_vm3, %v3460_v32  ;;  %v13684_v32 = vld [vmem:[%s17141_s9 + $0x78] sm:$0xff]  }
 0x2bf   : > { %3368 = vst.msk [vmem:[#allocation4 + $0xa0] sm:$0xf] %vm1064_vm2, %v3334_v33  ;;  %v11385_v43 = vcombine.high %v3743_v60, %v3745_v17  ;;  %v11384_v44 = vcombine.low %v3743_v60, %v3745_v17  ;;  %v13685_v33 = vld [vmem:[%s17141_s9 + $0x38] sm:$0xff]   ;;  %13082 = vmatprep.subr.bf16.mxu1 %v13684_v32  ;;  %v13689_v32 = vld [vmem:[%s17141_s9 + $0x28] sm:$0xff]  }
 0x2c0   : > { %13083 = vmatpush3.bf16.msra.mxu1 %v13685_v33 }
 0x2c1   : > { %4079 = vmatprep.mubr.bf16.mxu1 %v11385_v43  ;;  %v3588_v45 = vpop.permute.xlu1 %3587 }
 0x2c2   : > { %v2858_v58 = vpop.permute.xlu0 %2857  ;;  %4080 = vmatmul.mubr.bf16.gmra.mxu1 %v11384_v44  ;;  %3623 = vst.msk [vmem:[#allocation4 + $0x94] sm:$0xf] %vm1322_vm4, %v3588_v45 }
 0x2c3   : > { %2890 = vst.msk [vmem:[#allocation4 + $0xb4] sm:$0xf] %vm1064_vm2, %v2858_v58 }
 0x2c5   : > { %v3112_v19 = vpop.permute.xlu1 %3111 }
 0x2c6   : > { %v2986_v53 = vpop.permute.xlu0 %2985  ;;  %3145 = vst.msk [vmem:[#allocation4 + $0xa8] sm:$0xf] %vm1322_vm4, %v3112_v19 }
 0x2c7   : > { %3018 = vst.msk [vmem:[#allocation4 + $0xb4] sm:$0xf] %vm1193_vm3, %v2986_v53 }
 0x2c9   : > { %v3336_v40 = vpop.permute.xlu1 %3335  ;;  %v3747_v7 = vld [vmem:[#allocation4 + $0x90] sm:$0xff] }
 0x2ca   : > { %v3462_v50 = vpop.permute.xlu0 %3461  ;;  %3369 = vst.msk [vmem:[#allocation4 + $0xac] sm:$0xf] %vm1064_vm2, %v3336_v40 }
 0x2cb   : > { %3496 = vst.msk [vmem:[#allocation4 + $0xa0] sm:$0xf] %vm1193_vm3, %v3462_v50 }
 0x2cd   : > { %v3464_v37 = vpop.permute.xlu1 %3463 }
 0x2ce   : > { %v3590_v47 = vpop.permute.xlu0 %3589  ;;  %3497 = vst.msk [vmem:[#allocation4 + $0xac] sm:$0xf] %vm1193_vm3, %v3464_v37 }
 0x2cf   : > { %3624 = vst.msk [vmem:[#allocation4 + $0xa0] sm:$0xf] %vm1322_vm4, %v3590_v47 }
 0x2d1   : > { %v3592_v51 = vpop.permute.xlu1 %3591 }
 0x2d2   : > { %v3338_v54 = vpop.permute.xlu0 %3337  ;;  %3625 = vst.msk [vmem:[#allocation4 + $0xac] sm:$0xf] %vm1322_vm4, %v3592_v51 }
 0x2d3   : > { %3370 = vst.msk [vmem:[#allocation4 + $0xb8] sm:$0xf] %vm1064_vm2, %v3338_v54 }
 0x2d4   : > { %3498 = vst.msk [vmem:[#allocation4 + $0xb8] sm:$0xf] %vm1193_vm3, %v14829_v31  ;;  %v13680_v31 = vld [vmem:[%s17141_s9 + $0x80] sm:$0xff]  }
 0x2d5   : > { %13436 = vmatprep.subr.bf16.mxu0 %v13680_v31  ;;  %v4492_v28 = vpop.permute.xlu1 %4491 }
 0x2d6   : > { %v3749_v20 = vld [vmem:[#allocation4 + $0x9c] sm:$0xff]  ;;  %v3114_v14 = vpop.permute.xlu0 %3113  ;;  %13437 = vmatpush3.bf16.msra.mxu0 %v13680_v31  ;;  %4539 = vst.msk [vmem:[#allocation4] sm:$0xf] %vm1064_vm2, %v4492_v28  ;;  %v13686_v28 = vld [vmem:[%s17141_s9 + $0x70] sm:$0xff]  }
 0x2d7   : > { %3146 = vst.msk [vmem:[#allocation4 + $0xb4] sm:$0xf] %vm1322_vm4, %v3114_v14  ;;  %v11388_v46 = vcombine.high %v3747_v7, %v3749_v20  ;;  %v11387_v41 = vcombine.low %v3747_v7, %v3749_v20  ;;  %13084 = vmatprep.subr.bf16.mxu1 %v13686_v28 }
 0x2d9   : > { %4087 = vmatprep.mubr.bf16.mxu1 %v11388_v46  ;;  %v3751_v57 = vld [vmem:[#allocation4 + $0xa8] sm:$0xff]  ;;  %v4620_v45 = vpop.permute.xlu1 %4619 }
 0x2da   : > { %v3594_v56 = vpop.permute.xlu0 %3593  ;;  %4088 = vmatmul.mubr.bf16.gmra.mxu1 %v11387_v41  ;;  %4667 = vst.msk [vmem:[#allocation4] sm:$0xf] %vm1193_vm3, %v4620_v45  ;;  %v15107_v45 = vpop.f32.mrf.mxu0 }
 0x2db   : > { %3626 = vst.msk [vmem:[#allocation4 + $0xb8] sm:$0xf] %vm1322_vm4, %v3594_v56 }
 0x2e2   : > { %v3753_v5 = vld [vmem:[#allocation4 + $0xb4] sm:$0xff] }
 0x2e3   : > { %v11391_v61 = vcombine.high %v3751_v57, %v3753_v5  ;;  %v11390_v0 = vcombine.low %v3751_v57, %v3753_v5 }
 0x2e5   : > { %4095 = vmatprep.mubr.bf16.mxu1 %v11391_v61 }
 0x2e6   : > { %4096 = vmatmul.mubr.bf16.gmra.mxu1 %v11390_v0 }
 0x309   : > { %v13024_v8 = vpop.f32.mrf.mxu1 }
 0x30b   : > { %v13025_v9 = vpop.f32.mrf.mxu1 }
 0x30c   : > { %v13026_v26 = vadd.f32 %v13025_v9, %v13024_v8 }
 0x30d   : > { %v13027_v62 = vpop.f32.mrf.mxu1 }
 0x30e   : > { %v4139_v23 = vadd.f32 %v13026_v26, %v4138_v4 }
 0x30f   : > { %v13028_v16 = vpop.f32.mrf.mxu1 }
 0x310   : > { %v4208_v25 = vmul.f32 %v15051_v21, %v4139_v23  ;;  %v13029_v27 = vadd.f32 %v13028_v16, %v13027_v62 }
 0x312   : > { %v4231_v12 = vadd.f32 %v15056_v24, %v4208_v25  ;;  %v4142_v6 = vadd.f32 %v13029_v27, %v4141_v30 }
 0x314   : > { %v4247_v60 = vmax.f32 %v4231_v12, 0.0  ;;  %v4209_v17 = vmul.f32 %v15051_v21, %v4142_v6 }
 0x316   : > { %v4263_v43 = vmul.f32 %v4247_v60, %v14572_v48  ;;  %v4232_v44 = vadd.f32 %v15056_v24, %v4209_v17  ;;  %v13688_v17 = vld [vmem:[%s17141_s9 + $0x68] sm:$0xff]  }
 0x318   : > { %4279 = vst.msk [vmem:[#allocation3 + $0x10] sm:$0xff] %vm766_vm0, %v4263_v43  ;;  %v4248_v58 = vmax.f32 %v4232_v44, 0.0 }
 0x31a   : > { %v4264_v19 = vmul.f32 %v4248_v58, %v14560_v34  ;;  %v13691_v58 = vld [vmem:[%s17141_s9 + $0x60] sm:$0xff]  }
 0x31c   : > { %4280 = vst.msk [vmem:[#allocation3 + $0x18] sm:$0xff] %vm766_vm0, %v4264_v19  ;;  %v13692_v19 = vld [vmem:[%s17141_s9 + $0x20] sm:$0xff]  }
 0x31f   : > { %v4683_v53 = vld [vmem:[#allocation3 + $0xf] sm:$0xff] }
 0x320   : > { %v4428_v40 = vld [vmem:[#allocation3 + $0xd] sm:$0xff]  ;;  %v12531_v50 = vpack.c.bf16 %v4683_v53, %v4683_v53 }
 0x321   : > { %v12500_v37 = vpack.c.bf16 %v4428_v40, %v4428_v40  ;;  %v4332_v47 = vld [vmem:[#allocation3 + $0xc] sm:$0xff] }
 0x322   : > { %v4811_v51 = vld [vmem:[#allocation3 + $0x10] sm:$0xff]  ;;  %v13030_v54 = vpop.f32.mrf.mxu1  ;;  %v12484_v20 = vpack.c.bf16 %v4332_v47, %v4332_v47  ;;  %4747 = vrot.lane.b32.xlu1 %v12531_v50, %s17106_s1 }
 0x323   : > { %v4556_v7 = vld [vmem:[#allocation3 + $0xe] sm:$0xff]  ;;  %v12547_v14 = vpack.c.bf16 %v4811_v51, %v4811_v51  ;;  %4493 = vrot.lane.b32.xlu0 %v12500_v37, %s17108_s5  ;;  %v4812_v5 = vld [vmem:[#allocation3 + $0x18] sm:$0xff] }
 0x324   : > { %v13031_v46 = vpop.f32.mrf.mxu1  ;;  %v4907_v41 = vld [vmem:[#allocation3 + $0x11] sm:$0xff]  ;;  %4412 = vst.msk [vmem:[#allocation4 + $0xc] sm:$0xf] %vm935_vm1, %v12484_v20  ;;  %v12516_v31 = vpack.c.bf16 %v4556_v7, %v4556_v7  ;;  %v12548_v9 = vpack.c.bf16 %v4812_v5, %v4812_v5 }
 0x325   : > { %4891 = vst.msk [vmem:[#allocation4 + $0x4] sm:$0xf] %vm935_vm1, %v12547_v14  ;;  %v13032_v55 = vadd.f32 %v13031_v46, %v13030_v54  ;;  %v12563_v56 = vpack.c.bf16 %v4907_v41, %v4907_v41  ;;  %v4333_v57 = vld [vmem:[#allocation3 + $0x14] sm:$0xff]  ;;  %v4154_v54 = vpop.f32.mrf.mxu0 }
 0x326   : > { %v13033_v61 = vpop.f32.mrf.mxu1  ;;  %v4429_v0 = vld [vmem:[#allocation3 + $0x15] sm:$0xff]  ;;  %v12485_v8 = vpack.c.bf16 %v4333_v57, %v4333_v57  ;;  %4892 = vst.msk [vmem:[#allocation4 + $0x10] sm:$0xf] %vm935_vm1, %v12548_v9 }
 0x327   : > { %v4684_v4 = vld [vmem:[#allocation3 + $0x17] sm:$0xff]  ;;  %v4147_v26 = vadd.f32 %v13420_v15, %v13032_v55  ;;  %4971 = vrot.lane.b32.xlu1 %v12563_v56, %s17108_s5  ;;  %4621 = vrot.lane.b32.xlu0 %v12516_v31, %s17111_s4  ;;  %v12501_v25 = vpack.c.bf16 %v4429_v0, %v4429_v0  ;;  %v15128_v9 = vpop.f32.mrf.mxu0 }
 0x328   : > { %v13034_v62 = vpop.f32.mrf.mxu1  ;;  %4413 = vst.msk [vmem:[#allocation4 + $0x18] sm:$0xf] %vm935_vm1, %v12485_v8  ;;  %v12532_v27 = vpack.c.bf16 %v4684_v4, %v4684_v4  ;;  %v13687_v15 = vld [vmem:[%s17141_s9 + $0x30] sm:$0xff]   ;;  %v13693_v14 = vld [vmem:[%s17141_s9 + $0x58] sm:$0xff]  }
 0x329   : > { %v4210_v23 = vmul.f32 %v15051_v21, %v4147_v26  ;;  %v13035_v16 = vadd.f32 %v13034_v62, %v13033_v61  ;;  %v4557_v30 = vld [vmem:[#allocation3 + $0x16] sm:$0xff]  ;;  %13085 = vmatpush3.bf16.msra.mxu1 %v13687_v15 }
 0x32a   : > { %v12517_v60 = vpack.c.bf16 %v4557_v30, %v4557_v30  ;;  %13086 = vmatprep.subr.bf16.mxu1 %v13688_v17  ;;  %v13694_v46 = vld [vmem:[%s17141_s9 + $0x18] sm:$0xff]   ;;  %v13695_v56 = vld [vmem:[%s17141_s9 + $0x50] sm:$0xff]  }
 0x32b   : > { %v4233_v12 = vadd.f32 %v15056_v24, %v4210_v23  ;;  %v4150_v6 = vadd.f32 %v15046_v18, %v13035_v16  ;;  %4495 = vrot.lane.b32.xlu1 %v12501_v25, %s17108_s5  ;;  %4749 = vrot.lane.b32.xlu0 %v12532_v27, %s17106_s1  ;;  %v13696_v27 = vld [vmem:[%s17141_s9 + $0x10] sm:$0xff]   ;;  %s17147_s5 = sld [smem:[#allocation13_spill]] }
 0x32d   : > { %v4249_v3 = vmax.f32 %v4233_v12, 0.0  ;;  %v4211_v13 = vmul.f32 %v15051_v21, %v4150_v6  ;;  %13087 = vmatpush3.bf16.msra.mxu1 %v13689_v32  ;;  %v13697_v32 = vld [vmem:[%s17141_s9 + $0x48] sm:$0xff]  }
 0x32e   : > { %13088 = vmatprep.subr.bf16.mxu1 %v13691_v58 }
 0x32f   : > { %v4265_v18 = vmul.f32 %v4249_v3, %v14562_v22  ;;  %v4234_v33 = vadd.f32 %v15056_v24, %v4211_v13  ;;  %4623 = vrot.lane.b32.xlu1 %v12517_v60, %s17111_s4  ;;  %v4157_v13 = vpop.f32.mrf.mxu0 }
 0x331   : > { %4281 = vst.msk [vmem:[#allocation3 + $0x20] sm:$0xff] %vm766_vm0, %v4265_v18  ;;  %v4250_v43 = vmax.f32 %v4234_v33, 0.0  ;;  %13089 = vmatpush3.bf16.msra.mxu1 %v13692_v19 }
 0x332   : > { %13090 = vmatprep.subr.bf16.mxu1 %v13693_v14 }
 0x333   : > { %v4266_v44 = vmul.f32 %v4250_v43, %v14606_v39  ;;  %v13699_v43 = vld [vmem:[%s17141_s9 + $0x8] sm:$0xff]  }
 0x335   : > { %4282 = vst.msk [vmem:[#allocation3 + $0x28] sm:$0xff] %vm766_vm0, %v4266_v44  ;;  %13091 = vmatpush3.bf16.msra.mxu1 %v13694_v46 }
 0x336   : > { %13092 = vmatprep.subr.bf16.mxu1 %v13695_v56 }
 0x338   : > { %v5035_v53 = vld [vmem:[#allocation3 + $0x1a] sm:$0xff] }
 0x339   : > { %v4908_v40 = vld [vmem:[#allocation3 + $0x19] sm:$0xff]  ;;  %v12579_v50 = vpack.c.bf16 %v5035_v53, %v5035_v53  ;;  %13093 = vmatpush3.bf16.msra.mxu1 %v13696_v27 }
 0x33a   : > { %v12564_v37 = vpack.c.bf16 %v4908_v40, %v4908_v40  ;;  %v5163_v47 = vld [vmem:[#allocation3 + $0x1b] sm:$0xff]  ;;  %v13036_v7 = vpop.f32.mrf.mxu1  ;;  %13094 = vmatprep.subr.bf16.mxu1 %v13697_v32 }
 0x33b   : > { %v4430_v51 = vld [vmem:[#allocation3 + $0x1d] sm:$0xff]  ;;  %5099 = vrot.lane.b32.xlu1 %v12579_v50, %s17111_s4  ;;  %v12595_v0 = vpack.c.bf16 %v5163_v47, %v5163_v47 }
 0x33c   : > { %v5291_v20 = vld [vmem:[#allocation3 + $0x1c] sm:$0xff]  ;;  %4973 = vrot.lane.b32.xlu0 %v12564_v37, %s17144_s0  ;;  %v13037_v31 = vpop.f32.mrf.mxu1  ;;  %v5292_v57 = vld [vmem:[#allocation3 + $0x24] sm:$0xff]  ;;  %v12502_v4 = vpack.c.bf16 %v4430_v51, %v4430_v51 }
 0x33d   : > { %v12611_v41 = vpack.c.bf16 %v5291_v20, %v5291_v20  ;;  %v4813_v55 = vld [vmem:[#allocation3 + $0x20] sm:$0xff]  ;;  %v13038_v61 = vadd.f32 %v13037_v31, %v13036_v7  ;;  %v12612_v8 = vpack.c.bf16 %v5292_v57, %v5292_v57  ;;  %v4814_v16 = vld [vmem:[#allocation3 + $0x28] sm:$0xff]  ;;  %13095 = vmatpush3.bf16.msra.mxu1 %v13699_v43 }
 0x33e   : > { %v12549_v5 = vpack.c.bf16 %v4813_v55, %v4813_v55  ;;  %v13039_v26 = vpop.f32.mrf.mxu1  ;;  %v4685_v62 = vld [vmem:[#allocation3 + $0x1f] sm:$0xff]  ;;  %v12550_v28 = vpack.c.bf16 %v4814_v16, %v4814_v16  ;;  %v4686_v55 = vld [vmem:[#allocation3 + $0x27] sm:$0xff] }
 0x33f   : > { %5371 = vst.msk [vmem:[#allocation4 + $0x8] sm:$0xf] %vm935_vm1, %v12611_v41  ;;  %4414 = vst.msk [vmem:[#allocation4 + $0x24] sm:$0xf] %vm935_vm1, %v12611_v41  ;;  %v4558_v23 = vld [vmem:[#allocation3 + $0x1e] sm:$0xff]  ;;  %v4155_v25 = vadd.f32 %v13038_v61, %v4154_v54  ;;  %5227 = vrot.lane.b32.xlu1 %v12595_v0, %s17145_s2  ;;  %v12533_v6 = vpack.c.bf16 %v4685_v62, %v4685_v62  ;;  %v4559_v41 = vld [vmem:[#allocation3 + $0x26] sm:$0xff]  ;;  %v12534_v57 = vpack.c.bf16 %v4686_v55, %v4686_v55 }
 0x340   : > { %4893 = vst.msk [vmem:[#allocation4 + $0x1c] sm:$0xf] %vm935_vm1, %v12549_v5  ;;  %4497 = vrot.lane.b32.xlu0 %v12502_v4, %s17144_s0  ;;  %5372 = vst.msk [vmem:[#allocation4 + $0x14] sm:$0xf] %vm935_vm1, %v12612_v8  ;;  %v13040_v15 = vpop.f32.mrf.mxu1  ;;  %v12518_v3 = vpack.c.bf16 %v4558_v23, %v4558_v23  ;;  %v4909_v60 = vld [vmem:[#allocation3 + $0x21] sm:$0xff]  ;;  %v12519_v31 = vpack.c.bf16 %v4559_v41, %v4559_v41 }
 0x341   : > { %4415 = vst.msk [vmem:[#allocation4 + $0x30] sm:$0xf] %vm935_vm1, %v12612_v8  ;;  %v4212_v30 = vmul.f32 %v15051_v21, %v4155_v25  ;;  %v13041_v12 = vadd.f32 %v13040_v15, %v13039_v26  ;;  %4894 = vst.msk [vmem:[#allocation4 + $0x28] sm:$0xf] %vm935_vm1, %v12550_v28  ;;  %v5036_v17 = vld [vmem:[#allocation3 + $0x22] sm:$0xff]  ;;  %v12565_v19 = vpack.c.bf16 %v4909_v60, %v4909_v60 }
 0x342   : > { %v12580_v53 = vpack.c.bf16 %v5036_v17, %v5036_v17  ;;  %v4431_v40 = vld [vmem:[#allocation3 + $0x25] sm:$0xff] }
 0x343   : > { %v4235_v18 = vadd.f32 %v15056_v24, %v4212_v30  ;;  %v4158_v33 = vadd.f32 %v13041_v12, %v4157_v13  ;;  %4751 = vrot.lane.b32.xlu1 %v12533_v6, %s17145_s2  ;;  %v5164_v50 = vld [vmem:[#allocation3 + $0x23] sm:$0xff]  ;;  %v12503_v14 = vpack.c.bf16 %v4431_v40, %v4431_v40 }
 0x344   : > { %4625 = vrot.lane.b32.xlu0 %v12518_v3, %s17111_s4  ;;  %v13700_v37 = vld [vmem:[%s17141_s9 + $0x40] sm:$0xff]   ;;  %v12596_v46 = vpack.c.bf16 %v5164_v50, %v5164_v50  ;;  %s16916_s4 = scalar_lea.vmem %s17095_s23, %s17155_s27 }
 0x345   : > { %v4251_v44 = vmax.f32 %v4235_v18, 0.0  ;;  %v4213_v58 = vmul.f32 %v15051_v21, %v4158_v33  ;;  %v13701_v51 = vld [vmem:[%s17141_s9] sm:$0xff]   ;;  %13096 = vmatprep.subr.bf16.mxu1 %v13700_v37 }
 0x346   : > { %13097 = vmatpush3.bf16.msra.mxu1 %v13701_v51 }
 0x347   : > { %v13678_v47 = vld [vmem:[#allocation4 + $0x8] ss:$12 sps:$4 sm:$0xff]   ;;  %v4267_v54 = vmul.f32 %v4251_v44, %v14564_v35  ;;  %v4236_v7 = vadd.f32 %v15056_v24, %v4213_v58  ;;  %4975 = vrot.lane.b32.xlu1 %v12565_v19, %s17144_s0 }
 0x348   : > { %5101 = vrot.lane.b32.xlu0 %v12580_v53, %s17146_s8  ;;  %13438 = vmatprep.mubr.msk.bf16.mxu0 %vm766_vm0, %v13678_v47 }
 0x349   : > { %4283 = vst.msk [vmem:[#allocation3 + $0x30] sm:$0xff] %vm766_vm0, %v4267_v54  ;;  %v4252_v20 = vmax.f32 %v4236_v7, 0.0 }
 0x34b   : > { %v4268_v56 = vmul.f32 %v4252_v20, %v14661_v63  ;;  %4499 = vrot.lane.b32.xlu1 %v12503_v14, %s17144_s0 }
 0x34c   : > { %5229 = vrot.lane.b32.xlu0 %v12596_v46, %s17145_s2 }
 0x34d   : > { %4284 = vst.msk [vmem:[#allocation3 + $0x38] sm:$0xff] %vm766_vm0, %v4268_v56 }
 0x34f   : > { %4627 = vrot.lane.b32.xlu1 %v12519_v31, %s17146_s8 }
 0x350   : > { %4753 = vrot.lane.b32.xlu0 %v12534_v57, %s17145_s2  ;;  %v5037_v5 = vld [vmem:[#allocation3 + $0x2a] sm:$0xff] }
 0x351   : > { %v4910_v61 = vld [vmem:[#allocation3 + $0x29] sm:$0xff]  ;;  %v12581_v0 = vpack.c.bf16 %v5037_v5, %v5037_v5 }
 0x352   : > { %v12566_v4 = vpack.c.bf16 %v4910_v61, %v4910_v61  ;;  %v5165_v8 = vld [vmem:[#allocation3 + $0x2b] sm:$0xff]  ;;  %v13042_v26 = vpop.f32.mrf.mxu1 }
 0x353   : > { %v4432_v62 = vld [vmem:[#allocation3 + $0x2d] sm:$0xff]  ;;  %5103 = vrot.lane.b32.xlu1 %v12581_v0, %s17146_s8  ;;  %v12597_v12 = vpack.c.bf16 %v5165_v8, %v5165_v8  ;;  %v15195_v8 = vpop.f32.mrf.mxu0 }
 0x354   : > { %v5293_v23 = vld [vmem:[#allocation3 + $0x2c] sm:$0xff]  ;;  %4977 = vrot.lane.b32.xlu0 %v12566_v4, %s17144_s0  ;;  %v13043_v28 = vpop.f32.mrf.mxu1  ;;  %v5294_v15 = vld [vmem:[#allocation3 + $0x34] sm:$0xff]  ;;  %v12504_v6 = vpack.c.bf16 %v4432_v62, %v4432_v62 }
 0x355   : > { %v4815_v16 = vld [vmem:[#allocation3 + $0x30] sm:$0xff]  ;;  %v12613_v25 = vpack.c.bf16 %v5293_v23, %v5293_v23  ;;  %v13044_v30 = vadd.f32 %v13043_v28, %v13042_v26  ;;  %v12614_v3 = vpack.c.bf16 %v5294_v15, %v5294_v15  ;;  %v4816_v32 = vld [vmem:[#allocation3 + $0x38] sm:$0xff] }
 0x356   : > { %v12551_v27 = vpack.c.bf16 %v4815_v16, %v4815_v16  ;;  %v13045_v13 = vpop.f32.mrf.mxu1  ;;  %v4687_v60 = vld [vmem:[#allocation3 + $0x2f] sm:$0xff]  ;;  %v12552_v33 = vpack.c.bf16 %v4816_v32, %v4816_v32  ;;  %v4688_v5 = vld [vmem:[#allocation3 + $0x37] sm:$0xff] }
 0x357   : > { %5373 = vst.msk [vmem:[#allocation4 + $0x20] sm:$0xf] %vm935_vm1, %v12613_v25  ;;  %4416 = vst.msk [vmem:[#allocation4 + $0x3c] sm:$0xf] %vm935_vm1, %v12613_v25  ;;  %v4560_v17 = vld [vmem:[#allocation3 + $0x2e] sm:$0xff]  ;;  %v4163_v18 = vadd.f32 %v15107_v45, %v13044_v30  ;;  %5231 = vrot.lane.b32.xlu1 %v12597_v12, %s17145_s2  ;;  %v12535_v19 = vpack.c.bf16 %v4687_v60, %v4687_v60  ;;  %v4561_v57 = vld [vmem:[#allocation3 + $0x36] sm:$0xff]  ;;  %v12536_v4 = vpack.c.bf16 %v4688_v5, %v4688_v5 }
 0x358   : > { %4895 = vst.msk [vmem:[#allocation4 + $0x34] sm:$0xf] %vm935_vm1, %v12551_v27  ;;  %4501 = vrot.lane.b32.xlu0 %v12504_v6, %s17144_s0  ;;  %5374 = vst.msk [vmem:[#allocation4 + $0x2c] sm:$0xf] %vm935_vm1, %v12614_v3  ;;  %v13046_v43 = vpop.f32.mrf.mxu1  ;;  %v12520_v53 = vpack.c.bf16 %v4560_v17, %v4560_v17  ;;  %v4911_v40 = vld [vmem:[#allocation3 + $0x31] sm:$0xff]  ;;  %v12521_v0 = vpack.c.bf16 %v4561_v57, %v4561_v57  ;;  %v4170_v27 = vpop.f32.mrf.mxu0 }
 0x359   : > { %4417 = vst.msk [vmem:[#allocation4 + $0x48] sm:$0xf] %vm935_vm1, %v12614_v3  ;;  %v4214_v44 = vmul.f32 %v15051_v21, %v4163_v18  ;;  %v13047_v58 = vadd.f32 %v13046_v43, %v13045_v13  ;;  %4896 = vst.msk [vmem:[#allocation4 + $0x40] sm:$0xf] %vm935_vm1, %v12552_v33  ;;  %v5038_v50 = vld [vmem:[#allocation3 + $0x32] sm:$0xff]  ;;  %v12567_v54 = vpack.c.bf16 %v4911_v40, %v4911_v40 }
 0x35a   : > { %v12582_v7 = vpack.c.bf16 %v5038_v50, %v5038_v50  ;;  %v4433_v20 = vld [vmem:[#allocation3 + $0x35] sm:$0xff]  ;;  %v15204_v43 = vpop.f32.mrf.mxu0 }
 0x35b   : > { %v4237_v45 = vadd.f32 %v15056_v24, %v4214_v44  ;;  %v4166_v37 = vadd.f32 %v15128_v9, %v13047_v58  ;;  %4755 = vrot.lane.b32.xlu1 %v12535_v19, %s17145_s2  ;;  %v5166_v46 = vld [vmem:[#allocation3 + $0x33] sm:$0xff]  ;;  %v12505_v56 = vpack.c.bf16 %v4433_v20, %v4433_v20 }
 0x35c   : > { %4629 = vrot.lane.b32.xlu0 %v12520_v53, %s17146_s8  ;;  %v12598_v31 = vpack.c.bf16 %v5166_v46, %v5166_v46 }
 0x35d   : > { %v4253_v47 = vmax.f32 %v4237_v45, 0.0  ;;  %v4215_v51 = vmul.f32 %v15051_v21, %v4166_v37 }
 0x35f   : > { %v13681_v14 = vld [vmem:[#allocation4 + $0x20] ss:$12 sps:$4 sm:$0xff]   ;;  %v4269_v41 = vmul.f32 %v4253_v47, %v14566_v36  ;;  %v4238_v55 = vadd.f32 %v15056_v24, %v4215_v51  ;;  %4979 = vrot.lane.b32.xlu1 %v12567_v54, %s17144_s0 }
 0x360   : > { %5105 = vrot.lane.b32.xlu0 %v12582_v7, %s17146_s8  ;;  %13439 = vmatmul.mubr.msk.bf16.vlgmr.msra.gmra.mxu0 %vm766_vm0, %v13681_v14  ;;  %v4173_v7 = vpop.f32.mrf.mxu0 }
 0x361   : > { %4285 = vst.msk [vmem:[#allocation3 + $0x40] sm:$0xff] %vm766_vm0, %v4269_v41  ;;  %v4254_v9 = vmax.f32 %v4238_v55, 0.0 }
 0x363   : > { %v4270_v61 = vmul.f32 %v4254_v9, %v14722_v11  ;;  %4503 = vrot.lane.b32.xlu1 %v12505_v56, %s17144_s0 }
 0x364   : > { %5233 = vrot.lane.b32.xlu0 %v12598_v31, %s17145_s2 }
 0x365   : > { %4286 = vst.msk [vmem:[#allocation3 + $0x48] sm:$0xff] %vm766_vm0, %v4270_v61 }
 0x367   : > { %4631 = vrot.lane.b32.xlu1 %v12521_v0, %s17146_s8 }
 0x368   : > { %4757 = vrot.lane.b32.xlu0 %v12536_v4, %s17145_s2  ;;  %v5039_v26 = vld [vmem:[#allocation3 + $0x3a] sm:$0xff] }
 0x369   : > { %v4912_v62 = vld [vmem:[#allocation3 + $0x39] sm:$0xff]  ;;  %v12583_v23 = vpack.c.bf16 %v5039_v26, %v5039_v26 }
 0x36a   : > { %v12568_v16 = vpack.c.bf16 %v4912_v62, %v4912_v62  ;;  %v5167_v25 = vld [vmem:[#allocation3 + $0x3b] sm:$0xff]  ;;  %v13048_v28 = vpop.f32.mrf.mxu1 }
 0x36b   : > { %v4434_v15 = vld [vmem:[#allocation3 + $0x3d] sm:$0xff]  ;;  %5107 = vrot.lane.b32.xlu1 %v12583_v23, %s17146_s8  ;;  %v12599_v32 = vpack.c.bf16 %v5167_v25, %v5167_v25 }
 0x36c   : > { %v5295_v30 = vld [vmem:[#allocation3 + $0x3c] sm:$0xff]  ;;  %4981 = vrot.lane.b32.xlu0 %v12568_v16, %s17144_s0  ;;  %v13049_v13 = vpop.f32.mrf.mxu1  ;;  %v5296_v60 = vld [vmem:[#allocation3 + $0x44] sm:$0xff]  ;;  %v12506_v18 = vpack.c.bf16 %v4434_v15, %v4434_v15 }
 0x36d   : > { %v4817_v12 = vld [vmem:[#allocation3 + $0x40] sm:$0xff]  ;;  %v12615_v6 = vpack.c.bf16 %v5295_v30, %v5295_v30  ;;  %v13050_v17 = vadd.f32 %v13049_v13, %v13048_v28  ;;  %v12616_v33 = vpack.c.bf16 %v5296_v60, %v5296_v60  ;;  %v4818_v53 = vld [vmem:[#allocation3 + $0x48] sm:$0xff] }
 0x36e   : > { %v12553_v3 = vpack.c.bf16 %v4817_v12, %v4817_v12  ;;  %v13051_v44 = vpop.f32.mrf.mxu1  ;;  %v4689_v58 = vld [vmem:[#allocation3 + $0x3f] sm:$0xff]  ;;  %v12554_v50 = vpack.c.bf16 %v4818_v53, %v4818_v53  ;;  %v4690_v25 = vld [vmem:[#allocation3 + $0x47] sm:$0xff] }
 0x36f   : > { %5375 = vst.msk [vmem:[#allocation4 + $0x38] sm:$0xf] %vm935_vm1, %v12615_v6  ;;  %4418 = vst.msk [vmem:[#allocation4 + $0x54] sm:$0xf] %vm935_vm1, %v12615_v6  ;;  %v4562_v19 = vld [vmem:[#allocation3 + $0x3e] sm:$0xff]  ;;  %v4171_v40 = vadd.f32 %v13050_v17, %v4170_v27  ;;  %5235 = vrot.lane.b32.xlu1 %v12599_v32, %s17145_s2  ;;  %v12537_v51 = vpack.c.bf16 %v4689_v58, %v4689_v58  ;;  %v4563_v16 = vld [vmem:[#allocation3 + $0x46] sm:$0xff]  ;;  %v12538_v15 = vpack.c.bf16 %v4690_v25, %v4690_v25 }
 0x370   : > { %4897 = vst.msk [vmem:[#allocation4 + $0x4c] sm:$0xf] %vm935_vm1, %v12553_v3  ;;  %4505 = vrot.lane.b32.xlu0 %v12506_v18, %s17144_s0  ;;  %5376 = vst.msk [vmem:[#allocation4 + $0x44] sm:$0xf] %vm935_vm1, %v12616_v33  ;;  %v13052_v45 = vpop.f32.mrf.mxu1  ;;  %v12522_v54 = vpack.c.bf16 %v4562_v19, %v4562_v19  ;;  %v4913_v20 = vld [vmem:[#allocation3 + $0x41] sm:$0xff]  ;;  %v12523_v28 = vpack.c.bf16 %v4563_v16, %v4563_v16 }
 0x371   : > { %4419 = vst.msk [vmem:[#allocation4 + $0x60] sm:$0xf] %vm935_vm1, %v12616_v33  ;;  %v4216_v37 = vmul.f32 %v15051_v21, %v4171_v40  ;;  %v13053_v47 = vadd.f32 %v13052_v45, %v13051_v44  ;;  %4898 = vst.msk [vmem:[#allocation4 + $0x58] sm:$0xf] %vm935_vm1, %v12554_v50  ;;  %v5040_v14 = vld [vmem:[#allocation3 + $0x42] sm:$0xff]  ;;  %v12569_v56 = vpack.c.bf16 %v4913_v20, %v4913_v20 }
 0x372   : > { %v12584_v31 = vpack.c.bf16 %v5040_v14, %v5040_v14  ;;  %v4435_v57 = vld [vmem:[#allocation3 + $0x45] sm:$0xff] }
 0x373   : > { %v4239_v46 = vadd.f32 %v15056_v24, %v4216_v37  ;;  %v4174_v41 = vadd.f32 %v13053_v47, %v4173_v7  ;;  %4759 = vrot.lane.b32.xlu1 %v12537_v51, %s17145_s2  ;;  %v5168_v61 = vld [vmem:[#allocation3 + $0x43] sm:$0xff]  ;;  %v12507_v62 = vpack.c.bf16 %v4435_v57, %v4435_v57 }
 0x374   : > { %4633 = vrot.lane.b32.xlu0 %v12522_v54, %s17146_s8  ;;  %v12600_v23 = vpack.c.bf16 %v5168_v61, %v5168_v61 }
 0x375   : > { %v4255_v55 = vmax.f32 %v4239_v46, 0.0  ;;  %v4217_v9 = vmul.f32 %v15051_v21, %v4174_v41 }
 0x377   : > { %v13682_v5 = vld [vmem:[#allocation4 + $0x38] ss:$12 sps:$4 sm:$0xff]   ;;  %v4271_v0 = vmul.f32 %v4255_v55, %v14568_v38  ;;  %v4240_v4 = vadd.f32 %v15056_v24, %v4217_v9  ;;  %4983 = vrot.lane.b32.xlu1 %v12569_v56, %s17144_s0 }
 0x378   : > { %5109 = vrot.lane.b32.xlu0 %v12584_v31, %s17146_s8  ;;  %13442 = vmatprep.mubr.msk.bf16.mxu0 %vm766_vm0, %v13682_v5 }
 0x379   : > { %4287 = vst.msk [vmem:[#allocation3 + $0x50] sm:$0xff] %vm766_vm0, %v4271_v0  ;;  %v4256_v26 = vmax.f32 %v4240_v4, 0.0 }
 0x37b   : > { %v4272_v27 = vmul.f32 %v4256_v26, %v14761_v10  ;;  %4507 = vrot.lane.b32.xlu1 %v12507_v62, %s17144_s0 }
 0x37c   : > { %5237 = vrot.lane.b32.xlu0 %v12600_v23, %s17145_s2 }
 0x37d   : > { %4288 = vst.msk [vmem:[#allocation3 + $0x58] sm:$0xff] %vm766_vm0, %v4272_v27 }
 0x37f   : > { %4635 = vrot.lane.b32.xlu1 %v12523_v28, %s17146_s8 }
 0x380   : > { %4761 = vrot.lane.b32.xlu0 %v12538_v15, %s17145_s2  ;;  %v5041_v30 = vld [vmem:[#allocation3 + $0x4a] sm:$0xff] }
 0x381   : > { %v4914_v12 = vld [vmem:[#allocation3 + $0x49] sm:$0xff]  ;;  %v12585_v6 = vpack.c.bf16 %v5041_v30, %v5041_v30 }
 0x382   : > { %v12570_v3 = vpack.c.bf16 %v4914_v12, %v4914_v12  ;;  %v5169_v13 = vld [vmem:[#allocation3 + $0x4b] sm:$0xff]  ;;  %v13054_v60 = vpop.f32.mrf.mxu1 }
 0x383   : > { %v4436_v17 = vld [vmem:[#allocation3 + $0x4d] sm:$0xff]  ;;  %5111 = vrot.lane.b32.xlu1 %v12585_v6, %s17146_s8  ;;  %v12601_v40 = vpack.c.bf16 %v5169_v13, %v5169_v13 }
 0x384   : > { %v5297_v32 = vld [vmem:[#allocation3 + $0x4c] sm:$0xff]  ;;  %4985 = vrot.lane.b32.xlu0 %v12570_v3, %s17144_s0  ;;  %v13055_v58 = vpop.f32.mrf.mxu1  ;;  %v5298_v19 = vld [vmem:[#allocation3 + $0x54] sm:$0xff]  ;;  %v12508_v50 = vpack.c.bf16 %v4436_v17, %v4436_v17 }
 0x385   : > { %v4819_v18 = vld [vmem:[#allocation3 + $0x50] sm:$0xff]  ;;  %v12617_v33 = vpack.c.bf16 %v5297_v32, %v5297_v32  ;;  %v13056_v53 = vadd.f32 %v13055_v58, %v13054_v60  ;;  %v12618_v45 = vpack.c.bf16 %v5298_v19, %v5298_v19  ;;  %v4820_v54 = vld [vmem:[#allocation3 + $0x58] sm:$0xff]  ;;  %v15257_v32 = vpop.f32.mrf.mxu0 }
 0x386   : > { %v12555_v44 = vpack.c.bf16 %v4819_v18, %v4819_v18  ;;  %v13057_v37 = vpop.f32.mrf.mxu1  ;;  %v4691_v47 = vld [vmem:[#allocation3 + $0x4f] sm:$0xff]  ;;  %v12556_v20 = vpack.c.bf16 %v4820_v54, %v4820_v54  ;;  %v4692_v12 = vld [vmem:[#allocation3 + $0x57] sm:$0xff] }
 0x387   : > { %5377 = vst.msk [vmem:[#allocation4 + $0x50] sm:$0xf] %vm935_vm1, %v12617_v33  ;;  %4420 = vst.msk [vmem:[#allocation4 + $0x6c] sm:$0xf] %vm935_vm1, %v12617_v33  ;;  %v4564_v51 = vld [vmem:[#allocation3 + $0x4e] sm:$0xff]  ;;  %v4179_v7 = vadd.f32 %v15195_v8, %v13056_v53  ;;  %5239 = vrot.lane.b32.xlu1 %v12601_v40, %s17145_s2  ;;  %v12539_v55 = vpack.c.bf16 %v4691_v47, %v4691_v47  ;;  %v4565_v30 = vld [vmem:[#allocation3 + $0x56] sm:$0xff]  ;;  %v12540_v17 = vpack.c.bf16 %v4692_v12, %v4692_v12 }
 0x388   : > { %4899 = vst.msk [vmem:[#allocation4 + $0x64] sm:$0xf] %vm935_vm1, %v12555_v44  ;;  %4509 = vrot.lane.b32.xlu0 %v12508_v50, %s17144_s0  ;;  %5378 = vst.msk [vmem:[#allocation4 + $0x5c] sm:$0xf] %vm935_vm1, %v12618_v45  ;;  %v13058_v14 = vpop.f32.mrf.mxu1  ;;  %v12524_v9 = vpack.c.bf16 %v4564_v51, %v4564_v51  ;;  %v4915_v56 = vld [vmem:[#allocation3 + $0x51] sm:$0xff]  ;;  %v12525_v60 = vpack.c.bf16 %v4565_v30, %v4565_v30  ;;  %v4186_v50 = vpop.f32.mrf.mxu0 }
 0x389   : > { %4421 = vst.msk [vmem:[#allocation4 + $0x78] sm:$0xf] %vm935_vm1, %v12618_v45  ;;  %v4218_v46 = vmul.f32 %v15051_v21, %v4179_v7  ;;  %v13059_v41 = vadd.f32 %v13058_v14, %v13057_v37  ;;  %4900 = vst.msk [vmem:[#allocation4 + $0x70] sm:$0xf] %vm935_vm1, %v12556_v20  ;;  %v5042_v31 = vld [vmem:[#allocation3 + $0x52] sm:$0xff]  ;;  %v12571_v0 = vpack.c.bf16 %v4915_v56, %v4915_v56 }
 0x38a   : > { %v12586_v4 = vpack.c.bf16 %v5042_v31, %v5042_v31  ;;  %v4437_v26 = vld [vmem:[#allocation3 + $0x55] sm:$0xff] }
 0x38b   : > { %v4241_v8 = vadd.f32 %v15056_v24, %v4218_v46  ;;  %v4182_v57 = vadd.f32 %v15204_v43, %v13059_v41  ;;  %4763 = vrot.lane.b32.xlu1 %v12539_v55, %s17145_s2  ;;  %v5170_v23 = vld [vmem:[#allocation3 + $0x53] sm:$0xff]  ;;  %v15249_v43 = vpop.permute.xlu0 %5129  ;;  %v12509_v28 = vpack.c.bf16 %v4437_v26, %v4437_v26 }
 0x38c   : > { %4637 = vrot.lane.b32.xlu0 %v12524_v9, %s17146_s8  ;;  %v12602_v15 = vpack.c.bf16 %v5170_v23, %v5170_v23 }
 0x38d   : > { %v4257_v5 = vmax.f32 %v4241_v8, 0.0  ;;  %v4219_v61 = vmul.f32 %v15051_v21, %v4182_v57  ;;  %v15270_v8 = vpop.f32.mrf.mxu0 }
 0x38f   : > { %v13683_v62 = vld [vmem:[#allocation4 + $0x50] ss:$12 sps:$4 sm:$0xff]   ;;  %v4273_v16 = vmul.f32 %v4257_v5, %v14570_v42  ;;  %v4242_v25 = vadd.f32 %v15056_v24, %v4219_v61  ;;  %4987 = vrot.lane.b32.xlu1 %v12571_v0, %s17144_s0 }
 0x390   : > { %5113 = vrot.lane.b32.xlu0 %v12586_v4, %s17146_s8  ;;  %13443 = vmatmul.mubr.msk.bf16.gmra.mxu0 %vm766_vm0, %v13683_v62 }
 0x391   : > { %4289 = vst.msk [vmem:[#allocation3 + $0x60] sm:$0xff] %vm766_vm0, %v4273_v16  ;;  %v4258_v27 = vmax.f32 %v4242_v25, 0.0 }
 0x393   : > { %v4274_v6 = vmul.f32 %v4258_v27, %v14794_v29  ;;  %4511 = vrot.lane.b32.xlu1 %v12509_v28, %s17144_s0 }
 0x394   : > { %5241 = vrot.lane.b32.xlu0 %v12602_v15, %s17145_s2  ;;  %v4748_v3 = vpop.permute.xlu1 %4747  ;;  %v4189_v15 = vpop.f32.mrf.mxu0 }
 0x395   : > { %4290 = vst.msk [vmem:[#allocation3 + $0x68] sm:$0xff] %vm766_vm0, %v4274_v6  ;;  %v4494_v13 = vpop.permute.xlu0 %4493 }
 0x396   : > { %4795 = vst.msk [vmem:[#allocation4] sm:$0xf] %vm1322_vm4, %v4748_v3 }
 0x397   : > { %4540 = vst.msk [vmem:[#allocation4 + $0xc] sm:$0xf] %vm1064_vm2, %v4494_v13  ;;  %4639 = vrot.lane.b32.xlu1 %v12525_v60, %s17146_s8 }
 0x398   : > { %4765 = vrot.lane.b32.xlu0 %v12540_v17, %s17145_s2  ;;  %v5043_v18 = vld [vmem:[#allocation3 + $0x5a] sm:$0xff] }
 0x399   : > { %v4916_v33 = vld [vmem:[#allocation3 + $0x59] sm:$0xff]  ;;  %v4972_v44 = vpop.permute.xlu1 %4971  ;;  %v4622_v58 = vpop.permute.xlu0 %4621  ;;  %v12587_v19 = vpack.c.bf16 %v5043_v18, %v5043_v18 }
 0x39a   : > { %v12572_v53 = vpack.c.bf16 %v4916_v33, %v4916_v33  ;;  %v5171_v40 = vld [vmem:[#allocation3 + $0x5b] sm:$0xff]  ;;  %5019 = vst.msk [vmem:[#allocation4 + $0x4] sm:$0xf] %vm1064_vm2, %v4972_v44  ;;  %v13060_v45 = vpop.f32.mrf.mxu1 }
 0x39b   : > { %4668 = vst.msk [vmem:[#allocation4 + $0xc] sm:$0xf] %vm1193_vm3, %v4622_v58  ;;  %v4438_v37 = vld [vmem:[#allocation3 + $0x5d] sm:$0xff]  ;;  %5115 = vrot.lane.b32.xlu1 %v12587_v19, %s17146_s8  ;;  %v12603_v9 = vpack.c.bf16 %v5171_v40, %v5171_v40 }
 0x39c   : > { %v5299_v47 = vld [vmem:[#allocation3 + $0x5c] sm:$0xff]  ;;  %4989 = vrot.lane.b32.xlu0 %v12572_v53, %s17144_s0  ;;  %v13061_v20 = vpop.f32.mrf.mxu1  ;;  %v5300_v14 = vld [vmem:[#allocation3 + $0x64] sm:$0xff]  ;;  %v12510_v56 = vpack.c.bf16 %v4438_v37, %v4438_v37 }
 0x39d   : > { %v4821_v51 = vld [vmem:[#allocation3 + $0x60] sm:$0xff]  ;;  %v12619_v54 = vpack.c.bf16 %v5299_v47, %v5299_v47  ;;  %v13062_v46 = vadd.f32 %v13061_v20, %v13060_v45  ;;  %v4496_v41 = vpop.permute.xlu1 %4495  ;;  %v4750_v55 = vpop.permute.xlu0 %4749  ;;  %v12620_v31 = vpack.c.bf16 %v5300_v14, %v5300_v14  ;;  %v4822_v0 = vld [vmem:[#allocation3 + $0x68] sm:$0xff] }
 0x39e   : > { %v12557_v7 = vpack.c.bf16 %v4821_v51, %v4821_v51  ;;  %4541 = vst.msk [vmem:[#allocation4 + $0x18] sm:$0xf] %vm1064_vm2, %v4496_v41  ;;  %v13063_v57 = vpop.f32.mrf.mxu1  ;;  %v4693_v5 = vld [vmem:[#allocation3 + $0x5f] sm:$0xff]  ;;  %v12558_v26 = vpack.c.bf16 %v4822_v0, %v4822_v0  ;;  %v4694_v20 = vld [vmem:[#allocation3 + $0x67] sm:$0xff] }
 0x39f   : > { %5379 = vst.msk [vmem:[#allocation4 + $0x68] sm:$0xf] %vm935_vm1, %v12619_v54  ;;  %4422 = vst.msk [vmem:[#allocation4 + $0x84] sm:$0xf] %vm935_vm1, %v12619_v54  ;;  %v4566_v61 = vld [vmem:[#allocation3 + $0x5e] sm:$0xff]  ;;  %v4187_v4 = vadd.f32 %v13062_v46, %v4186_v50  ;;  %5243 = vrot.lane.b32.xlu1 %v12603_v9, %s17145_s2  ;;  %v12541_v27 = vpack.c.bf16 %v4693_v5, %v4693_v5  ;;  %v12542_v5 = vpack.c.bf16 %v4694_v20, %v4694_v20 }
 0x3a0   : > { %4901 = vst.msk [vmem:[#allocation4 + $0x7c] sm:$0xf] %vm935_vm1, %v12557_v7  ;;  %4513 = vrot.lane.b32.xlu0 %v12510_v56, %s17144_s0  ;;  %5380 = vst.msk [vmem:[#allocation4 + $0x74] sm:$0xf] %vm935_vm1, %v12620_v31  ;;  %v13064_v62 = vpop.f32.mrf.mxu1  ;;  %v12526_v28 = vpack.c.bf16 %v4566_v61, %v4566_v61  ;;  %v4917_v30 = vld [vmem:[#allocation3 + $0x61] sm:$0xff] }
 0x3a1   : > { %4796 = vst.msk [vmem:[#allocation4 + $0xc] sm:$0xf] %vm1322_vm4, %v4750_v55  ;;  %v4220_v23 = vmul.f32 %v15051_v21, %v4187_v4  ;;  %v13065_v16 = vadd.f32 %v13064_v62, %v13063_v57  ;;  %v4624_v25 = vpop.permute.xlu1 %4623  ;;  %v5044_v12 = vld [vmem:[#allocation3 + $0x62] sm:$0xff]  ;;  %v12573_v17 = vpack.c.bf16 %v4917_v30, %v4917_v30 }
 0x3a2   : > { %4423 = vst.msk [vmem:[#allocation4 + $0x90] sm:$0xf] %vm935_vm1, %v12620_v31  ;;  %4902 = vst.msk [vmem:[#allocation4 + $0x88] sm:$0xf] %vm935_vm1, %v12558_v26  ;;  %v12588_v18 = vpack.c.bf16 %v5044_v12, %v5044_v12  ;;  %v4439_v33 = vld [vmem:[#allocation3 + $0x65] sm:$0xff] }
 0x3a3   : > { %4669 = vst.msk [vmem:[#allocation4 + $0x18] sm:$0xf] %vm1193_vm3, %v4624_v25  ;;  %v4243_v6 = vadd.f32 %v15056_v24, %v4220_v23  ;;  %v4190_v3 = vadd.f32 %v13065_v16, %v4189_v15  ;;  %4767 = vrot.lane.b32.xlu1 %v12541_v27, %s17145_s2  ;;  %v5172_v19 = vld [vmem:[#allocation3 + $0x63] sm:$0xff]  ;;  %v12511_v47 = vpack.c.bf16 %v4439_v33, %v4439_v33  ;;  %v13890_v26 = vld [vmem:[%s17142_s29] ss:$0 sm:$0xff] }
 0x3a4   : > { %4641 = vrot.lane.b32.xlu0 %v12526_v28, %s17146_s8  ;;  %v12604_v51 = vpack.c.bf16 %v5172_v19, %v5172_v19  ;;  %v4567_v7 = vld [vmem:[#allocation3 + $0x66] sm:$0xff]  ;;  %v13891_v12 = vld [vmem:[%s17143_s3] ss:$0 sm:$0xff] }
 0x3a5   : > { %v4259_v13 = vmax.f32 %v4243_v6, 0.0  ;;  %v4221_v60 = vmul.f32 %v15051_v21, %v4190_v3  ;;  %v12527_v57 = vpack.c.bf16 %v4567_v7, %v4567_v7 }
 0x3a6   : > { %v13066_v44 = vpop.f32.mrf.mxu1 }
 0x3a7   : > { %v13690_v58 = vld [vmem:[#allocation4 + $0x68] ss:$12 sps:$4 sm:$0xff]   ;;  %v4275_v53 = vmul.f32 %v4259_v13, %v14575_v52  ;;  %v4244_v40 = vadd.f32 %v15056_v24, %v4221_v60  ;;  %4991 = vrot.lane.b32.xlu1 %v12573_v17, %s17144_s0 }
 0x3a8   : > { %5117 = vrot.lane.b32.xlu0 %v12588_v18, %s17146_s8  ;;  %v13067_v50 = vpop.f32.mrf.mxu1  ;;  %13446 = vmatprep.mubr.msk.bf16.mxu0 %vm766_vm0, %v13690_v58 }
 0x3a9   : > { %4291 = vst.msk [vmem:[#allocation3 + $0x70] sm:$0xff] %vm766_vm0, %v4275_v53  ;;  %v4260_v45 = vmax.f32 %v4244_v40, 0.0  ;;  %v13068_v37 = vadd.f32 %v13067_v50, %v13066_v44 }
 0x3aa   : > { %v13069_v54 = vpop.f32.mrf.mxu1 }
 0x3ab   : > { %v4276_v14 = vmul.f32 %v4260_v45, %v14805_v49  ;;  %v4195_v46 = vadd.f32 %v15257_v32, %v13068_v37  ;;  %4515 = vrot.lane.b32.xlu1 %v12511_v47, %s17144_s0 }
 0x3ac   : > { %5245 = vrot.lane.b32.xlu0 %v12604_v51, %s17145_s2  ;;  %v13070_v41 = vpop.f32.mrf.mxu1 }
 0x3ad   : > { %4292 = vst.msk [vmem:[#allocation3 + $0x78] sm:$0xff] %vm766_vm0, %v4276_v14  ;;  %v4222_v55 = vmul.f32 %v15051_v21, %v4195_v46  ;;  %v13071_v9 = vadd.f32 %v13070_v41, %v13069_v54  ;;  %v5100_v56 = vpop.permute.xlu1 %5099 }
 0x3ae   : > { %v4974_v31 = vpop.permute.xlu0 %4973  ;;  %5147 = vst.msk [vmem:[#allocation4 + $0x4] sm:$0xf] %vm1193_vm3, %v5100_v56 }
 0x3af   : > { %5020 = vst.msk [vmem:[#allocation4 + $0x10] sm:$0xf] %vm1064_vm2, %v4974_v31  ;;  %v4245_v32 = vadd.f32 %v15056_v24, %v4222_v55  ;;  %v4198_v61 = vadd.f32 %v15270_v8, %v13071_v9  ;;  %4643 = vrot.lane.b32.xlu1 %v12527_v57, %s17146_s8 }
 0x3b0   : > { %4769 = vrot.lane.b32.xlu0 %v12542_v5, %s17145_s2  ;;  %v5045_v0 = vld [vmem:[#allocation3 + $0x6a] sm:$0xff] }
 0x3b1   : > { %v4918_v4 = vld [vmem:[#allocation3 + $0x69] sm:$0xff]  ;;  %v4261_v21 = vmax.f32 %v4245_v32, 0.0  ;;  %v4223_v62 = vmul.f32 %v13890_v26, %v4198_v61  ;;  %v5228_v23 = vpop.permute.xlu1 %5227  ;;  %v12589_v25 = vpack.c.bf16 %v5045_v0, %v5045_v0 }
 0x3b2   : > { %v4498_v16 = vpop.permute.xlu0 %4497  ;;  %v12574_v27 = vpack.c.bf16 %v4918_v4, %v4918_v4  ;;  %v5173_v28 = vld [vmem:[#allocation3 + $0x6b] sm:$0xff]  ;;  %5275 = vst.msk [vmem:[#allocation4 + $0x4] sm:$0xf] %vm1322_vm4, %v5228_v23 }
 0x3b3   : > { %4542 = vst.msk [vmem:[#allocation4 + $0x24] sm:$0xf] %vm1064_vm2, %v4498_v16  ;;  %v4440_v24 = vld [vmem:[#allocation3 + $0x6d] sm:$0xff]  ;;  %v4277_v30 = vmul.f32 %v4261_v21, %v14581_v59  ;;  %v4246_v6 = vadd.f32 %v13891_v12, %v4223_v62  ;;  %5119 = vrot.lane.b32.xlu1 %v12589_v25, %s17146_s8  ;;  %v12605_v44 = vpack.c.bf16 %v5173_v28, %v5173_v28 }
 0x3b4   : > { %v5301_v8 = vld [vmem:[#allocation3 + $0x6c] sm:$0xff]  ;;  %4993 = vrot.lane.b32.xlu0 %v12574_v27, %s17144_s0  ;;  %v5302_v13 = vld [vmem:[#allocation3 + $0x74] sm:$0xff]  ;;  %v12512_v58 = vpack.c.bf16 %v4440_v24, %v4440_v24 }
 0x3b5   : > { %v4823_v15 = vld [vmem:[#allocation3 + $0x70] sm:$0xff]  ;;  %v12621_v3 = vpack.c.bf16 %v5301_v8, %v5301_v8  ;;  %4293 = vst.msk [vmem:[#allocation3 + $0x80] sm:$0xff] %vm766_vm0, %v4277_v30  ;;  %v4262_v17 = vmax.f32 %v4246_v6, 0.0  ;;  %v4752_v18 = vpop.permute.xlu1 %4751  ;;  %v12622_v19 = vpack.c.bf16 %v5302_v13, %v5302_v13  ;;  %v4824_v50 = vld [vmem:[#allocation3 + $0x78] sm:$0xff] }
 0x3b6   : > { %v12559_v60 = vpack.c.bf16 %v4823_v15, %v4823_v15  ;;  %v4626_v33 = vpop.permute.xlu0 %4625  ;;  %4797 = vst.msk [vmem:[#allocation4 + $0x18] sm:$0xf] %vm1322_vm4, %v4752_v18  ;;  %v4695_v53 = vld [vmem:[#allocation3 + $0x6f] sm:$0xff]  ;;  %v12560_v37 = vpack.c.bf16 %v4824_v50, %v4824_v50  ;;  %v4696_v24 = vld [vmem:[#allocation3 + $0x77] sm:$0xff] }
 0x3b7   : > { %5381 = vst.msk [vmem:[#allocation4 + $0x80] sm:$0xf] %vm935_vm1, %v12621_v3  ;;  %4424 = vst.msk [vmem:[#allocation4 + $0x9c] sm:$0xf] %vm935_vm1, %v12621_v3  ;;  %v4568_v40 = vld [vmem:[#allocation3 + $0x6e] sm:$0xff]  ;;  %v4278_v45 = vmul.f32 %v4262_v17, %v14819_v2  ;;  %5247 = vrot.lane.b32.xlu1 %v12605_v44, %s17145_s2  ;;  %v12543_v54 = vpack.c.bf16 %v4695_v53, %v4695_v53  ;;  %v4569_v28 = vld [vmem:[#allocation3 + $0x76] sm:$0xff] }
 0x3b8   : > { %4670 = vst.msk [vmem:[#allocation4 + $0x24] sm:$0xf] %vm1193_vm3, %v4626_v33  ;;  %4517 = vrot.lane.b32.xlu0 %v12512_v58, %s17144_s0  ;;  %v12528_v7 = vpack.c.bf16 %v4568_v40, %v4568_v40  ;;  %v4919_v20 = vld [vmem:[#allocation3 + $0x71] sm:$0xff]  ;;  %v12529_v13 = vpack.c.bf16 %v4569_v28, %v4569_v28 }
 0x3b9   : > { %4903 = vst.msk [vmem:[#allocation4 + $0x94] sm:$0xf] %vm935_vm1, %v12559_v60  ;;  %5382 = vst.msk [vmem:[#allocation4 + $0x8c] sm:$0xf] %vm935_vm1, %v12622_v19  ;;  %v4976_v47 = vpop.permute.xlu1 %4975  ;;  %v5046_v14 = vld [vmem:[#allocation3 + $0x72] sm:$0xff]  ;;  %v12575_v55 = vpack.c.bf16 %v4919_v20, %v4919_v20  ;;  %v5387_v30 = vld [vmem:[#allocation4] sm:$0xff]  ;;  %v12544_v60 = vpack.c.bf16 %v4696_v24, %v4696_v24 }
 0x3ba   : > { %4425 = vst.msk [vmem:[#allocation4 + $0xa8] sm:$0xf] %vm935_vm1, %v12622_v19  ;;  %v5102_v51 = vpop.permute.xlu0 %5101  ;;  %4904 = vst.msk [vmem:[#allocation4 + $0xa0] sm:$0xf] %vm935_vm1, %v12560_v37  ;;  %v12590_v9 = vpack.c.bf16 %v5046_v14, %v5046_v14  ;;  %v4441_v56 = vld [vmem:[#allocation3 + $0x75] sm:$0xff] }
 0x3bb   : > { %4294 = vst.msk [vmem:[#allocation3 + $0x88] sm:$0xff] %vm766_vm0, %v4278_v45  ;;  %4771 = vrot.lane.b32.xlu1 %v12543_v54, %s17145_s2  ;;  %v5174_v5 = vld [vmem:[#allocation3 + $0x73] sm:$0xff]  ;;  %v12513_v23 = vpack.c.bf16 %v4441_v56, %v4441_v56 }
 0x3bc   : > { %5021 = vst.msk [vmem:[#allocation4 + $0x1c] sm:$0xf] %vm1064_vm2, %v4976_v47  ;;  %4645 = vrot.lane.b32.xlu0 %v12528_v7, %s17146_s8  ;;  %v5303_v31 = vld [vmem:[#allocation3 + $0x7c] sm:$0xff]  ;;  %v12606_v16 = vpack.c.bf16 %v5174_v5, %v5174_v5  ;;  %v7053_v17 = vld [vmem:[#allocation3 + $0x94] sm:$0xff] }
 0x3bd   : > { %5148 = vst.msk [vmem:[#allocation4 + $0x10] sm:$0xf] %vm1193_vm3, %v5102_v51  ;;  %v4500_v46 = vpop.permute.xlu1 %4499  ;;  %v12623_v32 = vpack.c.bf16 %v5303_v31, %v5303_v31  ;;  %v4825_v61 = vld [vmem:[#allocation3 + $0x80] sm:$0xff]  ;;  %v12770_v19 = vpack.c.bf16 %v7053_v17, %v7053_v17 }
 0x3be   : > { %v5230_v41 = vpop.permute.xlu0 %5229  ;;  %4543 = vst.msk [vmem:[#allocation4 + $0x30] sm:$0xf] %vm1064_vm2, %v4500_v46  ;;  %v12561_v21 = vpack.c.bf16 %v4825_v61, %v4825_v61  ;;  %v5047_v44 = vld [vmem:[#allocation3 + $0x7a] sm:$0xff] }
 0x3bf   : > { %5276 = vst.msk [vmem:[#allocation4 + $0x10] sm:$0xf] %vm1322_vm4, %v5230_v41  ;;  %4995 = vrot.lane.b32.xlu1 %v12575_v55, %s17144_s0  ;;  %v4920_v58 = vld [vmem:[#allocation3 + $0x79] sm:$0xff]  ;;  %v12591_v50 = vpack.c.bf16 %v5047_v44, %v5047_v44 }
 0x3c0   : > { %v13698_v57 = vld [vmem:[#allocation4 + $0x80] ss:$12 sps:$4 sm:$0xff]   ;;  %5121 = vrot.lane.b32.xlu0 %v12590_v9, %s17146_s8  ;;  %5383 = vst.msk [vmem:[#allocation4 + $0x98] sm:$0xf] %vm935_vm1, %v12623_v32  ;;  %4426 = vst.msk [vmem:[#allocation4 + $0xb4] sm:$0xf] %vm935_vm1, %v12623_v32  ;;  %v12576_v45 = vpack.c.bf16 %v4920_v58, %v4920_v58 }
 0x3c1   : > { %13447 = vmatmul.mubr.msk.bf16.gmra.mxu0 %vm766_vm0, %v13698_v57  ;;  %v4628_v26 = vpop.permute.xlu1 %4627  ;;  %4905 = vst.msk [vmem:[#allocation4 + $0xac] sm:$0xf] %vm935_vm1, %v12561_v21  ;;  %v5175_v37 = vld [vmem:[#allocation3 + $0x7b] sm:$0xff] }
 0x3c2   : > { %v5304_v0 = vld [vmem:[#allocation3 + $0x84] sm:$0xff]  ;;  %v5305_v4 = vld [vmem:[#allocation3 + $0x8c] sm:$0xff]  ;;  %v4754_v62 = vpop.permute.xlu0 %4753  ;;  %4671 = vst.msk [vmem:[#allocation4 + $0x30] sm:$0xf] %vm1193_vm3, %v4628_v26  ;;  %v12607_v14 = vpack.c.bf16 %v5175_v37, %v5175_v37 }
 0x3c3   : > { %v12624_v25 = vpack.c.bf16 %v5304_v0, %v5304_v0  ;;  %v12625_v27 = vpack.c.bf16 %v5305_v4, %v5305_v4  ;;  %4798 = vst.msk [vmem:[#allocation4 + $0x24] sm:$0xf] %vm1322_vm4, %v4754_v62  ;;  %4519 = vrot.lane.b32.xlu1 %v12513_v23, %s17144_s0  ;;  %v4826_v8 = vld [vmem:[#allocation3 + $0x88] sm:$0xff]  ;;  %v4442_v47 = vld [vmem:[#allocation3 + $0x7d] sm:$0xff] }
 0x3c4   : > { %5249 = vrot.lane.b32.xlu0 %v12606_v16, %s17145_s2  ;;  %v12562_v15 = vpack.c.bf16 %v4826_v8, %v4826_v8  ;;  %v12514_v46 = vpack.c.bf16 %v4442_v47, %v4442_v47  ;;  %v4697_v41 = vld [vmem:[#allocation3 + $0x7f] sm:$0xff]  ;;  %v5049_v26 = vld [vmem:[#allocation3 + $0x8a] sm:$0xff] }
 0x3c5   : > { %5384 = vst.msk [vmem:[#allocation4 + $0xa4] sm:$0xf] %vm935_vm1, %v12624_v25  ;;  %5385 = vst.msk [vmem:[#allocation4 + $0xb0] sm:$0xf] %vm935_vm1, %v12625_v27  ;;  %v5104_v6 = vpop.permute.xlu1 %5103  ;;  %v4570_v55 = vld [vmem:[#allocation3 + $0x7e] sm:$0xff]  ;;  %v12545_v31 = vpack.c.bf16 %v4697_v41, %v4697_v41  ;;  %v12593_v25 = vpack.c.bf16 %v5049_v26, %v5049_v26  ;;  %v5177_v28 = vld [vmem:[#allocation3 + $0x8b] sm:$0xff] }
 0x3c6   : > { %v5389_v12 = vld [vmem:[#allocation4 + $0xc] sm:$0xff]  ;;  %v4978_v3 = vpop.permute.xlu0 %4977  ;;  %5149 = vst.msk [vmem:[#allocation4 + $0x1c] sm:$0xf] %vm1193_vm3, %v5104_v6  ;;  %v12530_v57 = vpack.c.bf16 %v4570_v55, %v4570_v55  ;;  %v4921_v5 = vld [vmem:[#allocation3 + $0x81] sm:$0xff]  ;;  %v12609_v6 = vpack.c.bf16 %v5177_v28, %v5177_v28 }
 0x3c7   : > { %5022 = vst.msk [vmem:[#allocation4 + $0x28] sm:$0xf] %vm1064_vm2, %v4978_v3  ;;  %v11566_v18 = vcombine.high %v5387_v30, %v5389_v12  ;;  %v11565_v33 = vcombine.low %v5387_v30, %v5389_v12  ;;  %4647 = vrot.lane.b32.xlu1 %v12529_v13, %s17146_s8  ;;  %v5048_v32 = vld [vmem:[#allocation3 + $0x82] sm:$0xff]  ;;  %v12577_v4 = vpack.c.bf16 %v4921_v5, %v4921_v5 }
 0x3c8   : > { %4906 = vst.msk [vmem:[#allocation4 + $0xb8] sm:$0xf] %vm935_vm1, %v12562_v15  ;;  %4773 = vrot.lane.b32.xlu0 %v12544_v60, %s17145_s2  ;;  %v12592_v21 = vpack.c.bf16 %v5048_v32, %v5048_v32  ;;  %v5176_v62 = vld [vmem:[#allocation3 + $0x83] sm:$0xff] }
 0x3c9   : > { %5703 = vmatprep.mubr.bf16.mxu1 %v11566_v18  ;;  %v5232_v53 = vpop.permute.xlu1 %5231  ;;  %v12608_v27 = vpack.c.bf16 %v5176_v62, %v5176_v62  ;;  %v4922_v24 = vld [vmem:[#allocation3 + $0x89] sm:$0xff]  ;;  %v5178_v18 = vld [vmem:[#allocation3 + $0x93] sm:$0xff] }
 0x3ca   : > { %v4502_v40 = vpop.permute.xlu0 %4501  ;;  %5704 = vmatmul.mubr.bf16.vlgmr.msra.gmra.mxu1 %v11565_v33  ;;  %5277 = vst.msk [vmem:[#allocation4 + $0x1c] sm:$0xf] %vm1322_vm4, %v5232_v53  ;;  %v12578_v3 = vpack.c.bf16 %v4922_v24, %v4922_v24  ;;  %v4698_v17 = vld [vmem:[#allocation3 + $0x87] sm:$0xff] }
 0x3cb   : > { %4544 = vst.msk [vmem:[#allocation4 + $0x3c] sm:$0xf] %vm1064_vm2, %v4502_v40  ;;  %5123 = vrot.lane.b32.xlu1 %v12591_v50, %s17146_s8  ;;  %v12546_v58 = vpack.c.bf16 %v4698_v17, %v4698_v17 }
 0x3cc   : > { %v13702_v51 = vld [vmem:[#allocation4 + $0x98] ss:$12 sps:$4 sm:$0xff]   ;;  %4997 = vrot.lane.b32.xlu0 %v12576_v45, %s17144_s0  ;;  %v13703_v54 = vld [vmem:[#allocation4 + $0xb0] ss:$12 sps:$4 sm:$0xff]  }
 0x3cd   : > { %13450 = vmatprep.mubr.msk.bf16.mxu0 %vm766_vm0, %v13702_v51  ;;  %7133 = vst.msk [vmem:[#allocation4 + $0xbc] sm:$0xf] %vm935_vm1, %v12770_v19  ;;  %v4756_v7 = vpop.permute.xlu1 %4755  ;;  %v12610_v19 = vpack.c.bf16 %v5178_v18, %v5178_v18 }
 0x3ce   : > { %v4630_v20 = vpop.permute.xlu0 %4629  ;;  %13451 = vmatmul.mubr.msk.bf16.gmra.mxu0 %vm766_vm0, %v13703_v54  ;;  %4799 = vst.msk [vmem:[#allocation4 + $0x30] sm:$0xf] %vm1322_vm4, %v4756_v7 }
 0x3cf   : > { %4672 = vst.msk [vmem:[#allocation4 + $0x3c] sm:$0xf] %vm1193_vm3, %v4630_v20  ;;  %5251 = vrot.lane.b32.xlu1 %v12607_v14, %s17145_s2 }
 0x3d0   : > { %4521 = vrot.lane.b32.xlu0 %v12514_v46, %s17144_s0 }
 0x3d1   : > { %v4980_v9 = vpop.permute.xlu1 %4979  ;;  %v5391_v8 = vld [vmem:[#allocation4 + $0x18] sm:$0xff] }
 0x3d2   : > { %v5106_v56 = vpop.permute.xlu0 %5105  ;;  %5023 = vst.msk [vmem:[#allocation4 + $0x34] sm:$0xf] %vm1064_vm2, %v4980_v9 }
 0x3d3   : > { %5150 = vst.msk [vmem:[#allocation4 + $0x28] sm:$0xf] %vm1193_vm3, %v5106_v56  ;;  %4775 = vrot.lane.b32.xlu1 %v12545_v31, %s17145_s2 }
 0x3d4   : > { %4649 = vrot.lane.b32.xlu0 %v12530_v57, %s17146_s8 }
 0x3d5   : > { %v4504_v61 = vpop.permute.xlu1 %4503 }
 0x3d6   : > { %v5234_v0 = vpop.permute.xlu0 %5233  ;;  %4545 = vst.msk [vmem:[#allocation4 + $0x48] sm:$0xf] %vm1064_vm2, %v4504_v61 }
 0x3d7   : > { %5278 = vst.msk [vmem:[#allocation4 + $0x28] sm:$0xf] %vm1322_vm4, %v5234_v0  ;;  %4999 = vrot.lane.b32.xlu1 %v12577_v4, %s17144_s0 }
 0x3d8   : > { %5125 = vrot.lane.b32.xlu0 %v12592_v21, %s17146_s8 }
 0x3d9   : > { %v4632_v23 = vpop.permute.xlu1 %4631 }
 0x3da   : > { %v4758_v16 = vpop.permute.xlu0 %4757  ;;  %4673 = vst.msk [vmem:[#allocation4 + $0x48] sm:$0xf] %vm1193_vm3, %v4632_v23 }
 0x3db   : > { %4800 = vst.msk [vmem:[#allocation4 + $0x3c] sm:$0xf] %vm1322_vm4, %v4758_v16  ;;  %5127 = vrot.lane.b32.xlu1 %v12593_v25, %s17146_s8 }
 0x3dc   : > { %5253 = vrot.lane.b32.xlu0 %v12608_v27, %s17145_s2 }
 0x3dd   : > { %v5108_v30 = vpop.permute.xlu1 %5107 }
 0x3de   : > { %v5393_v15 = vld [vmem:[#allocation4 + $0x24] sm:$0xff]  ;;  %v4982_v12 = vpop.permute.xlu0 %4981  ;;  %5151 = vst.msk [vmem:[#allocation4 + $0x34] sm:$0xf] %vm1193_vm3, %v5108_v30 }
 0x3df   : > { %5024 = vst.msk [vmem:[#allocation4 + $0x40] sm:$0xf] %vm1064_vm2, %v4982_v12  ;;  %v11569_v13 = vcombine.high %v5391_v8, %v5393_v15  ;;  %v11568_v60 = vcombine.low %v5391_v8, %v5393_v15  ;;  %5255 = vrot.lane.b32.xlu1 %v12609_v6, %s17145_s2 }
 0x3e0   : > { %5001 = vrot.lane.b32.xlu0 %v12578_v3, %s17144_s0 }
 0x3e1   : > { %5711 = vmatprep.mubr.bf16.mxu1 %v11569_v13  ;;  %v5236_v33 = vpop.permute.xlu1 %5235 }
 0x3e2   : > { %v4506_v44 = vpop.permute.xlu0 %4505  ;;  %5712 = vmatmul.mubr.bf16.gmra.mxu1 %v11568_v60  ;;  %5279 = vst.msk [vmem:[#allocation4 + $0x34] sm:$0xf] %vm1322_vm4, %v5236_v33 }
 0x3e3   : > { %4546 = vst.msk [vmem:[#allocation4 + $0x54] sm:$0xf] %vm1064_vm2, %v4506_v44 }
 0x3e4   : > { %4777 = vrot.lane.b32.xlu0 %v12546_v58, %s17145_s2 }
 0x3e5   : > { %v4760_v53 = vpop.permute.xlu1 %4759 }
 0x3e6   : > { %v4634_v40 = vpop.permute.xlu0 %4633  ;;  %4801 = vst.msk [vmem:[#allocation4 + $0x48] sm:$0xf] %vm1322_vm4, %v4760_v53  ;;  %v6174_v53 = vld [vmem:[#allocation3 + $0x5] sm:$0xff] }
 0x3e7   : > { %4674 = vst.msk [vmem:[#allocation4 + $0x54] sm:$0xf] %vm1193_vm3, %v4634_v40  ;;  %v12643_v40 = vpack.c.bf16 %v6174_v53, %v6174_v53 }
 0x3e8   : > { %5257 = vrot.lane.b32.xlu0 %v12610_v19, %s17145_s2 }
 0x3e9   : > { %v4984_v50 = vpop.permute.xlu1 %4983  ;;  %v5395_v7 = vld [vmem:[#allocation4 + $0x30] sm:$0xff]  ;;  %6238 = vrot.lane.b32.xlu1 %v12643_v40, %s17144_s0 }
 0x3ea   : > { %v5110_v45 = vpop.permute.xlu0 %5109  ;;  %5025 = vst.msk [vmem:[#allocation4 + $0x4c] sm:$0xf] %vm1064_vm2, %v4984_v50 }
 0x3eb   : > { %5152 = vst.msk [vmem:[#allocation4 + $0x40] sm:$0xf] %vm1193_vm3, %v5110_v45 }
 0x3ed   : > { %v4508_v37 = vpop.permute.xlu1 %4507 }
 0x3ee   : > { %v5238_v47 = vpop.permute.xlu0 %5237  ;;  %4547 = vst.msk [vmem:[#allocation4 + $0x60] sm:$0xf] %vm1064_vm2, %v4508_v37  ;;  %v6302_v37 = vld [vmem:[#allocation3 + $0x6] sm:$0xff] }
 0x3ef   : > { %5280 = vst.msk [vmem:[#allocation4 + $0x40] sm:$0xf] %vm1322_vm4, %v5238_v47  ;;  %v6797_v47 = vld [vmem:[#allocation3 + $0x92] sm:$0xff] }
 0x3f1   : > { %v4636_v51 = vpop.permute.xlu1 %4635 }
 0x3f2   : > { %v4762_v54 = vpop.permute.xlu0 %4761  ;;  %4675 = vst.msk [vmem:[#allocation4 + $0x60] sm:$0xf] %vm1193_vm3, %v4636_v51  ;;  %v12659_v51 = vpack.c.bf16 %v6302_v37, %v6302_v37 }
 0x3f3   : > { %4802 = vst.msk [vmem:[#allocation4 + $0x54] sm:$0xf] %vm1322_vm4, %v4762_v54  ;;  %v12738_v54 = vpack.c.bf16 %v6797_v47, %v6797_v47 }
 0x3f4   : > { %6366 = vrot.lane.b32.xlu1 %v12659_v51, %s17146_s8 }
 0x3f5   : > { %v5112_v14 = vpop.permute.xlu1 %5111  ;;  %6876 = vrot.lane.b32.xlu0 %v12738_v54, %s17146_s8 }
 0x3f6   : > { %v5397_v20 = vld [vmem:[#allocation4 + $0x3c] sm:$0xff]  ;;  %v4986_v46 = vpop.permute.xlu0 %4985  ;;  %5153 = vst.msk [vmem:[#allocation4 + $0x4c] sm:$0xf] %vm1193_vm3, %v5112_v14 }
 0x3f7   : > { %5026 = vst.msk [vmem:[#allocation4 + $0x58] sm:$0xf] %vm1064_vm2, %v4986_v46  ;;  %v11572_v41 = vcombine.high %v5395_v7, %v5397_v20  ;;  %v11571_v55 = vcombine.low %v5395_v7, %v5397_v20 }
 0x3f9   : > { %5719 = vmatprep.mubr.bf16.mxu1 %v11572_v41  ;;  %v5240_v9 = vpop.permute.xlu1 %5239 }
 0x3fa   : > { %v4510_v56 = vpop.permute.xlu0 %4509  ;;  %5720 = vmatmul.mubr.bf16.gmra.mxu1 %v11571_v55  ;;  %5281 = vst.msk [vmem:[#allocation4 + $0x4c] sm:$0xf] %vm1322_vm4, %v5240_v9 }
 0x3fb   : > { %4548 = vst.msk [vmem:[#allocation4 + $0x6c] sm:$0xf] %vm1064_vm2, %v4510_v56 }
 0x3fd   : > { %v4764_v31 = vpop.permute.xlu1 %4763 }
 0x3fe   : > { %v4638_v57 = vpop.permute.xlu0 %4637  ;;  %4803 = vst.msk [vmem:[#allocation4 + $0x60] sm:$0xf] %vm1322_vm4, %v4764_v31 }
 0x3ff   : > { %4676 = vst.msk [vmem:[#allocation4 + $0x6c] sm:$0xf] %vm1193_vm3, %v4638_v57 }
 0x401   : > { %v4988_v5 = vpop.permute.xlu1 %4987  ;;  %v5399_v26 = vld [vmem:[#allocation4 + $0x48] sm:$0xff] }
 0x402   : > { %v5114_v32 = vpop.permute.xlu0 %5113  ;;  %5027 = vst.msk [vmem:[#allocation4 + $0x64] sm:$0xf] %vm1064_vm2, %v4988_v5 }
 0x403   : > { %5154 = vst.msk [vmem:[#allocation4 + $0x58] sm:$0xf] %vm1193_vm3, %v5114_v32 }
 0x405   : > { %v4512_v61 = vpop.permute.xlu1 %4511 }
 0x406   : > { %v5242_v0 = vpop.permute.xlu0 %5241  ;;  %4549 = vst.msk [vmem:[#allocation4 + $0x78] sm:$0xf] %vm1064_vm2, %v4512_v61 }
 0x407   : > { %5282 = vst.msk [vmem:[#allocation4 + $0x58] sm:$0xf] %vm1322_vm4, %v5242_v0 }
 0x409   : > { %v4640_v4 = vpop.permute.xlu1 %4639 }
 0x40a   : > { %v4766_v21 = vpop.permute.xlu0 %4765  ;;  %4677 = vst.msk [vmem:[#allocation4 + $0x78] sm:$0xf] %vm1193_vm3, %v4640_v4 }
 0x40b   : > { %4804 = vst.msk [vmem:[#allocation4 + $0x6c] sm:$0xf] %vm1322_vm4, %v4766_v21 }
 0x40d   : > { %v5116_v23 = vpop.permute.xlu1 %5115 }
 0x40e   : > { %v5401_v62 = vld [vmem:[#allocation4 + $0x54] sm:$0xff]  ;;  %v4990_v16 = vpop.permute.xlu0 %4989  ;;  %5155 = vst.msk [vmem:[#allocation4 + $0x64] sm:$0xf] %vm1193_vm3, %v5116_v23 }
 0x40f   : > { %5028 = vst.msk [vmem:[#allocation4 + $0x70] sm:$0xf] %vm1064_vm2, %v4990_v16  ;;  %v11575_v25 = vcombine.high %v5399_v26, %v5401_v62  ;;  %v11574_v27 = vcombine.low %v5399_v26, %v5401_v62 }
 0x411   : > { %5727 = vmatprep.mubr.bf16.mxu1 %v11575_v25  ;;  %v5244_v28 = vpop.permute.xlu1 %5243 }
 0x412   : > { %v4514_v24 = vpop.permute.xlu0 %4513  ;;  %5728 = vmatmul.mubr.bf16.gmra.mxu1 %v11574_v27  ;;  %5283 = vst.msk [vmem:[#allocation4 + $0x64] sm:$0xf] %vm1322_vm4, %v5244_v28 }
 0x413   : > { %4550 = vst.msk [vmem:[#allocation4 + $0x84] sm:$0xf] %vm1064_vm2, %v4514_v24 }
 0x415   : > { %v4768_v8 = vpop.permute.xlu1 %4767 }
 0x416   : > { %v4642_v15 = vpop.permute.xlu0 %4641  ;;  %4805 = vst.msk [vmem:[#allocation4 + $0x78] sm:$0xf] %vm1322_vm4, %v4768_v8 }
 0x417   : > { %4678 = vst.msk [vmem:[#allocation4 + $0x84] sm:$0xf] %vm1193_vm3, %v4642_v15 }
 0x419   : > { %v4992_v30 = vpop.permute.xlu1 %4991  ;;  %v5403_v17 = vld [vmem:[#allocation4 + $0x60] sm:$0xff] }
 0x41a   : > { %v5118_v12 = vpop.permute.xlu0 %5117  ;;  %5029 = vst.msk [vmem:[#allocation4 + $0x7c] sm:$0xf] %vm1064_vm2, %v4992_v30 }
 0x41b   : > { %5156 = vst.msk [vmem:[#allocation4 + $0x70] sm:$0xf] %vm1193_vm3, %v5118_v12 }
 0x41d   : > { %v4516_v6 = vpop.permute.xlu1 %4515 }
 0x41e   : > { %v5246_v3 = vpop.permute.xlu0 %5245  ;;  %4551 = vst.msk [vmem:[#allocation4 + $0x90] sm:$0xf] %vm1064_vm2, %v4516_v6 }
 0x41f   : > { %5284 = vst.msk [vmem:[#allocation4 + $0x70] sm:$0xf] %vm1322_vm4, %v5246_v3 }
 0x421   : > { %v4644_v13 = vpop.permute.xlu1 %4643 }
 0x422   : > { %v4770_v60 = vpop.permute.xlu0 %4769  ;;  %4679 = vst.msk [vmem:[#allocation4 + $0x90] sm:$0xf] %vm1193_vm3, %v4644_v13 }
 0x423   : > { %4806 = vst.msk [vmem:[#allocation4 + $0x84] sm:$0xf] %vm1322_vm4, %v4770_v60 }
 0x425   : > { %v5120_v33 = vpop.permute.xlu1 %5119 }
 0x426   : > { %v5405_v18 = vld [vmem:[#allocation4 + $0x6c] sm:$0xff]  ;;  %v4994_v44 = vpop.permute.xlu0 %4993  ;;  %5157 = vst.msk [vmem:[#allocation4 + $0x7c] sm:$0xf] %vm1193_vm3, %v5120_v33 }
 0x427   : > { %5030 = vst.msk [vmem:[#allocation4 + $0x88] sm:$0xf] %vm1064_vm2, %v4994_v44  ;;  %v11578_v58 = vcombine.high %v5403_v17, %v5405_v18  ;;  %v11577_v19 = vcombine.low %v5403_v17, %v5405_v18  ;;  %v13706_v33 = vld [vmem:[%s17138_s26 + $0x110] sm:$0xff]   ;;  %v13440_v44 = vpop.f32.mrf.mxu0 }
 0x429   : > { %5735 = vmatprep.mubr.bf16.mxu1 %v11578_v58  ;;  %v5248_v50 = vpop.permute.xlu1 %5247  ;;  %v5802_v58 = vpop.f32.mrf.mxu0 }
 0x42a   : > { %v4518_v45 = vpop.permute.xlu0 %4517  ;;  %5736 = vmatmul.mubr.bf16.gmra.mxu1 %v11577_v19  ;;  %5285 = vst.msk [vmem:[#allocation4 + $0x7c] sm:$0xf] %vm1322_vm4, %v5248_v50 }
 0x42b   : > { %4552 = vst.msk [vmem:[#allocation4 + $0x9c] sm:$0xf] %vm1064_vm2, %v4518_v45  ;;  %v13441_v50 = vpop.f32.mrf.mxu0 }
 0x42d   : > { %v4772_v7 = vpop.permute.xlu1 %4771 }
 0x42e   : > { %v4646_v20 = vpop.permute.xlu0 %4645  ;;  %4807 = vst.msk [vmem:[#allocation4 + $0x90] sm:$0xf] %vm1322_vm4, %v4772_v7  ;;  %v5805_v7 = vpop.f32.mrf.mxu0 }
 0x42f   : > { %4680 = vst.msk [vmem:[#allocation4 + $0x9c] sm:$0xf] %vm1193_vm3, %v4646_v20  ;;  %v5865_v20 = vld [vmem:[#allocation2] sm:$0xff] }
 0x431   : > { %v4996_v14 = vpop.permute.xlu1 %4995  ;;  %v5407_v31 = vld [vmem:[#allocation4 + $0x78] sm:$0xff] }
 0x432   : > { %v5122_v46 = vpop.permute.xlu0 %5121  ;;  %5031 = vst.msk [vmem:[#allocation4 + $0x94] sm:$0xf] %vm1064_vm2, %v4996_v14 }
 0x433   : > { %5158 = vst.msk [vmem:[#allocation4 + $0x88] sm:$0xf] %vm1193_vm3, %v5122_v46 }
 0x435   : > { %v4520_v41 = vpop.permute.xlu1 %4519 }
 0x436   : > { %v5250_v55 = vpop.permute.xlu0 %5249  ;;  %4553 = vst.msk [vmem:[#allocation4 + $0xa8] sm:$0xf] %vm1064_vm2, %v4520_v41 }
 0x437   : > { %5286 = vst.msk [vmem:[#allocation4 + $0x88] sm:$0xf] %vm1322_vm4, %v5250_v55  ;;  %v5866_v55 = vld [vmem:[#allocation2 + $0x8] sm:$0xff] }
 0x439   : > { %v4648_v9 = vpop.permute.xlu1 %4647 }
 0x43a   : > { %v4774_v56 = vpop.permute.xlu0 %4773  ;;  %4681 = vst.msk [vmem:[#allocation4 + $0xa8] sm:$0xf] %vm1193_vm3, %v4648_v9 }
 0x43b   : > { %4808 = vst.msk [vmem:[#allocation4 + $0x9c] sm:$0xf] %vm1322_vm4, %v4774_v56  ;;  %v15457_v56 = vld [vmem:[%s17139_s30 + $0x1] ss:$0 sm:$0xff] }
 0x43d   : > { %v5124_v5 = vpop.permute.xlu1 %5123 }
 0x43e   : > { %v5409_v57 = vld [vmem:[#allocation4 + $0x84] sm:$0xff]  ;;  %v4998_v32 = vpop.permute.xlu0 %4997  ;;  %5159 = vst.msk [vmem:[#allocation4 + $0x94] sm:$0xf] %vm1193_vm3, %v5124_v5 }
 0x43f   : > { %5032 = vst.msk [vmem:[#allocation4 + $0xa0] sm:$0xf] %vm1064_vm2, %v4998_v32  ;;  %v11581_v61 = vcombine.high %v5407_v31, %v5409_v57  ;;  %v11580_v0 = vcombine.low %v5407_v31, %v5409_v57  ;;  %v15462_v57 = vld [vmem:[%s17140_s22 + $0x1] ss:$0 sm:$0xff] }
 0x441   : > { %5743 = vmatprep.mubr.bf16.mxu1 %v11581_v61  ;;  %v5252_v4 = vpop.permute.xlu1 %5251 }
 0x442   : > { %v4522_v21 = vpop.permute.xlu0 %4521  ;;  %5744 = vmatmul.mubr.bf16.gmra.mxu1 %v11580_v0  ;;  %5287 = vst.msk [vmem:[#allocation4 + $0x94] sm:$0xf] %vm1322_vm4, %v5252_v4  ;;  %v6078_v0 = vld [vmem:[#allocation3 + $0x4] sm:$0xff] }
 0x443   : > { %4554 = vst.msk [vmem:[#allocation4 + $0xb4] sm:$0xf] %vm1064_vm2, %v4522_v21  ;;  %v12627_v21 = vpack.c.bf16 %v6078_v0, %v6078_v0 }
 0x445   : > { %v4776_v26 = vpop.permute.xlu1 %4775  ;;  %6158 = vst.msk [vmem:[#allocation4] sm:$0xf] %vm935_vm1, %v12627_v21 }
 0x446   : > { %v4650_v62 = vpop.permute.xlu0 %4649  ;;  %4809 = vst.msk [vmem:[#allocation4 + $0xa8] sm:$0xf] %vm1322_vm4, %v4776_v26 }
 0x447   : > { %4682 = vst.msk [vmem:[#allocation4 + $0xb4] sm:$0xf] %vm1193_vm3, %v4650_v62 }
 0x449   : > { %v5000_v23 = vpop.permute.xlu1 %4999  ;;  %v5411_v8 = vld [vmem:[#allocation4 + $0x90] sm:$0xff] }
 0x44a   : > { %v5126_v16 = vpop.permute.xlu0 %5125  ;;  %5033 = vst.msk [vmem:[#allocation4 + $0xac] sm:$0xf] %vm1064_vm2, %v5000_v23 }
 0x44b   : > { %5160 = vst.msk [vmem:[#allocation4 + $0xa0] sm:$0xf] %vm1193_vm3, %v5126_v16 }
 0x44d   : > { %v5128_v25 = vpop.permute.xlu1 %5127 }
 0x44e   : > { %v5254_v27 = vpop.permute.xlu0 %5253  ;;  %5161 = vst.msk [vmem:[#allocation4 + $0xac] sm:$0xf] %vm1193_vm3, %v5128_v25 }
 0x44f   : > { %5288 = vst.msk [vmem:[#allocation4 + $0xa0] sm:$0xf] %vm1322_vm4, %v5254_v27 }
 0x450   : > { %v15491_v21 = vpop.f32.mrf.mxu0 }
 0x451   : > { %v5256_v28 = vpop.permute.xlu1 %5255 }
 0x452   : > { %v5002_v24 = vpop.permute.xlu0 %5001  ;;  %5289 = vst.msk [vmem:[#allocation4 + $0xac] sm:$0xf] %vm1322_vm4, %v5256_v28 }
 0x453   : > { %5034 = vst.msk [vmem:[#allocation4 + $0xb8] sm:$0xf] %vm1064_vm2, %v5002_v24 }
 0x454   : > { %5162 = vst.msk [vmem:[#allocation4 + $0xb8] sm:$0xf] %vm1193_vm3, %v15249_v43  ;;  %v13705_v43 = vld [vmem:[%s17138_s26 + $0x118] sm:$0xff]  }
 0x455   : > { %13454 = vmatprep.subr.bf16.mxu1 %v13705_v43 }
 0x456   : > { %v5413_v15 = vld [vmem:[#allocation4 + $0x9c] sm:$0xff]  ;;  %v4778_v30 = vpop.permute.xlu0 %4777  ;;  %13455 = vmatpush3.bf16.msra.mxu1 %v13705_v43 }
 0x457   : > { %4810 = vst.msk [vmem:[#allocation4 + $0xb4] sm:$0xf] %vm1322_vm4, %v4778_v30  ;;  %v11584_v12 = vcombine.high %v5411_v8, %v5413_v15  ;;  %v11583_v6 = vcombine.low %v5411_v8, %v5413_v15  ;;  %13456 = vmatprep.subr.bf16.mxu1 %v13706_v33 }
 0x459   : > { %5751 = vmatprep.mubr.bf16.mxu1 %v11584_v12  ;;  %v5415_v13 = vld [vmem:[#allocation4 + $0xa8] sm:$0xff] }
 0x45a   : > { %v5258_v3 = vpop.permute.xlu0 %5257  ;;  %5752 = vmatmul.mubr.bf16.gmra.mxu1 %v11583_v6 }
 0x45b   : > { %5290 = vst.msk [vmem:[#allocation4 + $0xb8] sm:$0xf] %vm1322_vm4, %v5258_v3  ;;  %13457 = vmatpush3.bf16.msra.mxu1 %v13706_v33  ;;  %v6239_v32 = vpop.permute.xlu1 %6238 }
 0x45c   : > { %6286 = vst.msk [vmem:[#allocation4] sm:$0xf] %vm1064_vm2, %v6239_v32 }
 0x462   : > { %v5417_v60 = vld [vmem:[#allocation4 + $0xb4] sm:$0xff] }
 0x463   : > { %v11587_v17 = vcombine.high %v5415_v13, %v5417_v60  ;;  %v11586_v18 = vcombine.low %v5415_v13, %v5417_v60  ;;  %v5867_v60 = vld [vmem:[#allocation2 + $0x10] sm:$0xff] }
 0x465   : > { %5759 = vmatprep.mubr.bf16.mxu1 %v11587_v17 }
 0x466   : > { %5760 = vmatmul.mubr.bf16.gmra.mxu1 %v11586_v18  ;;  %v6367_v27 = vpop.permute.xlu1 %6366 }
 0x467   : > { %6414 = vst.msk [vmem:[#allocation4] sm:$0xf] %vm1193_vm3, %v6367_v27 }
 0x48a   : > { %v13098_v19 = vpop.f32.mrf.mxu1 }
 0x48c   : > { %v13099_v53 = vpop.f32.mrf.mxu1 }
 0x48d   : > { %v13100_v40 = vadd.f32 %v13099_v53, %v13098_v19 }
 0x48e   : > { %v13101_v45 = vpop.f32.mrf.mxu1 }
 0x48f   : > { %v5803_v37 = vadd.f32 %v13100_v40, %v5802_v58 }
 0x490   : > { %v13102_v47 = vpop.f32.mrf.mxu1 }
 0x491   : > { %v5881_v51 = vmul.f32 %v5803_v37, %v14572_v48  ;;  %v13103_v54 = vadd.f32 %v13102_v47, %v13101_v45 }
 0x493   : > { %v5897_v14 = vadd.f32 %v5881_v51, %v5865_v20  ;;  %v5806_v46 = vadd.f32 %v13103_v54, %v5805_v7 }
 0x495   : > { %5913 = vst.msk [vmem:[#allocation2] sm:$0xff] %vm766_vm0, %v5897_v14  ;;  %v5882_v41 = vmul.f32 %v5806_v46, %v14560_v34 }
 0x497   : > { %v5898_v9 = vadd.f32 %v5882_v41, %v5866_v55 }
 0x499   : > { %5914 = vst.msk [vmem:[#allocation2 + $0x8] sm:$0xff] %vm766_vm0, %v5898_v9 }
 0x49c   : > { %v5929_v31 = vld [vmem:[#allocation2] sm:$0xff] }
 0x49d   : > { %v5953_v5 = vmul.f32 %v15457_v56, %v5929_v31 }
 0x49f   : > { %v5977_v61 = vadd.f32 %v15462_v57, %v5953_v5 }
 0x4a0   : > { %v5930_v4 = vld [vmem:[#allocation2 + $0x8] sm:$0xff] }
 0x4a1   : > { %v5993_v26 = vmax.f32 %v5977_v61, 0.0  ;;  %v5954_v62 = vmul.f32 %v15457_v56, %v5930_v4  ;;  %v13710_v4 = vld [vmem:[%s17138_s26 + $0x108] sm:$0xff]  }
 0x4a2   : > { %v13104_v23 = vpop.f32.mrf.mxu1  ;;  %13156 = vmatprep.subr.bf16.mxu0 %v13710_v4 }
 0x4a3   : > { %v6009_v16 = vmul.f32 %v5993_v26, %v14572_v48  ;;  %v5978_v25 = vadd.f32 %v15462_v57, %v5954_v62  ;;  %v13712_v62 = vld [vmem:[%s17138_s26 + $0xc8] sm:$0xff]  }
 0x4a4   : > { %v13105_v28 = vpop.f32.mrf.mxu1  ;;  %13157 = vmatpush3.bf16.msra.mxu0 %v13712_v62  ;;  %v13720_v62 = vld [vmem:[%s17138_s26 + $0xa8] sm:$0xff]  }
 0x4a5   : > { %6025 = vst.msk [vmem:[#allocation3 + $0x10] sm:$0xff] %vm766_vm0, %v6009_v16  ;;  %v5994_v24 = vmax.f32 %v5978_v25, 0.0  ;;  %v13106_v8 = vadd.f32 %v13105_v28, %v13104_v23 }
 0x4a6   : > { %v13107_v15 = vpop.f32.mrf.mxu1 }
 0x4a7   : > { %v6010_v30 = vmul.f32 %v5994_v24, %v14560_v34  ;;  %v5811_v12 = vadd.f32 %v13440_v44, %v13106_v8  ;;  %v5868_v44 = vld [vmem:[#allocation2 + $0x18] sm:$0xff]  ;;  %v13713_v24 = vld [vmem:[%s17138_s26 + $0x100] sm:$0xff]   ;;  %v5818_v8 = vpop.f32.mrf.mxu0 }
 0x4a8   : > { %v13108_v6 = vpop.f32.mrf.mxu1  ;;  %13158 = vmatprep.subr.bf16.mxu0 %v13713_v24 }
 0x4a9   : > { %6026 = vst.msk [vmem:[#allocation3 + $0x18] sm:$0xff] %vm766_vm0, %v6010_v30  ;;  %v5883_v3 = vmul.f32 %v5811_v12, %v14562_v22  ;;  %v13109_v13 = vadd.f32 %v13108_v6, %v13107_v15  ;;  %v13714_v30 = vld [vmem:[%s17138_s26 + $0xc0] sm:$0xff]  }
 0x4aa   : > { %13159 = vmatpush3.bf16.msra.mxu0 %v13714_v30 }
 0x4ab   : > { %v5899_v17 = vadd.f32 %v5883_v3, %v5867_v60  ;;  %v5814_v18 = vadd.f32 %v13441_v50, %v13109_v13 }
 0x4ac   : > { %v6430_v43 = vld [vmem:[#allocation3 + $0xf] sm:$0xff] }
 0x4ad   : > { %v6175_v33 = vld [vmem:[#allocation3 + $0xd] sm:$0xff]  ;;  %5915 = vst.msk [vmem:[#allocation2 + $0x10] sm:$0xff] %vm766_vm0, %v5899_v17  ;;  %v5884_v58 = vmul.f32 %v5814_v18, %v14606_v39  ;;  %v12675_v19 = vpack.c.bf16 %v6430_v43, %v6430_v43  ;;  %v13715_v17 = vld [vmem:[%s17138_s26 + $0xf8] sm:$0xff]   ;;  %v15513_v18 = vpop.f32.mrf.mxu0 }
 0x4ae   : > { %v12644_v53 = vpack.c.bf16 %v6175_v33, %v6175_v33  ;;  %v6079_v40 = vld [vmem:[#allocation3 + $0xc] sm:$0xff]  ;;  %v13716_v33 = vld [vmem:[%s17138_s26 + $0xb8] sm:$0xff]   ;;  %13160 = vmatprep.subr.bf16.mxu0 %v13715_v17 }
 0x4af   : > { %v6558_v45 = vld [vmem:[#allocation3 + $0x10] sm:$0xff]  ;;  %v12628_v47 = vpack.c.bf16 %v6079_v40, %v6079_v40  ;;  %v5900_v54 = vadd.f32 %v5884_v58, %v5868_v44  ;;  %6494 = vrot.lane.b32.xlu1 %v12675_v19, %s17145_s2  ;;  %13161 = vmatpush3.bf16.msra.mxu0 %v13716_v33 }
 0x4b0   : > { %v6303_v37 = vld [vmem:[#allocation3 + $0xe] sm:$0xff]  ;;  %v12691_v51 = vpack.c.bf16 %v6558_v45, %v6558_v45  ;;  %6240 = vrot.lane.b32.xlu0 %v12644_v53, %s17144_s0  ;;  %v6559_v46 = vld [vmem:[#allocation3 + $0x18] sm:$0xff] }
 0x4b1   : > { %v6654_v50 = vld [vmem:[#allocation3 + $0x11] sm:$0xff]  ;;  %6159 = vst.msk [vmem:[#allocation4 + $0xc] sm:$0xf] %vm935_vm1, %v12628_v47  ;;  %v12660_v20 = vpack.c.bf16 %v6303_v37, %v6303_v37  ;;  %v12692_v31 = vpack.c.bf16 %v6559_v46, %v6559_v46  ;;  %v5821_v37 = vpop.f32.mrf.mxu0  ;;  %v5869_v47 = vld [vmem:[#allocation2 + $0x20] sm:$0xff] }
 0x4b2   : > { %6638 = vst.msk [vmem:[#allocation4 + $0x4] sm:$0xf] %vm935_vm1, %v12691_v51  ;;  %v12707_v7 = vpack.c.bf16 %v6654_v50, %v6654_v50  ;;  %v6080_v14 = vld [vmem:[#allocation3 + $0x14] sm:$0xff] }
 0x4b3   : > { %5916 = vst.msk [vmem:[#allocation2 + $0x18] sm:$0xff] %vm766_vm0, %v5900_v54  ;;  %v6176_v41 = vld [vmem:[#allocation3 + $0x15] sm:$0xff]  ;;  %v12629_v9 = vpack.c.bf16 %v6080_v14, %v6080_v14  ;;  %v5870_v14 = vld [vmem:[#allocation2 + $0x28] sm:$0xff] }
 0x4b4   : > { %v6431_v55 = vld [vmem:[#allocation3 + $0x17] sm:$0xff]  ;;  %6718 = vrot.lane.b32.xlu1 %v12707_v7, %s17144_s0  ;;  %6368 = vrot.lane.b32.xlu0 %v12660_v20, %s17146_s8  ;;  %6639 = vst.msk [vmem:[#allocation4 + $0x10] sm:$0xf] %vm935_vm1, %v12692_v31  ;;  %v12645_v61 = vpack.c.bf16 %v6176_v41, %v6176_v41 }
 0x4b5   : > { %v5931_v5 = vld [vmem:[#allocation2 + $0x10] sm:$0xff]  ;;  %6160 = vst.msk [vmem:[#allocation4 + $0x18] sm:$0xf] %vm935_vm1, %v12629_v9  ;;  %v12676_v0 = vpack.c.bf16 %v6431_v55, %v6431_v55 }
 0x4b6   : > { %v5955_v32 = vmul.f32 %v15457_v56, %v5931_v5  ;;  %v6304_v26 = vld [vmem:[#allocation3 + $0x16] sm:$0xff] }
 0x4b7   : > { %v12661_v28 = vpack.c.bf16 %v6304_v26, %v6304_v26  ;;  %v13717_v44 = vld [vmem:[%s17138_s26 + $0xf0] sm:$0xff]  }
 0x4b8   : > { %v5979_v23 = vadd.f32 %v15462_v57, %v5955_v32  ;;  %6242 = vrot.lane.b32.xlu1 %v12645_v61, %s17144_s0  ;;  %6496 = vrot.lane.b32.xlu0 %v12676_v0, %s17145_s2  ;;  %v13718_v51 = vld [vmem:[%s17138_s26 + $0xb0] sm:$0xff]   ;;  %v13719_v32 = vld [vmem:[%s17138_s26 + $0xe8] sm:$0xff]  }
 0x4b9   : > { %13162 = vmatprep.subr.bf16.mxu0 %v13717_v44 }
 0x4ba   : > { %v5932_v16 = vld [vmem:[#allocation2 + $0x18] sm:$0xff]  ;;  %v5995_v25 = vmax.f32 %v5979_v23, 0.0  ;;  %v13110_v15 = vpop.f32.mrf.mxu1  ;;  %13163 = vmatpush3.bf16.msra.mxu0 %v13718_v51  ;;  %v13721_v23 = vld [vmem:[%s17138_s26 + $0xe0] sm:$0xff]  }
 0x4bb   : > { %v5956_v27 = vmul.f32 %v15457_v56, %v5932_v16  ;;  %13164 = vmatprep.subr.bf16.mxu0 %v13719_v32 }
 0x4bc   : > { %v6011_v12 = vmul.f32 %v5995_v25, %v14562_v22  ;;  %6370 = vrot.lane.b32.xlu1 %v12661_v28, %s17146_s8  ;;  %v13111_v3 = vpop.f32.mrf.mxu1 }
 0x4bd   : > { %v5980_v6 = vadd.f32 %v15462_v57, %v5956_v27  ;;  %v13112_v60 = vadd.f32 %v13111_v3, %v13110_v15  ;;  %v13722_v15 = vld [vmem:[%s17138_s26 + $0xa0] sm:$0xff]  }
 0x4be   : > { %6027 = vst.msk [vmem:[#allocation3 + $0x20] sm:$0xff] %vm766_vm0, %v6011_v12  ;;  %v13113_v43 = vpop.f32.mrf.mxu1  ;;  %13165 = vmatpush3.bf16.msra.mxu0 %v13720_v62  ;;  %v13723_v12 = vld [vmem:[%s17138_s26 + $0xd8] sm:$0xff]  }
 0x4bf   : > { %v5996_v13 = vmax.f32 %v5980_v6, 0.0  ;;  %v5819_v19 = vadd.f32 %v13112_v60, %v5818_v8  ;;  %13166 = vmatprep.subr.bf16.mxu0 %v13721_v23 }
 0x4c0   : > { %v13114_v53 = vpop.f32.mrf.mxu1 }
 0x4c1   : > { %v6012_v58 = vmul.f32 %v5996_v13, %v14606_v39  ;;  %v5885_v40 = vmul.f32 %v5819_v19, %v14564_v35  ;;  %v13115_v45 = vadd.f32 %v13114_v53, %v13113_v43  ;;  %v13726_v53 = vld [vmem:[%s17138_s26 + $0xd0] sm:$0xff]  }
 0x4c2   : > { %13167 = vmatpush3.bf16.msra.mxu0 %v13722_v15 }
 0x4c3   : > { %6028 = vst.msk [vmem:[#allocation3 + $0x28] sm:$0xff] %vm766_vm0, %v6012_v58  ;;  %v5901_v54 = vadd.f32 %v5885_v40, %v5869_v47  ;;  %v5822_v50 = vadd.f32 %v13115_v45, %v5821_v37  ;;  %13168 = vmatprep.subr.bf16.mxu0 %v13723_v12  ;;  %v13725_v58 = vld [vmem:[%s17138_s26 + $0x98] sm:$0xff]  }
 0x4c5   : > { %v6782_v7 = vld [vmem:[#allocation3 + $0x1a] sm:$0xff]  ;;  %5917 = vst.msk [vmem:[#allocation2 + $0x20] sm:$0xff] %vm766_vm0, %v5901_v54  ;;  %v5886_v46 = vmul.f32 %v5822_v50, %v14661_v63 }
 0x4c6   : > { %v6655_v20 = vld [vmem:[#allocation3 + $0x19] sm:$0xff]  ;;  %v12723_v41 = vpack.c.bf16 %v6782_v7, %v6782_v7  ;;  %13169 = vmatpush3.bf16.msra.mxu0 %v13725_v58 }
 0x4c7   : > { %v12708_v55 = vpack.c.bf16 %v6655_v20, %v6655_v20  ;;  %v6910_v9 = vld [vmem:[#allocation3 + $0x1b] sm:$0xff]  ;;  %v5902_v0 = vadd.f32 %v5886_v46, %v5870_v14  ;;  %13170 = vmatprep.subr.bf16.mxu0 %v13726_v53  ;;  %v13727_v20 = vld [vmem:[%s17138_s26 + $0x90] sm:$0xff]  }
 0x4c8   : > { %v6177_v31 = vld [vmem:[#allocation3 + $0x1d] sm:$0xff]  ;;  %6846 = vrot.lane.b32.xlu1 %v12723_v41, %s17146_s8  ;;  %v12739_v25 = vpack.c.bf16 %v6910_v9, %v6910_v9 }
 0x4c9   : > { %v7038_v5 = vld [vmem:[#allocation3 + $0x1c] sm:$0xff]  ;;  %6720 = vrot.lane.b32.xlu0 %v12708_v55, %s17144_s0  ;;  %5918 = vst.msk [vmem:[#allocation2 + $0x28] sm:$0xff] %vm766_vm0, %v5902_v0  ;;  %v12646_v27 = vpack.c.bf16 %v6177_v31, %v6177_v31 }
 0x4ca   : > { %v6560_v61 = vld [vmem:[#allocation3 + $0x20] sm:$0xff]  ;;  %v12755_v4 = vpack.c.bf16 %v7038_v5, %v7038_v5  ;;  %v6561_v30 = vld [vmem:[#allocation3 + $0x28] sm:$0xff]  ;;  %13171 = vmatpush3.bf16.msra.mxu0 %v13727_v20 }
 0x4cb   : > { %v12693_v26 = vpack.c.bf16 %v6560_v61, %v6560_v61  ;;  %v7039_v16 = vld [vmem:[#allocation3 + $0x24] sm:$0xff]  ;;  %v12694_v6 = vpack.c.bf16 %v6561_v30, %v6561_v30  ;;  %v5872_v30 = vld [vmem:[#allocation2 + $0x38] sm:$0xff] }
 0x4cc   : > { %v6432_v28 = vld [vmem:[#allocation3 + $0x1f] sm:$0xff]  ;;  %v12756_v24 = vpack.c.bf16 %v7039_v16, %v7039_v16  ;;  %7118 = vst.msk [vmem:[#allocation4 + $0x8] sm:$0xf] %vm935_vm1, %v12755_v4  ;;  %6161 = vst.msk [vmem:[#allocation4 + $0x24] sm:$0xf] %vm935_vm1, %v12755_v4  ;;  %6974 = vrot.lane.b32.xlu1 %v12739_v25, %s17145_s2  ;;  %v6433_v0 = vld [vmem:[#allocation3 + $0x27] sm:$0xff] }
 0x4cd   : > { %6640 = vst.msk [vmem:[#allocation4 + $0x1c] sm:$0xf] %vm935_vm1, %v12693_v26  ;;  %v6305_v8 = vld [vmem:[#allocation3 + $0x1e] sm:$0xff]  ;;  %6244 = vrot.lane.b32.xlu0 %v12646_v27, %s17144_s0  ;;  %v12677_v60 = vpack.c.bf16 %v6432_v28, %v6432_v28  ;;  %6641 = vst.msk [vmem:[#allocation4 + $0x28] sm:$0xf] %vm935_vm1, %v12694_v6  ;;  %v6306_v61 = vld [vmem:[#allocation3 + $0x26] sm:$0xff]  ;;  %v12678_v27 = vpack.c.bf16 %v6433_v0, %v6433_v0 }
 0x4ce   : > { %7119 = vst.msk [vmem:[#allocation4 + $0x14] sm:$0xf] %vm935_vm1, %v12756_v24  ;;  %6162 = vst.msk [vmem:[#allocation4 + $0x30] sm:$0xf] %vm935_vm1, %v12756_v24  ;;  %v5933_v3 = vld [vmem:[#allocation2 + $0x20] sm:$0xff]  ;;  %v12662_v17 = vpack.c.bf16 %v6305_v8, %v6305_v8  ;;  %v12663_v25 = vpack.c.bf16 %v6306_v61, %v6306_v61  ;;  %v5871_v28 = vld [vmem:[#allocation2 + $0x30] sm:$0xff] }
 0x4cf   : > { %v5957_v13 = vmul.f32 %v15457_v56, %v5933_v3  ;;  %v6656_v43 = vld [vmem:[#allocation3 + $0x21] sm:$0xff] }
 0x4d0   : > { %v6783_v33 = vld [vmem:[#allocation3 + $0x22] sm:$0xff]  ;;  %6498 = vrot.lane.b32.xlu1 %v12677_v60, %s17145_s2  ;;  %v12709_v37 = vpack.c.bf16 %v6656_v43, %v6656_v43 }
 0x4d1   : > { %v5981_v19 = vadd.f32 %v15462_v57, %v5957_v13  ;;  %6372 = vrot.lane.b32.xlu0 %v12662_v17, %s17146_s8  ;;  %v5934_v40 = vld [vmem:[#allocation2 + $0x28] sm:$0xff]  ;;  %v12724_v47 = vpack.c.bf16 %v6783_v33, %v6783_v33 }
 0x4d2   : > { %v5958_v44 = vmul.f32 %v15457_v56, %v5934_v40  ;;  %v6178_v51 = vld [vmem:[#allocation3 + $0x25] sm:$0xff]  ;;  %v13116_v50 = vpop.f32.mrf.mxu1 }
 0x4d3   : > { %v5997_v45 = vmax.f32 %v5981_v19, 0.0  ;;  %v6911_v54 = vld [vmem:[#allocation3 + $0x23] sm:$0xff]  ;;  %v12647_v31 = vpack.c.bf16 %v6178_v51, %v6178_v51 }
 0x4d4   : > { %v5982_v46 = vadd.f32 %v15462_v57, %v5958_v44  ;;  %6722 = vrot.lane.b32.xlu1 %v12709_v37, %s17144_s0  ;;  %v13117_v41 = vpop.f32.mrf.mxu1  ;;  %v12740_v5 = vpack.c.bf16 %v6911_v54, %v6911_v54 }
 0x4d5   : > { %v13704_v7 = vld [vmem:[#allocation4 + $0x8] ss:$12 sps:$4 sm:$0xff]   ;;  %v6013_v14 = vmul.f32 %v5997_v45, %v14564_v35  ;;  %6848 = vrot.lane.b32.xlu0 %v12724_v47, %s17146_s8  ;;  %v13118_v9 = vadd.f32 %v13117_v41, %v13116_v50 }
 0x4d6   : > { %13458 = vmatprep.mubr.msk.bf16.mxu1 %vm766_vm0, %v13704_v7  ;;  %v5998_v55 = vmax.f32 %v5982_v46, 0.0  ;;  %v13119_v32 = vpop.f32.mrf.mxu1 }
 0x4d7   : > { %6029 = vst.msk [vmem:[#allocation3 + $0x30] sm:$0xff] %vm766_vm0, %v6013_v14  ;;  %v5827_v26 = vadd.f32 %v15491_v21, %v13118_v9  ;;  %v15598_v14 = vpop.f32.mrf.mxu0 }
 0x4d8   : > { %v6014_v4 = vmul.f32 %v5998_v55, %v14661_v63  ;;  %6246 = vrot.lane.b32.xlu1 %v12647_v31, %s17144_s0  ;;  %v13120_v62 = vpop.f32.mrf.mxu1 }
 0x4d9   : > { %6976 = vrot.lane.b32.xlu0 %v12740_v5, %s17145_s2  ;;  %v5887_v23 = vmul.f32 %v5827_v26, %v14566_v36  ;;  %v13121_v16 = vadd.f32 %v13120_v62, %v13119_v32 }
 0x4da   : > { %6030 = vst.msk [vmem:[#allocation3 + $0x38] sm:$0xff] %vm766_vm0, %v6014_v4  ;;  %v5834_v4 = vpop.f32.mrf.mxu0 }
 0x4db   : > { %v5903_v24 = vadd.f32 %v5887_v23, %v5871_v28  ;;  %v5830_v8 = vadd.f32 %v15513_v18, %v13121_v16 }
 0x4dc   : > { %6374 = vrot.lane.b32.xlu1 %v12663_v25, %s17146_s8 }
 0x4dd   : > { %6500 = vrot.lane.b32.xlu0 %v12678_v27, %s17145_s2  ;;  %5919 = vst.msk [vmem:[#allocation2 + $0x30] sm:$0xff] %vm766_vm0, %v5903_v24  ;;  %v5888_v12 = vmul.f32 %v5830_v8, %v14722_v11 }
 0x4de   : > { %v6784_v21 = vld [vmem:[#allocation3 + $0x2a] sm:$0xff] }
 0x4df   : > { %v6657_v15 = vld [vmem:[#allocation3 + $0x29] sm:$0xff]  ;;  %v12725_v6 = vpack.c.bf16 %v6784_v21, %v6784_v21  ;;  %v5904_v33 = vadd.f32 %v5888_v12, %v5872_v30 }
 0x4e0   : > { %v12710_v3 = vpack.c.bf16 %v6657_v15, %v6657_v15  ;;  %v6912_v13 = vld [vmem:[#allocation3 + $0x2b] sm:$0xff]  ;;  %v15610_v15 = vpop.f32.mrf.mxu0 }
 0x4e1   : > { %v6179_v60 = vld [vmem:[#allocation3 + $0x2d] sm:$0xff]  ;;  %6850 = vrot.lane.b32.xlu1 %v12725_v6, %s17146_s8  ;;  %5920 = vst.msk [vmem:[#allocation2 + $0x38] sm:$0xff] %vm766_vm0, %v5904_v33  ;;  %v12741_v53 = vpack.c.bf16 %v6912_v13, %v6912_v13  ;;  %v6563_v47 = vld [vmem:[#allocation3 + $0x38] sm:$0xff] }
 0x4e2   : > { %v7040_v17 = vld [vmem:[#allocation3 + $0x2c] sm:$0xff]  ;;  %6724 = vrot.lane.b32.xlu0 %v12710_v3, %s17144_s0  ;;  %v7041_v19 = vld [vmem:[#allocation3 + $0x34] sm:$0xff]  ;;  %v12648_v40 = vpack.c.bf16 %v6179_v60, %v6179_v60  ;;  %v12696_v51 = vpack.c.bf16 %v6563_v47, %v6563_v47 }
 0x4e3   : > { %v6562_v43 = vld [vmem:[#allocation3 + $0x30] sm:$0xff]  ;;  %v12757_v18 = vpack.c.bf16 %v7040_v17, %v7040_v17  ;;  %v12758_v45 = vpack.c.bf16 %v7041_v19, %v7041_v19  ;;  %v5873_v19 = vld [vmem:[#allocation2 + $0x40] sm:$0xff] }
 0x4e4   : > { %v12695_v58 = vpack.c.bf16 %v6562_v43, %v6562_v43  ;;  %v6434_v44 = vld [vmem:[#allocation3 + $0x2f] sm:$0xff]  ;;  %6643 = vst.msk [vmem:[#allocation4 + $0x40] sm:$0xf] %vm935_vm1, %v12696_v51  ;;  %v6435_v6 = vld [vmem:[#allocation3 + $0x37] sm:$0xff] }
 0x4e5   : > { %7120 = vst.msk [vmem:[#allocation4 + $0x20] sm:$0xf] %vm935_vm1, %v12757_v18  ;;  %6163 = vst.msk [vmem:[#allocation4 + $0x3c] sm:$0xf] %vm935_vm1, %v12757_v18  ;;  %v6307_v37 = vld [vmem:[#allocation3 + $0x2e] sm:$0xff]  ;;  %6978 = vrot.lane.b32.xlu1 %v12741_v53, %s17145_s2  ;;  %v12679_v7 = vpack.c.bf16 %v6434_v44, %v6434_v44  ;;  %v6308_v12 = vld [vmem:[#allocation3 + $0x36] sm:$0xff]  ;;  %v12680_v18 = vpack.c.bf16 %v6435_v6, %v6435_v6 }
 0x4e6   : > { %6642 = vst.msk [vmem:[#allocation4 + $0x34] sm:$0xf] %vm935_vm1, %v12695_v58  ;;  %6248 = vrot.lane.b32.xlu0 %v12648_v40, %s17144_s0  ;;  %7121 = vst.msk [vmem:[#allocation4 + $0x2c] sm:$0xf] %vm935_vm1, %v12758_v45  ;;  %v5935_v54 = vld [vmem:[#allocation2 + $0x30] sm:$0xff]  ;;  %v12664_v20 = vpack.c.bf16 %v6307_v37, %v6307_v37  ;;  %v12665_v33 = vpack.c.bf16 %v6308_v12, %v6308_v12  ;;  %v5837_v58 = vpop.f32.mrf.mxu0  ;;  %v5874_v37 = vld [vmem:[#allocation2 + $0x48] sm:$0xff] }
 0x4e7   : > { %6164 = vst.msk [vmem:[#allocation4 + $0x48] sm:$0xf] %vm935_vm1, %v12758_v45  ;;  %v5959_v50 = vmul.f32 %v15457_v56, %v5935_v54  ;;  %v6658_v46 = vld [vmem:[#allocation3 + $0x31] sm:$0xff] }
 0x4e8   : > { %v6785_v41 = vld [vmem:[#allocation3 + $0x32] sm:$0xff]  ;;  %v12711_v32 = vpack.c.bf16 %v6658_v46, %v6658_v46 }
 0x4e9   : > { %v5983_v55 = vadd.f32 %v15462_v57, %v5959_v50  ;;  %6502 = vrot.lane.b32.xlu1 %v12679_v7, %s17145_s2  ;;  %v5936_v9 = vld [vmem:[#allocation2 + $0x38] sm:$0xff]  ;;  %v12726_v61 = vpack.c.bf16 %v6785_v41, %v6785_v41 }
 0x4ea   : > { %6376 = vrot.lane.b32.xlu0 %v12664_v20, %s17146_s8  ;;  %v5960_v5 = vmul.f32 %v15457_v56, %v5936_v9  ;;  %v6180_v0 = vld [vmem:[#allocation3 + $0x35] sm:$0xff]  ;;  %v13122_v26 = vpop.f32.mrf.mxu1 }
 0x4eb   : > { %v5999_v31 = vmax.f32 %v5983_v55, 0.0  ;;  %v6913_v23 = vld [vmem:[#allocation3 + $0x33] sm:$0xff]  ;;  %v12649_v8 = vpack.c.bf16 %v6180_v0, %v6180_v0 }
 0x4ec   : > { %v5984_v25 = vadd.f32 %v15462_v57, %v5960_v5  ;;  %v13123_v27 = vpop.f32.mrf.mxu1  ;;  %v12742_v21 = vpack.c.bf16 %v6913_v23, %v6913_v23 }
 0x4ed   : > { %v13707_v62 = vld [vmem:[#allocation4 + $0x20] ss:$12 sps:$4 sm:$0xff]   ;;  %v6015_v16 = vmul.f32 %v5999_v31, %v14566_v36  ;;  %6726 = vrot.lane.b32.xlu1 %v12711_v32, %s17144_s0  ;;  %v13124_v24 = vadd.f32 %v13123_v27, %v13122_v26 }
 0x4ee   : > { %6852 = vrot.lane.b32.xlu0 %v12726_v61, %s17146_s8  ;;  %13459 = vmatmul.mubr.msk.bf16.vlgmr.msra.gmra.mxu1 %vm766_vm0, %v13707_v62  ;;  %v6000_v28 = vmax.f32 %v5984_v25, 0.0  ;;  %v13125_v30 = vpop.f32.mrf.mxu1 }
 0x4ef   : > { %6031 = vst.msk [vmem:[#allocation3 + $0x40] sm:$0xff] %vm766_vm0, %v6015_v16  ;;  %v5835_v13 = vadd.f32 %v13124_v24, %v5834_v4 }
 0x4f0   : > { %v6016_v3 = vmul.f32 %v6000_v28, %v14722_v11  ;;  %v13126_v60 = vpop.f32.mrf.mxu1 }
 0x4f1   : > { %6250 = vrot.lane.b32.xlu1 %v12649_v8, %s17144_s0  ;;  %v5889_v17 = vmul.f32 %v5835_v13, %v14568_v38  ;;  %v13127_v43 = vadd.f32 %v13126_v60, %v13125_v30 }
 0x4f2   : > { %6980 = vrot.lane.b32.xlu0 %v12742_v21, %s17145_s2  ;;  %6032 = vst.msk [vmem:[#allocation3 + $0x48] sm:$0xff] %vm766_vm0, %v6016_v3 }
 0x4f3   : > { %v5905_v53 = vadd.f32 %v5889_v17, %v5873_v19  ;;  %v5838_v40 = vadd.f32 %v13127_v43, %v5837_v58 }
 0x4f5   : > { %6378 = vrot.lane.b32.xlu1 %v12665_v33, %s17146_s8  ;;  %5921 = vst.msk [vmem:[#allocation2 + $0x40] sm:$0xff] %vm766_vm0, %v5905_v53  ;;  %v5890_v47 = vmul.f32 %v5838_v40, %v14761_v10 }
 0x4f6   : > { %6504 = vrot.lane.b32.xlu0 %v12680_v18, %s17145_s2  ;;  %v6786_v45 = vld [vmem:[#allocation3 + $0x3a] sm:$0xff] }
 0x4f7   : > { %v6659_v44 = vld [vmem:[#allocation3 + $0x39] sm:$0xff]  ;;  %v12727_v51 = vpack.c.bf16 %v6786_v45, %v6786_v45  ;;  %v5906_v41 = vadd.f32 %v5890_v47, %v5874_v37 }
 0x4f8   : > { %v12712_v54 = vpack.c.bf16 %v6659_v44, %v6659_v44  ;;  %v6914_v50 = vld [vmem:[#allocation3 + $0x3b] sm:$0xff] }
 0x4f9   : > { %v6181_v7 = vld [vmem:[#allocation3 + $0x3d] sm:$0xff]  ;;  %6854 = vrot.lane.b32.xlu1 %v12727_v51, %s17146_s8  ;;  %5922 = vst.msk [vmem:[#allocation2 + $0x48] sm:$0xff] %vm766_vm0, %v5906_v41  ;;  %v12743_v5 = vpack.c.bf16 %v6914_v50, %v6914_v50  ;;  %v6565_v26 = vld [vmem:[#allocation3 + $0x48] sm:$0xff] }
 0x4fa   : > { %v7042_v20 = vld [vmem:[#allocation3 + $0x3c] sm:$0xff]  ;;  %6728 = vrot.lane.b32.xlu0 %v12712_v54, %s17144_s0  ;;  %v7043_v31 = vld [vmem:[#allocation3 + $0x44] sm:$0xff]  ;;  %v12650_v32 = vpack.c.bf16 %v6181_v7, %v6181_v7  ;;  %v12698_v62 = vpack.c.bf16 %v6565_v26, %v6565_v26 }
 0x4fb   : > { %v6564_v46 = vld [vmem:[#allocation3 + $0x40] sm:$0xff]  ;;  %v12759_v55 = vpack.c.bf16 %v7042_v20, %v7042_v20  ;;  %v12760_v61 = vpack.c.bf16 %v7043_v31, %v7043_v31 }
 0x4fc   : > { %v12697_v9 = vpack.c.bf16 %v6564_v46, %v6564_v46  ;;  %v6436_v0 = vld [vmem:[#allocation3 + $0x3f] sm:$0xff]  ;;  %6645 = vst.msk [vmem:[#allocation4 + $0x58] sm:$0xf] %vm935_vm1, %v12698_v62  ;;  %v6437_v47 = vld [vmem:[#allocation3 + $0x47] sm:$0xff] }
 0x4fd   : > { %7122 = vst.msk [vmem:[#allocation4 + $0x38] sm:$0xf] %vm935_vm1, %v12759_v55  ;;  %6165 = vst.msk [vmem:[#allocation4 + $0x54] sm:$0xf] %vm935_vm1, %v12759_v55  ;;  %v6309_v4 = vld [vmem:[#allocation3 + $0x3e] sm:$0xff]  ;;  %6982 = vrot.lane.b32.xlu1 %v12743_v5, %s17145_s2  ;;  %v12681_v25 = vpack.c.bf16 %v6436_v0, %v6436_v0  ;;  %v6310_v37 = vld [vmem:[#allocation3 + $0x46] sm:$0xff]  ;;  %v12682_v41 = vpack.c.bf16 %v6437_v47, %v6437_v47 }
 0x4fe   : > { %6644 = vst.msk [vmem:[#allocation4 + $0x4c] sm:$0xf] %vm935_vm1, %v12697_v9  ;;  %6252 = vrot.lane.b32.xlu0 %v12650_v32, %s17144_s0  ;;  %7123 = vst.msk [vmem:[#allocation4 + $0x44] sm:$0xf] %vm935_vm1, %v12760_v61  ;;  %v5937_v23 = vld [vmem:[#allocation2 + $0x40] sm:$0xff]  ;;  %v12666_v27 = vpack.c.bf16 %v6309_v4, %v6309_v4  ;;  %v12667_v46 = vpack.c.bf16 %v6310_v37, %v6310_v37  ;;  %v5875_v55 = vld [vmem:[#allocation2 + $0x50] sm:$0xff] }
 0x4ff   : > { %6166 = vst.msk [vmem:[#allocation4 + $0x60] sm:$0xf] %vm935_vm1, %v12760_v61  ;;  %v5961_v16 = vmul.f32 %v15457_v56, %v5937_v23  ;;  %v6660_v28 = vld [vmem:[#allocation3 + $0x41] sm:$0xff]  ;;  %v5876_v32 = vld [vmem:[#allocation2 + $0x58] sm:$0xff] }
 0x500   : > { %v6787_v24 = vld [vmem:[#allocation3 + $0x42] sm:$0xff]  ;;  %v12713_v6 = vpack.c.bf16 %v6660_v28, %v6660_v28 }
 0x501   : > { %v5985_v8 = vadd.f32 %v15462_v57, %v5961_v16  ;;  %6506 = vrot.lane.b32.xlu1 %v12681_v25, %s17145_s2  ;;  %v5938_v21 = vld [vmem:[#allocation2 + $0x48] sm:$0xff]  ;;  %v12728_v3 = vpack.c.bf16 %v6787_v24, %v6787_v24 }
 0x502   : > { %6380 = vrot.lane.b32.xlu0 %v12666_v27, %s17146_s8  ;;  %v5962_v12 = vmul.f32 %v15457_v56, %v5938_v21  ;;  %v6182_v13 = vld [vmem:[#allocation3 + $0x45] sm:$0xff]  ;;  %v13128_v60 = vpop.f32.mrf.mxu1 }
 0x503   : > { %v6001_v30 = vmax.f32 %v5985_v8, 0.0  ;;  %v6915_v43 = vld [vmem:[#allocation3 + $0x43] sm:$0xff]  ;;  %v12651_v40 = vpack.c.bf16 %v6182_v13, %v6182_v13 }
 0x504   : > { %v5986_v18 = vadd.f32 %v15462_v57, %v5962_v12  ;;  %v13129_v58 = vpop.f32.mrf.mxu1  ;;  %v12744_v45 = vpack.c.bf16 %v6915_v43, %v6915_v43 }
 0x505   : > { %v13708_v17 = vld [vmem:[#allocation4 + $0x38] ss:$12 sps:$4 sm:$0xff]   ;;  %v6017_v33 = vmul.f32 %v6001_v30, %v14568_v38  ;;  %6730 = vrot.lane.b32.xlu1 %v12713_v6, %s17144_s0  ;;  %v13130_v53 = vadd.f32 %v13129_v58, %v13128_v60 }
 0x506   : > { %6856 = vrot.lane.b32.xlu0 %v12728_v3, %s17146_s8  ;;  %13462 = vmatprep.mubr.msk.bf16.mxu1 %vm766_vm0, %v13708_v17  ;;  %v6002_v19 = vmax.f32 %v5986_v18, 0.0  ;;  %v13131_v44 = vpop.f32.mrf.mxu1 }
 0x507   : > { %6033 = vst.msk [vmem:[#allocation3 + $0x50] sm:$0xff] %vm766_vm0, %v6017_v33  ;;  %v5843_v54 = vadd.f32 %v15598_v14, %v13130_v53  ;;  %v15666_v33 = vpop.f32.mrf.mxu0 }
 0x508   : > { %v6018_v51 = vmul.f32 %v6002_v19, %v14761_v10  ;;  %v13132_v50 = vpop.f32.mrf.mxu1 }
 0x509   : > { %6254 = vrot.lane.b32.xlu1 %v12651_v40, %s17144_s0  ;;  %v5891_v7 = vmul.f32 %v5843_v54, %v14570_v42  ;;  %v13133_v20 = vadd.f32 %v13132_v50, %v13131_v44 }
 0x50a   : > { %6984 = vrot.lane.b32.xlu0 %v12744_v45, %s17145_s2  ;;  %6034 = vst.msk [vmem:[#allocation3 + $0x58] sm:$0xff] %vm766_vm0, %v6018_v51  ;;  %v5850_v51 = vpop.f32.mrf.mxu0 }
 0x50b   : > { %v5907_v9 = vadd.f32 %v5891_v7, %v5875_v55  ;;  %v5846_v31 = vadd.f32 %v15610_v15, %v13133_v20 }
 0x50d   : > { %6382 = vrot.lane.b32.xlu1 %v12667_v46, %s17146_s8  ;;  %5923 = vst.msk [vmem:[#allocation2 + $0x50] sm:$0xff] %vm766_vm0, %v5907_v9  ;;  %v5892_v61 = vmul.f32 %v5846_v31, %v14794_v29 }
 0x50e   : > { %6508 = vrot.lane.b32.xlu0 %v12682_v41, %s17145_s2  ;;  %v6788_v14 = vld [vmem:[#allocation3 + $0x4a] sm:$0xff]  ;;  %v15676_v41 = vpop.permute.xlu0 %6876 }
 0x50f   : > { %v6661_v5 = vld [vmem:[#allocation3 + $0x49] sm:$0xff]  ;;  %v12729_v0 = vpack.c.bf16 %v6788_v14, %v6788_v14  ;;  %v5908_v25 = vadd.f32 %v5892_v61, %v5876_v32 }
 0x510   : > { %v12714_v4 = vpack.c.bf16 %v6661_v5, %v6661_v5  ;;  %v6916_v26 = vld [vmem:[#allocation3 + $0x4b] sm:$0xff]  ;;  %v15680_v5 = vpop.f32.mrf.mxu0 }
 0x511   : > { %v6183_v62 = vld [vmem:[#allocation3 + $0x4d] sm:$0xff]  ;;  %6858 = vrot.lane.b32.xlu1 %v12729_v0, %s17146_s8  ;;  %5924 = vst.msk [vmem:[#allocation2 + $0x58] sm:$0xff] %vm766_vm0, %v5908_v25  ;;  %v12745_v24 = vpack.c.bf16 %v6916_v26, %v6916_v26  ;;  %v6567_v6 = vld [vmem:[#allocation3 + $0x58] sm:$0xff] }
 0x512   : > { %v7044_v23 = vld [vmem:[#allocation3 + $0x4c] sm:$0xff]  ;;  %6732 = vrot.lane.b32.xlu0 %v12714_v4, %s17144_s0  ;;  %v7045_v28 = vld [vmem:[#allocation3 + $0x54] sm:$0xff]  ;;  %v12652_v8 = vpack.c.bf16 %v6183_v62, %v6183_v62  ;;  %v12700_v3 = vpack.c.bf16 %v6567_v6, %v6567_v6 }
 0x513   : > { %v6566_v16 = vld [vmem:[#allocation3 + $0x50] sm:$0xff]  ;;  %v12761_v15 = vpack.c.bf16 %v7044_v23, %v7044_v23  ;;  %v12762_v21 = vpack.c.bf16 %v7045_v28, %v7045_v28  ;;  %v5853_v28 = vpop.f32.mrf.mxu0  ;;  %v5878_v6 = vld [vmem:[#allocation2 + $0x68] sm:$0xff] }
 0x514   : > { %v12699_v27 = vpack.c.bf16 %v6566_v16, %v6566_v16  ;;  %v6438_v30 = vld [vmem:[#allocation3 + $0x4f] sm:$0xff]  ;;  %6647 = vst.msk [vmem:[#allocation4 + $0x70] sm:$0xf] %vm935_vm1, %v12700_v3 }
 0x515   : > { %7124 = vst.msk [vmem:[#allocation4 + $0x50] sm:$0xf] %vm935_vm1, %v12761_v15  ;;  %6167 = vst.msk [vmem:[#allocation4 + $0x6c] sm:$0xf] %vm935_vm1, %v12761_v15  ;;  %v6311_v12 = vld [vmem:[#allocation3 + $0x4e] sm:$0xff]  ;;  %6986 = vrot.lane.b32.xlu1 %v12745_v24, %s17145_s2  ;;  %v12683_v17 = vpack.c.bf16 %v6438_v30, %v6438_v30  ;;  %v6312_v61 = vld [vmem:[#allocation3 + $0x56] sm:$0xff] }
 0x516   : > { %6646 = vst.msk [vmem:[#allocation4 + $0x64] sm:$0xf] %vm935_vm1, %v12699_v27  ;;  %6256 = vrot.lane.b32.xlu0 %v12652_v8, %s17144_s0  ;;  %7125 = vst.msk [vmem:[#allocation4 + $0x5c] sm:$0xf] %vm935_vm1, %v12762_v21  ;;  %v5939_v13 = vld [vmem:[#allocation2 + $0x50] sm:$0xff]  ;;  %v12668_v43 = vpack.c.bf16 %v6311_v12, %v6311_v12  ;;  %v12669_v15 = vpack.c.bf16 %v6312_v61, %v6312_v61  ;;  %v5877_v24 = vld [vmem:[#allocation2 + $0x60] sm:$0xff] }
 0x517   : > { %6168 = vst.msk [vmem:[#allocation4 + $0x78] sm:$0xf] %vm935_vm1, %v12762_v21  ;;  %v5963_v60 = vmul.f32 %v15457_v56, %v5939_v13  ;;  %v6662_v18 = vld [vmem:[#allocation3 + $0x51] sm:$0xff] }
 0x518   : > { %v6789_v58 = vld [vmem:[#allocation3 + $0x52] sm:$0xff]  ;;  %v12715_v44 = vpack.c.bf16 %v6662_v18, %v6662_v18 }
 0x519   : > { %v5987_v19 = vadd.f32 %v15462_v57, %v5963_v60  ;;  %6510 = vrot.lane.b32.xlu1 %v12683_v17, %s17145_s2  ;;  %v5940_v53 = vld [vmem:[#allocation2 + $0x58] sm:$0xff]  ;;  %v12730_v37 = vpack.c.bf16 %v6789_v58, %v6789_v58 }
 0x51a   : > { %6384 = vrot.lane.b32.xlu0 %v12668_v43, %s17146_s8  ;;  %v5964_v45 = vmul.f32 %v15457_v56, %v5940_v53  ;;  %v6184_v47 = vld [vmem:[#allocation3 + $0x55] sm:$0xff]  ;;  %v13134_v54 = vpop.f32.mrf.mxu1 }
 0x51b   : > { %v6003_v40 = vmax.f32 %v5987_v19, 0.0  ;;  %v6917_v7 = vld [vmem:[#allocation3 + $0x53] sm:$0xff]  ;;  %v12653_v31 = vpack.c.bf16 %v6184_v47, %v6184_v47 }
 0x51c   : > { %v5988_v46 = vadd.f32 %v15462_v57, %v5964_v45  ;;  %v13135_v55 = vpop.f32.mrf.mxu1  ;;  %v12746_v14 = vpack.c.bf16 %v6917_v7, %v6917_v7  ;;  %v6439_v57 = vld [vmem:[#allocation3 + $0x57] sm:$0xff] }
 0x51d   : > { %v13709_v50 = vld [vmem:[#allocation4 + $0x50] ss:$12 sps:$4 sm:$0xff]   ;;  %v6019_v20 = vmul.f32 %v6003_v40, %v14570_v42  ;;  %6734 = vrot.lane.b32.xlu1 %v12715_v44, %s17144_s0  ;;  %v13136_v9 = vadd.f32 %v13135_v55, %v13134_v54  ;;  %v12684_v27 = vpack.c.bf16 %v6439_v57, %v6439_v57 }
 0x51e   : > { %6860 = vrot.lane.b32.xlu0 %v12730_v37, %s17146_s8  ;;  %13463 = vmatmul.mubr.msk.bf16.gmra.mxu1 %vm766_vm0, %v13709_v50  ;;  %v6004_v56 = vmax.f32 %v5988_v46, 0.0  ;;  %v13137_v32 = vpop.f32.mrf.mxu1 }
 0x51f   : > { %6035 = vst.msk [vmem:[#allocation3 + $0x60] sm:$0xff] %vm766_vm0, %v6019_v20  ;;  %v5851_v4 = vadd.f32 %v13136_v9, %v5850_v51 }
 0x520   : > { %v6020_v0 = vmul.f32 %v6004_v56, %v14794_v29  ;;  %v13138_v26 = vpop.f32.mrf.mxu1 }
 0x521   : > { %6258 = vrot.lane.b32.xlu1 %v12653_v31, %s17144_s0  ;;  %v5893_v62 = vmul.f32 %v5851_v4, %v14575_v52  ;;  %v13139_v23 = vadd.f32 %v13138_v26, %v13137_v32  ;;  %v6495_v16 = vpop.permute.xlu1 %6494  ;;  %v13892_v26 = vld [vmem:[%s17139_s30 + $0x1] ss:$0 sm:$0xff] }
 0x522   : > { %6988 = vrot.lane.b32.xlu0 %v12746_v14, %s17145_s2  ;;  %6036 = vst.msk [vmem:[#allocation3 + $0x68] sm:$0xff] %vm766_vm0, %v6020_v0  ;;  %v6241_v25 = vpop.permute.xlu0 %6240 }
 0x523   : > { %6542 = vst.msk [vmem:[#allocation4] sm:$0xf] %vm1322_vm4, %v6495_v16  ;;  %v5909_v8 = vadd.f32 %v5893_v62, %v5877_v24  ;;  %v5854_v21 = vadd.f32 %v13139_v23, %v5853_v28  ;;  %v13893_v24 = vld [vmem:[%s17140_s22 + $0x1] ss:$0 sm:$0xff] }
 0x524   : > { %6287 = vst.msk [vmem:[#allocation4 + $0xc] sm:$0xf] %vm1064_vm2, %v6241_v25 }
 0x525   : > { %6386 = vrot.lane.b32.xlu1 %v12669_v15, %s17146_s8  ;;  %5925 = vst.msk [vmem:[#allocation2 + $0x60] sm:$0xff] %vm766_vm0, %v5909_v8  ;;  %v5894_v3 = vmul.f32 %v5854_v21, %v14805_v49 }
 0x526   : > { %6512 = vrot.lane.b32.xlu0 %v12684_v27, %s17145_s2  ;;  %v6790_v30 = vld [vmem:[#allocation3 + $0x5a] sm:$0xff]  ;;  %v6719_v13 = vpop.permute.xlu1 %6718  ;;  %v6369_v60 = vpop.permute.xlu0 %6368  ;;  %v5879_v27 = vld [vmem:[#allocation2 + $0x70] sm:$0xff] }
 0x527   : > { %v6663_v12 = vld [vmem:[#allocation3 + $0x59] sm:$0xff]  ;;  %v12731_v17 = vpack.c.bf16 %v6790_v30, %v6790_v30  ;;  %6766 = vst.msk [vmem:[#allocation4 + $0x4] sm:$0xf] %vm1064_vm2, %v6719_v13  ;;  %v13140_v58 = vpop.f32.mrf.mxu1  ;;  %v5910_v45 = vadd.f32 %v5894_v3, %v5878_v6 }
 0x528   : > { %v12716_v43 = vpack.c.bf16 %v6663_v12, %v6663_v12  ;;  %v6918_v18 = vld [vmem:[#allocation3 + $0x5b] sm:$0xff]  ;;  %6415 = vst.msk [vmem:[#allocation4 + $0xc] sm:$0xf] %vm1193_vm3, %v6369_v60 }
 0x529   : > { %v6185_v19 = vld [vmem:[#allocation3 + $0x5d] sm:$0xff]  ;;  %6862 = vrot.lane.b32.xlu1 %v12731_v17, %s17146_s8  ;;  %v13141_v47 = vpop.f32.mrf.mxu1  ;;  %5926 = vst.msk [vmem:[#allocation2 + $0x68] sm:$0xff] %vm766_vm0, %v5910_v45  ;;  %v12747_v20 = vpack.c.bf16 %v6918_v18, %v6918_v18  ;;  %v6569_v14 = vld [vmem:[#allocation3 + $0x68] sm:$0xff] }
 0x52a   : > { %v7046_v53 = vld [vmem:[#allocation3 + $0x5c] sm:$0xff]  ;;  %6736 = vrot.lane.b32.xlu0 %v12716_v43, %s17144_s0  ;;  %v7047_v51 = vld [vmem:[#allocation3 + $0x64] sm:$0xff]  ;;  %v13142_v54 = vadd.f32 %v13141_v47, %v13140_v58  ;;  %v6243_v50 = vpop.permute.xlu1 %6242  ;;  %v6497_v7 = vpop.permute.xlu0 %6496  ;;  %v12654_v46 = vpack.c.bf16 %v6185_v19, %v6185_v19  ;;  %v12702_v61 = vpack.c.bf16 %v6569_v14, %v6569_v14 }
 0x52b   : > { %v6568_v40 = vld [vmem:[#allocation3 + $0x60] sm:$0xff]  ;;  %v12763_v44 = vpack.c.bf16 %v7046_v53, %v7046_v53  ;;  %v12764_v56 = vpack.c.bf16 %v7047_v51, %v7047_v51  ;;  %6288 = vst.msk [vmem:[#allocation4 + $0x18] sm:$0xf] %vm1064_vm2, %v6243_v50  ;;  %v13143_v9 = vpop.f32.mrf.mxu1  ;;  %v5880_v60 = vld [vmem:[#allocation2 + $0x78] sm:$0xff] }
 0x52c   : > { %v12701_v37 = vpack.c.bf16 %v6568_v40, %v6568_v40  ;;  %v6440_v55 = vld [vmem:[#allocation3 + $0x5f] sm:$0xff]  ;;  %6543 = vst.msk [vmem:[#allocation4 + $0xc] sm:$0xf] %vm1322_vm4, %v6497_v7  ;;  %v5859_v32 = vadd.f32 %v15666_v33, %v13142_v54  ;;  %v6441_v51 = vld [vmem:[#allocation3 + $0x67] sm:$0xff] }
 0x52d   : > { %7126 = vst.msk [vmem:[#allocation4 + $0x68] sm:$0xf] %vm935_vm1, %v12763_v44  ;;  %6169 = vst.msk [vmem:[#allocation4 + $0x84] sm:$0xf] %vm935_vm1, %v12763_v44  ;;  %v6313_v31 = vld [vmem:[#allocation3 + $0x5e] sm:$0xff]  ;;  %6990 = vrot.lane.b32.xlu1 %v12747_v20, %s17145_s2  ;;  %v13144_v0 = vpop.f32.mrf.mxu1  ;;  %v12685_v4 = vpack.c.bf16 %v6440_v55, %v6440_v55  ;;  %v6314_v47 = vld [vmem:[#allocation3 + $0x66] sm:$0xff] }
 0x52e   : > { %6648 = vst.msk [vmem:[#allocation4 + $0x7c] sm:$0xf] %vm935_vm1, %v12701_v37  ;;  %6260 = vrot.lane.b32.xlu0 %v12654_v46, %s17144_s0  ;;  %7127 = vst.msk [vmem:[#allocation4 + $0x74] sm:$0xf] %vm935_vm1, %v12764_v56  ;;  %v5941_v57 = vld [vmem:[#allocation2 + $0x60] sm:$0xff]  ;;  %v5895_v23 = vmul.f32 %v5859_v32, %v14581_v59  ;;  %v13145_v33 = vadd.f32 %v13144_v0, %v13143_v9  ;;  %v6371_v16 = vpop.permute.xlu1 %6370  ;;  %v12670_v25 = vpack.c.bf16 %v6313_v31, %v6313_v31 }
 0x52f   : > { %6170 = vst.msk [vmem:[#allocation4 + $0x90] sm:$0xf] %vm935_vm1, %v12764_v56  ;;  %v5965_v62 = vmul.f32 %v13892_v26, %v5941_v57  ;;  %v6664_v15 = vld [vmem:[#allocation3 + $0x61] sm:$0xff]  ;;  %6649 = vst.msk [vmem:[#allocation4 + $0x88] sm:$0xf] %vm935_vm1, %v12702_v61  ;;  %v12671_v55 = vpack.c.bf16 %v6314_v47, %v6314_v47  ;;  %v12686_v56 = vpack.c.bf16 %v6441_v51, %v6441_v51 }
 0x530   : > { %6416 = vst.msk [vmem:[#allocation4 + $0x18] sm:$0xf] %vm1193_vm3, %v6371_v16  ;;  %v6791_v28 = vld [vmem:[#allocation3 + $0x62] sm:$0xff]  ;;  %v5911_v21 = vadd.f32 %v5895_v23, %v5879_v27  ;;  %v5862_v30 = vadd.f32 %v15680_v5, %v13145_v33  ;;  %v12717_v6 = vpack.c.bf16 %v6664_v15, %v6664_v15 }
 0x531   : > { %v5989_v8 = vadd.f32 %v13893_v24, %v5965_v62  ;;  %6514 = vrot.lane.b32.xlu1 %v12685_v4, %s17145_s2  ;;  %v5942_v12 = vld [vmem:[#allocation2 + $0x68] sm:$0xff]  ;;  %v12732_v43 = vpack.c.bf16 %v6791_v28, %v6791_v28 }
 0x532   : > { %6388 = vrot.lane.b32.xlu0 %v12670_v25, %s17146_s8  ;;  %v5966_v13 = vmul.f32 %v13892_v26, %v5942_v12  ;;  %5927 = vst.msk [vmem:[#allocation2 + $0x70] sm:$0xff] %vm766_vm0, %v5911_v21  ;;  %v5896_v17 = vmul.f32 %v5862_v30, %v14819_v2  ;;  %v6186_v18 = vld [vmem:[#allocation3 + $0x65] sm:$0xff] }
 0x533   : > { %v6005_v3 = vmax.f32 %v5989_v8, 0.0  ;;  %v6919_v19 = vld [vmem:[#allocation3 + $0x63] sm:$0xff]  ;;  %v12655_v44 = vpack.c.bf16 %v6186_v18, %v6186_v18 }
 0x534   : > { %v5990_v5 = vadd.f32 %v13893_v24, %v5966_v13  ;;  %v5912_v40 = vadd.f32 %v5896_v17, %v5880_v60  ;;  %v12748_v37 = vpack.c.bf16 %v6919_v19, %v6919_v19 }
 0x535   : > { %v13711_v58 = vld [vmem:[#allocation4 + $0x68] ss:$12 sps:$4 sm:$0xff]   ;;  %v6021_v53 = vmul.f32 %v6005_v3, %v14575_v52  ;;  %6738 = vrot.lane.b32.xlu1 %v12717_v6, %s17144_s0 }
 0x536   : > { %6864 = vrot.lane.b32.xlu0 %v12732_v43, %s17146_s8  ;;  %13466 = vmatprep.mubr.msk.bf16.mxu1 %vm766_vm0, %v13711_v58  ;;  %v6006_v45 = vmax.f32 %v5990_v5, 0.0  ;;  %5928 = vst.msk [vmem:[#allocation2 + $0x78] sm:$0xff] %vm766_vm0, %v5912_v40 }
 0x537   : > { %6037 = vst.msk [vmem:[#allocation3 + $0x70] sm:$0xff] %vm766_vm0, %v6021_v53 }
 0x538   : > { %v6022_v54 = vmul.f32 %v6006_v45, %v14805_v49 }
 0x539   : > { %6262 = vrot.lane.b32.xlu1 %v12655_v44, %s17144_s0  ;;  %v5943_v50 = vld [vmem:[#allocation2 + $0x70] sm:$0xff] }
 0x53a   : > { %6992 = vrot.lane.b32.xlu0 %v12748_v37, %s17145_s2  ;;  %6038 = vst.msk [vmem:[#allocation3 + $0x78] sm:$0xff] %vm766_vm0, %v6022_v54  ;;  %v5967_v7 = vmul.f32 %v13892_v26, %v5943_v50  ;;  %v6847_v20 = vpop.permute.xlu1 %6846 }
 0x53b   : > { %v6721_v46 = vpop.permute.xlu0 %6720  ;;  %6894 = vst.msk [vmem:[#allocation4 + $0x4] sm:$0xf] %vm1193_vm3, %v6847_v20 }
 0x53c   : > { %6767 = vst.msk [vmem:[#allocation4 + $0x10] sm:$0xf] %vm1064_vm2, %v6721_v46  ;;  %v5991_v9 = vadd.f32 %v13893_v24, %v5967_v7 }
 0x53d   : > { %6390 = vrot.lane.b32.xlu1 %v12671_v55, %s17146_s8  ;;  %v5944_v31 = vld [vmem:[#allocation2 + $0x78] sm:$0xff] }
 0x53e   : > { %6516 = vrot.lane.b32.xlu0 %v12686_v56, %s17145_s2  ;;  %v6792_v14 = vld [vmem:[#allocation3 + $0x6a] sm:$0xff]  ;;  %v6007_v61 = vmax.f32 %v5991_v9, 0.0  ;;  %v5968_v57 = vmul.f32 %v13892_v26, %v5944_v31  ;;  %v6975_v0 = vpop.permute.xlu1 %6974 }
 0x53f   : > { %v6665_v32 = vld [vmem:[#allocation3 + $0x69] sm:$0xff]  ;;  %v6245_v4 = vpop.permute.xlu0 %6244  ;;  %v12733_v62 = vpack.c.bf16 %v6792_v14, %v6792_v14  ;;  %7022 = vst.msk [vmem:[#allocation4 + $0x4] sm:$0xf] %vm1322_vm4, %v6975_v0 }
 0x540   : > { %v12718_v23 = vpack.c.bf16 %v6665_v32, %v6665_v32  ;;  %v6920_v33 = vld [vmem:[#allocation3 + $0x6b] sm:$0xff]  ;;  %6289 = vst.msk [vmem:[#allocation4 + $0x24] sm:$0xf] %vm1064_vm2, %v6245_v4  ;;  %v6023_v27 = vmul.f32 %v6007_v61, %v14581_v59  ;;  %v5992_v28 = vadd.f32 %v13893_v24, %v5968_v57 }
 0x541   : > { %v6187_v16 = vld [vmem:[#allocation3 + $0x6d] sm:$0xff]  ;;  %6866 = vrot.lane.b32.xlu1 %v12733_v62, %s17146_s8  ;;  %v12749_v3 = vpack.c.bf16 %v6920_v33, %v6920_v33  ;;  %v6571_v43 = vld [vmem:[#allocation3 + $0x78] sm:$0xff] }
 0x542   : > { %v7048_v25 = vld [vmem:[#allocation3 + $0x6c] sm:$0xff]  ;;  %6740 = vrot.lane.b32.xlu0 %v12718_v23, %s17144_s0  ;;  %v7049_v26 = vld [vmem:[#allocation3 + $0x74] sm:$0xff]  ;;  %6039 = vst.msk [vmem:[#allocation3 + $0x80] sm:$0xff] %vm766_vm0, %v6023_v27  ;;  %v6008_v30 = vmax.f32 %v5992_v28, 0.0  ;;  %v6499_v12 = vpop.permute.xlu1 %6498  ;;  %v12656_v13 = vpack.c.bf16 %v6187_v16, %v6187_v16  ;;  %v12704_v58 = vpack.c.bf16 %v6571_v43, %v6571_v43 }
 0x543   : > { %v6570_v15 = vld [vmem:[#allocation3 + $0x70] sm:$0xff]  ;;  %v12765_v8 = vpack.c.bf16 %v7048_v25, %v7048_v25  ;;  %v6373_v6 = vpop.permute.xlu0 %6372  ;;  %v12766_v60 = vpack.c.bf16 %v7049_v26, %v7049_v26  ;;  %6544 = vst.msk [vmem:[#allocation4 + $0x18] sm:$0xf] %vm1322_vm4, %v6499_v12 }
 0x544   : > { %v12703_v21 = vpack.c.bf16 %v6570_v15, %v6570_v15  ;;  %6417 = vst.msk [vmem:[#allocation4 + $0x24] sm:$0xf] %vm1193_vm3, %v6373_v6  ;;  %v6442_v24 = vld [vmem:[#allocation3 + $0x6f] sm:$0xff]  ;;  %v6024_v18 = vmul.f32 %v6008_v30, %v14819_v2  ;;  %v6443_v33 = vld [vmem:[#allocation3 + $0x77] sm:$0xff] }
 0x545   : > { %v6315_v17 = vld [vmem:[#allocation3 + $0x6e] sm:$0xff]  ;;  %7128 = vst.msk [vmem:[#allocation4 + $0x80] sm:$0xf] %vm935_vm1, %v12765_v8  ;;  %6171 = vst.msk [vmem:[#allocation4 + $0x9c] sm:$0xf] %vm935_vm1, %v12765_v8  ;;  %6994 = vrot.lane.b32.xlu1 %v12749_v3, %s17145_s2  ;;  %v12687_v5 = vpack.c.bf16 %v6442_v24, %v6442_v24  ;;  %v6316_v23 = vld [vmem:[#allocation3 + $0x76] sm:$0xff]  ;;  %v12688_v8 = vpack.c.bf16 %v6443_v33, %v6443_v33 }
 0x546   : > { %6650 = vst.msk [vmem:[#allocation4 + $0x94] sm:$0xf] %vm935_vm1, %v12703_v21  ;;  %6264 = vrot.lane.b32.xlu0 %v12656_v13, %s17144_s0  ;;  %7129 = vst.msk [vmem:[#allocation4 + $0x8c] sm:$0xf] %vm935_vm1, %v12766_v60  ;;  %v6723_v19 = vpop.permute.xlu1 %6722  ;;  %v12672_v40 = vpack.c.bf16 %v6315_v17, %v6315_v17  ;;  %v6666_v45 = vld [vmem:[#allocation3 + $0x71] sm:$0xff]  ;;  %v12673_v26 = vpack.c.bf16 %v6316_v23, %v6316_v23  ;;  %v7134_v21 = vld [vmem:[#allocation4] sm:$0xff] }
 0x547   : > { %6172 = vst.msk [vmem:[#allocation4 + $0xa8] sm:$0xf] %vm935_vm1, %v12766_v60  ;;  %v6849_v53 = vpop.permute.xlu0 %6848  ;;  %6651 = vst.msk [vmem:[#allocation4 + $0xa0] sm:$0xf] %vm935_vm1, %v12704_v58  ;;  %v6793_v44 = vld [vmem:[#allocation3 + $0x72] sm:$0xff]  ;;  %v12719_v54 = vpack.c.bf16 %v6666_v45, %v6666_v45 }
 0x548   : > { %6040 = vst.msk [vmem:[#allocation3 + $0x88] sm:$0xff] %vm766_vm0, %v6024_v18  ;;  %v12734_v50 = vpack.c.bf16 %v6793_v44, %v6793_v44  ;;  %v6188_v7 = vld [vmem:[#allocation3 + $0x75] sm:$0xff] }
 0x549   : > { %6768 = vst.msk [vmem:[#allocation4 + $0x1c] sm:$0xf] %vm1064_vm2, %v6723_v19  ;;  %6518 = vrot.lane.b32.xlu1 %v12687_v5, %s17145_s2  ;;  %v7050_v37 = vld [vmem:[#allocation3 + $0x7c] sm:$0xff]  ;;  %v6921_v55 = vld [vmem:[#allocation3 + $0x73] sm:$0xff]  ;;  %v12657_v57 = vpack.c.bf16 %v6188_v7, %v6188_v7 }
 0x54a   : > { %6895 = vst.msk [vmem:[#allocation4 + $0x10] sm:$0xf] %vm1193_vm3, %v6849_v53  ;;  %6392 = vrot.lane.b32.xlu0 %v12672_v40, %s17146_s8  ;;  %v6247_v47 = vpop.permute.xlu1 %6246  ;;  %v12767_v20 = vpack.c.bf16 %v7050_v37, %v7050_v37  ;;  %v6572_v56 = vld [vmem:[#allocation3 + $0x80] sm:$0xff]  ;;  %v12750_v0 = vpack.c.bf16 %v6921_v55, %v6921_v55  ;;  %v8720_v25 = vld [vmem:[#allocation3 + $0x94] sm:$0xff] }
 0x54b   : > { %v6977_v51 = vpop.permute.xlu0 %6976  ;;  %6290 = vst.msk [vmem:[#allocation4 + $0x30] sm:$0xf] %vm1064_vm2, %v6247_v47  ;;  %v12705_v14 = vpack.c.bf16 %v6572_v56, %v6572_v56  ;;  %v6794_v3 = vld [vmem:[#allocation3 + $0x7a] sm:$0xff]  ;;  %v12914_v60 = vpack.c.bf16 %v8720_v25, %v8720_v25 }
 0x54c   : > { %7023 = vst.msk [vmem:[#allocation4 + $0x10] sm:$0xf] %vm1322_vm4, %v6977_v51  ;;  %v6667_v13 = vld [vmem:[#allocation3 + $0x79] sm:$0xff]  ;;  %v12735_v43 = vpack.c.bf16 %v6794_v3, %v6794_v3 }
 0x54d   : > { %v13724_v46 = vld [vmem:[#allocation4 + $0x80] ss:$12 sps:$4 sm:$0xff]   ;;  %6742 = vrot.lane.b32.xlu1 %v12719_v54, %s17144_s0  ;;  %7130 = vst.msk [vmem:[#allocation4 + $0x98] sm:$0xf] %vm935_vm1, %v12767_v20  ;;  %6173 = vst.msk [vmem:[#allocation4 + $0xb4] sm:$0xf] %vm935_vm1, %v12767_v20  ;;  %v12720_v18 = vpack.c.bf16 %v6667_v13, %v6667_v13 }
 0x54e   : > { %6868 = vrot.lane.b32.xlu0 %v12734_v50, %s17146_s8  ;;  %13467 = vmatmul.mubr.msk.bf16.gmra.mxu1 %vm766_vm0, %v13724_v46  ;;  %v6375_v32 = vpop.permute.xlu1 %6374  ;;  %6652 = vst.msk [vmem:[#allocation4 + $0xac] sm:$0xf] %vm935_vm1, %v12705_v14  ;;  %v6922_v58 = vld [vmem:[#allocation3 + $0x7b] sm:$0xff] }
 0x54f   : > { %v7051_v9 = vld [vmem:[#allocation3 + $0x84] sm:$0xff]  ;;  %v7052_v31 = vld [vmem:[#allocation3 + $0x8c] sm:$0xff]  ;;  %v6501_v61 = vpop.permute.xlu0 %6500  ;;  %6418 = vst.msk [vmem:[#allocation4 + $0x30] sm:$0xf] %vm1193_vm3, %v6375_v32  ;;  %v12751_v44 = vpack.c.bf16 %v6922_v58, %v6922_v58 }
 0x550   : > { %v12768_v4 = vpack.c.bf16 %v7051_v9, %v7051_v9  ;;  %v12769_v62 = vpack.c.bf16 %v7052_v31, %v7052_v31  ;;  %6545 = vst.msk [vmem:[#allocation4 + $0x24] sm:$0xf] %vm1322_vm4, %v6501_v61  ;;  %v6573_v16 = vld [vmem:[#allocation3 + $0x88] sm:$0xff]  ;;  %v6189_v19 = vld [vmem:[#allocation3 + $0x7d] sm:$0xff] }
 0x551   : > { %6266 = vrot.lane.b32.xlu1 %v12657_v57, %s17144_s0  ;;  %v12706_v15 = vpack.c.bf16 %v6573_v16, %v6573_v16  ;;  %v12658_v37 = vpack.c.bf16 %v6189_v19, %v6189_v19  ;;  %v6444_v47 = vld [vmem:[#allocation3 + $0x7f] sm:$0xff]  ;;  %v6796_v32 = vld [vmem:[#allocation3 + $0x8a] sm:$0xff] }
 0x552   : > { %6996 = vrot.lane.b32.xlu0 %v12750_v0, %s17145_s2  ;;  %7131 = vst.msk [vmem:[#allocation4 + $0xa4] sm:$0xf] %vm935_vm1, %v12768_v4  ;;  %7132 = vst.msk [vmem:[#allocation4 + $0xb0] sm:$0xf] %vm935_vm1, %v12769_v62  ;;  %v6317_v51 = vld [vmem:[#allocation3 + $0x7e] sm:$0xff]  ;;  %v12689_v7 = vpack.c.bf16 %v6444_v47, %v6444_v47  ;;  %v12737_v4 = vpack.c.bf16 %v6796_v32, %v6796_v32  ;;  %v6924_v23 = vld [vmem:[#allocation3 + $0x8b] sm:$0xff] }
 0x553   : > { %v6851_v27 = vpop.permute.xlu1 %6850  ;;  %v7136_v30 = vld [vmem:[#allocation4 + $0xc] sm:$0xff]  ;;  %6653 = vst.msk [vmem:[#allocation4 + $0xb8] sm:$0xf] %vm935_vm1, %v12706_v15  ;;  %v12674_v20 = vpack.c.bf16 %v6317_v51, %v6317_v51  ;;  %v6668_v46 = vld [vmem:[#allocation3 + $0x81] sm:$0xff]  ;;  %v12753_v15 = vpack.c.bf16 %v6924_v23, %v6924_v23 }
 0x554   : > { %v6725_v28 = vpop.permute.xlu0 %6724  ;;  %v13728_v12 = vld [vmem:[#allocation4 + $0x4] ss:$12 sps:$4 sm:$0xff]   ;;  %6896 = vst.msk [vmem:[#allocation4 + $0x1c] sm:$0xf] %vm1193_vm3, %v6851_v27  ;;  %v11799_v6 = vcombine.low %v7134_v21, %v7136_v30  ;;  %v12721_v31 = vpack.c.bf16 %v6668_v46, %v6668_v46 }
 0x555   : > { %6769 = vst.msk [vmem:[#allocation4 + $0x28] sm:$0xf] %vm1064_vm2, %v6725_v28  ;;  %6394 = vrot.lane.b32.xlu1 %v12673_v26, %s17146_s8  ;;  %7450 = vmatprep.mubr.bf16.mxu0 %v13728_v12  ;;  %v6795_v55 = vld [vmem:[#allocation3 + $0x82] sm:$0xff]  ;;  %v6925_v12 = vld [vmem:[#allocation3 + $0x93] sm:$0xff] }
 0x556   : > { %6520 = vrot.lane.b32.xlu0 %v12688_v8, %s17145_s2  ;;  %7451 = vmatmul.mubr.bf16.vlgmr.msra.gmra.mxu0 %v11799_v6  ;;  %v12736_v14 = vpack.c.bf16 %v6795_v55, %v6795_v55  ;;  %v6923_v61 = vld [vmem:[#allocation3 + $0x83] sm:$0xff] }
 0x557   : > { %v6979_v24 = vpop.permute.xlu1 %6978  ;;  %v12752_v62 = vpack.c.bf16 %v6923_v61, %v6923_v61  ;;  %v6669_v33 = vld [vmem:[#allocation3 + $0x89] sm:$0xff] }
 0x558   : > { %v6249_v17 = vpop.permute.xlu0 %6248  ;;  %7024 = vst.msk [vmem:[#allocation4 + $0x1c] sm:$0xf] %vm1322_vm4, %v6979_v24  ;;  %v12722_v27 = vpack.c.bf16 %v6669_v33, %v6669_v33  ;;  %v6445_v30 = vld [vmem:[#allocation3 + $0x87] sm:$0xff] }
 0x559   : > { %6291 = vst.msk [vmem:[#allocation4 + $0x3c] sm:$0xf] %vm1064_vm2, %v6249_v17  ;;  %v13730_v53 = vld [vmem:[#allocation4 + $0x98] ss:$12 sps:$4 sm:$0xff]   ;;  %6870 = vrot.lane.b32.xlu1 %v12735_v43, %s17146_s8  ;;  %v13731_v5 = vld [vmem:[#allocation4 + $0xb0] ss:$12 sps:$4 sm:$0xff]   ;;  %v12690_v13 = vpack.c.bf16 %v6445_v30, %v6445_v30 }
 0x55a   : > { %6744 = vrot.lane.b32.xlu0 %v12720_v18, %s17144_s0  ;;  %13470 = vmatprep.mubr.msk.bf16.mxu1 %vm766_vm0, %v13730_v53  ;;  %8800 = vst.msk [vmem:[#allocation4 + $0xbc] sm:$0xf] %vm935_vm1, %v12914_v60  ;;  %v12754_v60 = vpack.c.bf16 %v6925_v12, %v6925_v12 }
 0x55b   : > { %v6503_v40 = vpop.permute.xlu1 %6502  ;;  %13471 = vmatmul.mubr.msk.bf16.gmra.mxu1 %vm766_vm0, %v13731_v5 }
 0x55c   : > { %v6377_v45 = vpop.permute.xlu0 %6376  ;;  %6546 = vst.msk [vmem:[#allocation4 + $0x30] sm:$0xf] %vm1322_vm4, %v6503_v40 }
 0x55d   : > { %6419 = vst.msk [vmem:[#allocation4 + $0x3c] sm:$0xf] %vm1193_vm3, %v6377_v45  ;;  %6998 = vrot.lane.b32.xlu1 %v12751_v44, %s17145_s2 }
 0x55e   : > { %6268 = vrot.lane.b32.xlu0 %v12658_v37, %s17144_s0 }
 0x55f   : > { %v6727_v54 = vpop.permute.xlu1 %6726  ;;  %v7138_v28 = vld [vmem:[#allocation4 + $0x18] sm:$0xff] }
 0x560   : > { %v6853_v50 = vpop.permute.xlu0 %6852  ;;  %6770 = vst.msk [vmem:[#allocation4 + $0x34] sm:$0xf] %vm1064_vm2, %v6727_v54 }
 0x561   : > { %6897 = vst.msk [vmem:[#allocation4 + $0x28] sm:$0xf] %vm1193_vm3, %v6853_v50  ;;  %6522 = vrot.lane.b32.xlu1 %v12689_v7, %s17145_s2 }
 0x562   : > { %6396 = vrot.lane.b32.xlu0 %v12674_v20, %s17146_s8 }
 0x563   : > { %v6251_v56 = vpop.permute.xlu1 %6250 }
 0x564   : > { %v6981_v9 = vpop.permute.xlu0 %6980  ;;  %6292 = vst.msk [vmem:[#allocation4 + $0x48] sm:$0xf] %vm1064_vm2, %v6251_v56 }
 0x565   : > { %7025 = vst.msk [vmem:[#allocation4 + $0x28] sm:$0xf] %vm1322_vm4, %v6981_v9  ;;  %6746 = vrot.lane.b32.xlu1 %v12721_v31, %s17144_s0 }
 0x566   : > { %6872 = vrot.lane.b32.xlu0 %v12736_v14, %s17146_s8 }
 0x567   : > { %v6379_v57 = vpop.permute.xlu1 %6378 }
 0x568   : > { %v6505_v0 = vpop.permute.xlu0 %6504  ;;  %6420 = vst.msk [vmem:[#allocation4 + $0x48] sm:$0xf] %vm1193_vm3, %v6379_v57 }
 0x569   : > { %6547 = vst.msk [vmem:[#allocation4 + $0x3c] sm:$0xf] %vm1322_vm4, %v6505_v0  ;;  %6874 = vrot.lane.b32.xlu1 %v12737_v4, %s17146_s8 }
 0x56a   : > { %7000 = vrot.lane.b32.xlu0 %v12752_v62, %s17145_s2 }
 0x56b   : > { %v6855_v16 = vpop.permute.xlu1 %6854 }
 0x56c   : > { %v6729_v25 = vpop.permute.xlu0 %6728  ;;  %v7140_v26 = vld [vmem:[#allocation4 + $0x24] sm:$0xff]  ;;  %6898 = vst.msk [vmem:[#allocation4 + $0x34] sm:$0xf] %vm1193_vm3, %v6855_v16 }
 0x56d   : > { %v13732_v8 = vld [vmem:[#allocation4 + $0x1c] ss:$12 sps:$4 sm:$0xff]   ;;  %6771 = vst.msk [vmem:[#allocation4 + $0x40] sm:$0xf] %vm1064_vm2, %v6729_v25  ;;  %v11802_v21 = vcombine.low %v7138_v28, %v7140_v26  ;;  %7002 = vrot.lane.b32.xlu1 %v12753_v15, %s17145_s2 }
 0x56e   : > { %6748 = vrot.lane.b32.xlu0 %v12722_v27, %s17144_s0  ;;  %7458 = vmatprep.mubr.bf16.mxu0 %v13732_v8  ;;  %v7841_v28 = vld [vmem:[#allocation3 + $0x5] sm:$0xff] }
 0x56f   : > { %v6983_v6 = vpop.permute.xlu1 %6982  ;;  %7459 = vmatmul.mubr.bf16.gmra.mxu0 %v11802_v21  ;;  %v12787_v26 = vpack.c.bf16 %v7841_v28, %v7841_v28  ;;  %v7969_v8 = vld [vmem:[#allocation3 + $0x6] sm:$0xff]  ;;  %v8464_v21 = vld [vmem:[#allocation3 + $0x92] sm:$0xff] }
 0x570   : > { %v6253_v3 = vpop.permute.xlu0 %6252  ;;  %7026 = vst.msk [vmem:[#allocation4 + $0x34] sm:$0xf] %vm1322_vm4, %v6983_v6  ;;  %v12803_v6 = vpack.c.bf16 %v7969_v8, %v7969_v8 }
 0x571   : > { %6293 = vst.msk [vmem:[#allocation4 + $0x54] sm:$0xf] %vm1064_vm2, %v6253_v3  ;;  %7905 = vrot.lane.b32.xlu1 %v12787_v26, %s17144_s0  ;;  %v12882_v3 = vpack.c.bf16 %v8464_v21, %v8464_v21  ;;  %v13748_v26 = vld [vmem:[%s17141_s9 + $0x118] sm:$0xff]  }
 0x572   : > { %6524 = vrot.lane.b32.xlu0 %v12690_v13, %s17145_s2  ;;  %13474 = vmatprep.subr.bf16.mxu0 %v13748_v26 }
 0x573   : > { %v6507_v24 = vpop.permute.xlu1 %6506  ;;  %13475 = vmatpush3.bf16.msra.mxu0 %v13748_v26 }
 0x574   : > { %v6381_v17 = vpop.permute.xlu0 %6380  ;;  %6548 = vst.msk [vmem:[#allocation4 + $0x48] sm:$0xf] %vm1322_vm4, %v6507_v24 }
 0x575   : > { %6421 = vst.msk [vmem:[#allocation4 + $0x54] sm:$0xf] %vm1193_vm3, %v6381_v17  ;;  %8033 = vrot.lane.b32.xlu1 %v12803_v6, %s17146_s8 }
 0x576   : > { %7004 = vrot.lane.b32.xlu0 %v12754_v60, %s17145_s2 }
 0x577   : > { %v6731_v43 = vpop.permute.xlu1 %6730  ;;  %v7142_v44 = vld [vmem:[#allocation4 + $0x30] sm:$0xff] }
 0x578   : > { %v6857_v18 = vpop.permute.xlu0 %6856  ;;  %6772 = vst.msk [vmem:[#allocation4 + $0x4c] sm:$0xf] %vm1064_vm2, %v6731_v43 }
 0x579   : > { %6899 = vst.msk [vmem:[#allocation4 + $0x40] sm:$0xf] %vm1193_vm3, %v6857_v18 }
 0x57a   : > { %8543 = vrot.lane.b32.xlu0 %v12882_v3, %s17146_s8 }
 0x57b   : > { %v6255_v58 = vpop.permute.xlu1 %6254 }
 0x57c   : > { %v6985_v19 = vpop.permute.xlu0 %6984  ;;  %6294 = vst.msk [vmem:[#allocation4 + $0x60] sm:$0xf] %vm1064_vm2, %v6255_v58 }
 0x57d   : > { %7027 = vst.msk [vmem:[#allocation4 + $0x40] sm:$0xf] %vm1322_vm4, %v6985_v19 }
 0x57f   : > { %v6383_v53 = vpop.permute.xlu1 %6382 }
 0x580   : > { %v6509_v5 = vpop.permute.xlu0 %6508  ;;  %6422 = vst.msk [vmem:[#allocation4 + $0x60] sm:$0xf] %vm1193_vm3, %v6383_v53 }
 0x581   : > { %6549 = vst.msk [vmem:[#allocation4 + $0x54] sm:$0xf] %vm1322_vm4, %v6509_v5 }
 0x583   : > { %v6859_v40 = vpop.permute.xlu1 %6858 }
 0x584   : > { %v6733_v45 = vpop.permute.xlu0 %6732  ;;  %v7144_v37 = vld [vmem:[#allocation4 + $0x3c] sm:$0xff]  ;;  %6900 = vst.msk [vmem:[#allocation4 + $0x4c] sm:$0xf] %vm1193_vm3, %v6859_v40 }
 0x585   : > { %v13734_v47 = vld [vmem:[#allocation4 + $0x34] ss:$12 sps:$4 sm:$0xff]   ;;  %6773 = vst.msk [vmem:[#allocation4 + $0x58] sm:$0xf] %vm1064_vm2, %v6733_v45  ;;  %v11805_v51 = vcombine.low %v7142_v44, %v7144_v37 }
 0x586   : > { %7466 = vmatprep.mubr.bf16.mxu0 %v13734_v47 }
 0x587   : > { %7467 = vmatmul.mubr.bf16.gmra.mxu0 %v11805_v51  ;;  %v6987_v54 = vpop.permute.xlu1 %6986 }
 0x588   : > { %v6257_v50 = vpop.permute.xlu0 %6256  ;;  %7028 = vst.msk [vmem:[#allocation4 + $0x4c] sm:$0xf] %vm1322_vm4, %v6987_v54 }
 0x589   : > { %6295 = vst.msk [vmem:[#allocation4 + $0x6c] sm:$0xf] %vm1064_vm2, %v6257_v50 }
 0x58b   : > { %v6511_v7 = vpop.permute.xlu1 %6510 }
 0x58c   : > { %v6385_v20 = vpop.permute.xlu0 %6384  ;;  %6550 = vst.msk [vmem:[#allocation4 + $0x60] sm:$0xf] %vm1322_vm4, %v6511_v7 }
 0x58d   : > { %6423 = vst.msk [vmem:[#allocation4 + $0x6c] sm:$0xf] %vm1193_vm3, %v6385_v20 }
 0x58f   : > { %v6735_v46 = vpop.permute.xlu1 %6734  ;;  %v7146_v57 = vld [vmem:[#allocation4 + $0x48] sm:$0xff] }
 0x590   : > { %v6861_v55 = vpop.permute.xlu0 %6860  ;;  %6774 = vst.msk [vmem:[#allocation4 + $0x64] sm:$0xf] %vm1064_vm2, %v6735_v46 }
 0x591   : > { %6901 = vst.msk [vmem:[#allocation4 + $0x58] sm:$0xf] %vm1193_vm3, %v6861_v55 }
 0x593   : > { %v6259_v56 = vpop.permute.xlu1 %6258 }
 0x594   : > { %v6989_v9 = vpop.permute.xlu0 %6988  ;;  %6296 = vst.msk [vmem:[#allocation4 + $0x78] sm:$0xf] %vm1064_vm2, %v6259_v56 }
 0x595   : > { %7029 = vst.msk [vmem:[#allocation4 + $0x58] sm:$0xf] %vm1322_vm4, %v6989_v9 }
 0x597   : > { %v6387_v31 = vpop.permute.xlu1 %6386 }
 0x598   : > { %v6513_v14 = vpop.permute.xlu0 %6512  ;;  %6424 = vst.msk [vmem:[#allocation4 + $0x78] sm:$0xf] %vm1193_vm3, %v6387_v31 }
 0x599   : > { %6551 = vst.msk [vmem:[#allocation4 + $0x6c] sm:$0xf] %vm1322_vm4, %v6513_v14 }
 0x59b   : > { %v6863_v32 = vpop.permute.xlu1 %6862 }
 0x59c   : > { %v6737_v61 = vpop.permute.xlu0 %6736  ;;  %v7148_v0 = vld [vmem:[#allocation4 + $0x54] sm:$0xff]  ;;  %6902 = vst.msk [vmem:[#allocation4 + $0x64] sm:$0xf] %vm1193_vm3, %v6863_v32 }
 0x59d   : > { %v13736_v4 = vld [vmem:[#allocation4 + $0x4c] ss:$12 sps:$4 sm:$0xff]   ;;  %6775 = vst.msk [vmem:[#allocation4 + $0x70] sm:$0xf] %vm1064_vm2, %v6737_v61  ;;  %v11808_v62 = vcombine.low %v7146_v57, %v7148_v0 }
 0x59e   : > { %7474 = vmatprep.mubr.bf16.mxu0 %v13736_v4 }
 0x59f   : > { %7475 = vmatmul.mubr.bf16.gmra.mxu0 %v11808_v62  ;;  %v6991_v23 = vpop.permute.xlu1 %6990 }
 0x5a0   : > { %v6261_v33 = vpop.permute.xlu0 %6260  ;;  %7030 = vst.msk [vmem:[#allocation4 + $0x64] sm:$0xf] %vm1322_vm4, %v6991_v23 }
 0x5a1   : > { %6297 = vst.msk [vmem:[#allocation4 + $0x84] sm:$0xf] %vm1064_vm2, %v6261_v33 }
 0x5a3   : > { %v6515_v16 = vpop.permute.xlu1 %6514 }
 0x5a4   : > { %v6389_v25 = vpop.permute.xlu0 %6388  ;;  %6552 = vst.msk [vmem:[#allocation4 + $0x78] sm:$0xf] %vm1322_vm4, %v6515_v16 }
 0x5a5   : > { %6425 = vst.msk [vmem:[#allocation4 + $0x84] sm:$0xf] %vm1193_vm3, %v6389_v25 }
 0x5a7   : > { %v6739_v15 = vpop.permute.xlu1 %6738  ;;  %v7150_v43 = vld [vmem:[#allocation4 + $0x60] sm:$0xff] }
 0x5a8   : > { %v6865_v27 = vpop.permute.xlu0 %6864  ;;  %6776 = vst.msk [vmem:[#allocation4 + $0x7c] sm:$0xf] %vm1064_vm2, %v6739_v15 }
 0x5a9   : > { %6903 = vst.msk [vmem:[#allocation4 + $0x70] sm:$0xf] %vm1193_vm3, %v6865_v27 }
 0x5ab   : > { %v6263_v30 = vpop.permute.xlu1 %6262 }
 0x5ac   : > { %v6993_v12 = vpop.permute.xlu0 %6992  ;;  %6298 = vst.msk [vmem:[#allocation4 + $0x90] sm:$0xf] %vm1064_vm2, %v6263_v30 }
 0x5ad   : > { %7031 = vst.msk [vmem:[#allocation4 + $0x70] sm:$0xf] %vm1322_vm4, %v6993_v12 }
 0x5ae   : > { %v13460_v12 = vpop.f32.mrf.mxu1 }
 0x5af   : > { %v6391_v13 = vpop.permute.xlu1 %6390 }
 0x5b0   : > { %v6517_v60 = vpop.permute.xlu0 %6516  ;;  %6426 = vst.msk [vmem:[#allocation4 + $0x90] sm:$0xf] %vm1193_vm3, %v6391_v13  ;;  %v7549_v6 = vpop.f32.mrf.mxu1 }
 0x5b1   : > { %6553 = vst.msk [vmem:[#allocation4 + $0x84] sm:$0xf] %vm1322_vm4, %v6517_v60 }
 0x5b3   : > { %v6867_v24 = vpop.permute.xlu1 %6866 }
 0x5b4   : > { %v6741_v17 = vpop.permute.xlu0 %6740  ;;  %v7152_v18 = vld [vmem:[#allocation4 + $0x6c] sm:$0xff]  ;;  %6904 = vst.msk [vmem:[#allocation4 + $0x7c] sm:$0xf] %vm1193_vm3, %v6867_v24  ;;  %v15877_v24 = vpop.f32.mrf.mxu1 }
 0x5b5   : > { %v13738_v58 = vld [vmem:[#allocation4 + $0x64] ss:$12 sps:$4 sm:$0xff]   ;;  %6777 = vst.msk [vmem:[#allocation4 + $0x88] sm:$0xf] %vm1064_vm2, %v6741_v17  ;;  %v11811_v19 = vcombine.low %v7150_v43, %v7152_v18  ;;  %v15882_v17 = vld [vmem:[%s17142_s29 + $0x1] ss:$0 sm:$0xff] }
 0x5b6   : > { %7482 = vmatprep.mubr.bf16.mxu0 %v13738_v58  ;;  %v15887_v58 = vld [vmem:[%s17143_s3 + $0x1] ss:$0 sm:$0xff] }
 0x5b7   : > { %7483 = vmatmul.mubr.bf16.gmra.mxu0 %v11811_v19  ;;  %v6995_v53 = vpop.permute.xlu1 %6994 }
 0x5b8   : > { %v6265_v5 = vpop.permute.xlu0 %6264  ;;  %7032 = vst.msk [vmem:[#allocation4 + $0x7c] sm:$0xf] %vm1322_vm4, %v6995_v53 }
 0x5b9   : > { %6299 = vst.msk [vmem:[#allocation4 + $0x9c] sm:$0xf] %vm1064_vm2, %v6265_v5 }
 0x5bb   : > { %v6519_v40 = vpop.permute.xlu1 %6518 }
 0x5bc   : > { %v6393_v45 = vpop.permute.xlu0 %6392  ;;  %6554 = vst.msk [vmem:[#allocation4 + $0x90] sm:$0xf] %vm1322_vm4, %v6519_v40 }
 0x5bd   : > { %6427 = vst.msk [vmem:[#allocation4 + $0x9c] sm:$0xf] %vm1193_vm3, %v6393_v45  ;;  %v7552_v45 = vpop.f32.mrf.mxu1 }
 0x5bf   : > { %v6743_v44 = vpop.permute.xlu1 %6742  ;;  %v7154_v46 = vld [vmem:[#allocation4 + $0x78] sm:$0xff] }
 0x5c0   : > { %v6869_v37 = vpop.permute.xlu0 %6868  ;;  %6778 = vst.msk [vmem:[#allocation4 + $0x94] sm:$0xf] %vm1064_vm2, %v6743_v44  ;;  %v7745_v44 = vld [vmem:[#allocation3 + $0x4] sm:$0xff] }
 0x5c1   : > { %6905 = vst.msk [vmem:[#allocation4 + $0x88] sm:$0xf] %vm1193_vm3, %v6869_v37 }
 0x5c3   : > { %v6267_v47 = vpop.permute.xlu1 %6266 }
 0x5c4   : > { %v6997_v51 = vpop.permute.xlu0 %6996  ;;  %6300 = vst.msk [vmem:[#allocation4 + $0xa8] sm:$0xf] %vm1064_vm2, %v6267_v47 }
 0x5c5   : > { %7033 = vst.msk [vmem:[#allocation4 + $0x88] sm:$0xf] %vm1322_vm4, %v6997_v51  ;;  %v12771_v51 = vpack.c.bf16 %v7745_v44, %v7745_v44  ;;  %v13756_v44 = vld [vmem:[%s17141_s9 + $0x100] sm:$0xff]  }
 0x5c7   : > { %v6395_v54 = vpop.permute.xlu1 %6394  ;;  %7825 = vst.msk [vmem:[#allocation4] sm:$0xf] %vm935_vm1, %v12771_v51 }
 0x5c8   : > { %v6521_v50 = vpop.permute.xlu0 %6520  ;;  %6428 = vst.msk [vmem:[#allocation4 + $0xa8] sm:$0xf] %vm1193_vm3, %v6395_v54 }
 0x5c9   : > { %6555 = vst.msk [vmem:[#allocation4 + $0x9c] sm:$0xf] %vm1322_vm4, %v6521_v50 }
 0x5cb   : > { %v6871_v7 = vpop.permute.xlu1 %6870 }
 0x5cc   : > { %v6745_v20 = vpop.permute.xlu0 %6744  ;;  %v7156_v55 = vld [vmem:[#allocation4 + $0x84] sm:$0xff]  ;;  %6906 = vst.msk [vmem:[#allocation4 + $0x94] sm:$0xf] %vm1193_vm3, %v6871_v7 }
 0x5cd   : > { %v13740_v56 = vld [vmem:[#allocation4 + $0x7c] ss:$12 sps:$4 sm:$0xff]   ;;  %6779 = vst.msk [vmem:[#allocation4 + $0xa0] sm:$0xf] %vm1064_vm2, %v6745_v20  ;;  %v11814_v9 = vcombine.low %v7154_v46, %v7156_v55 }
 0x5ce   : > { %7490 = vmatprep.mubr.bf16.mxu0 %v13740_v56 }
 0x5cf   : > { %7491 = vmatmul.mubr.bf16.gmra.mxu0 %v11814_v9  ;;  %v6999_v31 = vpop.permute.xlu1 %6998 }
 0x5d0   : > { %v6269_v14 = vpop.permute.xlu0 %6268  ;;  %7034 = vst.msk [vmem:[#allocation4 + $0x94] sm:$0xf] %vm1322_vm4, %v6999_v31 }
 0x5d1   : > { %6301 = vst.msk [vmem:[#allocation4 + $0xb4] sm:$0xf] %vm1064_vm2, %v6269_v14 }
 0x5d3   : > { %v6523_v32 = vpop.permute.xlu1 %6522 }
 0x5d4   : > { %v6397_v61 = vpop.permute.xlu0 %6396  ;;  %6556 = vst.msk [vmem:[#allocation4 + $0xa8] sm:$0xf] %vm1322_vm4, %v6523_v32 }
 0x5d5   : > { %6429 = vst.msk [vmem:[#allocation4 + $0xb4] sm:$0xf] %vm1193_vm3, %v6397_v61 }
 0x5d7   : > { %v6747_v57 = vpop.permute.xlu1 %6746  ;;  %v7158_v25 = vld [vmem:[#allocation4 + $0x90] sm:$0xff] }
 0x5d8   : > { %v6873_v0 = vpop.permute.xlu0 %6872  ;;  %6780 = vst.msk [vmem:[#allocation4 + $0xac] sm:$0xf] %vm1064_vm2, %v6747_v57 }
 0x5d9   : > { %6907 = vst.msk [vmem:[#allocation4 + $0xa0] sm:$0xf] %vm1193_vm3, %v6873_v0 }
 0x5db   : > { %v6875_v4 = vpop.permute.xlu1 %6874 }
 0x5dc   : > { %v7001_v62 = vpop.permute.xlu0 %7000  ;;  %6908 = vst.msk [vmem:[#allocation4 + $0xac] sm:$0xf] %vm1193_vm3, %v6875_v4 }
 0x5dd   : > { %7035 = vst.msk [vmem:[#allocation4 + $0xa0] sm:$0xf] %vm1322_vm4, %v7001_v62 }
 0x5df   : > { %v7003_v23 = vpop.permute.xlu1 %7002 }
 0x5e0   : > { %v6749_v33 = vpop.permute.xlu0 %6748  ;;  %7036 = vst.msk [vmem:[#allocation4 + $0xac] sm:$0xf] %vm1322_vm4, %v7003_v23 }
 0x5e1   : > { %6781 = vst.msk [vmem:[#allocation4 + $0xb8] sm:$0xf] %vm1064_vm2, %v6749_v33 }
 0x5e2   : > { %6909 = vst.msk [vmem:[#allocation4 + $0xb8] sm:$0xf] %vm1193_vm3, %v15676_v41  ;;  %v13749_v41 = vld [vmem:[%s17141_s9 + $0x110] sm:$0xff]  }
 0x5e3   : > { %13476 = vmatprep.subr.bf16.mxu0 %v13749_v41  ;;  %v7906_v53 = vpop.permute.xlu1 %7905 }
 0x5e4   : > { %v6525_v16 = vpop.permute.xlu0 %6524  ;;  %v7160_v15 = vld [vmem:[#allocation4 + $0x9c] sm:$0xff]  ;;  %13477 = vmatpush3.bf16.msra.mxu0 %v13749_v41  ;;  %7953 = vst.msk [vmem:[#allocation4] sm:$0xf] %vm1064_vm2, %v7906_v53 }
 0x5e5   : > { %v13742_v27 = vld [vmem:[#allocation4 + $0x94] ss:$12 sps:$4 sm:$0xff]   ;;  %6557 = vst.msk [vmem:[#allocation4 + $0xb4] sm:$0xf] %vm1322_vm4, %v6525_v16  ;;  %v11817_v28 = vcombine.low %v7158_v25, %v7160_v15 }
 0x5e6   : > { %7498 = vmatprep.mubr.bf16.mxu0 %v13742_v27 }
 0x5e7   : > { %7499 = vmatmul.mubr.bf16.gmra.mxu0 %v11817_v28  ;;  %v8034_v7 = vpop.permute.xlu1 %8033 }
 0x5e8   : > { %v7005_v8 = vpop.permute.xlu0 %7004  ;;  %8081 = vst.msk [vmem:[#allocation4] sm:$0xf] %vm1193_vm3, %v8034_v7  ;;  %v13758_v7 = vld [vmem:[%s17141_s9 + $0xf8] sm:$0xff]  }
 0x5e9   : > { %7037 = vst.msk [vmem:[#allocation4 + $0xb8] sm:$0xf] %vm1322_vm4, %v7005_v8 }
 0x5ec   : > { %v13746_v30 = vld [vmem:[#allocation4 + $0xa8] ss:$12 sps:$4 sm:$0xff]  }
 0x5f0   : > { %v13744_v21 = vld [vmem:[#allocation4 + $0xac] ss:$12 sps:$4 sm:$0xff]  }
 0x5f1   : > { %7506 = vmatprep.mubr.bf16.mxu0 %v13744_v21 }
 0x5f2   : > { %7507 = vmatmul.mubr.bf16.gmra.mxu0 %v13746_v30 }
 0x616   : > { %v13172_v3 = vpop.f32.mrf.mxu0 }
 0x618   : > { %v13173_v13 = vpop.f32.mrf.mxu0 }
 0x619   : > { %v13174_v60 = vadd.f32 %v13173_v13, %v13172_v3 }
 0x61a   : > { %v13175_v43 = vpop.f32.mrf.mxu0 }
 0x61b   : > { %v7550_v18 = vadd.f32 %v13174_v60, %v7549_v6  ;;  %v13753_v60 = vld [vmem:[%s17141_s9 + $0x108] sm:$0xff]  }
 0x61c   : > { %v13176_v19 = vpop.f32.mrf.mxu0  ;;  %13230 = vmatprep.subr.bf16.mxu1 %v13753_v60 }
 0x61d   : > { %v7620_v5 = vmul.f32 %v15882_v17, %v7550_v18  ;;  %v13177_v40 = vadd.f32 %v13176_v19, %v13175_v43 }
 0x61f   : > { %v7644_v37 = vadd.f32 %v15887_v58, %v7620_v5  ;;  %v7553_v47 = vadd.f32 %v13177_v40, %v7552_v45 }
 0x621   : > { %v7660_v54 = vmax.f32 %v7644_v37, 0.0  ;;  %v7621_v50 = vmul.f32 %v15882_v17, %v7553_v47 }
 0x623   : > { %v7676_v20 = vmul.f32 %v7660_v54, %v14572_v48  ;;  %v7645_v46 = vadd.f32 %v15887_v58, %v7621_v50  ;;  %v13757_v54 = vld [vmem:[%s17141_s9 + $0xc0] sm:$0xff]  }
 0x625   : > { %7692 = vst.msk [vmem:[#allocation3 + $0x10] sm:$0xff] %vm766_vm0, %v7676_v20  ;;  %v7661_v55 = vmax.f32 %v7645_v46, 0.0  ;;  %v13759_v46 = vld [vmem:[%s17141_s9 + $0xb8] sm:$0xff]  }
 0x627   : > { %v7677_v56 = vmul.f32 %v7661_v55, %v14560_v34 }
 0x629   : > { %7693 = vst.msk [vmem:[#allocation3 + $0x18] sm:$0xff] %vm766_vm0, %v7677_v56  ;;  %v13760_v56 = vld [vmem:[%s17141_s9 + $0xf0] sm:$0xff]  }
 0x62c   : > { %v8097_v9 = vld [vmem:[#allocation3 + $0xf] sm:$0xff] }
 0x62d   : > { %v7842_v31 = vld [vmem:[#allocation3 + $0xd] sm:$0xff]  ;;  %v12819_v14 = vpack.c.bf16 %v8097_v9, %v8097_v9  ;;  %v15940_v9 = vpop.f32.mrf.mxu1 }
 0x62e   : > { %v12788_v32 = vpack.c.bf16 %v7842_v31, %v7842_v31  ;;  %v7746_v61 = vld [vmem:[#allocation3 + $0xc] sm:$0xff] }
 0x62f   : > { %v8225_v57 = vld [vmem:[#allocation3 + $0x10] sm:$0xff]  ;;  %v13178_v0 = vpop.f32.mrf.mxu0  ;;  %v12772_v62 = vpack.c.bf16 %v7746_v61, %v7746_v61  ;;  %8161 = vrot.lane.b32.xlu1 %v12819_v14, %s17145_s2  ;;  %v7565_v61 = vpop.f32.mrf.mxu1 }
 0x630   : > { %v7970_v4 = vld [vmem:[#allocation3 + $0xe] sm:$0xff]  ;;  %v12835_v23 = vpack.c.bf16 %v8225_v57, %v8225_v57  ;;  %7907 = vrot.lane.b32.xlu0 %v12788_v32, %s17144_s0  ;;  %v8226_v26 = vld [vmem:[#allocation3 + $0x18] sm:$0xff] }
 0x631   : > { %v13179_v33 = vpop.f32.mrf.mxu0  ;;  %v8321_v16 = vld [vmem:[#allocation3 + $0x11] sm:$0xff]  ;;  %7826 = vst.msk [vmem:[#allocation4 + $0xc] sm:$0xf] %vm935_vm1, %v12772_v62  ;;  %v12804_v27 = vpack.c.bf16 %v7970_v4, %v7970_v4  ;;  %v12836_v6 = vpack.c.bf16 %v8226_v26, %v8226_v26  ;;  %v13763_v26 = vld [vmem:[%s17141_s9 + $0xa8] sm:$0xff]  }
 0x632   : > { %8305 = vst.msk [vmem:[#allocation4 + $0x4] sm:$0xf] %vm935_vm1, %v12835_v23  ;;  %v13180_v25 = vadd.f32 %v13179_v33, %v13178_v0  ;;  %v12851_v15 = vpack.c.bf16 %v8321_v16, %v8321_v16  ;;  %v7747_v28 = vld [vmem:[#allocation3 + $0x14] sm:$0xff]  ;;  %v13762_v16 = vld [vmem:[%s17141_s9 + $0xe8] sm:$0xff]  }
 0x633   : > { %v13181_v8 = vpop.f32.mrf.mxu0  ;;  %v7843_v41 = vld [vmem:[#allocation3 + $0x15] sm:$0xff]  ;;  %v12773_v30 = vpack.c.bf16 %v7747_v28, %v7747_v28  ;;  %8306 = vst.msk [vmem:[#allocation4 + $0x10] sm:$0xf] %vm935_vm1, %v12836_v6 }
 0x634   : > { %v8098_v21 = vld [vmem:[#allocation3 + $0x17] sm:$0xff]  ;;  %v7558_v3 = vadd.f32 %v13460_v12, %v13180_v25  ;;  %8385 = vrot.lane.b32.xlu1 %v12851_v15, %s17144_s0  ;;  %8035 = vrot.lane.b32.xlu0 %v12804_v27, %s17146_s8  ;;  %v12789_v19 = vpack.c.bf16 %v7843_v41, %v7843_v41  ;;  %v13755_v12 = vld [vmem:[%s17141_s9 + $0xc8] sm:$0xff]  }
 0x635   : > { %v13182_v13 = vpop.f32.mrf.mxu0  ;;  %7827 = vst.msk [vmem:[#allocation4 + $0x18] sm:$0xf] %vm935_vm1, %v12773_v30  ;;  %v12820_v53 = vpack.c.bf16 %v8098_v21, %v8098_v21  ;;  %v7971_v5 = vld [vmem:[#allocation3 + $0x16] sm:$0xff]  ;;  %13231 = vmatpush3.bf16.msra.mxu1 %v13755_v12  ;;  %v15957_v30 = vpop.f32.mrf.mxu1 }
 0x636   : > { %v7622_v43 = vmul.f32 %v15882_v17, %v7558_v3  ;;  %v13183_v18 = vadd.f32 %v13182_v13, %v13181_v8  ;;  %v12805_v51 = vpack.c.bf16 %v7971_v5, %v7971_v5  ;;  %13232 = vmatprep.subr.bf16.mxu1 %v13756_v44  ;;  %v13761_v31 = vld [vmem:[%s17141_s9 + $0xb0] sm:$0xff]   ;;  %v13764_v8 = vld [vmem:[%s17141_s9 + $0xe0] sm:$0xff]  }
 0x638   : > { %v7646_v40 = vadd.f32 %v15887_v58, %v7622_v43  ;;  %v7561_v45 = vadd.f32 %v15877_v24, %v13183_v18  ;;  %7909 = vrot.lane.b32.xlu1 %v12789_v19, %s17144_s0  ;;  %8163 = vrot.lane.b32.xlu0 %v12820_v53, %s17145_s2  ;;  %v13765_v53 = vld [vmem:[%s17141_s9 + $0xa0] sm:$0xff]  }
 0x639   : > { %13233 = vmatpush3.bf16.msra.mxu1 %v13757_v54 }
 0x63a   : > { %v7662_v37 = vmax.f32 %v7646_v40, 0.0  ;;  %v7623_v47 = vmul.f32 %v15882_v17, %v7561_v45  ;;  %13234 = vmatprep.subr.bf16.mxu1 %v13758_v7  ;;  %v13766_v40 = vld [vmem:[%s17141_s9 + $0xd8] sm:$0xff]  }
 0x63c   : > { %v7678_v24 = vmul.f32 %v7662_v37, %v14562_v22  ;;  %v7647_v50 = vadd.f32 %v15887_v58, %v7623_v47  ;;  %8037 = vrot.lane.b32.xlu1 %v12805_v51, %s17146_s8  ;;  %v7568_v47 = vpop.f32.mrf.mxu1 }
 0x63d   : > { %13235 = vmatpush3.bf16.msra.mxu1 %v13759_v46 }
 0x63e   : > { %7694 = vst.msk [vmem:[#allocation3 + $0x20] sm:$0xff] %vm766_vm0, %v7678_v24  ;;  %v7663_v20 = vmax.f32 %v7647_v50, 0.0  ;;  %13236 = vmatprep.subr.bf16.mxu1 %v13760_v56  ;;  %v13768_v24 = vld [vmem:[%s17141_s9 + $0x98] sm:$0xff]  }
 0x640   : > { %v7679_v55 = vmul.f32 %v7663_v20, %v14606_v39 }
 0x641   : > { %13237 = vmatpush3.bf16.msra.mxu1 %v13761_v31 }
 0x642   : > { %7695 = vst.msk [vmem:[#allocation3 + $0x28] sm:$0xff] %vm766_vm0, %v7679_v55  ;;  %13238 = vmatprep.subr.bf16.mxu1 %v13762_v16  ;;  %v13769_v55 = vld [vmem:[%s17141_s9 + $0xd0] sm:$0xff]  }
 0x645   : > { %v8449_v14 = vld [vmem:[#allocation3 + $0x1a] sm:$0xff]  ;;  %13239 = vmatpush3.bf16.msra.mxu1 %v13763_v26 }
 0x646   : > { %v8322_v32 = vld [vmem:[#allocation3 + $0x19] sm:$0xff]  ;;  %v12867_v0 = vpack.c.bf16 %v8449_v14, %v8449_v14  ;;  %13240 = vmatprep.subr.bf16.mxu1 %v13764_v8 }
 0x647   : > { %v13184_v57 = vpop.f32.mrf.mxu0  ;;  %v12852_v4 = vpack.c.bf16 %v8322_v32, %v8322_v32  ;;  %v8577_v62 = vld [vmem:[#allocation3 + $0x1b] sm:$0xff] }
 0x648   : > { %v7844_v23 = vld [vmem:[#allocation3 + $0x1d] sm:$0xff]  ;;  %8513 = vrot.lane.b32.xlu1 %v12867_v0, %s17146_s8  ;;  %v12883_v3 = vpack.c.bf16 %v8577_v62, %v8577_v62 }
 0x649   : > { %v8705_v33 = vld [vmem:[#allocation3 + $0x1c] sm:$0xff]  ;;  %8387 = vrot.lane.b32.xlu0 %v12852_v4, %s17144_s0  ;;  %v13185_v15 = vpop.f32.mrf.mxu0  ;;  %v8706_v21 = vld [vmem:[#allocation3 + $0x24] sm:$0xff]  ;;  %v12790_v13 = vpack.c.bf16 %v7844_v23, %v7844_v23  ;;  %13241 = vmatpush3.bf16.msra.mxu1 %v13765_v53 }
 0x64a   : > { %v8227_v25 = vld [vmem:[#allocation3 + $0x20] sm:$0xff]  ;;  %v12899_v27 = vpack.c.bf16 %v8705_v33, %v8705_v33  ;;  %v13186_v41 = vadd.f32 %v13185_v15, %v13184_v57  ;;  %v12900_v43 = vpack.c.bf16 %v8706_v21, %v8706_v21  ;;  %v8228_v12 = vld [vmem:[#allocation3 + $0x28] sm:$0xff]  ;;  %13242 = vmatprep.subr.bf16.mxu1 %v13766_v40  ;;  %v13770_v57 = vld [vmem:[%s17141_s9 + $0x90] sm:$0xff]  }
 0x64b   : > { %v12837_v28 = vpack.c.bf16 %v8227_v25, %v8227_v25  ;;  %v13187_v6 = vpop.f32.mrf.mxu0  ;;  %v8099_v60 = vld [vmem:[#allocation3 + $0x1f] sm:$0xff]  ;;  %v12838_v45 = vpack.c.bf16 %v8228_v12, %v8228_v12 }
 0x64c   : > { %8785 = vst.msk [vmem:[#allocation4 + $0x8] sm:$0xf] %vm935_vm1, %v12899_v27  ;;  %7828 = vst.msk [vmem:[#allocation4 + $0x24] sm:$0xf] %vm935_vm1, %v12899_v27  ;;  %v7566_v18 = vadd.f32 %v13186_v41, %v7565_v61  ;;  %v7972_v19 = vld [vmem:[#allocation3 + $0x1e] sm:$0xff]  ;;  %8641 = vrot.lane.b32.xlu1 %v12883_v3, %s17145_s2  ;;  %v12821_v51 = vpack.c.bf16 %v8099_v60, %v8099_v60  ;;  %v7973_v27 = vld [vmem:[#allocation3 + $0x26] sm:$0xff] }
 0x64d   : > { %8307 = vst.msk [vmem:[#allocation4 + $0x1c] sm:$0xf] %vm935_vm1, %v12837_v28  ;;  %7911 = vrot.lane.b32.xlu0 %v12790_v13, %s17144_s0  ;;  %v13188_v5 = vpop.f32.mrf.mxu0  ;;  %8786 = vst.msk [vmem:[#allocation4 + $0x14] sm:$0xf] %vm935_vm1, %v12900_v43  ;;  %v12806_v54 = vpack.c.bf16 %v7972_v19, %v7972_v19  ;;  %v8323_v20 = vld [vmem:[#allocation3 + $0x21] sm:$0xff]  ;;  %13243 = vmatpush3.bf16.msra.mxu1 %v13768_v24  ;;  %v12807_v26 = vpack.c.bf16 %v7973_v27, %v7973_v27 }
 0x64e   : > { %7829 = vst.msk [vmem:[#allocation4 + $0x30] sm:$0xf] %vm935_vm1, %v12900_v43  ;;  %v7624_v44 = vmul.f32 %v15882_v17, %v7566_v18  ;;  %v13189_v37 = vadd.f32 %v13188_v5, %v13187_v6  ;;  %8308 = vst.msk [vmem:[#allocation4 + $0x28] sm:$0xf] %vm935_vm1, %v12838_v45  ;;  %v8450_v46 = vld [vmem:[#allocation3 + $0x22] sm:$0xff]  ;;  %v12853_v14 = vpack.c.bf16 %v8323_v20, %v8323_v20  ;;  %13244 = vmatprep.subr.bf16.mxu1 %v13769_v55 }
 0x64f   : > { %v12868_v32 = vpack.c.bf16 %v8450_v46, %v8450_v46  ;;  %v7845_v61 = vld [vmem:[#allocation3 + $0x25] sm:$0xff] }
 0x650   : > { %v7648_v50 = vadd.f32 %v15887_v58, %v7624_v44  ;;  %v7569_v7 = vadd.f32 %v13189_v37, %v7568_v47  ;;  %8165 = vrot.lane.b32.xlu1 %v12821_v51, %s17145_s2  ;;  %v8578_v23 = vld [vmem:[#allocation3 + $0x23] sm:$0xff]  ;;  %v12791_v16 = vpack.c.bf16 %v7845_v61, %v7845_v61 }
 0x651   : > { %8039 = vrot.lane.b32.xlu0 %v12806_v54, %s17146_s8  ;;  %v12884_v25 = vpack.c.bf16 %v8578_v23, %v8578_v23  ;;  %13245 = vmatpush3.bf16.msra.mxu1 %v13770_v57  ;;  %v8100_v28 = vld [vmem:[#allocation3 + $0x27] sm:$0xff] }
 0x652   : > { %v7664_v56 = vmax.f32 %v7648_v50, 0.0  ;;  %v7625_v31 = vmul.f32 %v15882_v17, %v7569_v7  ;;  %v12822_v8 = vpack.c.bf16 %v8100_v28, %v8100_v28 }
 0x654   : > { %v7680_v0 = vmul.f32 %v7664_v56, %v14564_v35  ;;  %v7649_v4 = vadd.f32 %v15887_v58, %v7625_v31  ;;  %v13747_v62 = vld [vmem:[#allocation4 + $0x8] ss:$12 sps:$4 sm:$0xff]   ;;  %8389 = vrot.lane.b32.xlu1 %v12853_v14, %s17144_s0 }
 0x655   : > { %8515 = vrot.lane.b32.xlu0 %v12868_v32, %s17146_s8  ;;  %13478 = vmatprep.mubr.msk.bf16.mxu0 %vm766_vm0, %v13747_v62 }
 0x656   : > { %7696 = vst.msk [vmem:[#allocation3 + $0x30] sm:$0xff] %vm766_vm0, %v7680_v0  ;;  %v7665_v33 = vmax.f32 %v7649_v4, 0.0 }
 0x658   : > { %v7681_v15 = vmul.f32 %v7665_v33, %v14661_v63  ;;  %7913 = vrot.lane.b32.xlu1 %v12791_v16, %s17144_s0 }
 0x659   : > { %8643 = vrot.lane.b32.xlu0 %v12884_v25, %s17145_s2 }
 0x65a   : > { %7697 = vst.msk [vmem:[#allocation3 + $0x38] sm:$0xff] %vm766_vm0, %v7681_v15 }
 0x65c   : > { %8041 = vrot.lane.b32.xlu1 %v12807_v26, %s17146_s8 }
 0x65d   : > { %8167 = vrot.lane.b32.xlu0 %v12822_v8, %s17145_s2  ;;  %v8451_v41 = vld [vmem:[#allocation3 + $0x2a] sm:$0xff] }
 0x65e   : > { %v8324_v21 = vld [vmem:[#allocation3 + $0x29] sm:$0xff]  ;;  %v12869_v6 = vpack.c.bf16 %v8451_v41, %v8451_v41 }
 0x65f   : > { %v12854_v3 = vpack.c.bf16 %v8324_v21, %v8324_v21  ;;  %v13190_v13 = vpop.f32.mrf.mxu0  ;;  %v8707_v60 = vld [vmem:[#allocation3 + $0x2c] sm:$0xff] }
 0x660   : > { %v8229_v43 = vld [vmem:[#allocation3 + $0x30] sm:$0xff]  ;;  %v12901_v53 = vpack.c.bf16 %v8707_v60, %v8707_v60  ;;  %8517 = vrot.lane.b32.xlu1 %v12869_v6, %s17146_s8  ;;  %v16026_v6 = vpop.f32.mrf.mxu1 }
 0x661   : > { %v8579_v18 = vld [vmem:[#allocation3 + $0x2b] sm:$0xff]  ;;  %v12839_v12 = vpack.c.bf16 %v8229_v43, %v8229_v43  ;;  %8391 = vrot.lane.b32.xlu0 %v12854_v3, %s17144_s0  ;;  %v13191_v5 = vpop.f32.mrf.mxu0  ;;  %v8708_v40 = vld [vmem:[#allocation3 + $0x34] sm:$0xff] }
 0x662   : > { %v7846_v19 = vld [vmem:[#allocation3 + $0x2d] sm:$0xff]  ;;  %v13192_v45 = vadd.f32 %v13191_v5, %v13190_v13  ;;  %v12902_v44 = vpack.c.bf16 %v8708_v40, %v8708_v40  ;;  %8787 = vst.msk [vmem:[#allocation4 + $0x20] sm:$0xf] %vm935_vm1, %v12901_v53  ;;  %7830 = vst.msk [vmem:[#allocation4 + $0x3c] sm:$0xf] %vm935_vm1, %v12901_v53  ;;  %v12885_v47 = vpack.c.bf16 %v8579_v18, %v8579_v18  ;;  %v8230_v54 = vld [vmem:[#allocation3 + $0x38] sm:$0xff]  ;;  %v7581_v53 = vpop.f32.mrf.mxu1 }
 0x663   : > { %8309 = vst.msk [vmem:[#allocation4 + $0x34] sm:$0xf] %vm935_vm1, %v12839_v12  ;;  %v13193_v37 = vpop.f32.mrf.mxu0  ;;  %v12792_v51 = vpack.c.bf16 %v7846_v19, %v7846_v19  ;;  %v8101_v50 = vld [vmem:[#allocation3 + $0x2f] sm:$0xff]  ;;  %v12840_v20 = vpack.c.bf16 %v8230_v54, %v8230_v54  ;;  %v8102_v21 = vld [vmem:[#allocation3 + $0x37] sm:$0xff] }
 0x664   : > { %v7574_v24 = vadd.f32 %v15940_v9, %v13192_v45  ;;  %v7974_v7 = vld [vmem:[#allocation3 + $0x2e] sm:$0xff]  ;;  %8788 = vst.msk [vmem:[#allocation4 + $0x2c] sm:$0xf] %vm935_vm1, %v12902_v44  ;;  %7831 = vst.msk [vmem:[#allocation4 + $0x48] sm:$0xf] %vm935_vm1, %v12902_v44  ;;  %8645 = vrot.lane.b32.xlu1 %v12885_v47, %s17145_s2  ;;  %v12823_v31 = vpack.c.bf16 %v8101_v50, %v8101_v50  ;;  %v7975_v41 = vld [vmem:[#allocation3 + $0x36] sm:$0xff]  ;;  %v12824_v13 = vpack.c.bf16 %v8102_v21, %v8102_v21 }
 0x665   : > { %7915 = vrot.lane.b32.xlu0 %v12792_v51, %s17144_s0  ;;  %v13194_v46 = vpop.f32.mrf.mxu0  ;;  %8310 = vst.msk [vmem:[#allocation4 + $0x40] sm:$0xf] %vm935_vm1, %v12840_v20  ;;  %v12808_v14 = vpack.c.bf16 %v7974_v7, %v7974_v7  ;;  %v8325_v61 = vld [vmem:[#allocation3 + $0x31] sm:$0xff]  ;;  %v12809_v3 = vpack.c.bf16 %v7975_v41, %v7975_v41  ;;  %v16035_v7 = vpop.f32.mrf.mxu1 }
 0x666   : > { %v7626_v55 = vmul.f32 %v15882_v17, %v7574_v24  ;;  %v13195_v56 = vadd.f32 %v13194_v46, %v13193_v37  ;;  %v8452_v57 = vld [vmem:[#allocation3 + $0x32] sm:$0xff]  ;;  %v12855_v62 = vpack.c.bf16 %v8325_v61, %v8325_v61 }
 0x667   : > { %v12870_v23 = vpack.c.bf16 %v8452_v57, %v8452_v57  ;;  %v7847_v15 = vld [vmem:[#allocation3 + $0x35] sm:$0xff] }
 0x668   : > { %v7650_v9 = vadd.f32 %v15887_v58, %v7626_v55  ;;  %v7577_v32 = vadd.f32 %v15957_v30, %v13195_v56  ;;  %8169 = vrot.lane.b32.xlu1 %v12823_v31, %s17145_s2  ;;  %v8580_v27 = vld [vmem:[#allocation3 + $0x33] sm:$0xff]  ;;  %v12793_v28 = vpack.c.bf16 %v7847_v15, %v7847_v15 }
 0x669   : > { %8043 = vrot.lane.b32.xlu0 %v12808_v14, %s17146_s8  ;;  %v12886_v26 = vpack.c.bf16 %v8580_v27, %v8580_v27 }
 0x66a   : > { %v7666_v0 = vmax.f32 %v7650_v9, 0.0  ;;  %v7627_v4 = vmul.f32 %v15882_v17, %v7577_v32 }
 0x66b   : > { %v13750_v33 = vld [vmem:[#allocation4 + $0x20] ss:$12 sps:$4 sm:$0xff]  }
 0x66c   : > { %v7682_v16 = vmul.f32 %v7666_v0, %v14566_v36  ;;  %v7651_v25 = vadd.f32 %v15887_v58, %v7627_v4  ;;  %8393 = vrot.lane.b32.xlu1 %v12855_v62, %s17144_s0  ;;  %13479 = vmatmul.mubr.msk.bf16.vlgmr.msra.gmra.mxu0 %vm766_vm0, %v13750_v33  ;;  %v7584_v4 = vpop.f32.mrf.mxu1 }
 0x66d   : > { %8519 = vrot.lane.b32.xlu0 %v12870_v23, %s17146_s8 }
 0x66e   : > { %7698 = vst.msk [vmem:[#allocation3 + $0x40] sm:$0xff] %vm766_vm0, %v7682_v16  ;;  %v7667_v30 = vmax.f32 %v7651_v25, 0.0 }
 0x670   : > { %v7683_v8 = vmul.f32 %v7667_v30, %v14722_v11  ;;  %7917 = vrot.lane.b32.xlu1 %v12793_v28, %s17144_s0 }
 0x671   : > { %8647 = vrot.lane.b32.xlu0 %v12886_v26, %s17145_s2 }
 0x672   : > { %7699 = vst.msk [vmem:[#allocation3 + $0x48] sm:$0xff] %vm766_vm0, %v7683_v8 }
 0x674   : > { %8045 = vrot.lane.b32.xlu1 %v12809_v3, %s17146_s8 }
 0x675   : > { %8171 = vrot.lane.b32.xlu0 %v12824_v13, %s17145_s2  ;;  %v8453_v60 = vld [vmem:[#allocation3 + $0x3a] sm:$0xff] }
 0x676   : > { %v8326_v43 = vld [vmem:[#allocation3 + $0x39] sm:$0xff]  ;;  %v12871_v18 = vpack.c.bf16 %v8453_v60, %v8453_v60 }
 0x677   : > { %v12856_v19 = vpack.c.bf16 %v8326_v43, %v8326_v43  ;;  %v13196_v12 = vpop.f32.mrf.mxu0  ;;  %v8709_v5 = vld [vmem:[#allocation3 + $0x3c] sm:$0xff] }
 0x678   : > { %v8231_v40 = vld [vmem:[#allocation3 + $0x40] sm:$0xff]  ;;  %v12903_v37 = vpack.c.bf16 %v8709_v5, %v8709_v5  ;;  %8521 = vrot.lane.b32.xlu1 %v12871_v18, %s17146_s8 }
 0x679   : > { %v8581_v45 = vld [vmem:[#allocation3 + $0x3b] sm:$0xff]  ;;  %v12841_v47 = vpack.c.bf16 %v8231_v40, %v8231_v40  ;;  %8395 = vrot.lane.b32.xlu0 %v12856_v19, %s17144_s0  ;;  %v13197_v51 = vpop.f32.mrf.mxu0  ;;  %v8710_v54 = vld [vmem:[#allocation3 + $0x44] sm:$0xff] }
 0x67a   : > { %v7848_v44 = vld [vmem:[#allocation3 + $0x3d] sm:$0xff]  ;;  %v13198_v24 = vadd.f32 %v13197_v51, %v13196_v12  ;;  %v12904_v50 = vpack.c.bf16 %v8710_v54, %v8710_v54  ;;  %8789 = vst.msk [vmem:[#allocation4 + $0x38] sm:$0xf] %vm935_vm1, %v12903_v37  ;;  %7832 = vst.msk [vmem:[#allocation4 + $0x54] sm:$0xf] %vm935_vm1, %v12903_v37  ;;  %v12887_v46 = vpack.c.bf16 %v8581_v45, %v8581_v45  ;;  %v8232_v56 = vld [vmem:[#allocation3 + $0x48] sm:$0xff] }
 0x67b   : > { %8311 = vst.msk [vmem:[#allocation4 + $0x4c] sm:$0xf] %vm935_vm1, %v12841_v47  ;;  %v13199_v20 = vpop.f32.mrf.mxu0  ;;  %v12794_v55 = vpack.c.bf16 %v7848_v44, %v7848_v44  ;;  %v8103_v14 = vld [vmem:[#allocation3 + $0x3f] sm:$0xff]  ;;  %v12842_v32 = vpack.c.bf16 %v8232_v56, %v8232_v56  ;;  %v8104_v12 = vld [vmem:[#allocation3 + $0x47] sm:$0xff] }
 0x67c   : > { %v7582_v31 = vadd.f32 %v13198_v24, %v7581_v53  ;;  %v7976_v9 = vld [vmem:[#allocation3 + $0x3e] sm:$0xff]  ;;  %8790 = vst.msk [vmem:[#allocation4 + $0x44] sm:$0xf] %vm935_vm1, %v12904_v50  ;;  %7833 = vst.msk [vmem:[#allocation4 + $0x60] sm:$0xf] %vm935_vm1, %v12904_v50  ;;  %8649 = vrot.lane.b32.xlu1 %v12887_v46, %s17145_s2  ;;  %v12825_v62 = vpack.c.bf16 %v8103_v14, %v8103_v14  ;;  %v7977_v53 = vld [vmem:[#allocation3 + $0x46] sm:$0xff]  ;;  %v12826_v40 = vpack.c.bf16 %v8104_v12, %v8104_v12 }
 0x67d   : > { %7919 = vrot.lane.b32.xlu0 %v12794_v55, %s17144_s0  ;;  %v13200_v61 = vpop.f32.mrf.mxu0  ;;  %8312 = vst.msk [vmem:[#allocation4 + $0x58] sm:$0xf] %vm935_vm1, %v12842_v32  ;;  %v12810_v23 = vpack.c.bf16 %v7976_v9, %v7976_v9  ;;  %v8327_v25 = vld [vmem:[#allocation3 + $0x41] sm:$0xff]  ;;  %v12811_v5 = vpack.c.bf16 %v7977_v53, %v7977_v53 }
 0x67e   : > { %v7628_v57 = vmul.f32 %v15882_v17, %v7582_v31  ;;  %v13201_v0 = vadd.f32 %v13200_v61, %v13199_v20  ;;  %v8454_v15 = vld [vmem:[#allocation3 + $0x42] sm:$0xff]  ;;  %v12857_v28 = vpack.c.bf16 %v8327_v25, %v8327_v25 }
 0x67f   : > { %v12872_v26 = vpack.c.bf16 %v8454_v15, %v8454_v15  ;;  %v7849_v3 = vld [vmem:[#allocation3 + $0x45] sm:$0xff] }
 0x680   : > { %v7652_v33 = vadd.f32 %v15887_v58, %v7628_v57  ;;  %v7585_v16 = vadd.f32 %v13201_v0, %v7584_v4  ;;  %8173 = vrot.lane.b32.xlu1 %v12825_v62, %s17145_s2  ;;  %v8582_v13 = vld [vmem:[#allocation3 + $0x43] sm:$0xff]  ;;  %v12795_v43 = vpack.c.bf16 %v7849_v3, %v7849_v3 }
 0x681   : > { %8047 = vrot.lane.b32.xlu0 %v12810_v23, %s17146_s8  ;;  %v12888_v18 = vpack.c.bf16 %v8582_v13, %v8582_v13 }
 0x682   : > { %v7668_v27 = vmax.f32 %v7652_v33, 0.0  ;;  %v7629_v30 = vmul.f32 %v15882_v17, %v7585_v16 }
 0x683   : > { %v13751_v8 = vld [vmem:[#allocation4 + $0x38] ss:$12 sps:$4 sm:$0xff]  }
 0x684   : > { %v7684_v41 = vmul.f32 %v7668_v27, %v14568_v38  ;;  %v7653_v21 = vadd.f32 %v15887_v58, %v7629_v30  ;;  %8397 = vrot.lane.b32.xlu1 %v12857_v28, %s17144_s0  ;;  %13482 = vmatprep.mubr.msk.bf16.mxu0 %vm766_vm0, %v13751_v8 }
 0x685   : > { %8523 = vrot.lane.b32.xlu0 %v12872_v26, %s17146_s8 }
 0x686   : > { %7700 = vst.msk [vmem:[#allocation3 + $0x50] sm:$0xff] %vm766_vm0, %v7684_v41  ;;  %v7669_v60 = vmax.f32 %v7653_v21, 0.0 }
 0x688   : > { %v7685_v19 = vmul.f32 %v7669_v60, %v14761_v10  ;;  %7921 = vrot.lane.b32.xlu1 %v12795_v43, %s17144_s0 }
 0x689   : > { %8651 = vrot.lane.b32.xlu0 %v12888_v18, %s17145_s2 }
 0x68a   : > { %7701 = vst.msk [vmem:[#allocation3 + $0x58] sm:$0xff] %vm766_vm0, %v7685_v19 }
 0x68c   : > { %8049 = vrot.lane.b32.xlu1 %v12811_v5, %s17146_s8 }
 0x68d   : > { %8175 = vrot.lane.b32.xlu0 %v12826_v40, %s17145_s2  ;;  %v8455_v45 = vld [vmem:[#allocation3 + $0x4a] sm:$0xff] }
 0x68e   : > { %v8328_v44 = vld [vmem:[#allocation3 + $0x49] sm:$0xff]  ;;  %v12873_v37 = vpack.c.bf16 %v8455_v45, %v8455_v45 }
 0x68f   : > { %v12858_v47 = vpack.c.bf16 %v8328_v44, %v8328_v44  ;;  %v13202_v51 = vpop.f32.mrf.mxu0  ;;  %v8711_v54 = vld [vmem:[#allocation3 + $0x4c] sm:$0xff] }
 0x690   : > { %v8233_v24 = vld [vmem:[#allocation3 + $0x50] sm:$0xff]  ;;  %v12905_v46 = vpack.c.bf16 %v8711_v54, %v8711_v54  ;;  %8525 = vrot.lane.b32.xlu1 %v12873_v37, %s17146_s8 }
 0x691   : > { %v8583_v50 = vld [vmem:[#allocation3 + $0x4b] sm:$0xff]  ;;  %v12843_v55 = vpack.c.bf16 %v8233_v24, %v8233_v24  ;;  %8399 = vrot.lane.b32.xlu0 %v12858_v47, %s17144_s0  ;;  %v13203_v56 = vpop.f32.mrf.mxu0  ;;  %v8712_v31 = vld [vmem:[#allocation3 + $0x54] sm:$0xff] }
 0x692   : > { %v7850_v20 = vld [vmem:[#allocation3 + $0x4d] sm:$0xff]  ;;  %v13204_v14 = vadd.f32 %v13203_v56, %v13202_v51  ;;  %v12906_v9 = vpack.c.bf16 %v8712_v31, %v8712_v31  ;;  %8791 = vst.msk [vmem:[#allocation4 + $0x50] sm:$0xf] %vm935_vm1, %v12905_v46  ;;  %7834 = vst.msk [vmem:[#allocation4 + $0x6c] sm:$0xf] %vm935_vm1, %v12905_v46  ;;  %v12889_v61 = vpack.c.bf16 %v8583_v50, %v8583_v50  ;;  %v8234_v0 = vld [vmem:[#allocation3 + $0x58] sm:$0xff]  ;;  %v16088_v50 = vpop.f32.mrf.mxu1 }
 0x693   : > { %8313 = vst.msk [vmem:[#allocation4 + $0x64] sm:$0xf] %vm935_vm1, %v12843_v55  ;;  %v13205_v32 = vpop.f32.mrf.mxu0  ;;  %v12796_v57 = vpack.c.bf16 %v7850_v20, %v7850_v20  ;;  %v8105_v62 = vld [vmem:[#allocation3 + $0x4f] sm:$0xff]  ;;  %v12844_v33 = vpack.c.bf16 %v8234_v0, %v8234_v0  ;;  %v8106_v37 = vld [vmem:[#allocation3 + $0x57] sm:$0xff] }
 0x694   : > { %v7590_v4 = vadd.f32 %v16026_v6, %v13204_v14  ;;  %v7978_v23 = vld [vmem:[#allocation3 + $0x4e] sm:$0xff]  ;;  %8792 = vst.msk [vmem:[#allocation4 + $0x5c] sm:$0xf] %vm935_vm1, %v12906_v9  ;;  %7835 = vst.msk [vmem:[#allocation4 + $0x78] sm:$0xf] %vm935_vm1, %v12906_v9  ;;  %8653 = vrot.lane.b32.xlu1 %v12889_v61, %s17145_s2  ;;  %v12827_v27 = vpack.c.bf16 %v8105_v62, %v8105_v62  ;;  %v7979_v44 = vld [vmem:[#allocation3 + $0x56] sm:$0xff]  ;;  %v12828_v24 = vpack.c.bf16 %v8106_v37, %v8106_v37  ;;  %v7597_v61 = vpop.f32.mrf.mxu1 }
 0x695   : > { %7923 = vrot.lane.b32.xlu0 %v12796_v57, %s17144_s0  ;;  %v13206_v16 = vpop.f32.mrf.mxu0  ;;  %8314 = vst.msk [vmem:[#allocation4 + $0x70] sm:$0xf] %vm935_vm1, %v12844_v33  ;;  %v12812_v30 = vpack.c.bf16 %v7978_v23, %v7978_v23  ;;  %v8329_v26 = vld [vmem:[#allocation3 + $0x51] sm:$0xff]  ;;  %v12813_v54 = vpack.c.bf16 %v7979_v44, %v7979_v44 }
 0x696   : > { %v7630_v25 = vmul.f32 %v15882_v17, %v7590_v4  ;;  %v13207_v15 = vadd.f32 %v13206_v16, %v13205_v32  ;;  %v8456_v8 = vld [vmem:[#allocation3 + $0x52] sm:$0xff]  ;;  %v12859_v3 = vpack.c.bf16 %v8329_v26, %v8329_v26 }
 0x697   : > { %v12874_v13 = vpack.c.bf16 %v8456_v8, %v8456_v8  ;;  %v7851_v19 = vld [vmem:[#allocation3 + $0x55] sm:$0xff]  ;;  %v13473_v8 = vpop.f32.mrf.mxu1 }
 0x698   : > { %v7654_v6 = vadd.f32 %v15887_v58, %v7630_v25  ;;  %v7593_v28 = vadd.f32 %v16035_v7, %v13207_v15  ;;  %8177 = vrot.lane.b32.xlu1 %v12827_v27, %s17145_s2  ;;  %v8584_v53 = vld [vmem:[#allocation3 + $0x53] sm:$0xff]  ;;  %v16080_v7 = vpop.permute.xlu0 %8543  ;;  %v12797_v5 = vpack.c.bf16 %v7851_v19, %v7851_v19 }
 0x699   : > { %8051 = vrot.lane.b32.xlu0 %v12812_v30, %s17146_s8  ;;  %v12890_v40 = vpack.c.bf16 %v8584_v53, %v8584_v53 }
 0x69a   : > { %v7670_v41 = vmax.f32 %v7654_v6, 0.0  ;;  %v7631_v21 = vmul.f32 %v15882_v17, %v7593_v28 }
 0x69b   : > { %v13752_v60 = vld [vmem:[#allocation4 + $0x50] ss:$12 sps:$4 sm:$0xff]  }
 0x69c   : > { %v7686_v43 = vmul.f32 %v7670_v41, %v14570_v42  ;;  %v7655_v18 = vadd.f32 %v15887_v58, %v7631_v21  ;;  %8401 = vrot.lane.b32.xlu1 %v12859_v3, %s17144_s0  ;;  %13483 = vmatmul.mubr.msk.bf16.gmra.mxu0 %vm766_vm0, %v13752_v60 }
 0x69d   : > { %8527 = vrot.lane.b32.xlu0 %v12874_v13, %s17146_s8 }
 0x69e   : > { %7702 = vst.msk [vmem:[#allocation3 + $0x60] sm:$0xff] %vm766_vm0, %v7686_v43  ;;  %v7671_v12 = vmax.f32 %v7655_v18, 0.0 }
 0x6a0   : > { %v7687_v45 = vmul.f32 %v7671_v12, %v14794_v29  ;;  %7925 = vrot.lane.b32.xlu1 %v12797_v5, %s17144_s0 }
 0x6a1   : > { %8655 = vrot.lane.b32.xlu0 %v12890_v40, %s17145_s2  ;;  %v8162_v47 = vpop.permute.xlu1 %8161  ;;  %v7600_v40 = vpop.f32.mrf.mxu1 }
 0x6a2   : > { %7703 = vst.msk [vmem:[#allocation3 + $0x68] sm:$0xff] %vm766_vm0, %v7687_v45  ;;  %v7908_v51 = vpop.permute.xlu0 %7907 }
 0x6a3   : > { %8209 = vst.msk [vmem:[#allocation4] sm:$0xf] %vm1322_vm4, %v8162_v47 }
 0x6a4   : > { %7954 = vst.msk [vmem:[#allocation4 + $0xc] sm:$0xf] %vm1064_vm2, %v7908_v51  ;;  %8053 = vrot.lane.b32.xlu1 %v12813_v54, %s17146_s8 }
 0x6a5   : > { %8179 = vrot.lane.b32.xlu0 %v12828_v24, %s17145_s2  ;;  %v8457_v20 = vld [vmem:[#allocation3 + $0x5a] sm:$0xff] }
 0x6a6   : > { %v8330_v46 = vld [vmem:[#allocation3 + $0x59] sm:$0xff]  ;;  %v12875_v55 = vpack.c.bf16 %v8457_v20, %v8457_v20  ;;  %v8386_v31 = vpop.permute.xlu1 %8385  ;;  %v8036_v14 = vpop.permute.xlu0 %8035 }
 0x6a7   : > { %v12860_v56 = vpack.c.bf16 %v8330_v46, %v8330_v46  ;;  %v8713_v9 = vld [vmem:[#allocation3 + $0x5c] sm:$0xff]  ;;  %8433 = vst.msk [vmem:[#allocation4 + $0x4] sm:$0xf] %vm1064_vm2, %v8386_v31  ;;  %v13208_v57 = vpop.f32.mrf.mxu0 }
 0x6a8   : > { %v8235_v32 = vld [vmem:[#allocation3 + $0x60] sm:$0xff]  ;;  %8082 = vst.msk [vmem:[#allocation4 + $0xc] sm:$0xf] %vm1193_vm3, %v8036_v14  ;;  %v12907_v62 = vpack.c.bf16 %v8713_v9, %v8713_v9  ;;  %8529 = vrot.lane.b32.xlu1 %v12875_v55, %s17146_s8 }
 0x6a9   : > { %v8585_v0 = vld [vmem:[#allocation3 + $0x5b] sm:$0xff]  ;;  %v12845_v23 = vpack.c.bf16 %v8235_v32, %v8235_v32  ;;  %8403 = vrot.lane.b32.xlu0 %v12860_v56, %s17144_s0  ;;  %v8714_v33 = vld [vmem:[#allocation3 + $0x64] sm:$0xff]  ;;  %v13209_v16 = vpop.f32.mrf.mxu0 }
 0x6aa   : > { %v7852_v4 = vld [vmem:[#allocation3 + $0x5d] sm:$0xff]  ;;  %v12908_v25 = vpack.c.bf16 %v8714_v33, %v8714_v33  ;;  %8793 = vst.msk [vmem:[#allocation4 + $0x68] sm:$0xf] %vm935_vm1, %v12907_v62  ;;  %7836 = vst.msk [vmem:[#allocation4 + $0x84] sm:$0xf] %vm935_vm1, %v12907_v62  ;;  %v13210_v15 = vadd.f32 %v13209_v16, %v13208_v57  ;;  %v7910_v27 = vpop.permute.xlu1 %7909  ;;  %v8164_v30 = vpop.permute.xlu0 %8163  ;;  %v12891_v6 = vpack.c.bf16 %v8585_v0, %v8585_v0  ;;  %v8236_v26 = vld [vmem:[#allocation3 + $0x68] sm:$0xff] }
 0x6ab   : > { %8315 = vst.msk [vmem:[#allocation4 + $0x7c] sm:$0xf] %vm935_vm1, %v12845_v23  ;;  %v12798_v28 = vpack.c.bf16 %v7852_v4, %v7852_v4  ;;  %v13211_v41 = vpop.f32.mrf.mxu0  ;;  %v8107_v21 = vld [vmem:[#allocation3 + $0x5f] sm:$0xff]  ;;  %v12846_v13 = vpack.c.bf16 %v8236_v26, %v8236_v26  ;;  %v8108_v16 = vld [vmem:[#allocation3 + $0x67] sm:$0xff] }
 0x6ac   : > { %7955 = vst.msk [vmem:[#allocation4 + $0x18] sm:$0xf] %vm1064_vm2, %v7910_v27  ;;  %v7980_v3 = vld [vmem:[#allocation3 + $0x5e] sm:$0xff]  ;;  %v7598_v60 = vadd.f32 %v13210_v15, %v7597_v61  ;;  %8657 = vrot.lane.b32.xlu1 %v12891_v6, %s17145_s2  ;;  %v12829_v12 = vpack.c.bf16 %v8107_v21, %v8107_v21  ;;  %v7981_v33 = vld [vmem:[#allocation3 + $0x66] sm:$0xff] }
 0x6ad   : > { %8210 = vst.msk [vmem:[#allocation4 + $0xc] sm:$0xf] %vm1322_vm4, %v8164_v30  ;;  %7927 = vrot.lane.b32.xlu0 %v12798_v28, %s17144_s0  ;;  %v13212_v43 = vpop.f32.mrf.mxu0  ;;  %v12814_v5 = vpack.c.bf16 %v7980_v3, %v7980_v3  ;;  %v8331_v45 = vld [vmem:[#allocation3 + $0x61] sm:$0xff]  ;;  %v12815_v26 = vpack.c.bf16 %v7981_v33, %v7981_v33 }
 0x6ae   : > { %8794 = vst.msk [vmem:[#allocation4 + $0x74] sm:$0xf] %vm935_vm1, %v12908_v25  ;;  %7837 = vst.msk [vmem:[#allocation4 + $0x90] sm:$0xf] %vm935_vm1, %v12908_v25  ;;  %v7632_v18 = vmul.f32 %v15882_v17, %v7598_v60  ;;  %v13213_v19 = vadd.f32 %v13212_v43, %v13211_v41  ;;  %v8038_v53 = vpop.permute.xlu1 %8037  ;;  %v8458_v44 = vld [vmem:[#allocation3 + $0x62] sm:$0xff]  ;;  %v12861_v20 = vpack.c.bf16 %v8331_v45, %v8331_v45 }
 0x6af   : > { %8316 = vst.msk [vmem:[#allocation4 + $0x88] sm:$0xf] %vm935_vm1, %v12846_v13  ;;  %v12876_v46 = vpack.c.bf16 %v8458_v44, %v8458_v44  ;;  %v7853_v56 = vld [vmem:[#allocation3 + $0x65] sm:$0xff]  ;;  %v12830_v41 = vpack.c.bf16 %v8108_v16, %v8108_v16 }
 0x6b0   : > { %8083 = vst.msk [vmem:[#allocation4 + $0x18] sm:$0xf] %vm1193_vm3, %v8038_v53  ;;  %v7656_v37 = vadd.f32 %v15887_v58, %v7632_v18  ;;  %v7601_v47 = vadd.f32 %v13213_v19, %v7600_v40  ;;  %8181 = vrot.lane.b32.xlu1 %v12829_v12, %s17145_s2  ;;  %v8586_v31 = vld [vmem:[#allocation3 + $0x63] sm:$0xff]  ;;  %v12799_v4 = vpack.c.bf16 %v7853_v56, %v7853_v56 }
 0x6b1   : > { %8055 = vrot.lane.b32.xlu0 %v12814_v5, %s17146_s8  ;;  %v12892_v62 = vpack.c.bf16 %v8586_v31, %v8586_v31 }
 0x6b2   : > { %v7672_v51 = vmax.f32 %v7656_v37, 0.0  ;;  %v7633_v54 = vmul.f32 %v15882_v17, %v7601_v47  ;;  %v13214_v24 = vpop.f32.mrf.mxu0 }
 0x6b4   : > { %v7688_v14 = vmul.f32 %v7672_v51, %v14575_v52  ;;  %v7657_v9 = vadd.f32 %v15887_v58, %v7633_v54  ;;  %8405 = vrot.lane.b32.xlu1 %v12861_v20, %s17144_s0  ;;  %v13215_v32 = vpop.f32.mrf.mxu0 }
 0x6b5   : > { %v13754_v55 = vld [vmem:[#allocation4 + $0x68] ss:$12 sps:$4 sm:$0xff]   ;;  %8531 = vrot.lane.b32.xlu0 %v12876_v46, %s17146_s8  ;;  %v13216_v61 = vadd.f32 %v13215_v32, %v13214_v24 }
 0x6b6   : > { %13486 = vmatprep.mubr.msk.bf16.mxu0 %vm766_vm0, %v13754_v55  ;;  %7704 = vst.msk [vmem:[#allocation3 + $0x70] sm:$0xff] %vm766_vm0, %v7688_v14  ;;  %v7673_v57 = vmax.f32 %v7657_v9, 0.0  ;;  %v13217_v0 = vpop.f32.mrf.mxu0 }
 0x6b7   : > { %v7606_v23 = vadd.f32 %v16088_v50, %v13216_v61 }
 0x6b8   : > { %v7689_v25 = vmul.f32 %v7673_v57, %v14805_v49  ;;  %7929 = vrot.lane.b32.xlu1 %v12799_v4, %s17144_s0  ;;  %v13218_v15 = vpop.f32.mrf.mxu0 }
 0x6b9   : > { %8659 = vrot.lane.b32.xlu0 %v12892_v62, %s17145_s2  ;;  %v7634_v27 = vmul.f32 %v15882_v17, %v7606_v23  ;;  %v13219_v30 = vadd.f32 %v13218_v15, %v13217_v0 }
 0x6ba   : > { %7705 = vst.msk [vmem:[#allocation3 + $0x78] sm:$0xff] %vm766_vm0, %v7689_v25  ;;  %v8514_v6 = vpop.permute.xlu1 %8513 }
 0x6bb   : > { %v8388_v28 = vpop.permute.xlu0 %8387  ;;  %v7658_v50 = vadd.f32 %v15887_v58, %v7634_v27  ;;  %v7609_v21 = vadd.f32 %v13473_v8, %v13219_v30  ;;  %8561 = vst.msk [vmem:[#allocation4 + $0x4] sm:$0xf] %vm1193_vm3, %v8514_v6  ;;  %v13894_v8 = vld [vmem:[%s17143_s3 + $0x1] ss:$0 sm:$0xff] }
 0x6bc   : > { %8434 = vst.msk [vmem:[#allocation4 + $0x10] sm:$0xf] %vm1064_vm2, %v8388_v28  ;;  %8057 = vrot.lane.b32.xlu1 %v12815_v26, %s17146_s8 }
 0x6bd   : > { %8183 = vrot.lane.b32.xlu0 %v12830_v41, %s17145_s2  ;;  %v7674_v3 = vmax.f32 %v7658_v50, 0.0  ;;  %v7635_v13 = vmul.f32 %v15882_v17, %v7609_v21  ;;  %v8459_v60 = vld [vmem:[#allocation3 + $0x6a] sm:$0xff] }
 0x6be   : > { %v8332_v43 = vld [vmem:[#allocation3 + $0x69] sm:$0xff]  ;;  %v8642_v18 = vpop.permute.xlu1 %8641  ;;  %v12877_v53 = vpack.c.bf16 %v8459_v60, %v8459_v60 }
 0x6bf   : > { %v7912_v19 = vpop.permute.xlu0 %7911  ;;  %v12862_v12 = vpack.c.bf16 %v8332_v43, %v8332_v43  ;;  %v8587_v5 = vld [vmem:[#allocation3 + $0x6b] sm:$0xff]  ;;  %v7690_v58 = vmul.f32 %v7674_v3, %v14581_v59  ;;  %v7659_v40 = vadd.f32 %v13894_v8, %v7635_v13  ;;  %8689 = vst.msk [vmem:[#allocation4 + $0x4] sm:$0xf] %vm1322_vm4, %v8642_v18 }
 0x6c0   : > { %7956 = vst.msk [vmem:[#allocation4 + $0x24] sm:$0xf] %vm1064_vm2, %v7912_v19  ;;  %v7854_v45 = vld [vmem:[#allocation3 + $0x6d] sm:$0xff]  ;;  %8533 = vrot.lane.b32.xlu1 %v12877_v53, %s17146_s8  ;;  %v12893_v46 = vpack.c.bf16 %v8587_v5, %v8587_v5 }
 0x6c1   : > { %v8715_v17 = vld [vmem:[#allocation3 + $0x6c] sm:$0xff]  ;;  %8407 = vrot.lane.b32.xlu0 %v12862_v12, %s17144_s0  ;;  %7706 = vst.msk [vmem:[#allocation3 + $0x80] sm:$0xff] %vm766_vm0, %v7690_v58  ;;  %v7675_v51 = vmax.f32 %v7659_v40, 0.0  ;;  %v8716_v54 = vld [vmem:[#allocation3 + $0x74] sm:$0xff]  ;;  %v12800_v55 = vpack.c.bf16 %v7854_v45, %v7854_v45 }
 0x6c2   : > { %v8237_v44 = vld [vmem:[#allocation3 + $0x70] sm:$0xff]  ;;  %v12909_v37 = vpack.c.bf16 %v8715_v17, %v8715_v17  ;;  %v8166_v24 = vpop.permute.xlu1 %8165  ;;  %v12910_v56 = vpack.c.bf16 %v8716_v54, %v8716_v54  ;;  %v8238_v32 = vld [vmem:[#allocation3 + $0x78] sm:$0xff] }
 0x6c3   : > { %v12847_v47 = vpack.c.bf16 %v8237_v44, %v8237_v44  ;;  %v8040_v20 = vpop.permute.xlu0 %8039  ;;  %v7691_v31 = vmul.f32 %v7675_v51, %v14819_v2  ;;  %8211 = vst.msk [vmem:[#allocation4 + $0x18] sm:$0xf] %vm1322_vm4, %v8166_v24  ;;  %v8109_v14 = vld [vmem:[#allocation3 + $0x6f] sm:$0xff]  ;;  %v12848_v61 = vpack.c.bf16 %v8238_v32, %v8238_v32  ;;  %v8110_v58 = vld [vmem:[#allocation3 + $0x77] sm:$0xff] }
 0x6c4   : > { %8795 = vst.msk [vmem:[#allocation4 + $0x80] sm:$0xf] %vm935_vm1, %v12909_v37  ;;  %7838 = vst.msk [vmem:[#allocation4 + $0x9c] sm:$0xf] %vm935_vm1, %v12909_v37  ;;  %v7982_v9 = vld [vmem:[#allocation3 + $0x6e] sm:$0xff]  ;;  %8661 = vrot.lane.b32.xlu1 %v12893_v46, %s17145_s2  ;;  %v12831_v4 = vpack.c.bf16 %v8109_v14, %v8109_v14  ;;  %v7983_v5 = vld [vmem:[#allocation3 + $0x76] sm:$0xff]  ;;  %v12832_v37 = vpack.c.bf16 %v8110_v58, %v8110_v58 }
 0x6c5   : > { %8317 = vst.msk [vmem:[#allocation4 + $0x94] sm:$0xf] %vm935_vm1, %v12847_v47  ;;  %7931 = vrot.lane.b32.xlu0 %v12800_v55, %s17144_s0  ;;  %8796 = vst.msk [vmem:[#allocation4 + $0x8c] sm:$0xf] %vm935_vm1, %v12910_v56  ;;  %v12816_v62 = vpack.c.bf16 %v7982_v9, %v7982_v9  ;;  %v8333_v23 = vld [vmem:[#allocation3 + $0x71] sm:$0xff]  ;;  %v12817_v44 = vpack.c.bf16 %v7983_v5, %v7983_v5 }
 0x6c6   : > { %8084 = vst.msk [vmem:[#allocation4 + $0x24] sm:$0xf] %vm1193_vm3, %v8040_v20  ;;  %v8390_v57 = vpop.permute.xlu1 %8389  ;;  %v8460_v33 = vld [vmem:[#allocation3 + $0x72] sm:$0xff]  ;;  %v12863_v30 = vpack.c.bf16 %v8333_v23, %v8333_v23  ;;  %v13771_v47 = vld [vmem:[#allocation4] ss:$12 sps:$4 sm:$0xff]  }
 0x6c7   : > { %7839 = vst.msk [vmem:[#allocation4 + $0xa8] sm:$0xf] %vm935_vm1, %v12910_v56  ;;  %v8516_v0 = vpop.permute.xlu0 %8515  ;;  %8318 = vst.msk [vmem:[#allocation4 + $0xa0] sm:$0xf] %vm935_vm1, %v12848_v61  ;;  %v12878_v6 = vpack.c.bf16 %v8460_v33, %v8460_v33  ;;  %v7855_v28 = vld [vmem:[#allocation3 + $0x75] sm:$0xff] }
 0x6c8   : > { %7707 = vst.msk [vmem:[#allocation3 + $0x88] sm:$0xff] %vm766_vm0, %v7691_v31  ;;  %8185 = vrot.lane.b32.xlu1 %v12831_v4, %s17145_s2  ;;  %v8717_v16 = vld [vmem:[#allocation3 + $0x7c] sm:$0xff]  ;;  %v8588_v50 = vld [vmem:[#allocation3 + $0x73] sm:$0xff]  ;;  %v12801_v53 = vpack.c.bf16 %v7855_v28, %v7855_v28 }
 0x6c9   : > { %8435 = vst.msk [vmem:[#allocation4 + $0x1c] sm:$0xf] %vm1064_vm2, %v8390_v57  ;;  %8059 = vrot.lane.b32.xlu0 %v12816_v62, %s17146_s8  ;;  %v12911_v25 = vpack.c.bf16 %v8717_v16, %v8717_v16  ;;  %v8239_v26 = vld [vmem:[#allocation3 + $0x80] sm:$0xff]  ;;  %v12894_v12 = vpack.c.bf16 %v8588_v50, %v8588_v50 }
 0x6ca   : > { %8562 = vst.msk [vmem:[#allocation4 + $0x10] sm:$0xf] %vm1193_vm3, %v8516_v0  ;;  %v7914_v15 = vpop.permute.xlu1 %7913  ;;  %v12849_v21 = vpack.c.bf16 %v8239_v26, %v8239_v26  ;;  %v8461_v54 = vld [vmem:[#allocation3 + $0x7a] sm:$0xff] }
 0x6cb   : > { %v8644_v27 = vpop.permute.xlu0 %8643  ;;  %7957 = vst.msk [vmem:[#allocation4 + $0x30] sm:$0xf] %vm1064_vm2, %v7914_v15  ;;  %v8334_v24 = vld [vmem:[#allocation3 + $0x79] sm:$0xff]  ;;  %v12879_v55 = vpack.c.bf16 %v8461_v54, %v8461_v54 }
 0x6cc   : > { %8690 = vst.msk [vmem:[#allocation4 + $0x10] sm:$0xf] %vm1322_vm4, %v8644_v27  ;;  %v13767_v41 = vld [vmem:[#allocation4 + $0x80] ss:$12 sps:$4 sm:$0xff]   ;;  %8409 = vrot.lane.b32.xlu1 %v12863_v30, %s17144_s0  ;;  %v12864_v56 = vpack.c.bf16 %v8334_v24, %v8334_v24 }
 0x6cd   : > { %8797 = vst.msk [vmem:[#allocation4 + $0x98] sm:$0xf] %vm935_vm1, %v12911_v25  ;;  %7840 = vst.msk [vmem:[#allocation4 + $0xb4] sm:$0xf] %vm935_vm1, %v12911_v25  ;;  %8535 = vrot.lane.b32.xlu0 %v12878_v6, %s17146_s8  ;;  %13487 = vmatmul.mubr.msk.bf16.gmra.mxu0 %vm766_vm0, %v13767_v41  ;;  %v8589_v9 = vld [vmem:[#allocation3 + $0x7b] sm:$0xff] }
 0x6ce   : > { %8319 = vst.msk [vmem:[#allocation4 + $0xac] sm:$0xf] %vm935_vm1, %v12849_v21  ;;  %v8042_v18 = vpop.permute.xlu1 %8041  ;;  %v7856_v32 = vld [vmem:[#allocation3 + $0x7d] sm:$0xff]  ;;  %v12895_v0 = vpack.c.bf16 %v8589_v9, %v8589_v9 }
 0x6cf   : > { %v8718_v3 = vld [vmem:[#allocation3 + $0x84] sm:$0xff]  ;;  %v8719_v13 = vld [vmem:[#allocation3 + $0x8c] sm:$0xff]  ;;  %v8168_v19 = vpop.permute.xlu0 %8167  ;;  %8085 = vst.msk [vmem:[#allocation4 + $0x30] sm:$0xf] %vm1193_vm3, %v8042_v18  ;;  %v12802_v4 = vpack.c.bf16 %v7856_v32, %v7856_v32 }
 0x6d0   : > { %v12912_v60 = vpack.c.bf16 %v8718_v3, %v8718_v3  ;;  %v12913_v43 = vpack.c.bf16 %v8719_v13, %v8719_v13  ;;  %8212 = vst.msk [vmem:[#allocation4 + $0x24] sm:$0xf] %vm1322_vm4, %v8168_v19  ;;  %v8240_v8 = vld [vmem:[#allocation3 + $0x88] sm:$0xff]  ;;  %7933 = vrot.lane.b32.xlu1 %v12801_v53, %s17144_s0  ;;  %v8111_v62 = vld [vmem:[#allocation3 + $0x7f] sm:$0xff] }
 0x6d1   : > { %8663 = vrot.lane.b32.xlu0 %v12894_v12, %s17145_s2  ;;  %v12850_v40 = vpack.c.bf16 %v8240_v8, %v8240_v8  ;;  %v7984_v23 = vld [vmem:[#allocation3 + $0x7e] sm:$0xff]  ;;  %v12833_v25 = vpack.c.bf16 %v8111_v62, %v8111_v62  ;;  %v8463_v50 = vld [vmem:[#allocation3 + $0x8a] sm:$0xff] }
 0x6d2   : > { %8798 = vst.msk [vmem:[#allocation4 + $0xa4] sm:$0xf] %vm935_vm1, %v12912_v60  ;;  %8799 = vst.msk [vmem:[#allocation4 + $0xb0] sm:$0xf] %vm935_vm1, %v12913_v43  ;;  %v8518_v45 = vpop.permute.xlu1 %8517  ;;  %v12818_v15 = vpack.c.bf16 %v7984_v23, %v7984_v23  ;;  %v8335_v27 = vld [vmem:[#allocation3 + $0x81] sm:$0xff]  ;;  %v12881_v60 = vpack.c.bf16 %v8463_v50, %v8463_v50  ;;  %v8591_v18 = vld [vmem:[#allocation3 + $0x8b] sm:$0xff] }
 0x6d3   : > { %v8392_v17 = vpop.permute.xlu0 %8391  ;;  %v13773_v51 = vld [vmem:[#allocation4 + $0x4] ss:$12 sps:$4 sm:$0xff]   ;;  %8320 = vst.msk [vmem:[#allocation4 + $0xb8] sm:$0xf] %vm935_vm1, %v12850_v40  ;;  %v12865_v26 = vpack.c.bf16 %v8335_v27, %v8335_v27  ;;  %v12897_v5 = vpack.c.bf16 %v8591_v18, %v8591_v18 }
 0x6d4   : > { %8563 = vst.msk [vmem:[#allocation4 + $0x1c] sm:$0xf] %vm1193_vm3, %v8518_v45  ;;  %8061 = vrot.lane.b32.xlu1 %v12817_v44, %s17146_s8  ;;  %9117 = vmatprep.mubr.bf16.mxu1 %v13773_v51  ;;  %v8462_v30 = vld [vmem:[#allocation3 + $0x82] sm:$0xff] }
 0x6d5   : > { %8436 = vst.msk [vmem:[#allocation4 + $0x28] sm:$0xf] %vm1064_vm2, %v8392_v17  ;;  %8187 = vrot.lane.b32.xlu0 %v12832_v37, %s17145_s2  ;;  %9118 = vmatmul.mubr.bf16.vlgmr.msra.gmra.mxu1 %v13771_v47  ;;  %v12880_v41 = vpack.c.bf16 %v8462_v30, %v8462_v30  ;;  %v8590_v21 = vld [vmem:[#allocation3 + $0x83] sm:$0xff]  ;;  %v8592_v37 = vld [vmem:[#allocation3 + $0x93] sm:$0xff] }
 0x6d6   : > { %v8646_v20 = vpop.permute.xlu1 %8645  ;;  %v12896_v43 = vpack.c.bf16 %v8590_v21, %v8590_v21  ;;  %v8336_v19 = vld [vmem:[#allocation3 + $0x89] sm:$0xff]  ;;  %v12898_v24 = vpack.c.bf16 %v8592_v37, %v8592_v37 }
 0x6d7   : > { %v7916_v46 = vpop.permute.xlu0 %7915  ;;  %8691 = vst.msk [vmem:[#allocation4 + $0x1c] sm:$0xf] %vm1322_vm4, %v8646_v20  ;;  %v12866_v58 = vpack.c.bf16 %v8336_v19, %v8336_v19  ;;  %v8112_v44 = vld [vmem:[#allocation3 + $0x87] sm:$0xff] }
 0x6d8   : > { %7958 = vst.msk [vmem:[#allocation4 + $0x3c] sm:$0xf] %vm1064_vm2, %v7916_v46  ;;  %8537 = vrot.lane.b32.xlu1 %v12879_v55, %s17146_s8  ;;  %v12834_v54 = vpack.c.bf16 %v8112_v44, %v8112_v44 }
 0x6d9   : > { %v13774_v31 = vld [vmem:[#allocation4 + $0x98] ss:$12 sps:$4 sm:$0xff]   ;;  %v13775_v14 = vld [vmem:[#allocation4 + $0xb0] ss:$12 sps:$4 sm:$0xff]   ;;  %8411 = vrot.lane.b32.xlu0 %v12864_v56, %s17144_s0 }
 0x6da   : > { %13490 = vmatprep.mubr.msk.bf16.mxu0 %vm766_vm0, %v13774_v31  ;;  %v8170_v61 = vpop.permute.xlu1 %8169 }
 0x6db   : > { %v8044_v57 = vpop.permute.xlu0 %8043  ;;  %13491 = vmatmul.mubr.msk.bf16.gmra.mxu0 %vm766_vm0, %v13775_v14  ;;  %8213 = vst.msk [vmem:[#allocation4 + $0x30] sm:$0xf] %vm1322_vm4, %v8170_v61 }
 0x6dc   : > { %8086 = vst.msk [vmem:[#allocation4 + $0x3c] sm:$0xf] %vm1193_vm3, %v8044_v57  ;;  %8665 = vrot.lane.b32.xlu1 %v12895_v0, %s17145_s2 }
 0x6dd   : > { %7935 = vrot.lane.b32.xlu0 %v12802_v4, %s17144_s0 }
 0x6de   : > { %v8394_v33 = vpop.permute.xlu1 %8393  ;;  %v8805_v8 = vld [vmem:[#allocation4 + $0x18] sm:$0xff] }
 0x6df   : > { %v8520_v16 = vpop.permute.xlu0 %8519  ;;  %8437 = vst.msk [vmem:[#allocation4 + $0x34] sm:$0xf] %vm1064_vm2, %v8394_v33 }
 0x6e0   : > { %8564 = vst.msk [vmem:[#allocation4 + $0x28] sm:$0xf] %vm1193_vm3, %v8520_v16  ;;  %8189 = vrot.lane.b32.xlu1 %v12833_v25, %s17145_s2 }
 0x6e1   : > { %8063 = vrot.lane.b32.xlu0 %v12818_v15, %s17146_s8 }
 0x6e2   : > { %v7918_v6 = vpop.permute.xlu1 %7917 }
 0x6e3   : > { %v8648_v28 = vpop.permute.xlu0 %8647  ;;  %7959 = vst.msk [vmem:[#allocation4 + $0x48] sm:$0xf] %vm1064_vm2, %v7918_v6 }
 0x6e4   : > { %8692 = vst.msk [vmem:[#allocation4 + $0x28] sm:$0xf] %vm1322_vm4, %v8648_v28  ;;  %8413 = vrot.lane.b32.xlu1 %v12865_v26, %s17144_s0 }
 0x6e5   : > { %8539 = vrot.lane.b32.xlu0 %v12880_v41, %s17146_s8 }
 0x6e6   : > { %v8046_v3 = vpop.permute.xlu1 %8045 }
 0x6e7   : > { %v8172_v13 = vpop.permute.xlu0 %8171  ;;  %8087 = vst.msk [vmem:[#allocation4 + $0x48] sm:$0xf] %vm1193_vm3, %v8046_v3 }
 0x6e8   : > { %8214 = vst.msk [vmem:[#allocation4 + $0x3c] sm:$0xf] %vm1322_vm4, %v8172_v13  ;;  %8541 = vrot.lane.b32.xlu1 %v12881_v60, %s17146_s8 }
 0x6e9   : > { %8667 = vrot.lane.b32.xlu0 %v12896_v43, %s17145_s2 }
 0x6ea   : > { %v8522_v53 = vpop.permute.xlu1 %8521 }
 0x6eb   : > { %v8396_v12 = vpop.permute.xlu0 %8395  ;;  %v8807_v40 = vld [vmem:[#allocation4 + $0x24] sm:$0xff]  ;;  %8565 = vst.msk [vmem:[#allocation4 + $0x34] sm:$0xf] %vm1193_vm3, %v8522_v53 }
 0x6ec   : > { %v13776_v45 = vld [vmem:[#allocation4 + $0x1c] ss:$12 sps:$4 sm:$0xff]   ;;  %8438 = vst.msk [vmem:[#allocation4 + $0x40] sm:$0xf] %vm1064_vm2, %v8396_v12  ;;  %v12036_v17 = vcombine.low %v8805_v8, %v8807_v40  ;;  %8669 = vrot.lane.b32.xlu1 %v12897_v5, %s17145_s2 }
 0x6ed   : > { %8415 = vrot.lane.b32.xlu0 %v12866_v58, %s17144_s0  ;;  %9125 = vmatprep.mubr.bf16.mxu1 %v13776_v45 }
 0x6ee   : > { %v8650_v47 = vpop.permute.xlu1 %8649  ;;  %9126 = vmatmul.mubr.bf16.gmra.mxu1 %v12036_v17 }
 0x6ef   : > { %v7920_v51 = vpop.permute.xlu0 %7919  ;;  %8693 = vst.msk [vmem:[#allocation4 + $0x34] sm:$0xf] %vm1322_vm4, %v8650_v47 }
 0x6f0   : > { %7960 = vst.msk [vmem:[#allocation4 + $0x54] sm:$0xf] %vm1064_vm2, %v7920_v51 }
 0x6f1   : > { %8191 = vrot.lane.b32.xlu0 %v12834_v54, %s17145_s2 }
 0x6f2   : > { %v8174_v20 = vpop.permute.xlu1 %8173 }
 0x6f3   : > { %v8048_v46 = vpop.permute.xlu0 %8047  ;;  %8215 = vst.msk [vmem:[#allocation4 + $0x48] sm:$0xf] %vm1322_vm4, %v8174_v20 }
 0x6f4   : > { %8088 = vst.msk [vmem:[#allocation4 + $0x54] sm:$0xf] %vm1193_vm3, %v8048_v46 }
 0x6f5   : > { %8671 = vrot.lane.b32.xlu0 %v12898_v24, %s17145_s2 }
 0x6f6   : > { %v8398_v55 = vpop.permute.xlu1 %8397  ;;  %v8809_v0 = vld [vmem:[#allocation4 + $0x30] sm:$0xff] }
 0x6f7   : > { %v8524_v56 = vpop.permute.xlu0 %8523  ;;  %8439 = vst.msk [vmem:[#allocation4 + $0x4c] sm:$0xf] %vm1064_vm2, %v8398_v55 }
 0x6f8   : > { %8566 = vst.msk [vmem:[#allocation4 + $0x40] sm:$0xf] %vm1193_vm3, %v8524_v56 }
 0x6fa   : > { %v7922_v31 = vpop.permute.xlu1 %7921 }
 0x6fb   : > { %v8652_v14 = vpop.permute.xlu0 %8651  ;;  %7961 = vst.msk [vmem:[#allocation4 + $0x60] sm:$0xf] %vm1064_vm2, %v7922_v31 }
 0x6fc   : > { %8694 = vst.msk [vmem:[#allocation4 + $0x40] sm:$0xf] %vm1322_vm4, %v8652_v14 }
 0x6fe   : > { %v8050_v9 = vpop.permute.xlu1 %8049 }
 0x6ff   : > { %v8176_v32 = vpop.permute.xlu0 %8175  ;;  %8089 = vst.msk [vmem:[#allocation4 + $0x60] sm:$0xf] %vm1193_vm3, %v8050_v9  ;;  %v13794_v9 = vld [vmem:[%s17084_s12 + $0x8] sm:$0xff]  }
 0x700   : > { %8216 = vst.msk [vmem:[#allocation4 + $0x54] sm:$0xf] %vm1322_vm4, %v8176_v32  ;;  %13494 = vmatprep.subr.bf16.mxu0 %v13794_v9 }
 0x701   : > { %13495 = vmatpush3.bf16.msra.mxu0 %v13794_v9 }
 0x702   : > { %v8526_v61 = vpop.permute.xlu1 %8525 }
 0x703   : > { %v8400_v57 = vpop.permute.xlu0 %8399  ;;  %v8811_v4 = vld [vmem:[#allocation4 + $0x3c] sm:$0xff]  ;;  %8567 = vst.msk [vmem:[#allocation4 + $0x4c] sm:$0xf] %vm1193_vm3, %v8526_v61 }
 0x704   : > { %v13778_v62 = vld [vmem:[#allocation4 + $0x34] ss:$12 sps:$4 sm:$0xff]   ;;  %8440 = vst.msk [vmem:[#allocation4 + $0x58] sm:$0xf] %vm1064_vm2, %v8400_v57  ;;  %v12039_v23 = vcombine.low %v8809_v0, %v8811_v4 }
 0x705   : > { %9133 = vmatprep.mubr.bf16.mxu1 %v13778_v62 }
 0x706   : > { %9134 = vmatmul.mubr.bf16.gmra.mxu1 %v12039_v23  ;;  %v8654_v33 = vpop.permute.xlu1 %8653  ;;  %v13795_v23 = vld [vmem:[%s17084_s12] sm:$0xff]  }
 0x707   : > { %v7924_v16 = vpop.permute.xlu0 %7923  ;;  %8695 = vst.msk [vmem:[#allocation4 + $0x4c] sm:$0xf] %vm1322_vm4, %v8654_v33  ;;  %13496 = vmatprep.subr.bf16.mxu0 %v13795_v23 }
 0x708   : > { %7962 = vst.msk [vmem:[#allocation4 + $0x6c] sm:$0xf] %vm1064_vm2, %v7924_v16  ;;  %13497 = vmatpush3.bf16.msra.mxu0 %v13795_v23 }
 0x709   : > { %13534 = vmatprep.subr.bf16.mxu0 %v17119_v1 }
 0x70a   : > { %v8178_v25 = vpop.permute.xlu1 %8177 }
 0x70b   : > { %v8052_v15 = vpop.permute.xlu0 %8051  ;;  %8217 = vst.msk [vmem:[#allocation4 + $0x60] sm:$0xf] %vm1322_vm4, %v8178_v25 }
 0x70c   : > { %8090 = vst.msk [vmem:[#allocation4 + $0x6c] sm:$0xf] %vm1193_vm3, %v8052_v15 }
 0x70e   : > { %v8402_v27 = vpop.permute.xlu1 %8401  ;;  %v8813_v3 = vld [vmem:[#allocation4 + $0x48] sm:$0xff] }
 0x70f   : > { %v8528_v30 = vpop.permute.xlu0 %8527  ;;  %8441 = vst.msk [vmem:[#allocation4 + $0x64] sm:$0xf] %vm1064_vm2, %v8402_v27 }
 0x710   : > { %8568 = vst.msk [vmem:[#allocation4 + $0x58] sm:$0xf] %vm1193_vm3, %v8528_v30 }
 0x712   : > { %v7926_v6 = vpop.permute.xlu1 %7925 }
 0x713   : > { %v8656_v28 = vpop.permute.xlu0 %8655  ;;  %7963 = vst.msk [vmem:[#allocation4 + $0x78] sm:$0xf] %vm1064_vm2, %v7926_v6 }
 0x714   : > { %8696 = vst.msk [vmem:[#allocation4 + $0x58] sm:$0xf] %vm1322_vm4, %v8656_v28 }
 0x716   : > { %v8054_v26 = vpop.permute.xlu1 %8053 }
 0x717   : > { %v8180_v41 = vpop.permute.xlu0 %8179  ;;  %8091 = vst.msk [vmem:[#allocation4 + $0x78] sm:$0xf] %vm1193_vm3, %v8054_v26 }
 0x718   : > { %8218 = vst.msk [vmem:[#allocation4 + $0x6c] sm:$0xf] %vm1322_vm4, %v8180_v41 }
 0x71a   : > { %v8530_v50 = vpop.permute.xlu1 %8529 }
 0x71b   : > { %v8404_v21 = vpop.permute.xlu0 %8403  ;;  %v8815_v13 = vld [vmem:[#allocation4 + $0x54] sm:$0xff]  ;;  %8569 = vst.msk [vmem:[#allocation4 + $0x64] sm:$0xf] %vm1193_vm3, %v8530_v50 }
 0x71c   : > { %v13780_v60 = vld [vmem:[#allocation4 + $0x4c] ss:$12 sps:$4 sm:$0xff]   ;;  %8442 = vst.msk [vmem:[#allocation4 + $0x70] sm:$0xf] %vm1064_vm2, %v8404_v21  ;;  %v12042_v43 = vcombine.low %v8813_v3, %v8815_v13 }
 0x71d   : > { %9141 = vmatprep.mubr.bf16.mxu1 %v13780_v60 }
 0x71e   : > { %9142 = vmatmul.mubr.bf16.gmra.mxu1 %v12042_v43  ;;  %v8658_v18 = vpop.permute.xlu1 %8657 }
 0x71f   : > { %v7928_v19 = vpop.permute.xlu0 %7927  ;;  %8697 = vst.msk [vmem:[#allocation4 + $0x64] sm:$0xf] %vm1322_vm4, %v8658_v18  ;;  %v13782_v47 = vld [vmem:[#allocation4 + $0x60] ss:$12 sps:$4 sm:$0xff]  }
 0x720   : > { %7964 = vst.msk [vmem:[#allocation4 + $0x84] sm:$0xf] %vm1064_vm2, %v7928_v19 }
 0x722   : > { %v8182_v53 = vpop.permute.xlu1 %8181 }
 0x723   : > { %v8056_v12 = vpop.permute.xlu0 %8055  ;;  %8219 = vst.msk [vmem:[#allocation4 + $0x78] sm:$0xf] %vm1322_vm4, %v8182_v53 }
 0x724   : > { %8092 = vst.msk [vmem:[#allocation4 + $0x84] sm:$0xf] %vm1193_vm3, %v8056_v12 }
 0x726   : > { %v8406_v5 = vpop.permute.xlu1 %8405 }
 0x727   : > { %v8532_v58 = vpop.permute.xlu0 %8531  ;;  %8443 = vst.msk [vmem:[#allocation4 + $0x7c] sm:$0xf] %vm1064_vm2, %v8406_v5 }
 0x728   : > { %8570 = vst.msk [vmem:[#allocation4 + $0x70] sm:$0xf] %vm1193_vm3, %v8532_v58 }
 0x72a   : > { %v7930_v8 = vpop.permute.xlu1 %7929 }
 0x72b   : > { %v8660_v40 = vpop.permute.xlu0 %8659  ;;  %7965 = vst.msk [vmem:[#allocation4 + $0x90] sm:$0xf] %vm1064_vm2, %v7930_v8 }
 0x72c   : > { %8698 = vst.msk [vmem:[#allocation4 + $0x70] sm:$0xf] %vm1322_vm4, %v8660_v40  ;;  %v13480_v18 = vpop.f32.mrf.mxu0 }
 0x72e   : > { %v8058_v45 = vpop.permute.xlu1 %8057  ;;  %v9216_v19 = vpop.f32.mrf.mxu0 }
 0x72f   : > { %v8184_v17 = vpop.permute.xlu0 %8183  ;;  %8093 = vst.msk [vmem:[#allocation4 + $0x90] sm:$0xf] %vm1193_vm3, %v8058_v45 }
 0x730   : > { %8220 = vst.msk [vmem:[#allocation4 + $0x84] sm:$0xf] %vm1322_vm4, %v8184_v17 }
 0x732   : > { %v8534_v44 = vpop.permute.xlu1 %8533 }
 0x733   : > { %v8408_v37 = vpop.permute.xlu0 %8407  ;;  %v13784_v51 = vld [vmem:[#allocation4 + $0x64] ss:$12 sps:$4 sm:$0xff]   ;;  %8571 = vst.msk [vmem:[#allocation4 + $0x7c] sm:$0xf] %vm1193_vm3, %v8534_v44 }
 0x734   : > { %8444 = vst.msk [vmem:[#allocation4 + $0x88] sm:$0xf] %vm1064_vm2, %v8408_v37  ;;  %9149 = vmatprep.mubr.bf16.mxu1 %v13784_v51  ;;  %v9279_v37 = vld [vmem:[#allocation2] sm:$0xff] }
 0x735   : > { %9150 = vmatmul.mubr.bf16.gmra.mxu1 %v13782_v47 }
 0x736   : > { %v8662_v54 = vpop.permute.xlu1 %8661 }
 0x737   : > { %v7932_v24 = vpop.permute.xlu0 %7931  ;;  %8699 = vst.msk [vmem:[#allocation4 + $0x7c] sm:$0xf] %vm1322_vm4, %v8662_v54  ;;  %v13785_v4 = vld [vmem:[#allocation4 + $0x78] ss:$12 sps:$4 sm:$0xff]  }
 0x738   : > { %7966 = vst.msk [vmem:[#allocation4 + $0x9c] sm:$0xf] %vm1064_vm2, %v7932_v24  ;;  %v9280_v24 = vld [vmem:[#allocation2 + $0x8] sm:$0xff] }
 0x73a   : > { %v8186_v20 = vpop.permute.xlu1 %8185 }
 0x73b   : > { %v8060_v46 = vpop.permute.xlu0 %8059  ;;  %8221 = vst.msk [vmem:[#allocation4 + $0x90] sm:$0xf] %vm1322_vm4, %v8186_v20 }
 0x73c   : > { %8094 = vst.msk [vmem:[#allocation4 + $0x9c] sm:$0xf] %vm1193_vm3, %v8060_v46  ;;  %v16280_v46 = vld [vmem:[%s17082_s10] ss:$0 sm:$0xff] }
 0x73e   : > { %v8410_v55 = vpop.permute.xlu1 %8409 }
 0x73f   : > { %v8536_v56 = vpop.permute.xlu0 %8535  ;;  %8445 = vst.msk [vmem:[#allocation4 + $0x94] sm:$0xf] %vm1064_vm2, %v8410_v55 }
 0x740   : > { %8572 = vst.msk [vmem:[#allocation4 + $0x88] sm:$0xf] %vm1193_vm3, %v8536_v56  ;;  %v16285_v56 = vld [vmem:[%s17083_s11] ss:$0 sm:$0xff] }
 0x742   : > { %v7934_v31 = vpop.permute.xlu1 %7933 }
 0x743   : > { %v8664_v14 = vpop.permute.xlu0 %8663  ;;  %7967 = vst.msk [vmem:[#allocation4 + $0xa8] sm:$0xf] %vm1064_vm2, %v7934_v31 }
 0x744   : > { %8700 = vst.msk [vmem:[#allocation4 + $0x88] sm:$0xf] %vm1322_vm4, %v8664_v14 }
 0x746   : > { %v8062_v32 = vpop.permute.xlu1 %8061 }
 0x747   : > { %v8188_v61 = vpop.permute.xlu0 %8187  ;;  %8095 = vst.msk [vmem:[#allocation4 + $0xa8] sm:$0xf] %vm1193_vm3, %v8062_v32 }
 0x748   : > { %8222 = vst.msk [vmem:[#allocation4 + $0x9c] sm:$0xf] %vm1322_vm4, %v8188_v61 }
 0x74a   : > { %v8538_v57 = vpop.permute.xlu1 %8537 }
 0x74b   : > { %v8412_v0 = vpop.permute.xlu0 %8411  ;;  %v13787_v62 = vld [vmem:[#allocation4 + $0x7c] ss:$12 sps:$4 sm:$0xff]   ;;  %8573 = vst.msk [vmem:[#allocation4 + $0x94] sm:$0xf] %vm1193_vm3, %v8538_v57 }
 0x74c   : > { %8446 = vst.msk [vmem:[#allocation4 + $0xa0] sm:$0xf] %vm1064_vm2, %v8412_v0  ;;  %9157 = vmatprep.mubr.bf16.mxu1 %v13787_v62 }
 0x74d   : > { %9158 = vmatmul.mubr.bf16.gmra.mxu1 %v13785_v4 }
 0x74e   : > { %v8666_v33 = vpop.permute.xlu1 %8665 }
 0x74f   : > { %v7936_v16 = vpop.permute.xlu0 %7935  ;;  %8701 = vst.msk [vmem:[#allocation4 + $0x94] sm:$0xf] %vm1322_vm4, %v8666_v33  ;;  %v13788_v21 = vld [vmem:[#allocation4 + $0x90] ss:$12 sps:$4 sm:$0xff]  }
 0x750   : > { %7968 = vst.msk [vmem:[#allocation4 + $0xb4] sm:$0xf] %vm1064_vm2, %v7936_v16 }
 0x752   : > { %v8190_v25 = vpop.permute.xlu1 %8189 }
 0x753   : > { %v8064_v15 = vpop.permute.xlu0 %8063  ;;  %8223 = vst.msk [vmem:[#allocation4 + $0xa8] sm:$0xf] %vm1322_vm4, %v8190_v25 }
 0x754   : > { %8096 = vst.msk [vmem:[#allocation4 + $0xb4] sm:$0xf] %vm1193_vm3, %v8064_v15 }
 0x756   : > { %v8414_v27 = vpop.permute.xlu1 %8413 }
 0x757   : > { %v8540_v30 = vpop.permute.xlu0 %8539  ;;  %8447 = vst.msk [vmem:[#allocation4 + $0xac] sm:$0xf] %vm1064_vm2, %v8414_v27 }
 0x758   : > { %8574 = vst.msk [vmem:[#allocation4 + $0xa0] sm:$0xf] %vm1193_vm3, %v8540_v30 }
 0x75a   : > { %v8542_v6 = vpop.permute.xlu1 %8541 }
 0x75b   : > { %v8668_v28 = vpop.permute.xlu0 %8667  ;;  %8575 = vst.msk [vmem:[#allocation4 + $0xac] sm:$0xf] %vm1193_vm3, %v8542_v6 }
 0x75c   : > { %8702 = vst.msk [vmem:[#allocation4 + $0xa0] sm:$0xf] %vm1322_vm4, %v8668_v28 }
 0x75e   : > { %v8670_v26 = vpop.permute.xlu1 %8669 }
 0x75f   : > { %v8416_v41 = vpop.permute.xlu0 %8415  ;;  %8703 = vst.msk [vmem:[#allocation4 + $0xac] sm:$0xf] %vm1322_vm4, %v8670_v26  ;;  %v9281_v26 = vld [vmem:[#allocation2 + $0x10] sm:$0xff] }
 0x760   : > { %8448 = vst.msk [vmem:[#allocation4 + $0xb8] sm:$0xf] %vm1064_vm2, %v8416_v41 }
 0x761   : > { %8576 = vst.msk [vmem:[#allocation4 + $0xb8] sm:$0xf] %vm1193_vm3, %v16080_v7  ;;  %v13481_v7 = vpop.f32.mrf.mxu0 }
 0x763   : > { %v8192_v50 = vpop.permute.xlu0 %8191  ;;  %v13790_v3 = vld [vmem:[#allocation4 + $0x94] ss:$12 sps:$4 sm:$0xff]   ;;  %v9219_v44 = vpop.f32.mrf.mxu0 }
 0x764   : > { %8224 = vst.msk [vmem:[#allocation4 + $0xb4] sm:$0xf] %vm1322_vm4, %v8192_v50  ;;  %9165 = vmatprep.mubr.bf16.mxu1 %v13790_v3  ;;  %v9282_v3 = vld [vmem:[#allocation2 + $0x18] sm:$0xff] }
 0x765   : > { %9166 = vmatmul.mubr.bf16.gmra.mxu1 %v13788_v21 }
 0x767   : > { %v8672_v13 = vpop.permute.xlu0 %8671 }
 0x768   : > { %8704 = vst.msk [vmem:[#allocation4 + $0xb8] sm:$0xf] %vm1322_vm4, %v8672_v13  ;;  %v13484_v13 = vpop.f32.mrf.mxu0 }
 0x76b   : > { %v13791_v60 = vld [vmem:[#allocation4 + $0xa8] ss:$12 sps:$4 sm:$0xff]  }
 0x76f   : > { %v13793_v43 = vld [vmem:[#allocation4 + $0xac] ss:$12 sps:$4 sm:$0xff]  }
 0x770   : > { %9173 = vmatprep.mubr.bf16.mxu1 %v13793_v43 }
 0x771   : > { %9174 = vmatmul.mubr.bf16.gmra.mxu1 %v13791_v60 }
 0x795   : > { %v13246_v53 = vpop.f32.mrf.mxu1 }
 0x797   : > { %v13247_v12 = vpop.f32.mrf.mxu1 }
 0x798   : > { %v13248_v5 = vadd.f32 %v13247_v12, %v13246_v53 }
 0x799   : > { %v13249_v58 = vpop.f32.mrf.mxu1 }
 0x79a   : > { %v9217_v8 = vadd.f32 %v13248_v5, %v9216_v19  ;;  %v9232_v19 = vpop.f32.mrf.mxu0 }
 0x79b   : > { %v13250_v40 = vpop.f32.mrf.mxu1 }
 0x79c   : > { %v9295_v45 = vmul.f32 %v9217_v8, %v14572_v48  ;;  %v13251_v17 = vadd.f32 %v13250_v40, %v13249_v58  ;;  %v13485_v40 = vpop.f32.mrf.mxu0 }
 0x79e   : > { %v9311_v47 = vadd.f32 %v9295_v45, %v9279_v37  ;;  %v9220_v51 = vadd.f32 %v13251_v17, %v9219_v44 }
 0x7a0   : > { %9327 = vst.msk [vmem:[#allocation2] sm:$0xff] %vm766_vm0, %v9311_v47  ;;  %v9296_v54 = vmul.f32 %v9220_v51, %v14560_v34 }
 0x7a2   : > { %v9312_v20 = vadd.f32 %v9296_v54, %v9280_v24 }
 0x7a4   : > { %9328 = vst.msk [vmem:[#allocation2 + $0x8] sm:$0xff] %vm766_vm0, %v9312_v20  ;;  %v9235_v20 = vpop.f32.mrf.mxu0 }
 0x7a7   : > { %v9343_v55 = vld [vmem:[#allocation2] sm:$0xff] }
 0x7a8   : > { %v9366_v31 = vmul.f32 %v16280_v46, %v9343_v55  ;;  %v9283_v55 = vld [vmem:[#allocation2 + $0x20] sm:$0xff] }
 0x7aa   : > { %v9389_v14 = vadd.f32 %v16285_v56, %v9366_v31 }
 0x7ab   : > { %v9344_v9 = vld [vmem:[#allocation2 + $0x8] sm:$0xff] }
 0x7ac   : > { %v9367_v32 = vmul.f32 %v16280_v46, %v9344_v9  ;;  %v9405_v0 = vmax.f32 %v9389_v14, 0.0 }
 0x7ae   : > { %v13252_v61 = vpop.f32.mrf.mxu1  ;;  %v9390_v57 = vadd.f32 %v16285_v56, %v9367_v32  ;;  %v9421_v25 = vmul.f32 %v9405_v0, %v14572_v48 }
 0x7b0   : > { %v13253_v4 = vpop.f32.mrf.mxu1  ;;  %v9406_v23 = vmax.f32 %v9390_v57, 0.0 }
 0x7b1   : > { %v13254_v62 = vadd.f32 %v13253_v4, %v13252_v61  ;;  %v9284_v61 = vld [vmem:[#allocation2 + $0x28] sm:$0xff] }
 0x7b2   : > { %v13255_v33 = vpop.f32.mrf.mxu1  ;;  %v9422_v15 = vmul.f32 %v9406_v23, %v14560_v34 }
 0x7b3   : > { %v9225_v16 = vadd.f32 %v13480_v18, %v13254_v62 }
 0x7b4   : > { %v13256_v27 = vpop.f32.mrf.mxu1  ;;  %v16294_v28 = vpack.c.bf16 %v9422_v15, %v9421_v25 }
 0x7b5   : > { %v9297_v30 = vmul.f32 %v9225_v16, %v14562_v22  ;;  %v13257_v6 = vadd.f32 %v13256_v27, %v13255_v33 }
 0x7b6   : > { %13498 = vmatprep.mubr.msk.bf16.mxu0 %vm766_vm0, %v16294_v28 }
 0x7b7   : > { %v9313_v41 = vadd.f32 %v9297_v30, %v9281_v26  ;;  %v9228_v50 = vadd.f32 %v13481_v7, %v13257_v6 }
 0x7b9   : > { %9329 = vst.msk [vmem:[#allocation2 + $0x10] sm:$0xff] %vm766_vm0, %v9313_v41  ;;  %v9298_v21 = vmul.f32 %v9228_v50, %v14606_v39 }
 0x7bb   : > { %v9314_v48 = vadd.f32 %v9298_v21, %v9282_v3 }
 0x7bd   : > { %9330 = vst.msk [vmem:[#allocation2 + $0x18] sm:$0xff] %vm766_vm0, %v9314_v48 }
 0x7c0   : > { %v9345_v34 = vld [vmem:[#allocation2 + $0x10] sm:$0xff] }
 0x7c1   : > { %v9368_v60 = vmul.f32 %v16280_v46, %v9345_v34  ;;  %v9285_v34 = vld [vmem:[#allocation2 + $0x30] sm:$0xff] }
 0x7c3   : > { %v9391_v43 = vadd.f32 %v16285_v56, %v9368_v60 }
 0x7c4   : > { %v9346_v18 = vld [vmem:[#allocation2 + $0x18] sm:$0xff] }
 0x7c5   : > { %v9369_v12 = vmul.f32 %v16280_v46, %v9346_v18  ;;  %v9407_v58 = vmax.f32 %v9391_v43, 0.0  ;;  %v9286_v18 = vld [vmem:[#allocation2 + $0x38] sm:$0xff] }
 0x7c6   : > { %v13258_v53 = vpop.f32.mrf.mxu1 }
 0x7c7   : > { %v9392_v7 = vadd.f32 %v16285_v56, %v9369_v12  ;;  %v9423_v47 = vmul.f32 %v9407_v58, %v14562_v22 }
 0x7c8   : > { %v13259_v5 = vpop.f32.mrf.mxu1 }
 0x7c9   : > { %v13260_v8 = vadd.f32 %v13259_v5, %v13258_v53  ;;  %v9408_v17 = vmax.f32 %v9392_v7, 0.0  ;;  %v13488_v53 = vpop.f32.mrf.mxu0 }
 0x7ca   : > { %v13261_v45 = vpop.f32.mrf.mxu1 }
 0x7cb   : > { %v9233_v44 = vadd.f32 %v13260_v8, %v9232_v19  ;;  %v9424_v51 = vmul.f32 %v9408_v17, %v14606_v39  ;;  %v9248_v58 = vpop.f32.mrf.mxu0 }
 0x7cc   : > { %v13262_v37 = vpop.f32.mrf.mxu1 }
 0x7cd   : > { %v9299_v54 = vmul.f32 %v9233_v44, %v14564_v35  ;;  %v13263_v24 = vadd.f32 %v13262_v37, %v13261_v45  ;;  %v16308_v31 = vpack.c.bf16 %v9424_v51, %v9423_v47  ;;  %v13489_v47 = vpop.f32.mrf.mxu0 }
 0x7cf   : > { %v9315_v14 = vadd.f32 %v9299_v54, %v9283_v55  ;;  %v9236_v9 = vadd.f32 %v13263_v24, %v9235_v20  ;;  %13499 = vmatmul.mubr.msk.bf16.vlgmr.msra.gmra.mxu0 %vm766_vm0, %v16308_v31 }
 0x7d1   : > { %9331 = vst.msk [vmem:[#allocation2 + $0x20] sm:$0xff] %vm766_vm0, %v9315_v14  ;;  %v9300_v32 = vmul.f32 %v9236_v9, %v14661_v63 }
 0x7d3   : > { %v9316_v22 = vadd.f32 %v9300_v32, %v9284_v61  ;;  %v9251_v61 = vpop.f32.mrf.mxu0 }
 0x7d5   : > { %9332 = vst.msk [vmem:[#allocation2 + $0x28] sm:$0xff] %vm766_vm0, %v9316_v22  ;;  %v9287_v22 = vld [vmem:[#allocation2 + $0x40] sm:$0xff] }
 0x7d8   : > { %v9347_v39 = vld [vmem:[#allocation2 + $0x20] sm:$0xff] }
 0x7d9   : > { %v9370_v57 = vmul.f32 %v16280_v46, %v9347_v39 }
 0x7db   : > { %v9393_v0 = vadd.f32 %v16285_v56, %v9370_v57 }
 0x7dc   : > { %v9348_v4 = vld [vmem:[#allocation2 + $0x28] sm:$0xff] }
 0x7dd   : > { %v9371_v62 = vmul.f32 %v16280_v46, %v9348_v4  ;;  %v9409_v16 = vmax.f32 %v9393_v0, 0.0 }
 0x7de   : > { %v13264_v23 = vpop.f32.mrf.mxu1 }
 0x7df   : > { %v9394_v33 = vadd.f32 %v16285_v56, %v9371_v62  ;;  %v9425_v26 = vmul.f32 %v9409_v16, %v14564_v35 }
 0x7e0   : > { %v13265_v25 = vpop.f32.mrf.mxu1 }
 0x7e1   : > { %v13266_v15 = vadd.f32 %v13265_v25, %v13264_v23  ;;  %v9410_v27 = vmax.f32 %v9394_v33, 0.0 }
 0x7e2   : > { %v13267_v30 = vpop.f32.mrf.mxu1 }
 0x7e3   : > { %v9241_v6 = vadd.f32 %v13484_v13, %v13266_v15  ;;  %v9426_v41 = vmul.f32 %v9410_v27, %v14661_v63 }
 0x7e4   : > { %v13268_v50 = vpop.f32.mrf.mxu1 }
 0x7e5   : > { %v9301_v21 = vmul.f32 %v9241_v6, %v14566_v36  ;;  %v13269_v3 = vadd.f32 %v13268_v50, %v13267_v30  ;;  %v16322_v48 = vpack.c.bf16 %v9426_v41, %v9425_v26 }
 0x7e7   : > { %v9317_v60 = vadd.f32 %v9301_v21, %v9285_v34  ;;  %v9244_v43 = vadd.f32 %v13485_v40, %v13269_v3  ;;  %13502 = vmatprep.mubr.msk.bf16.mxu0 %vm766_vm0, %v16322_v48 }
 0x7e9   : > { %9333 = vst.msk [vmem:[#allocation2 + $0x30] sm:$0xff] %vm766_vm0, %v9317_v60  ;;  %v9302_v13 = vmul.f32 %v9244_v43, %v14722_v11 }
 0x7eb   : > { %v9318_v35 = vadd.f32 %v9302_v13, %v9286_v18  ;;  %v9289_v18 = vld [vmem:[#allocation2 + $0x50] sm:$0xff] }
 0x7ed   : > { %9334 = vst.msk [vmem:[#allocation2 + $0x38] sm:$0xff] %vm766_vm0, %v9318_v35 }
 0x7f0   : > { %v9349_v63 = vld [vmem:[#allocation2 + $0x30] sm:$0xff] }
 0x7f1   : > { %v9372_v19 = vmul.f32 %v16280_v46, %v9349_v63 }
 0x7f3   : > { %v9395_v12 = vadd.f32 %v16285_v56, %v9372_v19  ;;  %v13801_v19 = vld [vmem:[%s17087_s15 + $0x8] sm:$0xff]  }
 0x7f4   : > { %v9350_v5 = vld [vmem:[#allocation2 + $0x38] sm:$0xff]  ;;  %13514 = vmatprep.subr.bf16.mxu1 %v13801_v19 }
 0x7f5   : > { %v9373_v7 = vmul.f32 %v16280_v46, %v9350_v5  ;;  %v13270_v8 = vpop.f32.mrf.mxu1  ;;  %v9411_v45 = vmax.f32 %v9395_v12, 0.0  ;;  %13515 = vmatpush3.bf16.msra.mxu1 %v13801_v19  ;;  %v13803_v12 = vld [vmem:[%s17087_s15] sm:$0xff]  }
 0x7f6   : > { %13516 = vmatprep.subr.bf16.mxu1 %v13803_v12 }
 0x7f7   : > { %v9396_v40 = vadd.f32 %v16285_v56, %v9373_v7  ;;  %v13271_v17 = vpop.f32.mrf.mxu1  ;;  %v9427_v24 = vmul.f32 %v9411_v45, %v14566_v36  ;;  %v9288_v36 = vld [vmem:[#allocation2 + $0x48] sm:$0xff] }
 0x7f8   : > { %v13272_v44 = vadd.f32 %v13271_v17, %v13270_v8 }
 0x7f9   : > { %v9412_v37 = vmax.f32 %v9396_v40, 0.0  ;;  %v13273_v51 = vpop.f32.mrf.mxu1  ;;  %13517 = vmatpush3.bf16.msra.mxu1 %v13803_v12 }
 0x7fa   : > { %v9249_v54 = vadd.f32 %v13272_v44, %v9248_v58  ;;  %v13492_v58 = vpop.f32.mrf.mxu0 }
 0x7fb   : > { %v9428_v20 = vmul.f32 %v9412_v37, %v14722_v11  ;;  %v13274_v55 = vpop.f32.mrf.mxu1 }
 0x7fc   : > { %v9303_v14 = vmul.f32 %v9249_v54, %v14568_v38  ;;  %v13275_v9 = vadd.f32 %v13274_v55, %v13273_v51  ;;  %v9264_v17 = vpop.f32.mrf.mxu0 }
 0x7fd   : > { %v16336_v32 = vpack.c.bf16 %v9428_v20, %v9427_v24 }
 0x7fe   : > { %v9319_v39 = vadd.f32 %v9303_v14, %v9287_v22  ;;  %v9252_v57 = vadd.f32 %v13275_v9, %v9251_v61  ;;  %v13493_v20 = vpop.f32.mrf.mxu0 }
 0x7ff   : > { %13503 = vmatmul.mubr.msk.bf16.gmra.mxu0 %vm766_vm0, %v16336_v32 }
 0x800   : > { %9335 = vst.msk [vmem:[#allocation2 + $0x40] sm:$0xff] %vm766_vm0, %v9319_v39  ;;  %v9304_v0 = vmul.f32 %v9252_v57, %v14761_v10 }
 0x802   : > { %v9320_v4 = vadd.f32 %v9304_v0, %v9288_v36  ;;  %v9267_v36 = vpop.f32.mrf.mxu0 }
 0x804   : > { %9336 = vst.msk [vmem:[#allocation2 + $0x48] sm:$0xff] %vm766_vm0, %v9320_v4  ;;  %v9291_v4 = vld [vmem:[#allocation2 + $0x60] sm:$0xff] }
 0x807   : > { %v9351_v11 = vld [vmem:[#allocation2 + $0x40] sm:$0xff] }
 0x808   : > { %v9374_v62 = vmul.f32 %v16280_v46, %v9351_v11 }
 0x80a   : > { %v9397_v23 = vadd.f32 %v16285_v56, %v9374_v62 }
 0x80b   : > { %v9352_v33 = vld [vmem:[#allocation2 + $0x48] sm:$0xff] }
 0x80c   : > { %v9375_v16 = vmul.f32 %v16280_v46, %v9352_v33  ;;  %v9413_v27 = vmax.f32 %v9397_v23, 0.0  ;;  %v9292_v33 = vld [vmem:[#allocation2 + $0x68] sm:$0xff] }
 0x80d   : > { %v13276_v25 = vpop.f32.mrf.mxu1 }
 0x80e   : > { %v9398_v15 = vadd.f32 %v16285_v56, %v9375_v16  ;;  %v9429_v21 = vmul.f32 %v9413_v27, %v14568_v38 }
 0x80f   : > { %v13277_v30 = vpop.f32.mrf.mxu1 }
 0x810   : > { %v13278_v6 = vadd.f32 %v13277_v30, %v13276_v25  ;;  %v9414_v26 = vmax.f32 %v9398_v15, 0.0 }
 0x811   : > { %v13279_v41 = vpop.f32.mrf.mxu1 }
 0x812   : > { %v9257_v50 = vadd.f32 %v13488_v53, %v13278_v6  ;;  %v9430_v3 = vmul.f32 %v9414_v26, %v14761_v10  ;;  %v9290_v10 = vld [vmem:[#allocation2 + $0x58] sm:$0xff] }
 0x813   : > { %v13280_v34 = vpop.f32.mrf.mxu1 }
 0x814   : > { %v9305_v60 = vmul.f32 %v9257_v50, %v14570_v42  ;;  %v13281_v43 = vadd.f32 %v13280_v34, %v13279_v41  ;;  %v16350_v13 = vpack.c.bf16 %v9430_v3, %v9429_v21  ;;  %v9293_v21 = vld [vmem:[#allocation2 + $0x70] sm:$0xff] }
 0x816   : > { %v9321_v35 = vadd.f32 %v9305_v60, %v9289_v18  ;;  %v9260_v63 = vadd.f32 %v13489_v47, %v13281_v43  ;;  %13506 = vmatprep.mubr.msk.bf16.mxu0 %vm766_vm0, %v16350_v13 }
 0x818   : > { %9337 = vst.msk [vmem:[#allocation2 + $0x50] sm:$0xff] %vm766_vm0, %v9321_v35  ;;  %v9306_v38 = vmul.f32 %v9260_v63, %v14794_v29  ;;  %v9294_v63 = vld [vmem:[#allocation2 + $0x78] sm:$0xff] }
 0x81a   : > { %v9322_v53 = vadd.f32 %v9306_v38, %v9290_v10 }
 0x81c   : > { %9338 = vst.msk [vmem:[#allocation2 + $0x58] sm:$0xff] %vm766_vm0, %v9322_v53 }
 0x81f   : > { %v9353_v5 = vld [vmem:[#allocation2 + $0x50] sm:$0xff] }
 0x820   : > { %v9376_v7 = vmul.f32 %v16280_v46, %v9353_v5 }
 0x822   : > { %v9399_v8 = vadd.f32 %v16285_v56, %v9376_v7 }
 0x823   : > { %v9354_v40 = vld [vmem:[#allocation2 + $0x58] sm:$0xff] }
 0x824   : > { %v9377_v45 = vmul.f32 %v16280_v46, %v9354_v40  ;;  %v9415_v47 = vmax.f32 %v9399_v8, 0.0 }
 0x825   : > { %v13282_v44 = vpop.f32.mrf.mxu1 }
 0x826   : > { %v9400_v37 = vadd.f32 %v16285_v56, %v9377_v45  ;;  %v9431_v9 = vmul.f32 %v9415_v47, %v14570_v42 }
 0x827   : > { %v13283_v51 = vpop.f32.mrf.mxu1 }
 0x828   : > { %v13284_v54 = vadd.f32 %v13283_v51, %v13282_v44  ;;  %v9416_v24 = vmax.f32 %v9400_v37, 0.0 }
 0x829   : > { %v13285_v55 = vpop.f32.mrf.mxu1 }
 0x82a   : > { %v9265_v14 = vadd.f32 %v13284_v54, %v9264_v17  ;;  %v9432_v61 = vmul.f32 %v9416_v24, %v14794_v29 }
 0x82b   : > { %v13286_v22 = vpop.f32.mrf.mxu1 }
 0x82c   : > { %v9307_v39 = vmul.f32 %v9265_v14, %v14575_v52  ;;  %v13287_v57 = vadd.f32 %v13286_v22, %v13285_v55  ;;  %v9442_v0 = vpack.c.bf16 %v9432_v61, %v9431_v9 }
 0x82e   : > { %v9323_v11 = vadd.f32 %v9307_v39, %v9291_v4  ;;  %v9268_v62 = vadd.f32 %v13287_v57, %v9267_v36  ;;  %13507 = vmatmul.mubr.msk.bf16.gmra.mxu0 %vm766_vm0, %v9442_v0  ;;  %v13802_v39 = vld [vmem:[%s17147_s5 + $0x28] sm:$0xff]  }
 0x830   : > { %9339 = vst.msk [vmem:[#allocation2 + $0x60] sm:$0xff] %vm766_vm0, %v9323_v11  ;;  %v9308_v23 = vmul.f32 %v9268_v62, %v14805_v49 }
 0x831   : > { %v13288_v16 = vpop.f32.mrf.mxu1 }
 0x832   : > { %v9324_v42 = vadd.f32 %v9308_v23, %v9292_v33 }
 0x833   : > { %v13289_v25 = vpop.f32.mrf.mxu1 }
 0x834   : > { %9340 = vst.msk [vmem:[#allocation2 + $0x68] sm:$0xff] %vm766_vm0, %v9324_v42  ;;  %v13290_v29 = vadd.f32 %v13289_v25, %v13288_v16  ;;  %v13804_v16 = vld [vmem:[%s17147_s5 + $0x30] sm:$0xff]   ;;  %v13805_v42 = vld [vmem:[%s17147_s5 + $0x38] sm:$0xff]   ;;  %v13806_v25 = vld [vmem:[%s17147_s5 + $0x40] sm:$0xff]  }
 0x835   : > { %v13291_v15 = vpop.f32.mrf.mxu1 }
 0x836   : > { %v9273_v27 = vadd.f32 %v13492_v58, %v13290_v29 }
 0x837   : > { %v13292_v30 = vpop.f32.mrf.mxu1  ;;  %v9355_v6 = vld [vmem:[#allocation2 + $0x60] sm:$0xff] }
 0x838   : > { %v9309_v26 = vmul.f32 %v9273_v27, %v14581_v59  ;;  %v13293_v41 = vadd.f32 %v13292_v30, %v13291_v15  ;;  %v9378_v50 = vmul.f32 %v16280_v46, %v9355_v6 }
 0x83a   : > { %v9325_v3 = vadd.f32 %v9309_v26, %v9293_v21  ;;  %v9276_v34 = vadd.f32 %v13493_v20, %v13293_v41  ;;  %v9401_v60 = vadd.f32 %v16285_v56, %v9378_v50  ;;  %v16441_v20 = vld [vmem:[%s17086_s14] ss:$0 sm:$0xff] }
 0x83b   : > { %v9356_v43 = vld [vmem:[#allocation2 + $0x68] sm:$0xff] }
 0x83c   : > { %9341 = vst.msk [vmem:[#allocation2 + $0x70] sm:$0xff] %vm766_vm0, %v9325_v3  ;;  %v9310_v18 = vmul.f32 %v9276_v34, %v14819_v2  ;;  %v9379_v35 = vmul.f32 %v16280_v46, %v9356_v43  ;;  %v9417_v10 = vmax.f32 %v9401_v60, 0.0 }
 0x83e   : > { %v9326_v19 = vadd.f32 %v9310_v18, %v9294_v63  ;;  %v9402_v38 = vadd.f32 %v16285_v56, %v9379_v35  ;;  %v9433_v12 = vmul.f32 %v9417_v10, %v14575_v52 }
 0x840   : > { %9342 = vst.msk [vmem:[#allocation2 + $0x78] sm:$0xff] %vm766_vm0, %v9326_v19  ;;  %v9418_v53 = vmax.f32 %v9402_v38, 0.0 }
 0x842   : > { %v9434_v5 = vmul.f32 %v9418_v53, %v14805_v49 }
 0x843   : > { %v9357_v7 = vld [vmem:[#allocation2 + $0x70] sm:$0xff] }
 0x844   : > { %v9443_v58 = vpack.c.bf16 %v9434_v5, %v9433_v12  ;;  %v9380_v8 = vmul.f32 %v16280_v46, %v9357_v7 }
 0x846   : > { %13510 = vmatprep.mubr.msk.bf16.mxu0 %vm766_vm0, %v9443_v58  ;;  %v9403_v40 = vadd.f32 %v16285_v56, %v9380_v8 }
 0x847   : > { %v9358_v45 = vld [vmem:[#allocation2 + $0x78] sm:$0xff] }
 0x848   : > { %v9381_v17 = vmul.f32 %v16280_v46, %v9358_v45  ;;  %v9419_v37 = vmax.f32 %v9403_v40, 0.0  ;;  %v13798_v46 = vld [vmem:[%s17147_s5 + $0x10] sm:$0xff]  }
 0x84a   : > { %v9404_v44 = vadd.f32 %v16285_v56, %v9381_v17  ;;  %v9435_v51 = vmul.f32 %v9419_v37, %v14581_v59  ;;  %v13796_v59 = vld [vmem:[%s17147_s5] sm:$0xff]   ;;  %v13799_v56 = vld [vmem:[%s17147_s5 + $0x18] sm:$0xff]  }
 0x84c   : > { %v9420_v47 = vmax.f32 %v9404_v44, 0.0 }
 0x84e   : > { %v9436_v52 = vmul.f32 %v9420_v47, %v14819_v2  ;;  %v13797_v2 = vld [vmem:[%s17147_s5 + $0x8] sm:$0xff]  }
 0x850   : > { %v9444_v49 = vpack.c.bf16 %v9436_v52, %v9435_v51 }
 0x852   : > { %13511 = vmatmul.mubr.msk.bf16.gmra.mxu0 %vm766_vm0, %v9444_v49 }
 0x853   : > { %13535 = vmatpush3.bf16.msra.mxu0 %v9444_v49  ;;  %13550 = vmatprep.mubr.msk.bf16.mxu0 %vm13924_vm5, %v17119_v1 }
 0x854   : > { %13536 = vmatprep.subr.bf16.mxu0 %v17119_v1 }
 0x857   : > { %13537 = vmatpush3.bf16.msra.mxu0 %v9443_v58 }
 0x858   : > { %13538 = vmatprep.subr.bf16.mxu0 %v17119_v1 }
 0x85b   : > { %13539 = vmatpush3.bf16.msra.mxu0 %v9442_v0 }
 0x85c   : > { %13540 = vmatprep.subr.bf16.mxu0 %v17119_v1 }
 0x85f   : > { %13541 = vmatpush3.bf16.msra.mxu0 %v16350_v13 }
 0x860   : > { %13542 = vmatprep.subr.bf16.mxu0 %v17119_v1 }
 0x863   : > { %13543 = vmatpush3.bf16.msra.mxu0 %v16336_v32 }
 0x864   : > { %13544 = vmatprep.subr.bf16.mxu0 %v17119_v1 }
 0x867   : > { %13545 = vmatpush3.bf16.msra.mxu0 %v16322_v48  ;;  %v16432_v48 = vld [vmem:[%s17085_s13] ss:$0 sm:$0xff] }
 0x868   : > { %13546 = vmatprep.subr.bf16.mxu0 %v17119_v1 }
 0x86b   : > { %13547 = vmatpush3.bf16.msra.mxu0 %v16308_v31 }
 0x86c   : > { %13548 = vmatprep.subr.bf16.mxu0 %v17119_v1 }
 0x86f   : > { %13549 = vmatpush3.bf16.msra.mxu0 %v16294_v28  ;;  %v13800_v28 = vld [vmem:[%s17147_s5 + $0x20] sm:$0xff]  }
 0x872   : > { %13551 = vmatmul.mubr.bf16.vlgmr.msra.gmra.mxu0 %v13796_v59 }
 0x873   : > { %13554 = vmatprep.mubr.msk.bf16.mxu0 %vm13924_vm5, %v17119_v1 }
 0x87a   : > { %13555 = vmatmul.mubr.bf16.gmra.mxu0 %v13797_v2 }
 0x87b   : > { %13558 = vmatprep.mubr.msk.bf16.mxu0 %vm13924_vm5, %v17119_v1 }
 0x882   : > { %13559 = vmatmul.mubr.bf16.gmra.mxu0 %v13798_v46 }
 0x883   : > { %13562 = vmatprep.mubr.msk.bf16.mxu0 %vm13924_vm5, %v17119_v1 }
 0x88a   : > { %13563 = vmatmul.mubr.bf16.gmra.mxu0 %v13799_v56 }
 0x88b   : > { %13566 = vmatprep.mubr.msk.bf16.mxu0 %vm13924_vm5, %v17119_v1 }
 0x88f   : > { %v13500_v31 = vpop.f32.mrf.mxu0 }
 0x890   : > { %v9591_v54 = vmul.f32 %v13500_v31, %v16432_v48 }
 0x891   : > { %v9519_v32 = vpop.f32.mrf.mxu0 }
 0x892   : > { %v9589_v13 = vmul.f32 %v16432_v48, %v9519_v32  ;;  %13567 = vmatmul.mubr.bf16.gmra.mxu0 %v13800_v28  ;;  %v9614_v57 = vadd.f32 %v16441_v20, %v9591_v54 }
 0x893   : > { %v13501_v24 = vpop.f32.mrf.mxu0  ;;  %13570 = vmatprep.mubr.msk.bf16.mxu0 %vm13924_vm5, %v17119_v1 }
 0x894   : > { %v9592_v55 = vmul.f32 %v13501_v24, %v16432_v48  ;;  %v9612_v9 = vadd.f32 %v16441_v20, %v9589_v13  ;;  %v9630_v62 = vmax.f32 %v9614_v57, 0.0 }
 0x895   : > { %v9522_v14 = vpop.f32.mrf.mxu0 }
 0x896   : > { %v9615_v61 = vadd.f32 %v16441_v20, %v9592_v55  ;;  %v9590_v22 = vmul.f32 %v16432_v48, %v9522_v14  ;;  %v9628_v4 = vmax.f32 %v9612_v9, 0.0 }
 0x898   : > { %v9613_v0 = vadd.f32 %v16441_v20, %v9590_v22  ;;  %v9631_v36 = vmax.f32 %v9615_v61, 0.0 }
 0x89a   : > { %v9629_v11 = vmax.f32 %v9613_v0, 0.0  ;;  %13571 = vmatmul.mubr.bf16.gmra.mxu0 %v13802_v39  ;;  %v9645_v33 = vpack.c.bf16 %v9631_v36, %v9630_v62 }
 0x89b   : > { %13574 = vmatprep.mubr.msk.bf16.mxu0 %vm13924_vm5, %v17119_v1 }
 0x89c   : > { %v9644_v23 = vpack.c.bf16 %v9629_v11, %v9628_v4 }
 0x89e   : > { %13518 = vmatprep.mubr.msk.bf16.mxu1 %vm766_vm0, %v9644_v23 }
 0x89f   : > { %13519 = vmatmul.mubr.msk.bf16.vlgmr.msra.gmra.mxu1 %vm766_vm0, %v9645_v33 }
 0x8a2   : > { %13575 = vmatmul.mubr.bf16.gmra.mxu0 %v13804_v16 }
 0x8a3   : > { %13578 = vmatprep.mubr.msk.bf16.mxu0 %vm13924_vm5, %v17119_v1 }
 0x8aa   : > { %13579 = vmatmul.mubr.bf16.gmra.mxu0 %v13805_v42 }
 0x8ab   : > { %13582 = vmatprep.mubr.msk.bf16.mxu0 %vm13924_vm5, %v17119_v1 }
 0x8b2   : > { %13583 = vmatmul.mubr.bf16.gmra.mxu0 %v13806_v25 }
 0x8bf   : > { %v13504_v29 = vpop.f32.mrf.mxu0 }
 0x8c0   : > { %v9595_v30 = vmul.f32 %v13504_v29, %v16432_v48 }
 0x8c1   : > { %v9535_v15 = vpop.f32.mrf.mxu0 }
 0x8c2   : > { %v9593_v27 = vmul.f32 %v16432_v48, %v9535_v15  ;;  %v9618_v34 = vadd.f32 %v16441_v20, %v9595_v30 }
 0x8c3   : > { %v13505_v6 = vpop.f32.mrf.mxu0 }
 0x8c4   : > { %v9596_v26 = vmul.f32 %v13505_v6, %v16432_v48  ;;  %v9616_v50 = vadd.f32 %v16441_v20, %v9593_v27  ;;  %v9634_v63 = vmax.f32 %v9618_v34, 0.0 }
 0x8c5   : > { %v9538_v41 = vpop.f32.mrf.mxu0 }
 0x8c6   : > { %v9619_v21 = vadd.f32 %v16441_v20, %v9596_v26  ;;  %v9594_v3 = vmul.f32 %v16432_v48, %v9538_v41  ;;  %v9632_v18 = vmax.f32 %v9616_v50, 0.0 }
 0x8c8   : > { %v9617_v60 = vadd.f32 %v16441_v20, %v9594_v3  ;;  %v9635_v43 = vmax.f32 %v9619_v21, 0.0  ;;  %v13807_v21 = vld [vmem:[%s17088_s16 + $0x78] sm:$0xff]  }
 0x8c9   : > { %v13808_v3 = vld [vmem:[%s17088_s16 + $0x38] sm:$0xff]   ;;  %13341 = vmatprep.subr.bf16.mxu1 %v13807_v21 }
 0x8ca   : > { %v9633_v35 = vmax.f32 %v9617_v60, 0.0  ;;  %v9647_v38 = vpack.c.bf16 %v9635_v43, %v9634_v63  ;;  %13342 = vmatpush3.bf16.msra.mxu1 %v13808_v3 }
 0x8cc   : > { %v9646_v19 = vpack.c.bf16 %v9633_v35, %v9632_v18 }
 0x8ce   : > { %13522 = vmatprep.mubr.msk.bf16.mxu1 %vm766_vm0, %v9646_v19 }
 0x8cf   : > { %13523 = vmatmul.mubr.msk.bf16.gmra.mxu1 %vm766_vm0, %v9647_v38  ;;  %v13809_v38 = vld [vmem:[%s17088_s16 + $0x70] sm:$0xff]  }
 0x8d0   : > { %13343 = vmatprep.subr.bf16.mxu1 %v13809_v38  ;;  %v16598_v38 = vld [vmem:[%s17137_s25 + $0x10] sm:$0xff] }
 0x8d1   : > { %vm9791_vm6 = vcmp.gt.f32.partialorder %v16598_v38, 0.0 }
 0x8ee   : > { %v13508_v10 = vpop.f32.mrf.mxu0 }
 0x8ef   : > { %v9599_v5 = vmul.f32 %v13508_v10, %v16432_v48 }
 0x8f0   : > { %v9551_v53 = vpop.f32.mrf.mxu0 }
 0x8f1   : > { %v9597_v12 = vmul.f32 %v16432_v48, %v9551_v53  ;;  %v9622_v44 = vadd.f32 %v16441_v20, %v9599_v5  ;;  %v13810_v53 = vld [vmem:[%s17088_s16 + $0x30] sm:$0xff]  }
 0x8f2   : > { %v13509_v7 = vpop.f32.mrf.mxu0  ;;  %13344 = vmatpush3.bf16.msra.mxu1 %v13810_v53 }
 0x8f3   : > { %v9600_v58 = vmul.f32 %v13509_v7, %v16432_v48  ;;  %v9620_v40 = vadd.f32 %v16441_v20, %v9597_v12  ;;  %v9638_v49 = vmax.f32 %v9622_v44, 0.0  ;;  %v13811_v7 = vld [vmem:[%s17088_s16 + $0x68] sm:$0xff]  }
 0x8f4   : > { %v9554_v8 = vpop.f32.mrf.mxu0  ;;  %13345 = vmatprep.subr.bf16.mxu1 %v13811_v7  ;;  %v16621_v7 = vld [vmem:[%s17137_s25 + $0x38] sm:$0xff] }
 0x8f5   : > { %v9623_v45 = vadd.f32 %v16441_v20, %v9600_v58  ;;  %v9598_v17 = vmul.f32 %v16432_v48, %v9554_v8  ;;  %v9636_v51 = vmax.f32 %v9620_v40, 0.0  ;;  %v13812_v58 = vld [vmem:[%s17088_s16 + $0x28] sm:$0xff]   ;;  %vm17116_vm10 = vcmp.gt.f32.partialorder %v16621_v7, 0.0 }
 0x8f6   : > { %13346 = vmatpush3.bf16.msra.mxu1 %v13812_v58 }
 0x8f7   : > { %v9621_v37 = vadd.f32 %v16441_v20, %v9598_v17  ;;  %v9639_v47 = vmax.f32 %v9623_v45, 0.0  ;;  %v13813_v17 = vld [vmem:[%s17088_s16 + $0x60] sm:$0xff]  }
 0x8f8   : > { %13347 = vmatprep.subr.bf16.mxu1 %v13813_v17  ;;  %v16647_v17 = vld [vmem:[%s17137_s25 + $0x20] sm:$0xff] }
 0x8f9   : > { %v9637_v52 = vmax.f32 %v9621_v37, 0.0  ;;  %v9649_v2 = vpack.c.bf16 %v9639_v47, %v9638_v49  ;;  %v13814_v37 = vld [vmem:[%s17088_s16 + $0x20] sm:$0xff]   ;;  %vm9793_vm13 = vcmp.gt.f32.partialorder %v16647_v17, 0.0 }
 0x8fa   : > { %13348 = vmatpush3.bf16.msra.mxu1 %v13814_v37  ;;  %v16659_v37 = vld [vmem:[%s17137_s25 + $0x50] sm:$0xff] }
 0x8fb   : > { %v9648_v59 = vpack.c.bf16 %v9637_v52, %v9636_v51  ;;  %v13815_v52 = vld [vmem:[%s17088_s16 + $0x58] sm:$0xff]   ;;  %vm17118_vm15 = vcmp.gt.f32.partialorder %v16659_v37, 0.0 }
 0x8fc   : > { %13349 = vmatprep.subr.bf16.mxu1 %v13815_v52 }
 0x8fd   : > { %13526 = vmatprep.mubr.msk.bf16.mxu1 %vm766_vm0, %v9648_v59  ;;  %v13816_v59 = vld [vmem:[%s17088_s16 + $0x18] sm:$0xff]  }
 0x8fe   : > { %13527 = vmatmul.mubr.msk.bf16.gmra.mxu1 %vm766_vm0, %v9649_v2 }
 0x8ff   : > { %13350 = vmatpush3.bf16.msra.mxu1 %v13816_v59 }
 0x912   : > { %v13512_v46 = vpop.f32.mrf.mxu0 }
 0x913   : > { %v9603_v31 = vmul.f32 %v13512_v46, %v16432_v48 }
 0x914   : > { %v9567_v56 = vpop.f32.mrf.mxu0 }
 0x915   : > { %v9601_v28 = vmul.f32 %v16432_v48, %v9567_v56  ;;  %v9626_v9 = vadd.f32 %v16441_v20, %v9603_v31  ;;  %v13817_v56 = vld [vmem:[%s17088_s16 + $0x50] sm:$0xff]  }
 0x916   : > { %v13513_v32 = vpop.f32.mrf.mxu0  ;;  %13351 = vmatprep.subr.bf16.mxu1 %v13817_v56  ;;  %v13818_v31 = vld [vmem:[%s17088_s16 + $0x10] sm:$0xff]  }
 0x917   : > { %v9604_v13 = vmul.f32 %v13513_v32, %v16432_v48  ;;  %v9624_v24 = vadd.f32 %v16441_v20, %v9601_v28  ;;  %v9642_v0 = vmax.f32 %v9626_v9, 0.0  ;;  %13352 = vmatpush3.bf16.msra.mxu1 %v13818_v31 }
 0x918   : > { %v9570_v54 = vpop.f32.mrf.mxu0 }
 0x919   : > { %v9627_v55 = vadd.f32 %v16441_v20, %v9604_v13  ;;  %v9602_v14 = vmul.f32 %v16432_v48, %v9570_v54  ;;  %v9640_v39 = vmax.f32 %v9624_v24, 0.0  ;;  %v13819_v54 = vld [vmem:[%s17088_s16 + $0x48] sm:$0xff]  }
 0x91a   : > { %13353 = vmatprep.subr.bf16.mxu1 %v13819_v54 }
 0x91b   : > { %v9625_v61 = vadd.f32 %v16441_v20, %v9602_v14  ;;  %v9643_v22 = vmax.f32 %v9627_v55, 0.0  ;;  %v13820_v55 = vld [vmem:[%s17088_s16 + $0x8] sm:$0xff]  }
 0x91c   : > { %13354 = vmatpush3.bf16.msra.mxu1 %v13820_v55 }
 0x91d   : > { %v9641_v57 = vmax.f32 %v9625_v61, 0.0  ;;  %v9651_v4 = vpack.c.bf16 %v9643_v22, %v9642_v0 }
 0x91f   : > { %v9650_v36 = vpack.c.bf16 %v9641_v57, %v9640_v39 }
 0x921   : > { %13530 = vmatprep.mubr.msk.bf16.mxu1 %vm766_vm0, %v9650_v36 }
 0x922   : > { %13531 = vmatmul.mubr.msk.bf16.gmra.mxu1 %vm766_vm0, %v9651_v4 }
 0x932   : > { %v10101_v11 = vpop.f32.mrf.mxu0 }
 0x933   : > { %v12915_v62 = vpack.c.bf16 %v10101_v11, %v10101_v11 }
 0x934   : > { %v13552_v23 = vpop.f32.mrf.mxu0 }
 0x935   : > { %10180 = vst.msk [vmem:[#allocation5] sm:$0xf] %vm935_vm1, %v12915_v62 }
 0x936   : > { %v10104_v48 = vpop.f32.mrf.mxu0 }
 0x937   : > { %v12916_v33 = vpack.c.bf16 %v10104_v48, %v10104_v48 }
 0x938   : > { %v13553_v16 = vpop.f32.mrf.mxu0 }
 0x939   : > { %10181 = vst.msk [vmem:[#allocation5 + $0xc] sm:$0xf] %vm935_vm1, %v12916_v33  ;;  %v13821_v16 = vld [vmem:[%s17088_s16 + $0x40] sm:$0xff]  }
 0x93a   : > { %v10109_v20 = vpop.f32.mrf.mxu0  ;;  %13355 = vmatprep.subr.bf16.mxu1 %v13821_v16  ;;  %v16771_v16 = vld [vmem:[%s17137_s25 + $0x78] sm:$0xff] }
 0x93b   : > { %v12917_v42 = vpack.c.bf16 %v10109_v20, %v10109_v20  ;;  %v13822_v20 = vld [vmem:[%s17088_s16] sm:$0xff]  }
 0x93c   : > { %v13556_v25 = vpop.f32.mrf.mxu0  ;;  %13356 = vmatpush3.bf16.msra.mxu1 %v13822_v20 }
 0x93d   : > { %10188 = vrot.lane.b32.xlu1 %v12917_v42, %s17144_s0  ;;  %13586 = vmatprep.subr.bf16.mxu1 %v17119_v1 }
 0x93e   : > { %v10112_v29 = vpop.f32.mrf.mxu0 }
 0x93f   : > { %v12918_v15 = vpack.c.bf16 %v10112_v29, %v10112_v29 }
 0x940   : > { %v13557_v27 = vpop.f32.mrf.mxu0 }
 0x941   : > { %10190 = vrot.lane.b32.xlu0 %v12918_v15, %s17144_s0 }
 0x942   : > { %v10117_v30 = vpop.f32.mrf.mxu0 }
 0x943   : > { %v12919_v6 = vpack.c.bf16 %v10117_v30, %v10117_v30 }
 0x944   : > { %v13560_v26 = vpop.f32.mrf.mxu0 }
 0x945   : > { %10202 = vrot.lane.b32.xlu1 %v12919_v6, %s17146_s8 }
 0x946   : > { %v10120_v41 = vpop.f32.mrf.mxu0 }
 0x947   : > { %v12920_v50 = vpack.c.bf16 %v10120_v41, %v10120_v41 }
 0x948   : > { %v13561_v34 = vpop.f32.mrf.mxu0 }
 0x949   : > { %10204 = vrot.lane.b32.xlu0 %v12920_v50, %s17146_s8 }
 0x94a   : > { %v10125_v60 = vpop.f32.mrf.mxu0 }
 0x94b   : > { %v12921_v43 = vpack.c.bf16 %v10125_v60, %v10125_v60 }
 0x94c   : > { %v13564_v18 = vpop.f32.mrf.mxu0 }
 0x94d   : > { %10216 = vrot.lane.b32.xlu1 %v12921_v43, %s17145_s2 }
 0x94e   : > { %v10128_v35 = vpop.f32.mrf.mxu0 }
 0x94f   : > { %v12922_v63 = vpack.c.bf16 %v10128_v35, %v10128_v35 }
 0x950   : > { %v13565_v19 = vpop.f32.mrf.mxu0 }
 0x951   : > { %10218 = vrot.lane.b32.xlu0 %v12922_v63, %s17145_s2 }
 0x952   : > { %v10133_v10 = vpop.f32.mrf.mxu0 }
 0x953   : > { %v12923_v12 = vpack.c.bf16 %v10133_v10, %v10133_v10  ;;  %v16604_v10 = vld [vmem:[%s17137_s25] sm:$0xff] }
 0x954   : > { %v13568_v5 = vpop.f32.mrf.mxu0  ;;  %vm9789_vm7 = vcmp.gt.f32.partialorder %v16604_v10, 0.0 }
 0x955   : > { %10232 = vst.msk [vmem:[#allocation5 + $0x4] sm:$0xf] %vm935_vm1, %v12923_v12  ;;  %v16615_v5 = vld [vmem:[%s17137_s25 + $0x18] sm:$0xff] }
 0x956   : > { %v10136_v8 = vpop.f32.mrf.mxu0  ;;  %vm9792_vm9 = vcmp.gt.f32.partialorder %v16615_v5, 0.0 }
 0x957   : > { %v12924_v40 = vpack.c.bf16 %v10136_v8, %v10136_v8 }
 0x958   : > { %v13569_v45 = vpop.f32.mrf.mxu0 }
 0x959   : > { %10233 = vst.msk [vmem:[#allocation5 + $0x10] sm:$0xf] %vm935_vm1, %v12924_v40  ;;  %v16635_v40 = vld [vmem:[%s17137_s25 + $0x8] sm:$0xff]  ;;  %v16641_v45 = vld [vmem:[%s17137_s25 + $0x30] sm:$0xff] }
 0x95a   : > { %v10141_v44 = vpop.f32.mrf.mxu0  ;;  %vm9790_vm11 = vcmp.gt.f32.partialorder %v16635_v40, 0.0  ;;  %vm9795_vm12 = vcmp.gt.f32.partialorder %v16641_v45, 0.0 }
 0x95b   : > { %v12925_v47 = vpack.c.bf16 %v10141_v44, %v10141_v44  ;;  %v16653_v44 = vld [vmem:[%s17137_s25 + $0x28] sm:$0xff] }
 0x95c   : > { %v13572_v51 = vpop.f32.mrf.mxu0  ;;  %vm9794_vm14 = vcmp.gt.f32.partialorder %v16653_v44, 0.0 }
 0x95d   : > { %10240 = vrot.lane.b32.xlu1 %v12925_v47, %s17144_s0  ;;  %v16665_v47 = vld [vmem:[%s17137_s25 + $0x40] sm:$0xff]  ;;  %v16671_v51 = vld [vmem:[%s17137_s25 + $0x58] sm:$0xff] }
 0x95e   : > { %v10144_v49 = vpop.f32.mrf.mxu0 }
 0x95f   : > { %v12926_v2 = vpack.c.bf16 %v10144_v49, %v10144_v49  ;;  %v16568_v15 = vpop.f32.mrf.mxu1 }
 0x960   : > { %v13573_v46 = vpop.f32.mrf.mxu0  ;;  %v16610_v12 = vsel %vm9791_vm6, %v16568_v15, -1e+30 }
 0x961   : > { %10242 = vrot.lane.b32.xlu0 %v12926_v2, %s17144_s0  ;;  %v16571_v30 = vpop.f32.mrf.mxu1  ;;  %v9824_v52 = vsel %vm9821_vm8, %v16610_v12, -inf  ;;  %v16689_v2 = vld [vmem:[%s17137_s25 + $0x48] sm:$0xff] }
 0x962   : > { %v10149_v28 = vpop.f32.mrf.mxu0  ;;  %v16630_v8 = vsel %vm9789_vm7, %v16571_v30, -1e+30 }
 0x963   : > { %v12927_v32 = vpack.c.bf16 %v10149_v28, %v10149_v28  ;;  %v16574_v26 = vpop.f32.mrf.mxu1  ;;  %v9822_v56 = vsel %vm9821_vm8, %v16630_v8, -inf }
 0x964   : > { %v13576_v13 = vpop.f32.mrf.mxu0  ;;  %v16679_v49 = vsel %vm9792_vm9, %v16574_v26, -1e+30 }
 0x965   : > { %10254 = vrot.lane.b32.xlu1 %v12927_v32, %s17146_s8  ;;  %v16577_v50 = vpop.f32.mrf.mxu1  ;;  %v16710_v13 = vld [vmem:[%s17137_s25 + $0x70] sm:$0xff] }
 0x966   : > { %v10152_v24 = vpop.f32.mrf.mxu0  ;;  %v16697_v28 = vsel %vm9790_vm11, %v16577_v50, -1e+30 }
 0x967   : > { %v12928_v14 = vpack.c.bf16 %v10152_v24, %v10152_v24 }
 0x968   : > { %v13577_v9 = vpop.f32.mrf.mxu0 }
 0x969   : > { %10256 = vrot.lane.b32.xlu0 %v12928_v14, %s17146_s8  ;;  %v9825_v14 = vsel %vm9821_vm8, %v16679_v49, -inf }
 0x96a   : > { %v10157_v61 = vpop.f32.mrf.mxu0 }
 0x96b   : > { %v12929_v22 = vpack.c.bf16 %v10157_v61, %v10157_v61 }
 0x96c   : > { %v13580_v39 = vpop.f32.mrf.mxu0 }
 0x96d   : > { %10268 = vrot.lane.b32.xlu1 %v12929_v22, %s17145_s2  ;;  %v16742_v39 = vld [vmem:[%s17137_s25 + $0x60] sm:$0xff] }
 0x96e   : > { %v10160_v57 = vpop.f32.mrf.mxu0 }
 0x96f   : > { %v12930_v0 = vpack.c.bf16 %v10160_v57, %v10160_v57  ;;  %v9823_v57 = vsel %vm9821_vm8, %v16697_v28, -inf }
 0x970   : > { %v13581_v36 = vpop.f32.mrf.mxu0 }
 0x971   : > { %10270 = vrot.lane.b32.xlu0 %v12930_v0, %s17145_s2 }
 0x972   : > { %v10165_v4 = vpop.f32.mrf.mxu0 }
 0x973   : > { %v12931_v11 = vpack.c.bf16 %v10165_v4, %v10165_v4 }
 0x974   : > { %v13584_v62 = vpop.f32.mrf.mxu0 }
 0x975   : > { %10284 = vst.msk [vmem:[#allocation5 + $0x8] sm:$0xf] %vm935_vm1, %v12931_v11 }
 0x976   : > { %v10168_v23 = vpop.f32.mrf.mxu0 }
 0x977   : > { %v12932_v48 = vpack.c.bf16 %v10168_v23, %v10168_v23 }
 0x978   : > { %v13585_v33 = vpop.f32.mrf.mxu0 }
 0x979   : > { %10285 = vst.msk [vmem:[#allocation5 + $0x14] sm:$0xf] %vm935_vm1, %v12932_v48  ;;  %vm9797_vm1 = vcmp.gt.f32.partialorder %v16665_v47, 0.0 }
 0x98f   : > { %v16580_v21 = vpop.f32.mrf.mxu1 }
 0x990   : > { %v16702_v31 = vsel %vm9795_vm12, %v16580_v21, -1e+30 }
 0x991   : > { %v16582_v3 = vpop.f32.mrf.mxu1  ;;  %v9830_v0 = vsel %vm9821_vm8, %v16702_v31, -inf }
 0x992   : > { %v16716_v54 = vsel %vm9793_vm13, %v16582_v3, -1e+30 }
 0x993   : > { %v16584_v34 = vpop.f32.mrf.mxu1  ;;  %v9826_v62 = vsel %vm9821_vm8, %v16716_v54, -inf }
 0x994   : > { %v16684_v59 = vsel %vm17116_vm10, %v16584_v34, -1e+30  ;;  %vm9803_vm10 = vcmp.gt.f32.partialorder %v16710_v13, 0.0 }
 0x995   : > { %v16587_v43 = vpop.f32.mrf.mxu1  ;;  %v9832_v9 = vsel %vm9821_vm8, %v16684_v59, -inf }
 0x996   : > { %v16721_v24 = vsel %vm9794_vm14, %v16587_v43, -1e+30  ;;  %v9833_v20 = vmax.f32 %v9825_v14, %v9832_v9 }
 0x997   : > { %v9828_v23 = vsel %vm9821_vm8, %v16721_v24, -inf }
 0x9af   : > { %v10189_v42 = vpop.permute.xlu1 %10188 }
 0x9b0   : > { %10194 = vst.msk [vmem:[#allocation5] sm:$0xf] %vm1064_vm2, %v10189_v42 }
 0x9b3   : > { %v10191_v25 = vpop.permute.xlu0 %10190 }
 0x9b4   : > { %10195 = vst.msk [vmem:[#allocation5 + $0xc] sm:$0xf] %vm1064_vm2, %v10191_v25 }
 0x9b7   : > { %v10203_v29 = vpop.permute.xlu1 %10202 }
 0x9b8   : > { %10208 = vst.msk [vmem:[#allocation5] sm:$0xf] %vm1193_vm3, %v10203_v29 }
 0x9bb   : > { %v10205_v27 = vpop.permute.xlu0 %10204 }
 0x9bc   : > { %10209 = vst.msk [vmem:[#allocation5 + $0xc] sm:$0xf] %vm1193_vm3, %v10205_v27  ;;  %v9831_v27 = vmax.f32 %v9824_v52, %v9830_v0 }
 0x9be   : > { %v16589_v35 = vpop.f32.mrf.mxu1 }
 0x9bf   : > { %v10217_v6 = vpop.permute.xlu1 %10216  ;;  %v16735_v61 = vsel %vm17118_vm15, %v16589_v35, -1e+30  ;;  %vm9804_vm15 = vcmp.gt.f32.partialorder %v16771_v16, 0.0 }
 0x9c0   : > { %10222 = vst.msk [vmem:[#allocation5] sm:$0xf] %vm1322_vm4, %v10217_v6  ;;  %v16592_v19 = vpop.f32.mrf.mxu1  ;;  %v9838_v42 = vsel %vm9821_vm8, %v16735_v61, -inf }
 0x9c1   : > { %v16752_v36 = vsel %vm9797_vm1, %v16592_v19, -1e+30  ;;  %v9839_v14 = vmax.f32 %v9831_v27, %v9838_v42 }
 0x9c2   : > { %v16624_v58 = vpop.f32.mrf.mxu1  ;;  %v9834_v6 = vsel %vm9821_vm8, %v16752_v36, -inf }
 0x9c3   : > { %v10219_v41 = vpop.permute.xlu0 %10218 }
 0x9c4   : > { %10223 = vst.msk [vmem:[#allocation5 + $0xc] sm:$0xf] %vm1322_vm4, %v10219_v41  ;;  %v16704_v32 = vpop.f32.mrf.mxu1 }
 0x9cf   : > { %v10241_v60 = vpop.permute.xlu1 %10240 }
 0x9d0   : > { %10246 = vst.msk [vmem:[#allocation5 + $0x4] sm:$0xf] %vm1064_vm2, %v10241_v60 }
 0x9d3   : > { %v10243_v18 = vpop.permute.xlu0 %10242 }
 0x9d4   : > { %10247 = vst.msk [vmem:[#allocation5 + $0x10] sm:$0xf] %vm1064_vm2, %v10243_v18  ;;  %vm17117_vm2 = vcmp.gt.f32.partialorder %v16671_v51, 0.0  ;;  %v16795_v18 = vld [vmem:[%s17137_s25 + $0x68] sm:$0xff] }
 0x9d5   : > { %v16726_v55 = vsel %vm17117_vm2, %v16624_v58, -1e+30  ;;  %vm9801_vm2 = vcmp.gt.f32.partialorder %v16742_v39, 0.0 }
 0x9d6   : > { %v9840_v48 = vsel %vm9821_vm8, %v16726_v55, -inf }
 0x9d7   : > { %v10255_v63 = vpop.permute.xlu1 %10254 }
 0x9d8   : > { %10260 = vst.msk [vmem:[#allocation5 + $0x4] sm:$0xf] %vm1193_vm3, %v10255_v63  ;;  %v9827_v63 = vmax.f32 %v9822_v56, %v9826_v62 }
 0x9da   : > { %v9835_v56 = vmax.f32 %v9827_v63, %v9834_v6 }
 0x9db   : > { %v10257_v53 = vpop.permute.xlu0 %10256 }
 0x9dc   : > { %10261 = vst.msk [vmem:[#allocation5 + $0x10] sm:$0xf] %vm1193_vm3, %v10257_v53  ;;  %vm9798_vm3 = vcmp.gt.f32.partialorder %v16689_v2, 0.0  ;;  %v9829_v53 = vmax.f32 %v9823_v57, %v9828_v23 }
 0x9dd   : > { %v16757_v4 = vsel %vm9798_vm3, %v16704_v32, -1e+30 }
 0x9de   : > { %v9836_v41 = vsel %vm9821_vm8, %v16757_v4, -inf }
 0x9df   : > { %v10269_v46 = vpop.permute.xlu1 %10268  ;;  %v9837_v57 = vmax.f32 %v9829_v53, %v9836_v41  ;;  %v13827_v53 = vld [vmem:[%s17088_s16 + $0x80] sm:$0xff]  }
 0x9e0   : > { %10274 = vst.msk [vmem:[#allocation5 + $0x4] sm:$0xf] %vm1322_vm4, %v10269_v46  ;;  %v9841_v46 = vmax.f32 %v9833_v20, %v9840_v48  ;;  %v13826_v20 = vld [vmem:[%s17088_s16 + $0x88] sm:$0xff]  }
 0x9e2   : > { %v16737_v22 = vpop.f32.mrf.mxu1 }
 0x9e3   : > { %17148 = vst [vmem:[#allocation8_spill] sm:$0xff] %v16737_v22  ;;  %v10271_v11 = vpop.permute.xlu0 %10270  ;;  %v16779_v25 = vsel %vm9803_vm10, %v16737_v22, -1e+30  ;;  %v13823_v22 = vld [vmem:[#allocation5] ss:$12 sps:$4 sm:$0xff]  }
 0x9e4   : > { %10275 = vst.msk [vmem:[#allocation5 + $0x10] sm:$0xf] %vm1322_vm4, %v10271_v11  ;;  %v16766_v33 = vpop.f32.mrf.mxu1  ;;  %vm9802_vm4 = vcmp.gt.f32.partialorder %v16795_v18, 0.0  ;;  %v9846_v9 = vsel %vm9821_vm8, %v16779_v25, -inf }
 0x9e5   : > { %17149 = vst [vmem:[#allocation9_spill] sm:$0xff] %v16766_v33  ;;  %v16784_v29 = vsel %vm9801_vm2, %v16766_v33, -1e+30  ;;  %v9847_v42 = vmax.f32 %v9839_v14, %v9846_v9 }
 0x9e6   : > { %v16790_v60 = vpop.f32.mrf.mxu1  ;;  %v9842_v0 = vsel %vm9821_vm8, %v16784_v29, -inf }
 0x9e7   : > { %17150 = vst [vmem:[#allocation10_spill] sm:$0xff] %v16790_v60  ;;  %v16801_v52 = vsel %vm9804_vm15, %v16790_v60, -1e+30  ;;  %v9843_v27 = vmax.f32 %v9835_v56, %v9842_v0  ;;  %v13828_v0 = vld [vmem:[#allocation5 + $0x8] ss:$12 sps:$4 sm:$0xff]  }
 0x9e8   : > { %v9848_v11 = vsel %vm9821_vm8, %v16801_v52, -inf  ;;  %v16809_v1 = vpop.f32.mrf.mxu1 }
 0x9e9   : > { %v9849_v62 = vmax.f32 %v9841_v46, %v9848_v11  ;;  %v16814_v23 = vsel %vm9802_vm4, %v16809_v1, -1e+30  ;;  %v17151_v46 = vmov 0.0  }
 0x9ea   : > { %v9844_v48 = vsel %vm9821_vm8, %v16814_v23, -inf }
 0x9eb   : > { %v9845_v60 = vmax.f32 %v9837_v57, %v9844_v48  ;;  %v13825_v33 = vld [vmem:[#allocation5 + $0x4] ss:$12 sps:$4 sm:$0xff]   ;;  %v9851_v6 = vmax.f32 %v9847_v42, %v9849_v62 }
 0x9ec   : > { %10484 = vmatprep.mubr.bf16.mxu1 %v13825_v33 }
 0x9ed   : > { %v9850_v41 = vmax.f32 %v9843_v27, %v9845_v60  ;;  %10485 = vmatmul.mubr.bf16.vlgmr.msra.gmra.mxu1 %v13823_v22 }
 0x9ee   : > { %13587 = vmatpush3.bf16.msra.mxu1 %v13826_v20  ;;  %13590 = vmatprep.mubr.msk.bf16.mxu1 %vm13924_vm5, %v17151_v46 }
 0x9ef   : > { %v9852_v63 = vmax.f32 %v9850_v41, %v9851_v6  ;;  %13588 = vmatprep.subr.bf16.mxu1 %v17151_v46 }
 0x9f1   : > { %v9853_v14 = vrot.slane %v9852_v63, 4 }
 0x9f2   : > { %13589 = vmatpush3.bf16.msra.mxu1 %v13827_v53 }
 0x9f3   : > { %v9854_v9 = vmax.f32 %v9852_v63, %v9853_v14 }
 0x9f5   : > { %v9855_v11 = vrot.slane %v9854_v9, 2  ;;  %13591 = vmatmul.mubr.msk.bf16.vlgmr.msra.gmra.mxu1 %vm766_vm0, %v13828_v0 }
 0x9f7   : > { %v9856_v33 = vmax.f32 %v9854_v9, %v9855_v11 }
 0x9f9   : > { %v9857_v22 = vrot.slane %v9856_v33, 1 }
 0x9fb   : > { %v16828_v60 = vmax.f32 %v9856_v33, %v9857_v22 }
 0x9fd   : > { %v9859_v56 = vsub.f32 %v16630_v8, %v16828_v60  ;;  %v9860_v57 = vsub.f32 %v16697_v28, %v16828_v60  ;;  %v9861_v62 = vsub.f32 %v16610_v12, %v16828_v60  ;;  %v9862_v48 = vsub.f32 %v16679_v49, %v16828_v60 }
 0x9fe   : > { %v9863_v20 = vsub.f32 %v16716_v54, %v16828_v60  ;;  %v9864_v42 = vsub.f32 %v16721_v24, %v16828_v60  ;;  %v9865_v8 = vsub.f32 %v16702_v31, %v16828_v60  ;;  %v9866_v12 = vsub.f32 %v16684_v59, %v16828_v60 }
 0x9ff   : > { %v9875_v27 = vmul.f32 1.442695, %v9859_v56  ;;  %v9877_v6 = vmul.f32 1.442695, %v9860_v57  ;;  %v9879_v41 = vmul.f32 1.442695, %v9861_v62  ;;  %v9867_v54 = vsub.f32 %v16752_v36, %v16828_v60 }
 0xa00   : > { %v9881_v63 = vmul.f32 1.442695, %v9862_v48  ;;  %v9883_v28 = vmul.f32 1.442695, %v9863_v20  ;;  %v9885_v49 = vmul.f32 1.442695, %v9864_v42  ;;  %v9868_v53 = vsub.f32 %v16757_v4, %v16828_v60 }
 0xa01   : > { %13852 = vpow2.f32 %v9875_v27  ;;  %v9887_v24 = vmul.f32 1.442695, %v9865_v8  ;;  %v9889_v31 = vmul.f32 1.442695, %v9866_v12  ;;  %v9869_v14 = vsub.f32 %v16735_v61, %v16828_v60 }
 0xa02   : > { %13854 = vpow2.f32 %v9877_v6  ;;  %v9891_v9 = vmul.f32 1.442695, %v9867_v54  ;;  %v9870_v59 = vsub.f32 %v16726_v55, %v16828_v60  ;;  %v9893_v0 = vmul.f32 1.442695, %v9868_v53 }
 0xa03   : > { %13856 = vpow2.f32 %v9879_v41  ;;  %v9871_v36 = vsub.f32 %v16784_v29, %v16828_v60  ;;  %v9895_v11 = vmul.f32 1.442695, %v9869_v14  ;;  %v9872_v4 = vsub.f32 %v16814_v23, %v16828_v60 }
 0xa04   : > { %13858 = vpow2.f32 %v9881_v63  ;;  %v9897_v22 = vmul.f32 1.442695, %v9870_v59  ;;  %v9873_v61 = vsub.f32 %v16779_v25, %v16828_v60  ;;  %v9874_v23 = vsub.f32 %v16801_v52, %v16828_v60 }
 0xa05   : > { %13860 = vpow2.f32 %v9883_v28  ;;  %v9899_v62 = vmul.f32 1.442695, %v9871_v36  ;;  %v9901_v10 = vmul.f32 1.442695, %v9872_v4 }
 0xa06   : > { %13862 = vpow2.f32 %v9885_v49  ;;  %v9903_v63 = vmul.f32 1.442695, %v9873_v61  ;;  %v9905_v49 = vmul.f32 1.442695, %v9874_v23 }
 0xa07   : > { %13864 = vpow2.f32 %v9887_v24 }
 0xa08   : > { %13866 = vpow2.f32 %v9889_v31 }
 0xa09   : > { %13868 = vpow2.f32 %v9891_v9 }
 0xa0a   : > { %13870 = vpow2.f32 %v9893_v0 }
 0xa0b   : > { %13872 = vpow2.f32 %v9895_v11 }
 0xa0c   : > { %13874 = vpow2.f32 %v9897_v22 }
 0xa0d   : > { %13876 = vpow2.f32 %v9899_v62 }
 0xa0e   : > { %v13853_v33 = vpop.eup %13852  ;;  %13878 = vpow2.f32 %v9901_v10 }
 0xa0f   : > { %v13855_v56 = vpop.eup %13854  ;;  %v9907_v55 = vsel %vm9789_vm7, %v13853_v33, 0.0  ;;  %13880 = vpow2.f32 %v9903_v63  ;;  %vm17153_vm7 = vcmp.gt.f32.partialorder %v16659_v37, 0.0 }
 0xa10   : > { %v13857_v57 = vpop.eup %13856  ;;  %v9908_v29 = vsel %vm9790_vm11, %v13855_v56, 0.0  ;;  %v9923_v48 = vsel %vm9821_vm8, %v9907_v55, 0.0  ;;  %13882 = vpow2.f32 %v9905_v49 }
 0xa11   : > { %v13859_v20 = vpop.eup %13858  ;;  %v9909_v42 = vsel %vm9791_vm6, %v13857_v57, 0.0  ;;  %v9924_v25 = vsel %vm9821_vm8, %v9908_v29, 0.0  ;;  %vm17152_vm6 = vcmp.gt.f32.partialorder %v16621_v7, 0.0 }
 0xa12   : > { %v13861_v27 = vpop.eup %13860  ;;  %v9910_v6 = vsel %vm9792_vm9, %v13859_v20, 0.0  ;;  %v9925_v41 = vadd.f32 %v9924_v25, %v9923_v48  ;;  %v9926_v8 = vsel %vm9821_vm8, %v9909_v42, 0.0  ;;  %vm17154_vm9 = vcmp.gt.f32.partialorder %v16671_v51, 0.0 }
 0xa13   : > { %v13863_v40 = vpop.eup %13862  ;;  %v9911_v52 = vsel %vm9793_vm13, %v13861_v27, 0.0  ;;  %v9928_v12 = vsel %vm9821_vm8, %v9910_v6, 0.0 }
 0xa14   : > { %v9927_v28 = vadd.f32 %v9926_v8, %v9925_v41  ;;  %v13865_v38 = vpop.eup %13864  ;;  %v9912_v54 = vsel %vm9794_vm14, %v13863_v40, 0.0  ;;  %v9930_v53 = vsel %vm9821_vm8, %v9911_v52, 0.0  ;;  %vm10582_vm14 = vcmask 778752  }
 0xa15   : > { %v13867_v24 = vpop.eup %13866  ;;  %v9913_v31 = vsel %vm9795_vm12, %v13865_v38, 0.0  ;;  %v9932_v9 = vsel %vm9821_vm8, %v9912_v54, 0.0  ;;  %vm10572_vm12 = vcmask 516352  }
 0xa16   : > { %v9929_v5 = vadd.f32 %v9928_v12, %v9927_v28  ;;  %v13869_v17 = vpop.eup %13868  ;;  %v9914_v59 = vsel %vm17152_vm6, %v13867_v24, 0.0  ;;  %v9934_v44 = vsel %vm9821_vm8, %v9913_v31, 0.0 }
 0xa17   : > { %v13871_v36 = vpop.eup %13870  ;;  %v9915_v11 = vsel %vm9797_vm1, %v13869_v17, 0.0  ;;  %v9936_v45 = vsel %vm9821_vm8, %v9914_v59, 0.0  ;;  %vm10592_vm1 = vcmask 1041152  }
 0xa18   : > { %v9931_v14 = vadd.f32 %v9930_v53, %v9929_v5  ;;  %v13873_v4 = vpop.eup %13872  ;;  %v9916_v22 = vsel %vm9798_vm3, %v13871_v36, 0.0  ;;  %v9938_v55 = vsel %vm9821_vm8, %v9915_v11, 0.0 }
 0xa19   : > { %v13875_v61 = vpop.eup %13874  ;;  %v9917_v7 = vsel %vm17153_vm7, %v13873_v4, 0.0  ;;  %v9940_v29 = vsel %vm9821_vm8, %v9916_v22, 0.0  ;;  %v12156_v22 = vld [vmem:[%s17089_s17] ss:$0 sm:$0xff] }
 0xa1a   : > { %v9933_v0 = vadd.f32 %v9932_v9, %v9931_v14  ;;  %v13877_v62 = vpop.eup %13876  ;;  %v9918_v47 = vsel %vm17154_vm9, %v13875_v61, 0.0  ;;  %v9942_v23 = vsel %vm9821_vm8, %v9917_v7, 0.0  ;;  %v13829_v61 = vld [vmem:[%s17091_s19 + $0x78] sm:$0xff]   ;;  %v12157_v7 = vld [vmem:[%s17090_s18] ss:$0 sm:$0xff] }
 0xa1b   : > { %v13879_v20 = vpop.eup %13878  ;;  %v9919_v2 = vsel %vm9801_vm2, %v13877_v62, 0.0  ;;  %v9944_v27 = vsel %vm9821_vm8, %v9918_v47, 0.0  ;;  %13366 = vmatprep.subr.bf16.mxu1 %v13829_v61 }
 0xa1c   : > { %v9935_v33 = vadd.f32 %v9934_v44, %v9933_v0  ;;  %v13881_v25 = vpop.eup %13880  ;;  %v9920_v37 = vsel %vm9802_vm4, %v13879_v20, 0.0  ;;  %v9946_v41 = vsel %vm9821_vm8, %v9919_v2, 0.0 }
 0xa1d   : > { %v13883_v6 = vpop.eup %13882  ;;  %v9921_v51 = vsel %vm9803_vm10, %v13881_v25, 0.0  ;;  %v9948_v8 = vsel %vm9821_vm8, %v9920_v37, 0.0  ;;  %vm10556_vm10 = vsmask.f32 256 }
 0xa1e   : > { %v9937_v56 = vadd.f32 %v9936_v45, %v9935_v33  ;;  %v9922_v39 = vsel %vm9804_vm15, %v13883_v6, 0.0  ;;  %v9950_v52 = vsel %vm9821_vm8, %v9921_v51, 0.0  ;;  %v13832_v6 = vld [vmem:[%s17091_s19 + $0x30] sm:$0xff]   ;;  %vm10573_vm13 = vmand %vm10572_vm12, %vm10556_vm10 }
 0xa1f   : > { %v9952_v18 = vsel %vm9821_vm8, %v9922_v39, 0.0  ;;  %vm10583_vm15 = vmand %vm10582_vm14, %vm10556_vm10 }
 0xa20   : > { %v9939_v57 = vadd.f32 %v9938_v55, %v9937_v56  ;;  %v13830_v55 = vld [vmem:[%s17091_s19 + $0x38] sm:$0xff]   ;;  %vm10593_vm2 = vmand %vm10592_vm1, %vm10556_vm10 }
 0xa21   : > { %13367 = vmatpush3.bf16.msra.mxu1 %v13830_v55 }
 0xa22   : > { %v9941_v48 = vadd.f32 %v9940_v29, %v9939_v57 }
 0xa24   : > { %v9943_v42 = vadd.f32 %v9942_v23, %v9941_v48 }
 0xa26   : > { %v9945_v10 = vadd.f32 %v9944_v27, %v9943_v42 }
 0xa28   : > { %v9947_v40 = vadd.f32 %v9946_v41, %v9945_v10  ;;  %v13831_v10 = vld [vmem:[%s17091_s19 + $0x70] sm:$0xff]  }
 0xa29   : > { %13368 = vmatprep.subr.bf16.mxu1 %v13831_v10 }
 0xa2a   : > { %v9949_v63 = vadd.f32 %v9948_v8, %v9947_v40  ;;  %v10558_v8 = vld [vmem:[#allocation5] sm:$0x1]  ;;  %13369 = vmatpush3.bf16.msra.mxu1 %v13832_v6 }
 0xa2c   : > { %v9951_v28 = vadd.f32 %v9950_v52, %v9949_v63 }
 0xa2e   : > { %v9953_v38 = vadd.f32 %v9952_v18, %v9951_v28  ;;  %v10600_v28 = vld [vmem:[#allocation5 + $0x4] sm:$0x1] }
 0xa30   : > { %v9954_v12 = vrot.slane %v9953_v38, 4 }
 0xa32   : > { %v9955_v49 = vadd.f32 %v9954_v12, %v9953_v38  ;;  %v10628_v38 = vld [vmem:[#allocation5 + $0x8] sm:$0x1] }
 0xa34   : > { %v9956_v54 = vrot.slane %v9955_v49, 2 }
 0xa36   : > { %v9957_v5 = vadd.f32 %v9956_v54, %v9955_v49 }
 0xa38   : > { %v9958_v13 = vrot.slane %v9957_v5, 1 }
 0xa3a   : > { %v9959_v24 = vadd.f32 %v9958_v13, %v9957_v5  ;;  %v13833_v13 = vld [vmem:[%s17091_s19 + $0x68] sm:$0xff]  }
 0xa3b   : > { %13370 = vmatprep.subr.bf16.mxu1 %v13833_v13 }
 0xa3c   : > { %13884 = vlog2.f32 %v9959_v24  ;;  %v13834_v24 = vld [vmem:[%s17091_s19 + $0x28] sm:$0xff]  }
 0xa3d   : > { %13371 = vmatpush3.bf16.msra.mxu1 %v13834_v24 }
 0xa49   : > { %v13885_v53 = vpop.eup %13884 }
 0xa4a   : > { %v9961_v31 = vmul.f32 0.6931472, %v13885_v53 }
 0xa4c   : > { %v9962_v16 = vadd.f32 %v9961_v31, %v16828_v60  ;;  %v13835_v31 = vld [vmem:[%s17091_s19 + $0x60] sm:$0xff]  }
 0xa4d   : > { %13372 = vmatprep.subr.bf16.mxu1 %v13835_v31 }
 0xa4e   : > { %v9963_v14 = vsub.f32 %v16571_v30, %v9962_v16  ;;  %v9964_v17 = vsub.f32 %v16577_v50, %v9962_v16  ;;  %v9965_v9 = vsub.f32 %v16568_v15, %v9962_v16  ;;  %v9966_v59 = vsub.f32 %v16574_v26, %v9962_v16 }
 0xa4f   : > { %v9967_v60 = vsub.f32 %v16582_v3, %v9962_v16  ;;  %v9968_v0 = vsub.f32 %v16587_v43, %v9962_v16  ;;  %v9969_v36 = vsub.f32 %v16580_v21, %v9962_v16  ;;  %v9970_v44 = vsub.f32 %v16584_v34, %v9962_v16  ;;  %v17156_v21 = vld [vmem:[#allocation9_spill] sm:$0xff]  ;;  %v17157_v43 = vld [vmem:[#allocation8_spill] sm:$0xff] }
 0xa50   : > { %v9971_v30 = vsub.f32 %v16592_v19, %v9962_v16  ;;  %v9972_v50 = vsub.f32 %v16704_v32, %v9962_v16  ;;  %v9973_v15 = vsub.f32 %v16589_v35, %v9962_v16  ;;  %v9974_v26 = vsub.f32 %v16624_v58, %v9962_v16  ;;  %9979 = vst.msk [vmem:[%s16916_s4] sm:$0xff] %vm9821_vm8, %v9963_v14  ;;  %v17158_v19 = vld [vmem:[#allocation10_spill] sm:$0xff]  ;;  %v13837_v14 = vld [vmem:[%s17091_s19 + $0x58] sm:$0xff]  }
 0xa51   : > { %9980 = vst.msk [vmem:[%s16916_s4 + $0x8] sm:$0xff] %vm9821_vm8, %v9964_v17  ;;  %9981 = vst.msk [vmem:[%s16916_s4 + $0x10] sm:$0xff] %vm9821_vm8, %v9965_v9  ;;  %v9975_v3 = vsub.f32 %v17156_v21, %v9962_v16  ;;  %v9976_v34 = vsub.f32 %v16809_v1, %v9962_v16  ;;  %v9977_v35 = vsub.f32 %v17157_v43, %v9962_v16  ;;  %v13838_v17 = vld [vmem:[%s17091_s19 + $0x18] sm:$0xff]   ;;  %v13839_v9 = vld [vmem:[%s17091_s19 + $0x50] sm:$0xff]  }
 0xa52   : > { %9982 = vst.msk [vmem:[%s16916_s4 + $0x18] sm:$0xff] %vm9821_vm8, %v9966_v59  ;;  %v9978_v58 = vsub.f32 %v17158_v19, %v9962_v16  ;;  %9983 = vst.msk [vmem:[%s16916_s4 + $0x20] sm:$0xff] %vm9821_vm8, %v9967_v60  ;;  %v13836_v16 = vld [vmem:[%s17091_s19 + $0x20] sm:$0xff]   ;;  %v13840_v59 = vld [vmem:[%s17091_s19 + $0x10] sm:$0xff]  }
 0xa53   : > { %9984 = vst.msk [vmem:[%s16916_s4 + $0x28] sm:$0xff] %vm9821_vm8, %v9968_v0  ;;  %9985 = vst.msk [vmem:[%s16916_s4 + $0x30] sm:$0xff] %vm9821_vm8, %v9969_v36  ;;  %13373 = vmatpush3.bf16.msra.mxu1 %v13836_v16  ;;  %v13841_v60 = vld [vmem:[%s17091_s19 + $0x48] sm:$0xff]   ;;  %v13843_v36 = vld [vmem:[%s17091_s19 + $0x40] sm:$0xff]  }
 0xa54   : > { %9986 = vst.msk [vmem:[%s16916_s4 + $0x38] sm:$0xff] %vm9821_vm8, %v9970_v44  ;;  %9987 = vst.msk [vmem:[%s16916_s4 + $0x40] sm:$0xff] %vm9821_vm8, %v9971_v30  ;;  %13374 = vmatprep.subr.bf16.mxu1 %v13837_v14  ;;  %v13842_v0 = vld [vmem:[%s17091_s19 + $0x8] sm:$0xff]   ;;  %v13844_v44 = vld [vmem:[%s17091_s19] sm:$0xff]  }
 0xa55   : > { %9988 = vst.msk [vmem:[%s16916_s4 + $0x48] sm:$0xff] %vm9821_vm8, %v9972_v50  ;;  %9989 = vst.msk [vmem:[%s16916_s4 + $0x50] sm:$0xff] %vm9821_vm8, %v9973_v15 }
 0xa56   : > { %9990 = vst.msk [vmem:[%s16916_s4 + $0x58] sm:$0xff] %vm9821_vm8, %v9974_v26  ;;  %9991 = vst.msk [vmem:[%s16916_s4 + $0x60] sm:$0xff] %vm9821_vm8, %v9975_v3 }
 0xa57   : > { %9992 = vst.msk [vmem:[%s16916_s4 + $0x68] sm:$0xff] %vm9821_vm8, %v9976_v34  ;;  %9993 = vst.msk [vmem:[%s16916_s4 + $0x70] sm:$0xff] %vm9821_vm8, %v9977_v35  ;;  %13375 = vmatpush3.bf16.msra.mxu1 %v13838_v17 }
 0xa58   : > { %9994 = vst.msk [vmem:[%s16916_s4 + $0x78] sm:$0xff] %vm9821_vm8, %v9978_v58  ;;  %vm10555_vm8 = vcmask 253952   ;;  %13376 = vmatprep.subr.bf16.mxu1 %v13839_v9 }
 0xa59   : > { %vm16979_vm11 = vmand %vm10555_vm8, %vm10556_vm10 }
 0xa5b   : > { %13377 = vmatpush3.bf16.msra.mxu1 %v13840_v59 }
 0xa5c   : > { %13378 = vmatprep.subr.bf16.mxu1 %v13841_v60 }
 0xa5f   : > { %13379 = vmatpush3.bf16.msra.mxu1 %v13842_v0 }
 0xa60   : > { %13380 = vmatprep.subr.bf16.mxu1 %v13843_v36 }
 0xa63   : > { %13381 = vmatpush3.bf16.msra.mxu1 %v13844_v44 }
 0xa64   : > { %13594 = vmatprep.subr.bf16.mxu1 %v17151_v46 }
 0xaad   : > { %v13357_v1 = vpop.f32.mrf.mxu1 }
 0xaaf   : > { %v13358_v32 = vpop.f32.mrf.mxu1 }
 0xab0   : > { %v13359_v4 = vadd.f32 %v13358_v32, %v13357_v1 }
 0xab1   : > { %v13360_v11 = vpop.f32.mrf.mxu1 }
 0xab3   : > { %v13361_v33 = vpop.f32.mrf.mxu1 }
 0xab4   : > { %v13362_v62 = vadd.f32 %v13361_v33, %v13360_v11 }
 0xab5   : > { %v10527_v45 = vpop.f32.mrf.mxu1 }
 0xab6   : > { %v10528_v56 = vadd.f32 %v13359_v4, %v10527_v45 }
 0xab7   : > { %v13592_v57 = vpop.f32.mrf.mxu1 }
 0xab8   : > { %v10541_v29 = vmul.f32 %v12156_v22, %v10528_v56  ;;  %v13848_v57 = vld [vmem:[%s17091_s19 + $0x80] sm:$0xff]  }
 0xab9   : > { %v10530_v47 = vpop.f32.mrf.mxu1 }
 0xaba   : > { %v10550_v48 = vadd.f32 %v12157_v7, %v10541_v29  ;;  %v10531_v20 = vadd.f32 %v13362_v62, %v10530_v47  ;;  %v13850_v29 = vld [vmem:[%s17093_s21 + $0x8] sm:$0xff]   ;;  %v13851_v47 = vld [vmem:[%s17093_s21] sm:$0xff]  }
 0xabb   : > { %v13593_v23 = vpop.f32.mrf.mxu1 }
 0xabc   : > { %v10552_v2 = vmax.f32 %v10550_v48, 0.0  ;;  %v10542_v42 = vmul.f32 %v12156_v22, %v10531_v20 }
 0xabe   : > { %v10554_v25 = vpack.c.bf16 %v10552_v2, %v10552_v2  ;;  %v10551_v27 = vadd.f32 %v12157_v7, %v10542_v42  ;;  %v13847_v7 = vld [vmem:[%s17091_s19 + $0x88] sm:$0xff]   ;;  %v10669_v42 = vld [vmem:[%s17092_s20] sm:$0x1] }
 0xac0   : > { %v12162_v41 = vrot.slane %v10554_v25, 10  ;;  %v10553_v51 = vmax.f32 %v10551_v27, 0.0  ;;  %v10565_v40 = vshrl.u32 %v10554_v25, 16  ;;  %v10559_v39 = vsel %vm16979_vm11, %v10554_v25, %v10558_v8 }
 0xac1   : > { %10560 = vst [vmem:[#allocation5] sm:$0x1] %v10559_v39  ;;  %v12160_v12 = vrot.slane %v10554_v25, 9  ;;  %v12164_v54 = vrot.slane %v10554_v25, 11 }
 0xac2   : > { %v10627_v63 = vpack.c.bf16 %v10553_v51, %v10553_v51  ;;  %10569 = vrot.lane.b32.xlu1 %v10565_v40, %s17144_s0  ;;  %v12163_v52 = vrot.slane %v10565_v40, 10  ;;  %v10601_v18 = vsel %vm16979_vm11, %v12162_v41, %v10600_v28  ;;  %v12161_v5 = vrot.slane %v10565_v40, 9 }
 0xac3   : > { %10602 = vst [vmem:[#allocation5 + $0x4] sm:$0x1] %v10601_v18  ;;  %v12165_v53 = vrot.slane %v10565_v40, 11 }
 0xac4   : > { %10605 = vrot.lane.b32.xlu0 %v12163_v52, %s17144_s0  ;;  %v10629_v49 = vsel %vm16979_vm11, %v10627_v63, %v10628_v38  ;;  %s748_s0 = scalar_lea.vmem %s17096_s24, %s17163_s28 }
 0xac5   : > { %10630 = vst [vmem:[#allocation5 + $0x8] sm:$0x1] %v10629_v49 }
 0xac6   : > { %10579 = vrot.lane.b32.xlu1 %v12160_v12, %s17146_s8 }
 0xac8   : > { %10613 = vrot.lane.b32.xlu0 %v12164_v54, %s17146_s8  ;;  %v10574_v50 = vld [vmem:[#allocation5] sm:$0x1] }
 0xaca   : > { %10589 = vrot.lane.b32.xlu1 %v12161_v5, %s17145_s2  ;;  %v10608_v26 = vld [vmem:[#allocation5 + $0x4] sm:$0x1] }
 0xacc   : > { %10621 = vrot.lane.b32.xlu0 %v12165_v53, %s17145_s2  ;;  %v13849_v62 = vld [vmem:[#allocation5 + $0x8] ss:$0 sps:$4 sm:$0x11]  }
 0xb34   : > { %v10570_v30 = vpop.permute.xlu1 %10569 }
 0xb35   : > { %v10575_v15 = vsel %vm10573_vm13, %v10570_v30, %v10574_v50 }
 0xb36   : > { %10576 = vst [vmem:[#allocation5] sm:$0x1] %v10575_v15  ;;  %v10606_v21 = vpop.permute.xlu0 %10605 }
 0xb37   : > { %v10609_v3 = vsel %vm10573_vm13, %v10606_v21, %v10608_v26 }
 0xb38   : > { %10610 = vst [vmem:[#allocation5 + $0x4] sm:$0x1] %v10609_v3  ;;  %v10580_v34 = vpop.permute.xlu1 %10579 }
 0xb3a   : > { %v10614_v58 = vpop.permute.xlu0 %10613 }
 0xb3c   : > { %v10590_v32 = vpop.permute.xlu1 %10589 }
 0xb3d   : > { %v10584_v43 = vld [vmem:[#allocation5] sm:$0x1] }
 0xb3e   : > { %v10585_v35 = vsel %vm10583_vm15, %v10580_v34, %v10584_v43  ;;  %v10622_v45 = vpop.permute.xlu0 %10621 }
 0xb3f   : > { %10586 = vst [vmem:[#allocation5] sm:$0x1] %v10585_v35  ;;  %v10616_v19 = vld [vmem:[#allocation5 + $0x4] sm:$0x1] }
 0xb40   : > { %v10617_v1 = vsel %vm10583_vm15, %v10614_v58, %v10616_v19 }
 0xb41   : > { %10618 = vst [vmem:[#allocation5 + $0x4] sm:$0x1] %v10617_v1 }
 0xb46   : > { %v10594_v11 = vld [vmem:[#allocation5] sm:$0x1] }
 0xb47   : > { %v10595_v33 = vsel %vm10593_vm2, %v10590_v32, %v10594_v11 }
 0xb48   : > { %10596 = vst [vmem:[#allocation5] sm:$0x1] %v10595_v33  ;;  %v10624_v4 = vld [vmem:[#allocation5 + $0x4] sm:$0x1] }
 0xb49   : > { %v10625_v22 = vsel %vm10593_vm2, %v10622_v45, %v10624_v4 }
 0xb4a   : > { %10626 = vst [vmem:[#allocation5 + $0x4] sm:$0x1] %v10625_v22 }
 0xb51   : > { %v10631_v56 = vld [vmem:[#allocation5] sm:$0x11] }
 0xb52   : > { %v12166_v61 = vcombine.low %v10631_v56, %v10631_v56  ;;  %v12167_v55 = vcombine.high %v10631_v56, %v10631_v56 }
 0xb54   : > { %10823 = vmatprep.mubr.bf16.mxu1 %v12167_v55 }
 0xb55   : > { %10824 = vmatmul.mubr.bf16.vlgmr.msra.gmra.mxu1 %v12166_v61 }
 0xb56   : > { %13595 = vmatpush3.bf16.msra.mxu1 %v13847_v7  ;;  %13598 = vmatprep.mubr.msk.bf16.mxu1 %vm13924_vm5, %v17151_v46 }
 0xb57   : > { %13596 = vmatprep.subr.bf16.mxu1 %v17151_v46 }
 0xb5a   : > { %13597 = vmatpush3.bf16.msra.mxu1 %v13848_v57 }
 0xb5b   : > { %13602 = vmatprep.subr.bf16.mxu1 %v17151_v46 }
 0xb5d   : > { %13599 = vmatmul.mubr.msk.bf16.vlgmr.msra.gmra.mxu1 %vm766_vm0, %v13849_v62 }
 0xb5e   : > { %13606 = vmatprep.mubr.msk.bf16.mxu1 %vm13924_vm5, %v17151_v46  ;;  %13603 = vmatpush3.bf16.msra.mxu1 %v13850_v29 }
 0xb5f   : > { %13604 = vmatprep.subr.bf16.mxu1 %v17151_v46  ;;  %v10877_v46 = vld [vmem:[#allocation6] sm:$0x1] }
 0xb62   : > { %13605 = vmatpush3.bf16.msra.mxu1 %v13851_v47 }
 0xc15   : > { %v13382_v48 = vpop.f32.mrf.mxu1 }
 0xc17   : > { %v13383_v20 = vpop.f32.mrf.mxu1 }
 0xc18   : > { %v13384_v23 = vadd.f32 %v13383_v20, %v13382_v48 }
 0xc19   : > { %v13385_v2 = vpop.f32.mrf.mxu1 }
 0xc1a   : > { %v10826_v27 = vadd.f32 %v13384_v23, %v10669_v42 }
 0xc1b   : > { %v13386_v25 = vpop.f32.mrf.mxu1 }
 0xc1d   : > { %v10865_v37 = vpop.f32.mrf.mxu1 }
 0xc1e   : > { %v10866_v10 = vadd.f32 %v10865_v37, %v10826_v27 }
 0xc1f   : > { %v13600_v6 = vpop.f32.mrf.mxu1 }
 0xc20   : > { %v10871_v41 = vmax.f32 %v10866_v10, 0.0 }
 0xc21   : > { %v10868_v51 = vpop.f32.mrf.mxu1 }
 0xc22   : > { %v10872_v40 = vpack.c.bf16 %v10871_v41, %v10871_v41 }
 0xc23   : > { %v13601_v8 = vpop.f32.mrf.mxu1 }
 0xc24   : > { %13607 = vmatmul.mubr.msk.bf16.vlgmr.msra.gmra.mxu1 %vm766_vm0, %v10872_v40 }
 0xce4   : > { %v10927_v39 = vpop.f32.mrf.mxu1 }
 0xce5   : > { %v10928_v63 = vadd.f32 %v10927_v39, %v10877_v46 }
 0xce6   : > { %v13608_v52 = vpop.f32.mrf.mxu1 }
 0xce7   : > { %13886 = vtanh.f32 %v10928_v63 }
 0xce8   : > { %v10930_v28 = vpop.f32.mrf.mxu1 }
 0xcea   : > { %v13609_v18 = vpop.f32.mrf.mxu1 }
 0xcf4   : > { %v13887_v38 = vpop.eup %13886 }
 0xcf5   : > { %10936 = vperm.xlu1 %13625, %v13887_v38  }
 0xd70   : > { %v10937_v12 = vpop.permute.xlu1 %10936 }
 0xd71   : > { %10939 = vst [vmem:[%s748_s0] sm:$0x1] %v10937_v12 }
 0xd72 PF: > { %s17161_s5 = sld [smem:[#allocation7_spill]] }
 0xd78   : > { %s37_s27 = sadd.s32 1, %s17161_s5  }
 0xd79   : > { %p34_p4 = scmp.ge.s32.totalorder %s37_s27, 4  }
 0xd7b   :  { %36 = sbr.rel (!%p34_p4) target bundleno = 11 (0xb), region = 160 }

</bundles_post_ra>
